<compile_context>
chip_gen: v7x
topology: tpu7x:2x2x1
jax: 0.10.0
libtpu: 0.0.40
codegen_flags: <defaults>
</compile_context>

<pallas_src>
import numpy as np
import jax
import jax.numpy as jnp
from jax.experimental import pallas as pl
from jax.experimental.pallas import tpu as pltpu


# ----------------------------------------------------------------------------
# In-kernel helpers
# ----------------------------------------------------------------------------
def _mish(y):
    # y * tanh(softplus(y)) with PyTorch's softplus threshold=20 semantics.
    # tanh(log(1+e)) = ((1+e)^2 - 1) / ((1+e)^2 + 1); the reciprocal runs on the EUP.
    t = 1.0 + jnp.exp(jnp.minimum(y, 20.0))
    t2 = t * t
    tanh_sp = (t2 - 1.0) * pl.reciprocal(t2 + 1.0, approx=True)
    return jnp.where(y > 20.0, y, y * tanh_sp)


# ----------------------------------------------------------------------------
# Kernel 1: conv1 (3x3 s1, 3->32) = im2col-matmul + folded-BN bias + Mish
# ----------------------------------------------------------------------------
def _conv1_kernel(a_ref, w_ref, b_ref, o_ref):
    # a: (M, 27) bf16 patches, w: (27, 32) bf16 (BN scale folded in), b: (1, 32) f32.
    acc = jnp.dot(a_ref[...], w_ref[...], preferred_element_type=jnp.float32)
    o_ref[...] = _mish(acc + b_ref[...]).astype(o_ref.dtype)


# ----------------------------------------------------------------------------
# Kernel 2: conv2 .. conv6 (+ ResBlock) fully fused, activations live in VMEM
# ----------------------------------------------------------------------------
def _stage2_kernel(p2_ref, w2_ref, w34_ref, wra_ref, e_ref, wrb_ref,
                   w5_ref, w6a_ref, w6b_ref,
                   b2_ref, b34_ref, bra_ref, brb_ref, b5_ref, b6_ref, o_ref):
    f32 = jnp.float32
    # conv2: 3x3 stride-2 (patches built in the wrapper): (M,288)@(288,64)
    x2 = _mish(jnp.dot(p2_ref[...], w2_ref[...], preferred_element_type=f32)
               + b2_ref[...])
    # conv3 + conv4 merged into one lane-dense matmul: (M,64)@(64,128)
    y34 = _mish(jnp.dot(x2, w34_ref[...], preferred_element_type=f32) + b34_ref[...])
    half = w34_ref.shape[1] // 2
    x4 = y34[:, :half]            # conv4 output (feeds the residual block)
    x3 = y34[:, half:]            # conv3 output (feeds conv6's second half)
    # ResBlock: res_a 1x1 (64->32)
    ra = _mish(jnp.dot(x4, wra_ref[...], preferred_element_type=f32) + bra_ref[...])
    # res_b 3x3 (32->64) as 9 gather-matmul taps; e_ref[k] is a constant 0/1
    # neighbour-selection matrix (also encodes zero padding + batch separation).
    acc = jnp.zeros((p2_ref.shape[0], wrb_ref.shape[2]), f32)
    for k in range(wrb_ref.shape[0]):
        tap = jnp.dot(e_ref[k], ra, preferred_element_type=f32)
        acc = acc + jnp.dot(tap, wrb_ref[k], preferred_element_type=f32)
    r = _mish(acc + brb_ref[...]) + x4            # fused residual add
    # conv5 1x1 (64->64)
    x5 = _mish(jnp.dot(r, w5_ref[...], preferred_element_type=f32) + b5_ref[...])
    # conv6 1x1 on concat(x5, x3): split weights -> no concatenate needed.
    y6 = (jnp.dot(x5, w6a_ref[...], preferred_element_type=f32)
          + jnp.dot(x3, w6b_ref[...], preferred_element_type=f32) + b6_ref[...])
    o_ref[...] = _mish(y6).astype(o_ref.dtype)


# ----------------------------------------------------------------------------
# Wrapper-side glue (all static shapes / strides)
# ----------------------------------------------------------------------------
def _im2col(x, k, stride):
    """x: (N,H,W,C) -> (N*Ho*Wo, k*k*C).  k / stride are Python ints (static)."""
    p = k // 2
    xp = jnp.pad(x, ((0, 0), (p, p), (p, p), (0, 0)))
    n, hp, wp, c = xp.shape
    ho = (hp - k) // stride + 1
    wo = (wp - k) // stride + 1
    cols = []
    for i in range(k):
        for j in range(k):
            cols.append(xp[:, i:i + ho * stride:stride, j:j + wo * stride:stride, :])
    patches = jnp.concatenate(cols, axis=-1)
    return patches.reshape(n * ho * wo, k * k * c), ho, wo


def _make_neighbor_select(n, h, w, k=3):
    """E[t] @ x_flat gathers, for every output pixel, its neighbour at tap t
    (zero row when the neighbour is outside the image / other batch element)."""
    m = n * h * w
    e = np.zeros((k * k, m, m), np.float32)
    for di in range(k):
        for dj in range(k):
            t = di * k + dj
            for b in range(n):
                for i in range(h):
                    ii = i + di - k // 2
                    if not 0 <= ii < h:
                        continue
                    for j in range(w):
                        jj = j + dj - k // 2
                        if not 0 <= jj < w:
                            continue
                        e[t, (b * h + i) * w + j, (b * h + ii) * w + jj] = 1.0
    return e


# ----------------------------------------------------------------------------
# Parameters (deterministic synthetic init, eval-mode BN folded into weights)
# ----------------------------------------------------------------------------
def make_downsample1_params(seed=0, n=2, h=16, w=16):
    key = jax.random.PRNGKey(seed)
    ks = jax.random.split(key, 8)
    eps = 1e-5

    def conv_bn(key, k, cin, cout):
        kw, kg, kb = jax.random.split(key, 3)
        wgt = jax.random.normal(kw, (k, k, cin, cout), jnp.float32) / np.sqrt(k * k * cin)
        gamma = 1.0 + 0.1 * jax.random.normal(kg, (cout,), jnp.float32)
        beta = 0.1 * jax.random.normal(kb, (cout,), jnp.float32)
        # Eval-mode BN with default running stats (mean=0, var=1), folded in.
        scale = gamma / jnp.sqrt(1.0 + eps)
        return (wgt * scale).reshape(k * k * cin, cout), beta.reshape(1, cout)

    w1, b1 = conv_bn(ks[0], 3, 3, 32)
    w2, b2 = conv_bn(ks[1], 3, 32, 64)
    w3, b3 = conv_bn(ks[2], 1, 64, 64)
    w4, b4 = conv_bn(ks[3], 1, 64, 64)
    wra, bra = conv_bn(ks[4], 1, 64, 32)
    wrb, brb = conv_bn(ks[5], 3, 32, 64)
    w5, b5 = conv_bn(ks[6], 1, 64, 64)
    w6, b6 = conv_bn(ks[7], 1, 128, 64)

    e_rb = jnp.asarray(_make_neighbor_select(n, h // 2, w // 2), jnp.float32)

    return {
        "w1": w1.astype(jnp.bfloat16), "b1": b1,
        "w2": w2.astype(jnp.bfloat16), "b2": b2,
        # columns [0:64] = conv4 (-> x4), columns [64:128] = conv3 (-> x3)
        "w34": jnp.concatenate([w4, w3], axis=1),
        "b34": jnp.concatenate([b4, b3], axis=1),
        "wra": wra, "bra": bra,
        "wrb": wrb.reshape(9, 32, 64), "brb": brb,
        "w5": w5, "b5": b5,
        "w6a": w6[:64], "w6b": w6[64:], "b6": b6,   # conv6 split over the concat
        "e_rb": e_rb,
    }


_VMEM_SPEC = pl.BlockSpec(memory_space=pltpu.MemorySpace.VMEM)


# ----------------------------------------------------------------------------
# DownSample1 forward (NCHW in / NCHW out, matching the PyTorch module)
# ----------------------------------------------------------------------------
@jax.jit
def downsample1_forward(params, x_nchw):
    x = jnp.transpose(x_nchw, (0, 2, 3, 1)).astype(jnp.float32)   # NCHW -> NHWC
    n = x.shape[0]

    # conv1: 3x3 s1, 3->32 (static im2col in the wrapper, fused matmul/BN/Mish kernel)
    p1, ho1, wo1 = _im2col(x, 3, 1)
    x1_flat = pl.pallas_call(
        _conv1_kernel,
        out_shape=jax.ShapeDtypeStruct((p1.shape[0], params["w1"].shape[1]),
                                       jnp.bfloat16),
        in_specs=[_VMEM_SPEC] * 3,
        out_specs=_VMEM_SPEC,
    )(p1.astype(jnp.bfloat16), params["w1"], params["b1"])
    x1 = x1_flat.reshape(n, ho1, wo1, -1)

    # conv2 .. conv6 (+ ResBlock) in one fused kernel; intermediates never hit HBM.
    # TODO(synk): the stride-2 im2col for conv2 is still wrapper-side XLA glue
    # (in-kernel strided patch extraction was avoided for lowering robustness).
    p2, ho2, wo2 = _im2col(x1, 3, 2)
    cout = params["w6a"].shape[1]
    out_flat = pl.pallas_call(
        _stage2_kernel,
        out_shape=jax.ShapeDtypeStruct((p2.shape[0], cout), jnp.float32),
        in_specs=[_VMEM_SPEC] * 15,
        out_specs=_VMEM_SPEC,
    )(p2, params["w2"], params["w34"], params["wra"], params["e_rb"],
      params["wrb"], params["w5"], params["w6a"], params["w6b"],
      params["b2"], params["b34"], params["bra"], params["brb"],
      params["b5"], params["b6"])

    out = out_flat.reshape(n, ho2, wo2, cout)
    return jnp.transpose(out, (0, 3, 1, 2))                        # NHWC -> NCHW


if __name__ == "__main__":
    x = jax.random.normal(jax.random.PRNGKey(0), (2, 3, 16, 16), jnp.float32)  # NCHW
    params = make_downsample1_params(seed=0, n=2, h=16, w=16)
    out = downsample1_forward(params, x)
    out = jax.block_until_ready(out)
    assert out.shape == (2, 64, 8, 8), out.shape
    assert bool(jnp.all(jnp.isfinite(out)))
    print("KERNEL_OK")
</pallas_src>

<mosaic_0001>
module attributes {stable_mosaic.version = 11 : i64} {
  func.func @_conv1_kernel(%arg0: memref<512x27xbf16, #tpu.memory_space<vmem>>, %arg1: memref<27x32xbf16, #tpu.memory_space<vmem>>, %arg2: memref<1x32xf32, #tpu.memory_space<vmem>>, %arg3: memref<512x32xbf16, #tpu.memory_space<vmem>>) attributes {dimension_semantics = [], scalar_prefetch = 0 : i64, scratch_operands = 0 : i64, tpu.core_type = #tpu.core_type<tc>} {
    %c0 = arith.constant 0 : index
    %c0_0 = arith.constant 0 : index
    %0 = vector.load %arg0[%c0, %c0_0] : memref<512x27xbf16, #tpu.memory_space<vmem>>, vector<512x27xbf16>
    %c0_1 = arith.constant 0 : index
    %c0_2 = arith.constant 0 : index
    %1 = vector.load %arg1[%c0_1, %c0_2] : memref<27x32xbf16, #tpu.memory_space<vmem>>, vector<27x32xbf16>
    %cst = arith.constant dense<0.000000e+00> : vector<512x32xf32>
    %2 = tpu.matmul %0, %1, %cst {dimension_numbers = #tpu.dot_dimension_numbers<[1], [0], [0], [1], [0, 0, 1, 1], [], []>} : vector<512x27xbf16>, vector<27x32xbf16>, vector<512x32xf32> -> vector<512x32xf32>
    %c0_3 = arith.constant 0 : index
    %c0_4 = arith.constant 0 : index
    %3 = vector.load %arg2[%c0_3, %c0_4] : memref<1x32xf32, #tpu.memory_space<vmem>>, vector<1x32xf32>
    %4 = vector.broadcast %3 : vector<1x32xf32> to vector<512x32xf32>
    %5 = arith.addf %2, %4 : vector<512x32xf32>
    %cst_5 = arith.constant 2.000000e+01 : f32
    %6 = vector.broadcast %cst_5 : f32 to vector<512x32xf32>
    %7 = arith.minimumf %5, %6 : vector<512x32xf32>
    %8 = math.exp %7 : vector<512x32xf32>
    %cst_6 = arith.constant 1.000000e+00 : f32
    %9 = vector.broadcast %cst_6 : f32 to vector<512x32xf32>
    %10 = arith.addf %9, %8 : vector<512x32xf32>
    %11 = arith.mulf %10, %10 : vector<512x32xf32>
    %cst_7 = arith.constant 1.000000e+00 : f32
    %12 = vector.broadcast %cst_7 : f32 to vector<512x32xf32>
    %13 = arith.subf %11, %12 : vector<512x32xf32>
    %cst_8 = arith.constant 1.000000e+00 : f32
    %14 = vector.broadcast %cst_8 : f32 to vector<512x32xf32>
    %15 = arith.addf %11, %14 : vector<512x32xf32>
    %16 = tpu.reciprocal %15 {approx = true} : vector<512x32xf32> -> vector<512x32xf32>
    %17 = arith.mulf %13, %16 : vector<512x32xf32>
    %cst_9 = arith.constant 2.000000e+01 : f32
    %18 = vector.broadcast %cst_9 : f32 to vector<512x32xf32>
    %19 = arith.cmpf ogt, %5, %18 : vector<512x32xf32>
    %20 = arith.mulf %5, %17 : vector<512x32xf32>
    %21 = arith.select %19, %5, %20 : vector<512x32xi1>, vector<512x32xf32>
    %22 = arith.truncf %21 : vector<512x32xf32> to vector<512x32xbf16>
    %c0_10 = arith.constant 0 : index
    %c0_11 = arith.constant 0 : index
    %23 = vector.load %arg3[%c0_10, %c0_11] : memref<512x32xbf16, #tpu.memory_space<vmem>>, vector<512x32xbf16>
    tpu.vector_store %arg3[%c0_10, %c0_11], %22 {strides = array<i32>} : memref<512x32xbf16, #tpu.memory_space<vmem>>, vector<512x32xbf16>,
    return
  }
}

module attributes {stable_mosaic.version = 11 : i64} {
  func.func @_stage2_kernel(%arg0: memref<128x288xbf16, #tpu.memory_space<vmem>>, %arg1: memref<288x64xbf16, #tpu.memory_space<vmem>>, %arg2: memref<64x128xf32, #tpu.memory_space<vmem>>, %arg3: memref<64x32xf32, #tpu.memory_space<vmem>>, %arg4: memref<9x128x128xf32, #tpu.memory_space<vmem>>, %arg5: memref<9x32x64xf32, #tpu.memory_space<vmem>>, %arg6: memref<64x64xf32, #tpu.memory_space<vmem>>, %arg7: memref<64x64xf32, #tpu.memory_space<vmem>>, %arg8: memref<64x64xf32, #tpu.memory_space<vmem>>, %arg9: memref<1x64xf32, #tpu.memory_space<vmem>>, %arg10: memref<1x128xf32, #tpu.memory_space<vmem>>, %arg11: memref<1x32xf32, #tpu.memory_space<vmem>>, %arg12: memref<1x64xf32, #tpu.memory_space<vmem>>, %arg13: memref<1x64xf32, #tpu.memory_space<vmem>>, %arg14: memref<1x64xf32, #tpu.memory_space<vmem>>, %arg15: memref<128x64xf32, #tpu.memory_space<vmem>>) attributes {dimension_semantics = [], scalar_prefetch = 0 : i64, scratch_operands = 0 : i64, tpu.core_type = #tpu.core_type<tc>} {
    %c0 = arith.constant 0 : index
    %c0_0 = arith.constant 0 : index
    %0 = vector.load %arg0[%c0, %c0_0] : memref<128x288xbf16, #tpu.memory_space<vmem>>, vector<128x288xbf16>
    %c0_1 = arith.constant 0 : index
    %c0_2 = arith.constant 0 : index
    %1 = vector.load %arg1[%c0_1, %c0_2] : memref<288x64xbf16, #tpu.memory_space<vmem>>, vector<288x64xbf16>
    %cst = arith.constant dense<0.000000e+00> : vector<128x64xf32>
    %2 = tpu.matmul %0, %1, %cst {dimension_numbers = #tpu.dot_dimension_numbers<[1], [0], [0], [1], [0, 0, 1, 1], [], []>} : vector<128x288xbf16>, vector<288x64xbf16>, vector<128x64xf32> -> vector<128x64xf32>
    %c0_3 = arith.constant 0 : index
    %c0_4 = arith.constant 0 : index
    %3 = vector.load %arg9[%c0_3, %c0_4] : memref<1x64xf32, #tpu.memory_space<vmem>>, vector<1x64xf32>
    %4 = vector.broadcast %3 : vector<1x64xf32> to vector<128x64xf32>
    %5 = arith.addf %2, %4 : vector<128x64xf32>
    %cst_5 = arith.constant 2.000000e+01 : f32
    %6 = vector.broadcast %cst_5 : f32 to vector<128x64xf32>
    %7 = arith.minimumf %5, %6 : vector<128x64xf32>
    %8 = math.exp %7 : vector<128x64xf32>
    %cst_6 = arith.constant 1.000000e+00 : f32
    %9 = vector.broadcast %cst_6 : f32 to vector<128x64xf32>
    %10 = arith.addf %9, %8 : vector<128x64xf32>
    %11 = arith.mulf %10, %10 : vector<128x64xf32>
    %cst_7 = arith.constant 1.000000e+00 : f32
    %12 = vector.broadcast %cst_7 : f32 to vector<128x64xf32>
    %13 = arith.subf %11, %12 : vector<128x64xf32>
    %cst_8 = arith.constant 1.000000e+00 : f32
    %14 = vector.broadcast %cst_8 : f32 to vector<128x64xf32>
    %15 = arith.addf %11, %14 : vector<128x64xf32>
    %16 = tpu.reciprocal %15 {approx = true} : vector<128x64xf32> -> vector<128x64xf32>
    %17 = arith.mulf %13, %16 : vector<128x64xf32>
    %cst_9 = arith.constant 2.000000e+01 : f32
    %18 = vector.broadcast %cst_9 : f32 to vector<128x64xf32>
    %19 = arith.cmpf ogt, %5, %18 : vector<128x64xf32>
    %20 = arith.mulf %5, %17 : vector<128x64xf32>
    %21 = arith.select %19, %5, %20 : vector<128x64xi1>, vector<128x64xf32>
    %c0_10 = arith.constant 0 : index
    %c0_11 = arith.constant 0 : index
    %22 = vector.load %arg2[%c0_10, %c0_11] : memref<64x128xf32, #tpu.memory_space<vmem>>, vector<64x128xf32>
    %cst_12 = arith.constant dense<0.000000e+00> : vector<128x128xf32>
    %23 = tpu.matmul %21, %22, %cst_12 {dimension_numbers = #tpu.dot_dimension_numbers<[1], [0], [0], [1], [0, 0, 1, 1], [], []>} : vector<128x64xf32>, vector<64x128xf32>, vector<128x128xf32> -> vector<128x128xf32>
    %c0_13 = arith.constant 0 : index
    %c0_14 = arith.constant 0 : index
    %24 = vector.load %arg10[%c0_13, %c0_14] : memref<1x128xf32, #tpu.memory_space<vmem>>, vector<1x128xf32>
    %25 = vector.broadcast %24 : vector<1x128xf32> to vector<128x128xf32>
    %26 = arith.addf %23, %25 : vector<128x128xf32>
    %cst_15 = arith.constant 2.000000e+01 : f32
    %27 = vector.broadcast %cst_15 : f32 to vector<128x128xf32>
    %28 = arith.minimumf %26, %27 : vector<128x128xf32>
    %29 = math.exp %28 : vector<128x128xf32>
    %cst_16 = arith.constant 1.000000e+00 : f32
    %30 = vector.broadcast %cst_16 : f32 to vector<128x128xf32>
    %31 = arith.addf %30, %29 : vector<128x128xf32>
    %32 = arith.mulf %31, %31 : vector<128x128xf32>
    %cst_17 = arith.constant 1.000000e+00 : f32
    %33 = vector.broadcast %cst_17 : f32 to vector<128x128xf32>
    %34 = arith.subf %32, %33 : vector<128x128xf32>
    %cst_18 = arith.constant 1.000000e+00 : f32
    %35 = vector.broadcast %cst_18 : f32 to vector<128x128xf32>
    %36 = arith.addf %32, %35 : vector<128x128xf32>
    %37 = tpu.reciprocal %36 {approx = true} : vector<128x128xf32> -> vector<128x128xf32>
    %38 = arith.mulf %34, %37 : vector<128x128xf32>
    %cst_19 = arith.constant 2.000000e+01 : f32
    %39 = vector.broadcast %cst_19 : f32 to vector<128x128xf32>
    %40 = arith.cmpf ogt, %26, %39 : vector<128x128xf32>
    %41 = arith.mulf %26, %38 : vector<128x128xf32>
    %42 = arith.select %40, %26, %41 : vector<128x128xi1>, vector<128x128xf32>
    %43 = vector.extract_strided_slice %42 {offsets = [0, 0], sizes = [128, 64], strides = [1, 1]} : vector<128x128xf32> to vector<128x64xf32>
    %44 = vector.extract_strided_slice %42 {offsets = [0, 64], sizes = [128, 64], strides = [1, 1]} : vector<128x128xf32> to vector<128x64xf32>
    %c0_20 = arith.constant 0 : index
    %c0_21 = arith.constant 0 : index
    %45 = vector.load %arg3[%c0_20, %c0_21] : memref<64x32xf32, #tpu.memory_space<vmem>>, vector<64x32xf32>
    %cst_22 = arith.constant dense<0.000000e+00> : vector<128x32xf32>
    %46 = tpu.matmul %43, %45, %cst_22 {dimension_numbers = #tpu.dot_dimension_numbers<[1], [0], [0], [1], [0, 0, 1, 1], [], []>} : vector<128x64xf32>, vector<64x32xf32>, vector<128x32xf32> -> vector<128x32xf32>
    %c0_23 = arith.constant 0 : index
    %c0_24 = arith.constant 0 : index
    %47 = vector.load %arg11[%c0_23, %c0_24] : memref<1x32xf32, #tpu.memory_space<vmem>>, vector<1x32xf32>
    %48 = vector.broadcast %47 : vector<1x32xf32> to vector<128x32xf32>
    %49 = arith.addf %46, %48 : vector<128x32xf32>
    %cst_25 = arith.constant 2.000000e+01 : f32
    %50 = vector.broadcast %cst_25 : f32 to vector<128x32xf32>
    %51 = arith.minimumf %49, %50 : vector<128x32xf32>
    %52 = math.exp %51 : vector<128x32xf32>
    %cst_26 = arith.constant 1.000000e+00 : f32
    %53 = vector.broadcast %cst_26 : f32 to vector<128x32xf32>
    %54 = arith.addf %53, %52 : vector<128x32xf32>
    %55 = arith.mulf %54, %54 : vector<128x32xf32>
    %cst_27 = arith.constant 1.000000e+00 : f32
    %56 = vector.broadcast %cst_27 : f32 to vector<128x32xf32>
    %57 = arith.subf %55, %56 : vector<128x32xf32>
    %cst_28 = arith.constant 1.000000e+00 : f32
    %58 = vector.broadcast %cst_28 : f32 to vector<128x32xf32>
    %59 = arith.addf %55, %58 : vector<128x32xf32>
    %60 = tpu.reciprocal %59 {approx = true} : vector<128x32xf32> -> vector<128x32xf32>
    %61 = arith.mulf %57, %60 : vector<128x32xf32>
    %cst_29 = arith.constant 2.000000e+01 : f32
    %62 = vector.broadcast %cst_29 : f32 to vector<128x32xf32>
    %63 = arith.cmpf ogt, %49, %62 : vector<128x32xf32>
    %64 = arith.mulf %49, %61 : vector<128x32xf32>
    %65 = arith.select %63, %49, %64 : vector<128x32xi1>, vector<128x32xf32>
    %cst_30 = arith.constant 0.000000e+00 : f32
    %66 = vector.broadcast %cst_30 : f32 to vector<128x64xf32>
    %c0_31 = arith.constant 0 : index
    %c0_32 = arith.constant 0 : index
    %c0_33 = arith.constant 0 : index
    %67 = vector.load %arg4[%c0_31, %c0_32, %c0_33] : memref<9x128x128xf32, #tpu.memory_space<vmem>>, vector<1x128x128xf32>
    %68 = vector.shape_cast %67 : vector<1x128x128xf32> to vector<128x128xf32>
    %cst_34 = arith.constant dense<0.000000e+00> : vector<128x32xf32>
    %69 = tpu.matmul %68, %65, %cst_34 {dimension_numbers = #tpu.dot_dimension_numbers<[1], [0], [0], [1], [0, 0, 1, 1], [], []>} : vector<128x128xf32>, vector<128x32xf32>, vector<128x32xf32> -> vector<128x32xf32>
    %c0_35 = arith.constant 0 : index
    %c0_36 = arith.constant 0 : index
    %c0_37 = arith.constant 0 : index
    %70 = vector.load %arg5[%c0_35, %c0_36, %c0_37] : memref<9x32x64xf32, #tpu.memory_space<vmem>>, vector<1x32x64xf32>
    %71 = vector.shape_cast %70 : vector<1x32x64xf32> to vector<32x64xf32>
    %cst_38 = arith.constant dense<0.000000e+00> : vector<128x64xf32>
    %72 = tpu.matmul %69, %71, %cst_38 {dimension_numbers = #tpu.dot_dimension_numbers<[1], [0], [0], [1], [0, 0, 1, 1], [], []>} : vector<128x32xf32>, vector<32x64xf32>, vector<128x64xf32> -> vector<128x64xf32>
    %73 = arith.addf %66, %72 : vector<128x64xf32>
    %c1 = arith.constant 1 : index
    %c0_39 = arith.constant 0 : index
    %c0_40 = arith.constant 0 : index
    %74 = vector.load %arg4[%c1, %c0_39, %c0_40] : memref<9x128x128xf32, #tpu.memory_space<vmem>>, vector<1x128x128xf32>
    %75 = vector.shape_cast %74 : vector<1x128x128xf32> to vector<128x128xf32>
    %cst_41 = arith.constant dense<0.000000e+00> : vector<128x32xf32>
    %76 = tpu.matmul %75, %65, %cst_41 {dimension_numbers = #tpu.dot_dimension_numbers<[1], [0], [0], [1], [0, 0, 1, 1], [], []>} : vector<128x128xf32>, vector<128x32xf32>, vector<128x32xf32> -> vector<128x32xf32>
    %c1_42 = arith.constant 1 : index
    %c0_43 = arith.constant 0 : index
    %c0_44 = arith.constant 0 : index
    %77 = vector.load %arg5[%c1_42, %c0_43, %c0_44] : memref<9x32x64xf32, #tpu.memory_space<vmem>>, vector<1x32x64xf32>
    %78 = vector.shape_cast %77 : vector<1x32x64xf32> to vector<32x64xf32>
    %cst_45 = arith.constant dense<0.000000e+00> : vector<128x64xf32>
    %79 = tpu.matmul %76, %78, %cst_45 {dimension_numbers = #tpu.dot_dimension_numbers<[1], [0], [0], [1], [0, 0, 1, 1], [], []>} : vector<128x32xf32>, vector<32x64xf32>, vector<128x64xf32> -> vector<128x64xf32>
    %80 = arith.addf %73, %79 : vector<128x64xf32>
    %c2 = arith.constant 2 : index
    %c0_46 = arith.constant 0 : index
    %c0_47 = arith.constant 0 : index
    %81 = vector.load %arg4[%c2, %c0_46, %c0_47] : memref<9x128x128xf32, #tpu.memory_space<vmem>>, vector<1x128x128xf32>
    %82 = vector.shape_cast %81 : vector<1x128x128xf32> to vector<128x128xf32>
    %cst_48 = arith.constant dense<0.000000e+00> : vector<128x32xf32>
    %83 = tpu.matmul %82, %65, %cst_48 {dimension_numbers = #tpu.dot_dimension_numbers<[1], [0], [0], [1], [0, 0, 1, 1], [], []>} : vector<128x128xf32>, vector<128x32xf32>, vector<128x32xf32> -> vector<128x32xf32>
    %c2_49 = arith.constant 2 : index
    %c0_50 = arith.constant 0 : index
    %c0_51 = arith.constant 0 : index
    %84 = vector.load %arg5[%c2_49, %c0_50, %c0_51] : memref<9x32x64xf32, #tpu.memory_space<vmem>>, vector<1x32x64xf32>
    %85 = vector.shape_cast %84 : vector<1x32x64xf32> to vector<32x64xf32>
    %cst_52 = arith.constant dense<0.000000e+00> : vector<128x64xf32>
    %86 = tpu.matmul %83, %85, %cst_52 {dimension_numbers = #tpu.dot_dimension_numbers<[1], [0], [0], [1], [0, 0, 1, 1], [], []>} : vector<128x32xf32>, vector<32x64xf32>, vector<128x64xf32> -> vector<128x64xf32>
    %87 = arith.addf %80, %86 : vector<128x64xf32>
    %c3 = arith.constant 3 : index
    %c0_53 = arith.constant 0 : index
    %c0_54 = arith.constant 0 : index
    %88 = vector.load %arg4[%c3, %c0_53, %c0_54] : memref<9x128x128xf32, #tpu.memory_space<vmem>>, vector<1x128x128xf32>
    %89 = vector.shape_cast %88 : vector<1x128x128xf32> to vector<128x128xf32>
    %cst_55 = arith.constant dense<0.000000e+00> : vector<128x32xf32>
    %90 = tpu.matmul %89, %65, %cst_55 {dimension_numbers = #tpu.dot_dimension_numbers<[1], [0], [0], [1], [0, 0, 1, 1], [], []>} : vector<128x128xf32>, vector<128x32xf32>, vector<128x32xf32> -> vector<128x32xf32>
    %c3_56 = arith.constant 3 : index
    %c0_57 = arith.constant 0 : index
    %c0_58 = arith.constant 0 : index
    %91 = vector.load %arg5[%c3_56, %c0_57, %c0_58] : memref<9x32x64xf32, #tpu.memory_space<vmem>>, vector<1x32x64xf32>
    %92 = vector.shape_cast %91 : vector<1x32x64xf32> to vector<32x64xf32>
    %cst_59 = arith.constant dense<0.000000e+00> : vector<128x64xf32>
    %93 = tpu.matmul %90, %92, %cst_59 {dimension_numbers = #tpu.dot_dimension_numbers<[1], [0], [0], [1], [0, 0, 1, 1], [], []>} : vector<128x32xf32>, vector<32x64xf32>, vector<128x64xf32> -> vector<128x64xf32>
    %94 = arith.addf %87, %93 : vector<128x64xf32>
    %c4 = arith.constant 4 : index
    %c0_60 = arith.constant 0 : index
    %c0_61 = arith.constant 0 : index
    %95 = vector.load %arg4[%c4, %c0_60, %c0_61] : memref<9x128x128xf32, #tpu.memory_space<vmem>>, vector<1x128x128xf32>
    %96 = vector.shape_cast %95 : vector<1x128x128xf32> to vector<128x128xf32>
    %cst_62 = arith.constant dense<0.000000e+00> : vector<128x32xf32>
    %97 = tpu.matmul %96, %65, %cst_62 {dimension_numbers = #tpu.dot_dimension_numbers<[1], [0], [0], [1], [0, 0, 1, 1], [], []>} : vector<128x128xf32>, vector<128x32xf32>, vector<128x32xf32> -> vector<128x32xf32>
    %c4_63 = arith.constant 4 : index
    %c0_64 = arith.constant 0 : index
    %c0_65 = arith.constant 0 : index
    %98 = vector.load %arg5[%c4_63, %c0_64, %c0_65] : memref<9x32x64xf32, #tpu.memory_space<vmem>>, vector<1x32x64xf32>
    %99 = vector.shape_cast %98 : vector<1x32x64xf32> to vector<32x64xf32>
    %cst_66 = arith.constant dense<0.000000e+00> : vector<128x64xf32>
    %100 = tpu.matmul %97, %99, %cst_66 {dimension_numbers = #tpu.dot_dimension_numbers<[1], [0], [0], [1], [0, 0, 1, 1], [], []>} : vector<128x32xf32>, vector<32x64xf32>, vector<128x64xf32> -> vector<128x64xf32>
    %101 = arith.addf %94, %100 : vector<128x64xf32>
    %c5 = arith.constant 5 : index
    %c0_67 = arith.constant 0 : index
    %c0_68 = arith.constant 0 : index
    %102 = vector.load %arg4[%c5, %c0_67, %c0_68] : memref<9x128x128xf32, #tpu.memory_space<vmem>>, vector<1x128x128xf32>
    %103 = vector.shape_cast %102 : vector<1x128x128xf32> to vector<128x128xf32>
    %cst_69 = arith.constant dense<0.000000e+00> : vector<128x32xf32>
    %104 = tpu.matmul %103, %65, %cst_69 {dimension_numbers = #tpu.dot_dimension_numbers<[1], [0], [0], [1], [0, 0, 1, 1], [], []>} : vector<128x128xf32>, vector<128x32xf32>, vector<128x32xf32> -> vector<128x32xf32>
    %c5_70 = arith.constant 5 : index
    %c0_71 = arith.constant 0 : index
    %c0_72 = arith.constant 0 : index
    %105 = vector.load %arg5[%c5_70, %c0_71, %c0_72] : memref<9x32x64xf32, #tpu.memory_space<vmem>>, vector<1x32x64xf32>
    %106 = vector.shape_cast %105 : vector<1x32x64xf32> to vector<32x64xf32>
    %cst_73 = arith.constant dense<0.000000e+00> : vector<128x64xf32>
    %107 = tpu.matmul %104, %106, %cst_73 {dimension_numbers = #tpu.dot_dimension_numbers<[1], [0], [0], [1], [0, 0, 1, 1], [], []>} : vector<128x32xf32>, vector<32x64xf32>, vector<128x64xf32> -> vector<128x64xf32>
    %108 = arith.addf %101, %107 : vector<128x64xf32>
    %c6 = arith.constant 6 : index
    %c0_74 = arith.constant 0 : index
    %c0_75 = arith.constant 0 : index
    %109 = vector.load %arg4[%c6, %c0_74, %c0_75] : memref<9x128x128xf32, #tpu.memory_space<vmem>>, vector<1x128x128xf32>
    %110 = vector.shape_cast %109 : vector<1x128x128xf32> to vector<128x128xf32>
    %cst_76 = arith.constant dense<0.000000e+00> : vector<128x32xf32>
    %111 = tpu.matmul %110, %65, %cst_76 {dimension_numbers = #tpu.dot_dimension_numbers<[1], [0], [0], [1], [0, 0, 1, 1], [], []>} : vector<128x128xf32>, vector<128x32xf32>, vector<128x32xf32> -> vector<128x32xf32>
    %c6_77 = arith.constant 6 : index
    %c0_78 = arith.constant 0 : index
    %c0_79 = arith.constant 0 : index
    %112 = vector.load %arg5[%c6_77, %c0_78, %c0_79] : memref<9x32x64xf32, #tpu.memory_space<vmem>>, vector<1x32x64xf32>
    %113 = vector.shape_cast %112 : vector<1x32x64xf32> to vector<32x64xf32>
    %cst_80 = arith.constant dense<0.000000e+00> : vector<128x64xf32>
    %114 = tpu.matmul %111, %113, %cst_80 {dimension_numbers = #tpu.dot_dimension_numbers<[1], [0], [0], [1], [0, 0, 1, 1], [], []>} : vector<128x32xf32>, vector<32x64xf32>, vector<128x64xf32> -> vector<128x64xf32>
    %115 = arith.addf %108, %114 : vector<128x64xf32>
    %c7 = arith.constant 7 : index
    %c0_81 = arith.constant 0 : index
    %c0_82 = arith.constant 0 : index
    %116 = vector.load %arg4[%c7, %c0_81, %c0_82] : memref<9x128x128xf32, #tpu.memory_space<vmem>>, vector<1x128x128xf32>
    %117 = vector.shape_cast %116 : vector<1x128x128xf32> to vector<128x128xf32>
    %cst_83 = arith.constant dense<0.000000e+00> : vector<128x32xf32>
    %118 = tpu.matmul %117, %65, %cst_83 {dimension_numbers = #tpu.dot_dimension_numbers<[1], [0], [0], [1], [0, 0, 1, 1], [], []>} : vector<128x128xf32>, vector<128x32xf32>, vector<128x32xf32> -> vector<128x32xf32>
    %c7_84 = arith.constant 7 : index
    %c0_85 = arith.constant 0 : index
    %c0_86 = arith.constant 0 : index
    %119 = vector.load %arg5[%c7_84, %c0_85, %c0_86] : memref<9x32x64xf32, #tpu.memory_space<vmem>>, vector<1x32x64xf32>
    %120 = vector.shape_cast %119 : vector<1x32x64xf32> to vector<32x64xf32>
    %cst_87 = arith.constant dense<0.000000e+00> : vector<128x64xf32>
    %121 = tpu.matmul %118, %120, %cst_87 {dimension_numbers = #tpu.dot_dimension_numbers<[1], [0], [0], [1], [0, 0, 1, 1], [], []>} : vector<128x32xf32>, vector<32x64xf32>, vector<128x64xf32> -> vector<128x64xf32>
    %122 = arith.addf %115, %121 : vector<128x64xf32>
    %c8 = arith.constant 8 : index
    %c0_88 = arith.constant 0 : index
    %c0_89 = arith.constant 0 : index
    %123 = vector.load %arg4[%c8, %c0_88, %c0_89] : memref<9x128x128xf32, #tpu.memory_space<vmem>>, vector<1x128x128xf32>
    %124 = vector.shape_cast %123 : vector<1x128x128xf32> to vector<128x128xf32>
    %cst_90 = arith.constant dense<0.000000e+00> : vector<128x32xf32>
    %125 = tpu.matmul %124, %65, %cst_90 {dimension_numbers = #tpu.dot_dimension_numbers<[1], [0], [0], [1], [0, 0, 1, 1], [], []>} : vector<128x128xf32>, vector<128x32xf32>, vector<128x32xf32> -> vector<128x32xf32>
    %c8_91 = arith.constant 8 : index
    %c0_92 = arith.constant 0 : index
    %c0_93 = arith.constant 0 : index
    %126 = vector.load %arg5[%c8_91, %c0_92, %c0_93] : memref<9x32x64xf32, #tpu.memory_space<vmem>>, vector<1x32x64xf32>
    %127 = vector.shape_cast %126 : vector<1x32x64xf32> to vector<32x64xf32>
    %cst_94 = arith.constant dense<0.000000e+00> : vector<128x64xf32>
    %128 = tpu.matmul %125, %127, %cst_94 {dimension_numbers = #tpu.dot_dimension_numbers<[1], [0], [0], [1], [0, 0, 1, 1], [], []>} : vector<128x32xf32>, vector<32x64xf32>, vector<128x64xf32> -> vector<128x64xf32>
    %129 = arith.addf %122, %128 : vector<128x64xf32>
    %c0_95 = arith.constant 0 : index
    %c0_96 = arith.constant 0 : index
    %130 = vector.load %arg12[%c0_95, %c0_96] : memref<1x64xf32, #tpu.memory_space<vmem>>, vector<1x64xf32>
    %131 = vector.broadcast %130 : vector<1x64xf32> to vector<128x64xf32>
    %132 = arith.addf %129, %131 : vector<128x64xf32>
    %cst_97 = arith.constant 2.000000e+01 : f32
    %133 = vector.broadcast %cst_97 : f32 to vector<128x64xf32>
    %134 = arith.minimumf %132, %133 : vector<128x64xf32>
    %135 = math.exp %134 : vector<128x64xf32>
    %cst_98 = arith.constant 1.000000e+00 : f32
    %136 = vector.broadcast %cst_98 : f32 to vector<128x64xf32>
    %137 = arith.addf %136, %135 : vector<128x64xf32>
    %138 = arith.mulf %137, %137 : vector<128x64xf32>
    %cst_99 = arith.constant 1.000000e+00 : f32
    %139 = vector.broadcast %cst_99 : f32 to vector<128x64xf32>
    %140 = arith.subf %138, %139 : vector<128x64xf32>
    %cst_100 = arith.constant 1.000000e+00 : f32
    %141 = vector.broadcast %cst_100 : f32 to vector<128x64xf32>
    %142 = arith.addf %138, %141 : vector<128x64xf32>
    %143 = tpu.reciprocal %142 {approx = true} : vector<128x64xf32> -> vector<128x64xf32>
    %144 = arith.mulf %140, %143 : vector<128x64xf32>
    %cst_101 = arith.constant 2.000000e+01 : f32
    %145 = vector.broadcast %cst_101 : f32 to vector<128x64xf32>
    %146 = arith.cmpf ogt, %132, %145 : vector<128x64xf32>
    %147 = arith.mulf %132, %144 : vector<128x64xf32>
    %148 = arith.select %146, %132, %147 : vector<128x64xi1>, vector<128x64xf32>
    %149 = arith.addf %148, %43 : vector<128x64xf32>
    %c0_102 = arith.constant 0 : index
    %c0_103 = arith.constant 0 : index
    %150 = vector.load %arg6[%c0_102, %c0_103] : memref<64x64xf32, #tpu.memory_space<vmem>>, vector<64x64xf32>
    %cst_104 = arith.constant dense<0.000000e+00> : vector<128x64xf32>
    %151 = tpu.matmul %149, %150, %cst_104 {dimension_numbers = #tpu.dot_dimension_numbers<[1], [0], [0], [1], [0, 0, 1, 1], [], []>} : vector<128x64xf32>, vector<64x64xf32>, vector<128x64xf32> -> vector<128x64xf32>
    %c0_105 = arith.constant 0 : index
    %c0_106 = arith.constant 0 : index
    %152 = vector.load %arg13[%c0_105, %c0_106] : memref<1x64xf32, #tpu.memory_space<vmem>>, vector<1x64xf32>
    %153 = vector.broadcast %152 : vector<1x64xf32> to vector<128x64xf32>
    %154 = arith.addf %151, %153 : vector<128x64xf32>
    %cst_107 = arith.constant 2.000000e+01 : f32
    %155 = vector.broadcast %cst_107 : f32 to vector<128x64xf32>
    %156 = arith.minimumf %154, %155 : vector<128x64xf32>
    %157 = math.exp %156 : vector<128x64xf32>
    %cst_108 = arith.constant 1.000000e+00 : f32
    %158 = vector.broadcast %cst_108 : f32 to vector<128x64xf32>
    %159 = arith.addf %158, %157 : vector<128x64xf32>
    %160 = arith.mulf %159, %159 : vector<128x64xf32>
    %cst_109 = arith.constant 1.000000e+00 : f32
    %161 = vector.broadcast %cst_109 : f32 to vector<128x64xf32>
    %162 = arith.subf %160, %161 : vector<128x64xf32>
    %cst_110 = arith.constant 1.000000e+00 : f32
    %163 = vector.broadcast %cst_110 : f32 to vector<128x64xf32>
    %164 = arith.addf %160, %163 : vector<128x64xf32>
    %165 = tpu.reciprocal %164 {approx = true} : vector<128x64xf32> -> vector<128x64xf32>
    %166 = arith.mulf %162, %165 : vector<128x64xf32>
    %cst_111 = arith.constant 2.000000e+01 : f32
    %167 = vector.broadcast %cst_111 : f32 to vector<128x64xf32>
    %168 = arith.cmpf ogt, %154, %167 : vector<128x64xf32>
    %169 = arith.mulf %154, %166 : vector<128x64xf32>
    %170 = arith.select %168, %154, %169 : vector<128x64xi1>, vector<128x64xf32>
    %c0_112 = arith.constant 0 : index
    %c0_113 = arith.constant 0 : index
    %171 = vector.load %arg7[%c0_112, %c0_113] : memref<64x64xf32, #tpu.memory_space<vmem>>, vector<64x64xf32>
    %cst_114 = arith.constant dense<0.000000e+00> : vector<128x64xf32>
    %172 = tpu.matmul %170, %171, %cst_114 {dimension_numbers = #tpu.dot_dimension_numbers<[1], [0], [0], [1], [0, 0, 1, 1], [], []>} : vector<128x64xf32>, vector<64x64xf32>, vector<128x64xf32> -> vector<128x64xf32>
    %c0_115 = arith.constant 0 : index
    %c0_116 = arith.constant 0 : index
    %173 = vector.load %arg8[%c0_115, %c0_116] : memref<64x64xf32, #tpu.memory_space<vmem>>, vector<64x64xf32>
    %cst_117 = arith.constant dense<0.000000e+00> : vector<128x64xf32>
    %174 = tpu.matmul %44, %173, %cst_117 {dimension_numbers = #tpu.dot_dimension_numbers<[1], [0], [0], [1], [0, 0, 1, 1], [], []>} : vector<128x64xf32>, vector<64x64xf32>, vector<128x64xf32> -> vector<128x64xf32>
    %175 = arith.addf %172, %174 : vector<128x64xf32>
    %c0_118 = arith.constant 0 : index
    %c0_119 = arith.constant 0 : index
    %176 = vector.load %arg14[%c0_118, %c0_119] : memref<1x64xf32, #tpu.memory_space<vmem>>, vector<1x64xf32>
    %177 = vector.broadcast %176 : vector<1x64xf32> to vector<128x64xf32>
    %178 = arith.addf %175, %177 : vector<128x64xf32>
    %cst_120 = arith.constant 2.000000e+01 : f32
    %179 = vector.broadcast %cst_120 : f32 to vector<128x64xf32>
    %180 = arith.minimumf %178, %179 : vector<128x64xf32>
    %181 = math.exp %180 : vector<128x64xf32>
    %cst_121 = arith.constant 1.000000e+00 : f32
    %182 = vector.broadcast %cst_121 : f32 to vector<128x64xf32>
    %183 = arith.addf %182, %181 : vector<128x64xf32>
    %184 = arith.mulf %183, %183 : vector<128x64xf32>
    %cst_122 = arith.constant 1.000000e+00 : f32
    %185 = vector.broadcast %cst_122 : f32 to vector<128x64xf32>
    %186 = arith.subf %184, %185 : vector<128x64xf32>
    %cst_123 = arith.constant 1.000000e+00 : f32
    %187 = vector.broadcast %cst_123 : f32 to vector<128x64xf32>
    %188 = arith.addf %184, %187 : vector<128x64xf32>
    %189 = tpu.reciprocal %188 {approx = true} : vector<128x64xf32> -> vector<128x64xf32>
    %190 = arith.mulf %186, %189 : vector<128x64xf32>
    %cst_124 = arith.constant 2.000000e+01 : f32
    %191 = vector.broadcast %cst_124 : f32 to vector<128x64xf32>
    %192 = arith.cmpf ogt, %178, %191 : vector<128x64xf32>
    %193 = arith.mulf %178, %190 : vector<128x64xf32>
    %194 = arith.select %192, %178, %193 : vector<128x64xi1>, vector<128x64xf32>
    %c0_125 = arith.constant 0 : index
    %c0_126 = arith.constant 0 : index
    %195 = vector.load %arg15[%c0_125, %c0_126] : memref<128x64xf32, #tpu.memory_space<vmem>>, vector<128x64xf32>
    tpu.vector_store %arg15[%c0_125, %c0_126], %194 {strides = array<i32>} : memref<128x64xf32, #tpu.memory_space<vmem>>, vector<128x64xf32>,
    return
  }
}

</mosaic_0001>

<bundles_post_ra>
// kernel: downsample1_forward.2
= control target key start
LH: loop header
LB: loop body
LE: loop exit
PB: predicated region body
PF: predicated region fallthrough
CT: control target
= control target key end

     0   :  { %vm358_vm0 = vcmask 1044480   ;;  %vm359_vm1 = vcmask 1045504   ;;  %vm261_vm2 = vcmask 220160   ;;  %v2404_v1 = vmov 65535   ;;  %s3563_s1 = inlined_call_operand.vmem [shape: bf16[27,32], index: 1, kind: input, shape index: {}]   ;;  %s3564_s0 = inlined_call_operand.vmem [shape: bf16[512,27], index: 0, kind: input, shape index: {}]   ;;  %s3565_s2 = inlined_call_operand.vmem [shape: f32[1,32], index: 2, kind: input, shape index: {}]   ;;  %s3566_s3 = inlined_call_operand.vmem [shape: bf16[512,32], index: 3, kind: output, shape index: {}]  }
   0x1   :  { %v2113_v0 = vld [vmem:[%s3563_s1] sm:$0xff]   ;;  %v360_v2 = vsel %vm358_vm0, 4294967295, %v2404_v1  ;;  %v2114_v3 = vld [vmem:[%s3563_s1 + $0x8] sm:$0x3f]   ;;  %v2119_v10 = vld [vmem:[%s3564_s0 + $0x10] sm:$0xff]   ;;  %vm1678_vm4 = vcmask 257024  }
   0x2   :  { %2040 = vmatprep.subr.bf16.mxu0 %v2113_v0  ;;  %2108 = vmatprep.subr.bf16.mxu1 %v2113_v0  ;;  %v361_v4 = vsel %vm359_vm1, %v360_v2, 0  ;;  %v2115_v5 = vld [vmem:[%s3564_s0] sm:$0xff]   ;;  %v2117_v8 = vld [vmem:[%s3564_s0 + $0x8] sm:$0xff]   ;;  %v2120_v11 = vld [vmem:[%s3564_s0 + $0x90] sm:$0xff]  }
   0x3   :  { %2041 = vmatpush3.bf16.msra.mxu0 %v2113_v0  ;;  %2110 = vmatpush3.bf16.msra.mxu1 %v2113_v0  ;;  %v363_v6 = vand.u32 %v2114_v3, %v361_v4  ;;  %v2116_v7 = vld [vmem:[%s3564_s0 + $0x80] sm:$0xff]   ;;  %v2118_v9 = vld [vmem:[%s3564_s0 + $0x88] sm:$0xff]   ;;  %v2121_v12 = vld [vmem:[%s3564_s0 + $0x18] sm:$0xff]  }
   0x4   :  { %2044 = vmatprep.mubr.msk.bf16.mxu0 %vm261_vm2, %v2115_v5  ;;  %2076 = vmatprep.mubr.msk.bf16.mxu1 %vm261_vm2, %v2116_v7  ;;  %v2122_v13 = vld [vmem:[%s3564_s0 + $0x98] sm:$0xff]   ;;  %v2123_v14 = vld [vmem:[%s3564_s0 + $0x20] sm:$0xff]   ;;  %v2125_v16 = vld [vmem:[%s3564_s0 + $0x28] sm:$0xff]  }
   0x5   :  { %2042 = vmatprep.subr.bf16.mxu0 %v363_v6  ;;  %2109 = vmatprep.subr.bf16.mxu1 %v363_v6  ;;  %v2124_v15 = vld [vmem:[%s3564_s0 + $0xa0] sm:$0xff]   ;;  %v2126_v17 = vld [vmem:[%s3564_s0 + $0xa8] sm:$0xff]   ;;  %v2127_v18 = vld [vmem:[%s3564_s0 + $0x30] sm:$0xff]  }
   0x6   :  { %v2128_v19 = vld [vmem:[%s3564_s0 + $0xb0] sm:$0xff]   ;;  %v2129_v20 = vld [vmem:[%s3564_s0 + $0x38] sm:$0xff]   ;;  %v2131_v22 = vld [vmem:[%s3564_s0 + $0x40] sm:$0xff]  }
   0x7   :  { %2043 = vmatpush3.bf16.msra.mxu0 %v363_v6  ;;  %2111 = vmatpush3.bf16.msra.mxu1 %v363_v6  ;;  %v2130_v21 = vld [vmem:[%s3564_s0 + $0xb8] sm:$0xff]   ;;  %v2132_v23 = vld [vmem:[%s3564_s0 + $0xc0] sm:$0xff]   ;;  %v2133_v24 = vld [vmem:[%s3564_s0 + $0x48] sm:$0xff]  }
   0x8   :  { %v2134_v25 = vld [vmem:[%s3564_s0 + $0xc8] sm:$0xff]   ;;  %v2135_v26 = vld [vmem:[%s3564_s0 + $0x50] sm:$0xff]   ;;  %v2137_v28 = vld [vmem:[%s3564_s0 + $0x58] sm:$0xff]  }
   0x9   :  { %v2136_v27 = vld [vmem:[%s3564_s0 + $0xd0] sm:$0xff]   ;;  %v2138_v29 = vld [vmem:[%s3564_s0 + $0xd8] sm:$0xff]   ;;  %v2139_v30 = vld [vmem:[%s3564_s0 + $0x60] sm:$0xff]  }
   0xa   :  { %2045 = vmatmul.mubr.msk.bf16.vlgmr.msra.gmra.mrb[0].mxu0 %vm261_vm2, %v2117_v8  ;;  %2077 = vmatmul.mubr.msk.bf16.vlgmr.msra.gmra.mrb[0].mxu1 %vm261_vm2, %v2118_v9  ;;  %v2140_v31 = vld [vmem:[%s3564_s0 + $0xe0] sm:$0xff]   ;;  %v2141_v32 = vld [vmem:[%s3564_s0 + $0x68] sm:$0xff]   ;;  %v2143_v34 = vld [vmem:[%s3564_s0 + $0x70] sm:$0xff]  }
   0xb   :  { %2048 = vmatprep.mubr.msk.bf16.mxu0 %vm261_vm2, %v2119_v10  ;;  %2080 = vmatprep.mubr.msk.bf16.mxu1 %vm261_vm2, %v2120_v11  ;;  %v2142_v33 = vld [vmem:[%s3564_s0 + $0xe8] sm:$0xff]   ;;  %v2144_v35 = vld [vmem:[%s3564_s0 + $0xf0] sm:$0xff]   ;;  %v2145_v36 = vld [vmem:[%s3564_s0 + $0x78] sm:$0xff]  }
   0xc   :  { %v2146_v37 = vld [vmem:[%s3564_s0 + $0xf8] sm:$0xff]   ;;  %v2562_v38 = vld [vmem:[%s3565_s2] ss:$0 sm:$0xff] }
  0x12   :  { %2049 = vmatmul.mubr.msk.bf16.gmra.mrb[4].mxu0 %vm261_vm2, %v2121_v12  ;;  %2081 = vmatmul.mubr.msk.bf16.gmra.mrb[4].mxu1 %vm261_vm2, %v2122_v13 }
  0x13   :  { %2052 = vmatprep.mubr.msk.bf16.mxu0 %vm261_vm2, %v2123_v14  ;;  %2084 = vmatprep.mubr.msk.bf16.mxu1 %vm261_vm2, %v2124_v15 }
  0x1a   :  { %2053 = vmatmul.mubr.msk.bf16.gmra.mrb[8].mxu0 %vm261_vm2, %v2125_v16  ;;  %2085 = vmatmul.mubr.msk.bf16.gmra.mrb[8].mxu1 %vm261_vm2, %v2126_v17 }
  0x1b   :  { %2056 = vmatprep.mubr.msk.bf16.mxu0 %vm261_vm2, %v2127_v18  ;;  %2088 = vmatprep.mubr.msk.bf16.mxu1 %vm261_vm2, %v2128_v19 }
  0x22   :  { %2057 = vmatmul.mubr.msk.bf16.gmra.mrb[12].mxu0 %vm261_vm2, %v2129_v20  ;;  %2089 = vmatmul.mubr.msk.bf16.gmra.mrb[12].mxu1 %vm261_vm2, %v2130_v21 }
  0x23   :  { %2060 = vmatprep.mubr.msk.bf16.mxu0 %vm261_vm2, %v2131_v22  ;;  %2092 = vmatprep.mubr.msk.bf16.mxu1 %vm261_vm2, %v2132_v23 }
  0x2a   :  { %2061 = vmatmul.mubr.msk.bf16.gmra.mrb[16].mxu0 %vm261_vm2, %v2133_v24  ;;  %2093 = vmatmul.mubr.msk.bf16.gmra.mrb[16].mxu1 %vm261_vm2, %v2134_v25 }
  0x2b   :  { %2064 = vmatprep.mubr.msk.bf16.mxu0 %vm261_vm2, %v2135_v26  ;;  %2096 = vmatprep.mubr.msk.bf16.mxu1 %vm261_vm2, %v2136_v27 }
  0x32   :  { %2065 = vmatmul.mubr.msk.bf16.gmra.mrb[20].mxu0 %vm261_vm2, %v2137_v28  ;;  %2097 = vmatmul.mubr.msk.bf16.gmra.mrb[20].mxu1 %vm261_vm2, %v2138_v29 }
  0x33   :  { %2068 = vmatprep.mubr.msk.bf16.mxu0 %vm261_vm2, %v2139_v30  ;;  %2100 = vmatprep.mubr.msk.bf16.mxu1 %vm261_vm2, %v2140_v31 }
  0x3a   :  { %2069 = vmatmul.mubr.msk.bf16.gmra.mrb[24].mxu0 %vm261_vm2, %v2141_v32  ;;  %2101 = vmatmul.mubr.msk.bf16.gmra.mrb[24].mxu1 %vm261_vm2, %v2142_v33 }
  0x3b   :  { %2072 = vmatprep.mubr.msk.bf16.mxu0 %vm261_vm2, %v2143_v34  ;;  %2104 = vmatprep.mubr.msk.bf16.mxu1 %vm261_vm2, %v2144_v35 }
  0x42   :  { %2073 = vmatmul.mubr.msk.bf16.gmra.mrb[28].mxu0 %vm261_vm2, %v2145_v36  ;;  %2105 = vmatmul.mubr.msk.bf16.gmra.mrb[28].mxu1 %vm261_vm2, %v2146_v37 }
  0xdd   :  { %v2046_v39 = vpop.f32.mrb[0].mxu0  ;;  %v2078_v40 = vpop.f32.mrb[0].mxu1 }
  0xde   :  { %v2565_v41 = vadd.f32 %v2046_v39, %v2562_v38  ;;  %v2568_v42 = vadd.f32 %v2078_v40, %v2562_v38  ;;  %v399_v43 = vpop.f32.mrb[1].mxu0  ;;  %v527_v44 = vpop.f32.mrb[1].mxu1 }
  0xdf   :  { %v2571_v45 = vadd.f32 %v2562_v38, %v399_v43  ;;  %v2574_v46 = vadd.f32 %v2562_v38, %v527_v44  ;;  %v2047_v47 = vpop.f32.mrb[2].mxu0  ;;  %v2079_v48 = vpop.f32.mrb[2].mxu1 }
  0xe0   :  { %v656_v49 = vmin.f32 %v2565_v41, 20.0  ;;  %v688_v50 = vmin.f32 %v2568_v42, 20.0  ;;  %v402_v51 = vpop.f32.mrb[3].mxu0  ;;  %v530_v52 = vpop.f32.mrb[3].mxu1  ;;  %v2581_v57 = vadd.f32 %v2047_v47, %v2562_v38  ;;  %v2584_v58 = vadd.f32 %v2079_v48, %v2562_v38 }
  0xe1   :  { %v654_v53 = vmin.f32 %v2571_v45, 20.0  ;;  %v686_v54 = vmin.f32 %v2574_v46, 20.0  ;;  %v2587_v61 = vadd.f32 %v2562_v38, %v402_v51  ;;  %v2590_v62 = vadd.f32 %v2562_v38, %v530_v52 }
  0xe2   :  { %v722_v55 = vmul.f32 1.442695, %v656_v49  ;;  %v786_v56 = vmul.f32 1.442695, %v688_v50  ;;  %v657_v63 = vmin.f32 %v2581_v57, 20.0  ;;  %v689_v0 = vmin.f32 %v2584_v58, 20.0 }
  0xe3   :  { %v718_v59 = vmul.f32 1.442695, %v654_v53  ;;  %v782_v60 = vmul.f32 1.442695, %v686_v54  ;;  %v655_v1 = vmin.f32 %v2587_v61, 20.0  ;;  %v687_v6 = vmin.f32 %v2590_v62, 20.0 }
  0xe4   :  { %2147 = vpow2.f32 %v722_v55  ;;  %v724_v4 = vmul.f32 1.442695, %v657_v63  ;;  %v788_v5 = vmul.f32 1.442695, %v689_v0  ;;  %vm1232_vm3 = vcmp.gt.f32.partialorder %v2565_v41, 20.0 }
  0xe5   :  { %2149 = vpow2.f32 %v786_v56  ;;  %v2050_v2 = vpop.f32.mrb[4].mxu0  ;;  %v2082_v3 = vpop.f32.mrb[4].mxu1  ;;  %v720_v8 = vmul.f32 1.442695, %v655_v1  ;;  %v784_v12 = vmul.f32 1.442695, %v687_v6 }
  0xe6   :  { %2151 = vpow2.f32 %v718_v59  ;;  %v415_v7 = vpop.f32.mrb[5].mxu0  ;;  %v2597_v9 = vadd.f32 %v2050_v2, %v2562_v38  ;;  %v543_v10 = vpop.f32.mrb[5].mxu1  ;;  %v2600_v13 = vadd.f32 %v2082_v3, %v2562_v38  ;;  %vm1264_vm5 = vcmp.gt.f32.partialorder %v2568_v42, 20.0 }
  0xe7   :  { %2153 = vpow2.f32 %v782_v60  ;;  %v2051_v11 = vpop.f32.mrb[6].mxu0  ;;  %v2603_v14 = vadd.f32 %v2562_v38, %v415_v7  ;;  %v2083_v15 = vpop.f32.mrb[6].mxu1  ;;  %v2607_v18 = vadd.f32 %v2562_v38, %v543_v10  ;;  %vm1230_vm6 = vcmp.gt.f32.partialorder %v2571_v45, 20.0 }
  0xe8   :  { %2155 = vpow2.f32 %v724_v4  ;;  %v418_v16 = vpop.f32.mrb[7].mxu0  ;;  %v660_v17 = vmin.f32 %v2597_v9, 20.0  ;;  %v546_v19 = vpop.f32.mrb[7].mxu1  ;;  %v692_v20 = vmin.f32 %v2600_v13, 20.0  ;;  %v2613_v26 = vadd.f32 %v2051_v11, %v2562_v38 }
  0xe9   :  { %2157 = vpow2.f32 %v788_v5  ;;  %v658_v21 = vmin.f32 %v2603_v14, 20.0  ;;  %v690_v23 = vmin.f32 %v2607_v18, 20.0  ;;  %v2616_v28 = vadd.f32 %v2083_v15, %v2562_v38 }
  0xea   :  { %2159 = vpow2.f32 %v720_v8  ;;  %v730_v22 = vmul.f32 1.442695, %v660_v17  ;;  %v794_v24 = vmul.f32 1.442695, %v692_v20  ;;  %v2619_v29 = vadd.f32 %v2562_v38, %v418_v16 }
  0xeb   :  { %2161 = vpow2.f32 %v784_v12  ;;  %v726_v25 = vmul.f32 1.442695, %v658_v21  ;;  %v790_v27 = vmul.f32 1.442695, %v690_v23  ;;  %v661_v33 = vmin.f32 %v2613_v26, 20.0 }
  0xec   :  { %2163 = vpow2.f32 %v730_v22  ;;  %v693_v48 = vmin.f32 %v2616_v28, 20.0  ;;  %v659_v54 = vmin.f32 %v2619_v29, 20.0  ;;  %v2641_v2 = vadd.f32 %v2562_v38, %v546_v19 }
  0xed   :  { %v2621_v30 = vpop.f32.mrb[8].mxu0  ;;  %v2623_v31 = vpop.f32.mrb[8].mxu1  ;;  %2165 = vpow2.f32 %v794_v24  ;;  %v732_v47 = vmul.f32 1.442695, %v661_v33  ;;  %vm1262_vm7 = vcmp.gt.f32.partialorder %v2574_v46, 20.0  ;;  %vm1233_vm8 = vcmp.gt.f32.partialorder %v2581_v57, 20.0 }
  0xee   :  { %v2148_v32 = vpop.eup %2147  ;;  %v2626_v34 = vpop.f32.mrb[9].mxu0  ;;  %2167 = vpow2.f32 %v726_v25  ;;  %v2643_v7 = vmul.f32 1.442695, %v693_v48  ;;  %v2645_v12 = vmul.f32 1.442695, %v659_v54  ;;  %vm1265_vm9 = vcmp.gt.f32.partialorder %v2584_v58, 20.0 }
  0xef   :  { %v2628_v35 = vpop.f32.mrb[9].mxu1  ;;  %v2150_v36 = vpop.eup %2149  ;;  %v848_v37 = vadd.f32 1.0, %v2148_v32  ;;  %2169 = vpow2.f32 %v790_v27  ;;  %vm1231_vm10 = vcmp.gt.f32.partialorder %v2587_v61, 20.0  ;;  %vm1263_vm11 = vcmp.gt.f32.partialorder %v2590_v62, 20.0 }
  0xf0   :  { %v2630_v39 = vpop.f32.mrb[10].mxu0  ;;  %v2632_v40 = vpop.f32.mrb[10].mxu1  ;;  %v880_v44 = vadd.f32 1.0, %v2150_v36  ;;  %2171 = vpow2.f32 %v732_v47  ;;  %vm1236_vm12 = vcmp.gt.f32.partialorder %v2597_v9, 20.0  ;;  %vm1268_vm13 = vcmp.gt.f32.partialorder %v2600_v13, 20.0 }
  0xf1   :  { %v2152_v43 = vpop.eup %2151  ;;  %v2635_v49 = vpop.f32.mrb[11].mxu0  ;;  %v912_v52 = vmul.f32 %v848_v37, %v848_v37  ;;  %vm1234_vm14 = vcmp.gt.f32.partialorder %v2603_v14, 20.0  ;;  %vm1266_vm15 = vcmp.gt.f32.partialorder %v2607_v18, 20.0  ;;  %vm1237_vm0 = vcmp.gt.f32.partialorder %v2613_v26, 20.0 }
  0xf2   :  { %v2637_v50 = vpop.f32.mrb[11].mxu1  ;;  %v2154_v51 = vpop.eup %2153  ;;  %v846_v53 = vadd.f32 1.0, %v2152_v43  ;;  %v944_v56 = vmul.f32 %v880_v44, %v880_v44  ;;  %vm1269_vm1 = vcmp.gt.f32.partialorder %v2616_v28, 20.0  ;;  %vm1235_vm2 = vcmp.gt.f32.partialorder %v2619_v29, 20.0 }
  0xf3   :  { %v2156_v55 = vpop.eup %2155  ;;  %v878_v59 = vadd.f32 1.0, %v2154_v51  ;;  %v1040_v63 = vadd.f32 1.0, %v912_v52  ;;  %v2651_v17 = vadd.f32 -1.0, %v912_v52 }
  0xf4   :  { %v2158_v60 = vpop.eup %2157  ;;  %v910_v0 = vmul.f32 %v846_v53, %v846_v53  ;;  %v849_v1 = vadd.f32 1.0, %v2156_v55  ;;  %v1072_v4 = vadd.f32 1.0, %v944_v56  ;;  %v2657_v24 = vadd.f32 -1.0, %v944_v56 }
  0xf5   :  { %v2160_v3 = vpop.eup %2159  ;;  %v942_v5 = vmul.f32 %v878_v59, %v878_v59  ;;  %v881_v6 = vadd.f32 1.0, %v2158_v60  ;;  %2173 = vrcp.f32 %v1040_v63  ;;  %v2647_v15 = vpop.f32.mrb[12].mxu0 }
  0xf6   :  { %v2162_v8 = vpop.eup %2161  ;;  %v1038_v10 = vadd.f32 1.0, %v910_v0  ;;  %v913_v11 = vmul.f32 %v849_v1, %v849_v1  ;;  %v2649_v16 = vpop.f32.mrb[12].mxu1  ;;  %2175 = vrcp.f32 %v1072_v4  ;;  %v847_v27 = vadd.f32 1.0, %v2160_v3 }
  0xf7   :  { %v1070_v19 = vadd.f32 1.0, %v942_v5  ;;  %v945_v20 = vmul.f32 %v881_v6, %v881_v6  ;;  %v2653_v21 = vpop.f32.mrb[13].mxu0  ;;  %v2655_v22 = vpop.f32.mrb[13].mxu1  ;;  %v2663_v37 = vadd.f32 -1.0, %v910_v0  ;;  %v879_v44 = vadd.f32 1.0, %v2162_v8 }
  0xf8   :  { %v2164_v23 = vpop.eup %2163  ;;  %2177 = vrcp.f32 %v1038_v10  ;;  %v1041_v25 = vadd.f32 1.0, %v913_v11  ;;  %v2659_v32 = vpop.f32.mrb[14].mxu0  ;;  %v911_v52 = vmul.f32 %v847_v27, %v847_v27  ;;  %v1846_v56 = vadd.f32 -1.0, %v942_v5 }
  0xf9   :  { %v2661_v33 = vpop.f32.mrb[14].mxu1  ;;  %v2166_v36 = vpop.eup %2165  ;;  %2179 = vrcp.f32 %v1070_v19  ;;  %v1073_v43 = vadd.f32 1.0, %v945_v20  ;;  %v852_v53 = vadd.f32 1.0, %v2164_v23  ;;  %v943_v59 = vmul.f32 %v879_v44, %v879_v44 }
  0xfa   :  { %v2665_v47 = vpop.f32.mrb[15].mxu0  ;;  %v2667_v48 = vpop.f32.mrb[15].mxu1  ;;  %2181 = vrcp.f32 %v1041_v25  ;;  %v884_v54 = vadd.f32 1.0, %v2166_v36  ;;  %v1817_v63 = vadd.f32 -1.0, %v913_v11  ;;  %v1039_v0 = vadd.f32 1.0, %v911_v52 }
  0xfb   :  { %v2168_v51 = vpop.eup %2167  ;;  %2183 = vrcp.f32 %v1073_v43  ;;  %v916_v1 = vmul.f32 %v852_v53, %v852_v53  ;;  %v1849_v6 = vadd.f32 -1.0, %v945_v20  ;;  %v1071_v8 = vadd.f32 1.0, %v943_v59 }
  0xfc   :  { %v2170_v55 = vpop.eup %2169  ;;  %v850_v60 = vadd.f32 1.0, %v2168_v51  ;;  %v948_v3 = vmul.f32 %v884_v54, %v884_v54  ;;  %v2672_v5 = vadd.f32 -1.0, %v911_v52  ;;  %2185 = vrcp.f32 %v1039_v0 }
  0xfd   :  { %v2172_v4 = vpop.eup %2171  ;;  %v882_v19 = vadd.f32 1.0, %v2170_v55  ;;  %v1044_v23 = vadd.f32 1.0, %v916_v1  ;;  %v691_v25 = vmin.f32 %v2641_v2, 20.0  ;;  %v2675_v11 = vpop.f32.mrb[16].mxu0  ;;  %v2680_v36 = vadd.f32 -1.0, %v943_v59 }
  0xfe   :  { %v914_v10 = vmul.f32 %v850_v60, %v850_v60  ;;  %v2677_v27 = vpop.f32.mrb[16].mxu1  ;;  %2187 = vrcp.f32 %v1071_v8  ;;  %v1076_v20 = vadd.f32 1.0, %v948_v3  ;;  %v2682_v44 = vpop.f32.mrb[17].mxu0  ;;  %v2687_v53 = vadd.f32 -1.0, %v916_v1 }
  0xff   :  { %3567 = vst [vmem:[#allocation2_spill] sm:$0xff] %v2682_v44  ;;  %v2684_v51 = vpop.f32.mrb[17].mxu1  ;;  %v2174_v52 = vpop.eup %2173  ;;  %2189 = vrcp.f32 %v1044_v23  ;;  %v2689_v54 = vmul.f32 %v882_v19, %v882_v19  ;;  %v853_v55 = vadd.f32 1.0, %v2172_v4  ;;  %v2697_v44 = vadd.f32 -1.0, %v948_v3 }
 0x100   :  { %v1042_v43 = vadd.f32 1.0, %v914_v10  ;;  %3568 = vst [vmem:[#allocation3_spill] sm:$0xff] %v2684_v51  ;;  %v2691_v60 = vpop.f32.mrb[18].mxu0  ;;  %v2693_v59 = vpop.f32.mrb[18].mxu1  ;;  %v1168_v8 = vmul.f32 %v2174_v52, %v2651_v17  ;;  %2191 = vrcp.f32 %v1076_v20  ;;  %v2701_v1 = vadd.f32 %v2621_v30, %v2562_v38 }
 0x101   :  { %3569 = vst [vmem:[#allocation4_spill] sm:$0xff] %v2691_v60  ;;  %3570 = vst [vmem:[#allocation5_spill] sm:$0xff] %v2693_v59  ;;  %v2176_v0 = vpop.eup %2175  ;;  %v2703_v23 = vpop.f32.mrb[19].mxu0  ;;  %v2708_v59 = vadd.f32 -1.0, %v914_v10  ;;  %v1074_v17 = vadd.f32 1.0, %v2689_v54  ;;  %v2713_v51 = vmul.f32 %v853_v55, %v853_v55 }
 0x102   :  { %3571 = vst [vmem:[#allocation6_spill] sm:$0xff] %v2703_v23  ;;  %v2705_v19 = vpop.f32.mrb[19].mxu1  ;;  %v2178_v4 = vpop.eup %2177  ;;  %v1200_v60 = vmul.f32 %v2176_v0, %v2657_v24  ;;  %2193 = vrcp.f32 %v1042_v43  ;;  %v1296_v3 = vmul.f32 %v1168_v8, %v2565_v41  ;;  %v792_v24 = vmul.f32 1.442695, %v691_v25 }
 0x103   :  { %3572 = vst [vmem:[#allocation7_spill] sm:$0xff] %v2705_v19  ;;  %v2180_v52 = vpop.eup %2179  ;;  %v1166_v20 = vmul.f32 %v2178_v4, %v2663_v37  ;;  %2195 = vpow2.f32 %v2643_v7  ;;  %v664_v7 = vmin.f32 %v2701_v1, 20.0 }
 0x104   :  { %v2182_v30 = vpop.eup %2181  ;;  %v1328_v19 = vmul.f32 %v1200_v60, %v2568_v42  ;;  %v1198_v23 = vmul.f32 %v2180_v52, %v1846_v56  ;;  %2197 = vrcp.f32 %v1074_v17  ;;  %v1360_v43 = vsel %vm1232_vm3, %v2565_v41, %v1296_v3 }
 0x105   :  { %v2184_v10 = vpop.eup %2183  ;;  %v1294_v0 = vmul.f32 %v1166_v20, %v2571_v45  ;;  %v1169_v37 = vmul.f32 %v2182_v30, %v1817_v63  ;;  %v1944_v55 = vpack.c.bf16 %v1360_v43, %v1360_v43  ;;  %v2729_v8 = vpop.f32.mrb[20].mxu0  ;;  %2199 = vpow2.f32 %v2645_v12 }
 0x106   :  { %v1392_v56 = vsel %vm1264_vm5, %v2568_v42, %v1328_v19  ;;  %v1326_v60 = vmul.f32 %v1198_v23, %v2574_v46  ;;  %v1201_v25 = vmul.f32 %v2184_v10, %v1849_v6  ;;  %v2731_v41 = vpop.f32.mrb[20].mxu1  ;;  %v1045_v42 = vadd.f32 1.0, %v2713_v51  ;;  %v2739_v19 = vpop.f32.mrb[21].mxu0 }
 0x107   :  { %v1976_v4 = vpack.c.bf16 %v1392_v56, %v1392_v56  ;;  %v1358_v63 = vsel %vm1230_vm6, %v2571_v45, %v1294_v0  ;;  %v1297_v17 = vmul.f32 %v1169_v37, %v2581_v57  ;;  %v2741_v6 = vpop.f32.mrb[21].mxu1  ;;  %v2186_v23 = vpop.eup %2185  ;;  %1681 = vst.msk [vmem:[%s3566_s3 + $0x8] sm:$0xf] %vm1678_vm4, %v1944_v55  ;;  %vm1267_vm3 = vcmp.gt.f32.partialorder %v2641_v2, 20.0 }
 0x108   :  { %v1942_v52 = vpack.c.bf16 %v1358_v63, %v1358_v63  ;;  %v1390_v45 = vsel %vm1262_vm7, %v2574_v46, %v1326_v60  ;;  %v1329_v3 = vmul.f32 %v1201_v25, %v2584_v58  ;;  %v2753_v20 = vpop.f32.mrb[22].mxu0  ;;  %v2755_v30 = vpop.f32.mrb[22].mxu1  ;;  %v1167_v0 = vmul.f32 %v2186_v23, %v2672_v5 }
 0x109   :  { %v2188_v10 = vpop.eup %2187  ;;  %1713 = vst.msk [vmem:[%s3566_s3 + $0x88] sm:$0xf] %vm1678_vm4, %v1976_v4  ;;  %v1974_v43 = vpack.c.bf16 %v1390_v45, %v1390_v45  ;;  %v1361_v46 = vsel %vm1233_vm8, %v2581_v57, %v1297_v17  ;;  %2201 = vrcp.f32 %v1045_v42  ;;  %v2765_v37 = vpop.f32.mrb[23].mxu0  ;;  %v738_v17 = vmul.f32 1.442695, %v664_v7 }
 0x10a   :  { %v2767_v12 = vpop.f32.mrb[23].mxu1  ;;  %v2190_v55 = vpop.eup %2189  ;;  %1679 = vst.msk [vmem:[%s3566_s3] sm:$0xf] %vm1678_vm4, %v1942_v52  ;;  %v1945_v56 = vpack.c.bf16 %v1361_v46, %v1361_v46  ;;  %v1393_v60 = vsel %vm1265_vm9, %v2584_v58, %v1329_v3  ;;  %v1199_v57 = vmul.f32 %v2188_v10, %v2680_v36  ;;  %2203 = vpow2.f32 %v792_v24 }
 0x10b   :  { %v2192_v5 = vpop.eup %2191  ;;  %1711 = vst.msk [vmem:[%s3566_s3 + $0x80] sm:$0xf] %vm1678_vm4, %v1974_v43  ;;  %v1977_v25 = vpack.c.bf16 %v1393_v60, %v1393_v60  ;;  %v1295_v4 = vmul.f32 %v1167_v0, %v2587_v61  ;;  %v1172_v63 = vmul.f32 %v2190_v55, %v2687_v53  ;;  %v1850_v24 = vadd.f32 -1.0, %v2689_v54 }
 0x10c   :  { %v2194_v42 = vpop.eup %2193  ;;  %1682 = vst.msk [vmem:[%s3566_s3 + $0xc] sm:$0xf] %vm1678_vm4, %v1945_v56  ;;  %v1327_v58 = vmul.f32 %v1199_v57, %v2590_v62  ;;  %v1204_v36 = vmul.f32 %v2192_v5, %v2697_v44  ;;  %v2792_v23 = vadd.f32 %v2623_v31, %v2562_v38  ;;  %2205 = vpow2.f32 %v738_v17 }
 0x10d   :  { %v2196_v52 = vpop.eup %2195  ;;  %1714 = vst.msk [vmem:[%s3566_s3 + $0x8c] sm:$0xf] %vm1678_vm4, %v1977_v25  ;;  %v1359_v53 = vsel %vm1231_vm10, %v2587_v61, %v1295_v4  ;;  %v1300_v7 = vmul.f32 %v1172_v63, %v2597_v9  ;;  %v1170_v44 = vmul.f32 %v2194_v42, %v2708_v59  ;;  %v2807_v43 = vpop.f32.mrb[24].mxu0  ;;  %vm1240_vm5 = vcmp.gt.f32.partialorder %v2701_v1, 20.0 }
 0x10e   :  { %v2198_v54 = vpop.eup %2197  ;;  %v1943_v45 = vpack.c.bf16 %v1359_v53, %v1359_v53  ;;  %v1391_v31 = vsel %vm1263_vm11, %v2590_v62, %v1327_v58  ;;  %v1332_v3 = vmul.f32 %v1204_v36, %v2600_v13  ;;  %v885_v10 = vadd.f32 1.0, %v2196_v52  ;;  %v2809_v46 = vpop.f32.mrb[24].mxu1 }
 0x10f   :  { %v1975_v0 = vpack.c.bf16 %v1391_v31, %v1391_v31  ;;  %v1364_v61 = vsel %vm1236_vm12, %v2597_v9, %v1300_v7  ;;  %v1298_v59 = vmul.f32 %v1170_v44, %v2603_v14  ;;  %v1202_v55 = vmul.f32 %v2198_v54, %v1850_v24  ;;  %v2815_v56 = vpop.f32.mrb[25].mxu0  ;;  %v2817_v60 = vpop.f32.mrb[25].mxu1 }
 0x110   :  { %1680 = vst.msk [vmem:[%s3566_s3 + $0x4] sm:$0xf] %vm1678_vm4, %v1943_v45  ;;  %v1948_v62 = vpack.c.bf16 %v1364_v61, %v1364_v61  ;;  %v1396_v57 = vsel %vm1268_vm13, %v2600_v13, %v1332_v3  ;;  %v2826_v5 = vmul.f32 %v885_v10, %v885_v10  ;;  %v696_v9 = vmin.f32 %v2792_v23, 20.0  ;;  %v2829_v25 = vpop.f32.mrb[26].mxu0  ;;  %v2831_v4 = vpop.f32.mrb[26].mxu1 }
 0x111   :  { %1712 = vst.msk [vmem:[%s3566_s3 + $0x84] sm:$0xf] %vm1678_vm4, %v1975_v0  ;;  %v1980_v63 = vpack.c.bf16 %v1396_v57, %v1396_v57  ;;  %v1362_v17 = vsel %vm1234_vm14, %v2603_v14, %v1298_v59  ;;  %v1330_v13 = vmul.f32 %v1202_v55, %v2607_v18  ;;  %v2842_v42 = vpop.f32.mrb[27].mxu0  ;;  %v2844_v58 = vpop.f32.mrb[27].mxu1  ;;  %v1821_v52 = vadd.f32 -1.0, %v2713_v51 }
 0x112   :  { %v2200_v36 = vpop.eup %2199  ;;  %1685 = vst.msk [vmem:[%s3566_s3 + $0x18] sm:$0xf] %vm1678_vm4, %v1948_v62  ;;  %v1946_v24 = vpack.c.bf16 %v1362_v17, %v1362_v17  ;;  %v1077_v53 = vadd.f32 1.0, %v2826_v5  ;;  %v802_v14 = vmul.f32 1.442695, %v696_v9  ;;  %v2859_v45 = vadd.f32 %v2562_v38, %v2626_v34 }
 0x113   :  { %v2202_v7 = vpop.eup %2201  ;;  %1717 = vst.msk [vmem:[%s3566_s3 + $0x98] sm:$0xf] %vm1678_vm4, %v1980_v63  ;;  %v1394_v44 = vsel %vm1266_vm15, %v2607_v18, %v1330_v13  ;;  %v851_v54 = vadd.f32 1.0, %v2200_v36  ;;  %v2863_v31 = vadd.f32 %v2562_v38, %v2628_v35  ;;  %v2871_v18 = vadd.f32 %v2630_v39, %v2562_v38 }
 0x114   :  { %v2204_v51 = vpop.eup %2203  ;;  %1683 = vst.msk [vmem:[%s3566_s3 + $0x10] sm:$0xf] %vm1678_vm4, %v1946_v24  ;;  %v1978_v3 = vpack.c.bf16 %v1394_v44, %v1394_v44  ;;  %v1173_v10 = vmul.f32 %v2202_v7, %v1821_v52  ;;  %2207 = vrcp.f32 %v1077_v53  ;;  %v662_v61 = vmin.f32 %v2859_v45, 20.0 }
 0x115   :  { %v915_v0 = vmul.f32 %v851_v54, %v851_v54  ;;  %v883_v34 = vadd.f32 1.0, %v2204_v51  ;;  %2209 = vpow2.f32 %v802_v14  ;;  %v694_v59 = vmin.f32 %v2863_v31, 20.0  ;;  %v2880_v55 = vpop.f32.mrb[28].mxu0  ;;  %v2882_v62 = vpop.f32.mrb[28].mxu1 }
 0x116   :  { %1715 = vst.msk [vmem:[%s3566_s3 + $0x90] sm:$0xf] %vm1678_vm4, %v1978_v3  ;;  %v1301_v35 = vmul.f32 %v1173_v10, %v2613_v26  ;;  %v2206_v39 = vpop.eup %2205  ;;  %v734_v63 = vmul.f32 1.442695, %v662_v61  ;;  %v2885_v17 = vpop.f32.mrb[29].mxu0  ;;  %v665_v52 = vmin.f32 %v2871_v18, 20.0  ;;  %v2901_v51 = vadd.f32 %v2562_v38, %v2635_v49 }
 0x117   :  { %v1043_v57 = vadd.f32 1.0, %v915_v0  ;;  %v947_v9 = vmul.f32 %v883_v34, %v883_v34  ;;  %v856_v36 = vadd.f32 1.0, %v2206_v39  ;;  %v798_v24 = vmul.f32 1.442695, %v694_v59  ;;  %v2889_v54 = vpop.f32.mrb[29].mxu1  ;;  %v2915_v39 = vpop.f32.mrb[30].mxu0 }
 0x118   :  { %v1365_v13 = vsel %vm1237_vm0, %v2613_v26, %v1301_v35  ;;  %v740_v44 = vmul.f32 1.442695, %v665_v52  ;;  %v2897_v26 = vadd.f32 %v2632_v40, %v2562_v38  ;;  %v2905_v3 = vadd.f32 %v2562_v38, %v2637_v50  ;;  %v2923_v52 = vpop.f32.mrb[30].mxu1 }
 0x119   :  { %v1949_v53 = vpack.c.bf16 %v1365_v13, %v1365_v13  ;;  %2211 = vrcp.f32 %v1043_v57  ;;  %v1075_v14 = vadd.f32 1.0, %v947_v9  ;;  %v920_v7 = vmul.f32 %v856_v36, %v856_v36  ;;  %3573 = vst [vmem:[#allocation8_spill] sm:$0xff] %v2923_v52 }
 0x11a   :  { %2213 = vpow2.f32 %v734_v63  ;;  %v2909_v34 = vadd.f32 %v2647_v15, %v2562_v38  ;;  %v1853_v61 = vadd.f32 -1.0, %v2826_v5  ;;  %v697_v40 = vmin.f32 %v2897_v26, 20.0 }
 0x11b   :  { %1686 = vst.msk [vmem:[%s3566_s3 + $0x1c] sm:$0xf] %vm1678_vm4, %v1949_v53  ;;  %2215 = vrcp.f32 %v1075_v14  ;;  %v1048_v10 = vadd.f32 1.0, %v920_v7  ;;  %v663_v35 = vmin.f32 %v2901_v51, 20.0  ;;  %v695_v49 = vmin.f32 %v2905_v3, 20.0 }
 0x11c   :  { %2217 = vpow2.f32 %v798_v24  ;;  %v804_v63 = vmul.f32 1.442695, %v697_v40  ;;  %v668_v15 = vmin.f32 %v2909_v34, 20.0  ;;  %v2921_v24 = vadd.f32 %v2649_v16, %v2562_v38 }
 0x11d   :  { %2219 = vpow2.f32 %v740_v44  ;;  %v736_v13 = vmul.f32 1.442695, %v663_v35  ;;  %v800_v36 = vmul.f32 1.442695, %v695_v49  ;;  %v2928_v44 = vadd.f32 %v2562_v38, %v2653_v21 }
 0x11e   :  { %v2208_v59 = vpop.eup %2207  ;;  %2221 = vrcp.f32 %v1048_v10  ;;  %v746_v14 = vmul.f32 1.442695, %v668_v15  ;;  %v1819_v10 = vadd.f32 -1.0, %v915_v0  ;;  %v700_v40 = vmin.f32 %v2921_v24, 20.0 }
 0x11f   :  { %v2210_v50 = vpop.eup %2209  ;;  %v1205_v57 = vmul.f32 %v2208_v59, %v1853_v61  ;;  %2223 = vpow2.f32 %v804_v63  ;;  %v666_v59 = vmin.f32 %v2928_v44, 20.0  ;;  %v1851_v63 = vadd.f32 -1.0, %v947_v9 }
 0x120   :  { %v888_v5 = vadd.f32 1.0, %v2210_v50  ;;  %2225 = vpow2.f32 %v736_v13  ;;  %v810_v13 = vmul.f32 1.442695, %v700_v40  ;;  %v2944_v9 = vadd.f32 %v2562_v38, %v2655_v22 }
 0x121   :  { %v1333_v53 = vmul.f32 %v1205_v57, %v2616_v28  ;;  %2227 = vpow2.f32 %v800_v36  ;;  %vm1272_vm6 = vcmp.gt.f32.partialorder %v2792_v23, 20.0  ;;  %vm1238_vm7 = vcmp.gt.f32.partialorder %v2859_v45, 20.0 }
 0x122   :  { %v2930_v61 = vmul.f32 %v888_v5, %v888_v5  ;;  %2229 = vpow2.f32 %v746_v14  ;;  %v742_v5 = vmul.f32 1.442695, %v666_v59  ;;  %v1824_v14 = vadd.f32 -1.0, %v920_v7 }
 0x123   :  { %v2212_v35 = vpop.eup %2211  ;;  %v1397_v16 = vsel %vm1269_vm1, %v2616_v28, %v1333_v53  ;;  %v2946_v53 = vpop.f32.mrb[31].mxu0  ;;  %vm1270_vm8 = vcmp.gt.f32.partialorder %v2863_v31, 20.0  ;;  %vm1241_vm9 = vcmp.gt.f32.partialorder %v2871_v18, 20.0  ;;  %vm1273_vm10 = vcmp.gt.f32.partialorder %v2897_v26, 20.0 }
 0x124   :  { %v2214_v49 = vpop.eup %2213  ;;  %v1981_v50 = vpack.c.bf16 %v1397_v16, %v1397_v16  ;;  %v1171_v57 = vmul.f32 %v2212_v35, %v1819_v10  ;;  %v1080_v21 = vadd.f32 1.0, %v2930_v61  ;;  %3574 = vst [vmem:[#allocation9_spill] sm:$0xff] %v2946_v53  ;;  %vm1239_vm11 = vcmp.gt.f32.partialorder %v2901_v51, 20.0 }
 0x125   :  { %v2216_v0 = vpop.eup %2215  ;;  %v854_v15 = vadd.f32 1.0, %v2214_v49  ;;  %vm1271_vm12 = vcmp.gt.f32.partialorder %v2905_v3, 20.0  ;;  %vm1244_vm13 = vcmp.gt.f32.partialorder %v2909_v34, 20.0  ;;  %vm1276_vm14 = vcmp.gt.f32.partialorder %v2921_v24, 20.0 }
 0x126   :  { %v2218_v52 = vpop.eup %2217  ;;  %1718 = vst.msk [vmem:[%s3566_s3 + $0x9c] sm:$0xf] %vm1678_vm4, %v1981_v50  ;;  %v1299_v28 = vmul.f32 %v1171_v57, %v2619_v29  ;;  %v1203_v36 = vmul.f32 %v2216_v0, %v1851_v63  ;;  %2231 = vrcp.f32 %v1080_v21  ;;  %v2952_v57 = vpop.f32.mrb[31].mxu1  ;;  %vm1242_vm15 = vcmp.gt.f32.partialorder %v2928_v44, 20.0 }
 0x127   :  { %v2220_v10 = vpop.eup %2219  ;;  %v918_v40 = vmul.f32 %v854_v15, %v854_v15  ;;  %v886_v35 = vadd.f32 1.0, %v2218_v52  ;;  %2233 = vpow2.f32 %v810_v13  ;;  %3575 = vst [vmem:[#allocation10_spill] sm:$0xff] %v2952_v57  ;;  %v698_v15 = vmin.f32 %v2944_v9, 20.0 }
 0x128   :  { %v2222_v16 = vpop.eup %2221  ;;  %v1363_v59 = vsel %vm1235_vm2, %v2619_v29, %v1299_v28  ;;  %v1331_v49 = vmul.f32 %v1203_v36, %v2641_v2  ;;  %v857_v50 = vadd.f32 1.0, %v2220_v10  ;;  %2235 = vpow2.f32 %v742_v5 }
 0x129   :  { %v1947_v22 = vpack.c.bf16 %v1363_v59, %v1363_v59  ;;  %v1176_v63 = vmul.f32 %v2222_v16, %v1824_v14  ;;  %v1046_v21 = vadd.f32 1.0, %v918_v40  ;;  %v950_v52 = vmul.f32 %v886_v35, %v886_v35  ;;  %v2224_v13 = vpop.eup %2223 }
 0x12a   :  { %v1395_v7 = vsel %vm1267_vm3, %v2641_v2, %v1331_v49  ;;  %v921_v0 = vmul.f32 %v857_v50, %v857_v50  ;;  %v2226_v28 = vpop.eup %2225  ;;  %v2965_v2 = vadd.f32 %v2659_v32, %v2562_v38  ;;  %v889_v16 = vadd.f32 1.0, %v2224_v13 }
 0x12b   :  { %1684 = vst.msk [vmem:[%s3566_s3 + $0x14] sm:$0xf] %vm1678_vm4, %v1947_v22  ;;  %v1979_v29 = vpack.c.bf16 %v1395_v7, %v1395_v7  ;;  %v1304_v5 = vmul.f32 %v1176_v63, %v2701_v1  ;;  %2237 = vrcp.f32 %v1046_v21  ;;  %v1078_v36 = vadd.f32 1.0, %v950_v52  ;;  %v2228_v14 = vpop.eup %2227 }
 0x12c   :  { %v1049_v10 = vadd.f32 1.0, %v921_v0  ;;  %v855_v59 = vadd.f32 1.0, %v2226_v28  ;;  %v806_v49 = vmul.f32 1.442695, %v698_v15  ;;  %v887_v22 = vadd.f32 1.0, %v2228_v14  ;;  %v2230_v63 = vpop.eup %2229 }
 0x12d   :  { %1716 = vst.msk [vmem:[%s3566_s3 + $0x94] sm:$0xf] %vm1678_vm4, %v1979_v29  ;;  %v1368_v35 = vsel %vm1240_vm5, %v2701_v1, %v1304_v5  ;;  %2239 = vrcp.f32 %v1078_v36  ;;  %v1856_v32 = vadd.f32 -1.0, %v2930_v61  ;;  %v953_v21 = vmul.f32 %v889_v16, %v889_v16 }
 0x12e   :  { %v1952_v50 = vpack.c.bf16 %v1368_v35, %v1368_v35  ;;  %2241 = vrcp.f32 %v1049_v10  ;;  %v919_v7 = vmul.f32 %v855_v59, %v855_v59  ;;  %v951_v1 = vmul.f32 %v887_v22, %v887_v22 }
 0x12f   :  { %v860_v13 = vadd.f32 1.0, %v2230_v63  ;;  %2243 = vpow2.f32 %v806_v49  ;;  %v669_v15 = vmin.f32 %v2965_v2, 20.0  ;;  %v1822_v28 = vadd.f32 -1.0, %v918_v40 }
 0x130   :  { %v2232_v57 = vpop.eup %2231  ;;  %1689 = vst.msk [vmem:[%s3566_s3 + $0x28] sm:$0xf] %vm1678_vm4, %v1952_v50  ;;  %v1081_v61 = vadd.f32 1.0, %v953_v21  ;;  %v1854_v10 = vadd.f32 -1.0, %v950_v52  ;;  %v1047_v14 = vadd.f32 1.0, %v919_v7  ;;  %v1079_v35 = vadd.f32 1.0, %v951_v1 }
 0x131   :  { %v2234_v29 = vpop.eup %2233  ;;  %v1208_v5 = vmul.f32 %v2232_v57, %v1856_v32  ;;  %v924_v16 = vmul.f32 %v860_v13, %v860_v13  ;;  %v748_v63 = vmul.f32 1.442695, %v669_v15  ;;  %v2984_v40 = vadd.f32 %v2661_v33, %v2562_v38 }
 0x132   :  { %v2236_v36 = vpop.eup %2235  ;;  %2245 = vrcp.f32 %v1081_v61  ;;  %v892_v50 = vadd.f32 1.0, %v2234_v29  ;;  %v1825_v61 = vadd.f32 -1.0, %v921_v0  ;;  %v3002_v0 = vadd.f32 %v2562_v38, %v2665_v47 }
 0x133   :  { %v1336_v59 = vmul.f32 %v1208_v5, %v2792_v23  ;;  %v858_v22 = vadd.f32 1.0, %v2236_v36  ;;  %2247 = vrcp.f32 %v1047_v14  ;;  %v1052_v49 = vadd.f32 1.0, %v924_v16 }
 0x134   :  { %2249 = vrcp.f32 %v1079_v35  ;;  %v956_v32 = vmul.f32 %v892_v50, %v892_v50  ;;  %v701_v15 = vmin.f32 %v2984_v40, 20.0  ;;  %v1857_v36 = vadd.f32 -1.0, %v953_v21 }
 0x135   :  { %v2238_v57 = vpop.eup %2237  ;;  %v1400_v52 = vsel %vm1272_vm6, %v2792_v23, %v1336_v59  ;;  %v2990_v13 = vmul.f32 %v858_v22, %v858_v22  ;;  %2251 = vrcp.f32 %v1052_v49  ;;  %v1823_v35 = vadd.f32 -1.0, %v919_v7 }
 0x136   :  { %v1984_v29 = vpack.c.bf16 %v1400_v52, %v1400_v52  ;;  %v1174_v5 = vmul.f32 %v2238_v57, %v1822_v28  ;;  %v1084_v33 = vadd.f32 1.0, %v956_v32  ;;  %2253 = vpow2.f32 %v748_v63 }
 0x137   :  { %v1050_v14 = vadd.f32 1.0, %v2990_v13  ;;  %v2240_v53 = vpop.eup %2239  ;;  %v812_v59 = vmul.f32 1.442695, %v701_v15  ;;  %v3006_v21 = vadd.f32 %v2562_v38, %v2667_v48  ;;  %v1855_v57 = vadd.f32 -1.0, %v951_v1 }
 0x138   :  { %1721 = vst.msk [vmem:[%s3566_s3 + $0xa8] sm:$0xf] %vm1678_vm4, %v1984_v29  ;;  %v1302_v23 = vmul.f32 %v1174_v5, %v2859_v45  ;;  %v2242_v28 = vpop.eup %2241  ;;  %v1206_v50 = vmul.f32 %v2240_v53, %v1854_v10  ;;  %2255 = vrcp.f32 %v1084_v33  ;;  %v3014_v53 = vadd.f32 %v2675_v11, %v2562_v38 }
 0x139   :  { %v2244_v22 = vpop.eup %2243  ;;  %v1177_v49 = vmul.f32 %v2242_v28, %v1825_v61  ;;  %2257 = vrcp.f32 %v1050_v14  ;;  %v699_v52 = vmin.f32 %v3006_v21, 20.0  ;;  %v1828_v11 = vadd.f32 -1.0, %v924_v16 }
 0x13a   :  { %v1366_v7 = vsel %vm1238_vm7, %v2859_v45, %v1302_v23  ;;  %v1334_v47 = vmul.f32 %v1206_v50, %v2863_v31  ;;  %v890_v48 = vadd.f32 1.0, %v2244_v22  ;;  %2259 = vpow2.f32 %v812_v59 }
 0x13b   :  { %v1950_v10 = vpack.c.bf16 %v1366_v7, %v1366_v7  ;;  %v1305_v63 = vmul.f32 %v1177_v49, %v2871_v18  ;;  %v667_v45 = vmin.f32 %v3002_v0, 20.0  ;;  %v672_v1 = vmin.f32 %v3014_v53, 20.0 }
 0x13c   :  { %v2246_v29 = vpop.eup %2245  ;;  %v1398_v38 = vsel %vm1270_vm8, %v2863_v31, %v1334_v47  ;;  %v3029_v5 = vmul.f32 %v890_v48, %v890_v48  ;;  %v1860_v22 = vadd.f32 -1.0, %v956_v32  ;;  %vm1274_vm0 = vcmp.gt.f32.partialorder %v2944_v9, 20.0 }
 0x13d   :  { %1687 = vst.msk [vmem:[%s3566_s3 + $0x20] sm:$0xf] %vm1678_vm4, %v1950_v10  ;;  %v2248_v15 = vpop.eup %2247  ;;  %v1982_v61 = vpack.c.bf16 %v1398_v38, %v1398_v38  ;;  %v1369_v33 = vsel %vm1241_vm9, %v2871_v18, %v1305_v63  ;;  %v1209_v14 = vmul.f32 %v2246_v29, %v1857_v36  ;;  %v744_v23 = vmul.f32 1.442695, %v667_v45 }
 0x13e   :  { %v2250_v59 = vpop.eup %2249  ;;  %v1953_v28 = vpack.c.bf16 %v1369_v33, %v1369_v33  ;;  %v1175_v50 = vmul.f32 %v2248_v15, %v1823_v35  ;;  %v1082_v7 = vadd.f32 1.0, %v3029_v5  ;;  %v808_v10 = vmul.f32 1.442695, %v699_v52 }
 0x13f   :  { %v2252_v31 = vpop.eup %2251  ;;  %1719 = vst.msk [vmem:[%s3566_s3 + $0xa0] sm:$0xf] %vm1678_vm4, %v1982_v61  ;;  %v1337_v16 = vmul.f32 %v1209_v14, %v2897_v26  ;;  %v1207_v49 = vmul.f32 %v2250_v59, %v1855_v57  ;;  %2261 = vpow2.f32 %v744_v23  ;;  %v754_v36 = vmul.f32 1.442695, %v672_v1 }
 0x140   :  { %1690 = vst.msk [vmem:[%s3566_s3 + $0x2c] sm:$0xf] %vm1678_vm4, %v1953_v28  ;;  %v1303_v18 = vmul.f32 %v1175_v50, %v2901_v51  ;;  %v1180_v32 = vmul.f32 %v2252_v31, %v1828_v11  ;;  %2263 = vrcp.f32 %v1082_v7  ;;  %v2254_v35 = vpop.eup %2253  ;;  %v1826_v63 = vadd.f32 -1.0, %v2990_v13  ;;  %v3073_v28 = vld [vmem:[%s3565_s2] ss:$0 sm:$0xff] }
 0x141   :  { %v1401_v47 = vsel %vm1273_vm10, %v2897_v26, %v1337_v16  ;;  %v1335_v48 = vmul.f32 %v1207_v49, %v2905_v3  ;;  %2265 = vpow2.f32 %v808_v10  ;;  %v861_v38 = vadd.f32 1.0, %v2254_v35  ;;  %v3576_v7 = vld [vmem:[#allocation2_spill] sm:$0xff] }
 0x142   :  { %v2256_v57 = vpop.eup %2255  ;;  %v1985_v45 = vpack.c.bf16 %v1401_v47, %v1401_v47  ;;  %v1367_v52 = vsel %vm1239_vm11, %v2901_v51, %v1303_v18  ;;  %v1308_v29 = vmul.f32 %v1180_v32, %v2909_v34  ;;  %2267 = vpow2.f32 %v754_v36 }
 0x143   :  { %v2258_v11 = vpop.eup %2257  ;;  %v1951_v1 = vpack.c.bf16 %v1367_v52, %v1367_v52  ;;  %v1399_v26 = vsel %vm1271_vm12, %v2905_v3, %v1335_v48  ;;  %v1212_v15 = vmul.f32 %v2256_v57, %v1860_v22  ;;  %v925_v14 = vmul.f32 %v861_v38, %v861_v38  ;;  %v3577_v52 = vld [vmem:[#allocation3_spill] sm:$0xff]  ;;  %v3578_v38 = vld [vmem:[#allocation4_spill] sm:$0xff] }
 0x144   :  { %v2260_v61 = vpop.eup %2259  ;;  %1722 = vst.msk [vmem:[%s3566_s3 + $0xac] sm:$0xf] %vm1678_vm4, %v1985_v45  ;;  %v1983_v13 = vpack.c.bf16 %v1399_v26, %v1399_v26  ;;  %v1372_v51 = vsel %vm1244_vm13, %v2909_v34, %v1308_v29  ;;  %v1178_v33 = vmul.f32 %v2258_v11, %v1826_v63  ;;  %v3077_v50 = vadd.f32 %v3073_v28, %v2677_v27 }
 0x145   :  { %1688 = vst.msk [vmem:[%s3566_s3 + $0x24] sm:$0xf] %vm1678_vm4, %v1951_v1  ;;  %v1956_v3 = vpack.c.bf16 %v1372_v51, %v1372_v51  ;;  %v1340_v23 = vmul.f32 %v1212_v15, %v2921_v24  ;;  %v893_v59 = vadd.f32 1.0, %v2260_v61  ;;  %v1053_v22 = vadd.f32 1.0, %v925_v14 }
 0x146   :  { %1720 = vst.msk [vmem:[%s3566_s3 + $0xa4] sm:$0xf] %vm1678_vm4, %v1983_v13  ;;  %v1306_v34 = vmul.f32 %v1178_v33, %v2928_v44  ;;  %v3087_v31 = vadd.f32 %v3073_v28, %v3576_v7  ;;  %v704_v49 = vmin.f32 %v3077_v50, 20.0  ;;  %v1858_v47 = vadd.f32 -1.0, %v3029_v5  ;;  %v3579_v33 = vld [vmem:[#allocation5_spill] sm:$0xff] }
 0x147   :  { %1693 = vst.msk [vmem:[%s3566_s3 + $0x38] sm:$0xf] %vm1678_vm4, %v1956_v3  ;;  %v1404_v27 = vsel %vm1276_vm14, %v2921_v24, %v1340_v23  ;;  %v957_v16 = vmul.f32 %v893_v59, %v893_v59  ;;  %2269 = vrcp.f32 %v1053_v22  ;;  %v3113_v11 = vadd.f32 %v3073_v28, %v3578_v38 }
 0x148   :  { %v1988_v10 = vpack.c.bf16 %v1404_v27, %v1404_v27  ;;  %v1370_v18 = vsel %vm1242_vm15, %v2928_v44, %v1306_v34  ;;  %v670_v32 = vmin.f32 %v3087_v31, 20.0  ;;  %v818_v63 = vmul.f32 1.442695, %v704_v49 }
 0x149   :  { %v2262_v36 = vpop.eup %2261  ;;  %v1954_v35 = vpack.c.bf16 %v1370_v18, %v1370_v18  ;;  %v1085_v48 = vadd.f32 1.0, %v957_v16  ;;  %v3105_v44 = vadd.f32 %v3073_v28, %v3577_v52  ;;  %v673_v51 = vmin.f32 %v3113_v11, 20.0 }
 0x14a   :  { %v2264_v57 = vpop.eup %2263  ;;  %1725 = vst.msk [vmem:[%s3566_s3 + $0xb8] sm:$0xf] %vm1678_vm4, %v1988_v10  ;;  %v859_v24 = vadd.f32 1.0, %v2262_v36  ;;  %v750_v45 = vmul.f32 1.442695, %v670_v32  ;;  %v3120_v3 = vadd.f32 %v3073_v28, %v3579_v33  ;;  %v1829_v18 = vadd.f32 -1.0, %v925_v14 }
 0x14b   :  { %v2266_v29 = vpop.eup %2265  ;;  %1691 = vst.msk [vmem:[%s3566_s3 + $0x30] sm:$0xf] %vm1678_vm4, %v1954_v35  ;;  %v1210_v5 = vmul.f32 %v2264_v57, %v1858_v47  ;;  %2271 = vrcp.f32 %v1085_v48  ;;  %v702_v15 = vmin.f32 %v3105_v44, 20.0  ;;  %v756_v27 = vmul.f32 1.442695, %v673_v51  ;;  %v3580_v47 = vld [vmem:[#allocation6_spill] sm:$0xff] }
 0x14c   :  { %v923_v1 = vmul.f32 %v859_v24, %v859_v24  ;;  %v891_v26 = vadd.f32 1.0, %v2266_v29  ;;  %2273 = vpow2.f32 %v818_v63  ;;  %v2268_v61 = vpop.eup %2267  ;;  %v705_v36 = vmin.f32 %v3120_v3, 20.0  ;;  %v3581_v48 = vld [vmem:[#allocation7_spill] sm:$0xff] }
 0x14d   :  { %v1338_v13 = vmul.f32 %v1210_v5, %v2944_v9  ;;  %2275 = vpow2.f32 %v750_v45  ;;  %v864_v34 = vadd.f32 1.0, %v2268_v61  ;;  %v814_v7 = vmul.f32 1.442695, %v702_v15 }
 0x14e   :  { %v1051_v23 = vadd.f32 1.0, %v923_v1  ;;  %v955_v59 = vmul.f32 %v891_v26, %v891_v26  ;;  %v3135_v63 = vadd.f32 %v3073_v28, %v3581_v48  ;;  %v3139_v14 = vadd.f32 %v3073_v28, %v2729_v8 }
 0x14f   :  { %v1402_v22 = vsel %vm1274_vm0, %v2944_v9, %v1338_v13  ;;  %v928_v32 = vmul.f32 %v864_v34, %v864_v34  ;;  %v3131_v9 = vadd.f32 %v3073_v28, %v3580_v47  ;;  %vm1245_vm1 = vcmp.gt.f32.partialorder %v2965_v2, 20.0 }
 0x150   :  { %v1986_v49 = vpack.c.bf16 %v1402_v22, %v1402_v22  ;;  %2277 = vrcp.f32 %v1051_v23  ;;  %v1083_v10 = vadd.f32 1.0, %v955_v59  ;;  %v1861_v45 = vadd.f32 -1.0, %v957_v16 }
 0x151   :  { %2279 = vpow2.f32 %v814_v7  ;;  %v2270_v35 = vpop.eup %2269  ;;  %v1056_v24 = vadd.f32 1.0, %v928_v32  ;;  %v820_v52 = vmul.f32 1.442695, %v705_v36  ;;  %v671_v29 = vmin.f32 %v3131_v9, 20.0 }
 0x152   :  { %1723 = vst.msk [vmem:[%s3566_s3 + $0xb0] sm:$0xf] %vm1678_vm4, %v1986_v49  ;;  %2281 = vrcp.f32 %v1083_v10  ;;  %v1181_v57 = vmul.f32 %v2270_v35, %v1829_v18  ;;  %v703_v5 = vmin.f32 %v3135_v63, 20.0  ;;  %vm1277_vm2 = vcmp.gt.f32.partialorder %v2984_v40, 20.0 }
 0x153   :  { %2283 = vpow2.f32 %v756_v27  ;;  %v676_v8 = vmin.f32 %v3139_v14, 20.0  ;;  %v752_v13 = vmul.f32 1.442695, %v671_v29  ;;  %vm1243_vm3 = vcmp.gt.f32.partialorder %v3002_v0, 20.0 }
 0x154   :  { %v1309_v26 = vmul.f32 %v1181_v57, %v2965_v2  ;;  %2285 = vrcp.f32 %v1056_v24  ;;  %v816_v51 = vmul.f32 1.442695, %v703_v5  ;;  %v1827_v49 = vadd.f32 -1.0, %v923_v1 }
 0x155   :  { %v2272_v38 = vpop.eup %2271  ;;  %2287 = vpow2.f32 %v820_v52  ;;  %v762_v34 = vmul.f32 1.442695, %v676_v8  ;;  %v3154_v18 = vadd.f32 %v3073_v28, %v2731_v41  ;;  %v1859_v35 = vadd.f32 -1.0, %v955_v59 }
 0x156   :  { %v2274_v15 = vpop.eup %2273  ;;  %v1213_v61 = vmul.f32 %v2272_v38, %v1861_v45  ;;  %v1373_v16 = vsel %vm1245_vm1, %v2965_v2, %v1309_v26  ;;  %2289 = vpow2.f32 %v752_v13  ;;  %v3167_v41 = vadd.f32 %v3073_v28, %v2739_v19 }
 0x157   :  { %v2276_v33 = vpop.eup %2275  ;;  %v896_v23 = vadd.f32 1.0, %v2274_v15  ;;  %v1957_v22 = vpack.c.bf16 %v1373_v16, %v1373_v16  ;;  %2291 = vpow2.f32 %v816_v51  ;;  %vm1275_vm5 = vcmp.gt.f32.partialorder %v3006_v21, 20.0 }
 0x158   :  { %v1341_v7 = vmul.f32 %v1213_v61, %v2984_v40  ;;  %v862_v27 = vadd.f32 1.0, %v2276_v33  ;;  %2293 = vpow2.f32 %v762_v34  ;;  %v1832_v26 = vadd.f32 -1.0, %v928_v32 }
 0x159   :  { %v960_v10 = vmul.f32 %v896_v23, %v896_v23  ;;  %1694 = vst.msk [vmem:[%s3566_s3 + $0x3c] sm:$0xf] %vm1678_vm4, %v1957_v22  ;;  %vm1248_vm6 = vcmp.gt.f32.partialorder %v3014_v53, 20.0  ;;  %v674_v33 = vmin.f32 %v3167_v41, 20.0  ;;  %v3185_v22 = vadd.f32 %v3073_v28, %v2741_v6 }
 0x15a   :  { %v2278_v36 = vpop.eup %2277  ;;  %v1405_v2 = vsel %vm1277_vm2, %v2984_v40, %v1341_v7  ;;  %v3163_v47 = vmul.f32 %v862_v27, %v862_v27  ;;  %v708_v40 = vmin.f32 %v3154_v18, 20.0  ;;  %vm1280_vm7 = vcmp.gt.f32.partialorder %v3077_v50, 20.0 }
 0x15b   :  { %v2280_v1 = vpop.eup %2279  ;;  %v1989_v48 = vpack.c.bf16 %v1405_v2, %v1405_v2  ;;  %v1179_v57 = vmul.f32 %v2278_v36, %v1827_v49  ;;  %v1088_v24 = vadd.f32 1.0, %v960_v10  ;;  %vm1246_vm8 = vcmp.gt.f32.partialorder %v3087_v31, 20.0 }
 0x15c   :  { %v2282_v45 = vpop.eup %2281  ;;  %v1054_v52 = vadd.f32 1.0, %v3163_v47  ;;  %v894_v29 = vadd.f32 1.0, %v2280_v1  ;;  %v826_v15 = vmul.f32 1.442695, %v708_v40  ;;  %v1864_v40 = vadd.f32 -1.0, %v960_v10 }
 0x15d   :  { %v2284_v59 = vpop.eup %2283  ;;  %1726 = vst.msk [vmem:[%s3566_s3 + $0xbc] sm:$0xf] %vm1678_vm4, %v1989_v48  ;;  %v1307_v5 = vmul.f32 %v1179_v57, %v3002_v0  ;;  %v1211_v38 = vmul.f32 %v2282_v45, %v1859_v35  ;;  %2295 = vrcp.f32 %v1088_v24  ;;  %v758_v35 = vmul.f32 1.442695, %v674_v33 }
 0x15e   :  { %2297 = vrcp.f32 %v1054_v52  ;;  %v958_v19 = vmul.f32 %v894_v29, %v894_v29  ;;  %v865_v8 = vadd.f32 1.0, %v2284_v59  ;;  %v2286_v61 = vpop.eup %2285  ;;  %v706_v52 = vmin.f32 %v3185_v22, 20.0 }
 0x15f   :  { %v1371_v13 = vsel %vm1243_vm3, %v3002_v0, %v1307_v5  ;;  %v1339_v51 = vmul.f32 %v1211_v38, %v3006_v21  ;;  %v2288_v16 = vpop.eup %2287  ;;  %v1184_v34 = vmul.f32 %v2286_v61, %v1832_v26  ;;  %2299 = vpow2.f32 %v826_v15 }
 0x160   :  { %v1955_v23 = vpack.c.bf16 %v1371_v13, %v1371_v13  ;;  %v1086_v32 = vadd.f32 1.0, %v958_v19  ;;  %v929_v27 = vmul.f32 %v865_v8, %v865_v8  ;;  %v897_v0 = vadd.f32 1.0, %v2288_v16  ;;  %v2290_v49 = vpop.eup %2289 }
 0x161   :  { %v1403_v7 = vsel %vm1275_vm5, %v3006_v21, %v1339_v51  ;;  %v1312_v2 = vmul.f32 %v1184_v34, %v3014_v53  ;;  %v2292_v6 = vpop.eup %2291  ;;  %v863_v21 = vadd.f32 1.0, %v2290_v49  ;;  %v822_v8 = vmul.f32 1.442695, %v706_v52 }
 0x162   :  { %1692 = vst.msk [vmem:[%s3566_s3 + $0x34] sm:$0xf] %vm1678_vm4, %v1955_v23  ;;  %v1987_v36 = vpack.c.bf16 %v1403_v7, %v1403_v7  ;;  %2301 = vrcp.f32 %v1086_v32  ;;  %v1057_v1 = vadd.f32 1.0, %v929_v27  ;;  %v961_v48 = vmul.f32 %v897_v0, %v897_v0  ;;  %v2294_v57 = vpop.eup %2293 }
 0x163   :  { %v1376_v24 = vsel %vm1248_vm6, %v3014_v53, %v1312_v2  ;;  %v895_v45 = vadd.f32 1.0, %v2292_v6  ;;  %2303 = vpow2.f32 %v758_v35  ;;  %v927_v5 = vmul.f32 %v863_v21, %v863_v21 }
 0x164   :  { %1724 = vst.msk [vmem:[%s3566_s3 + $0xb4] sm:$0xf] %vm1678_vm4, %v1987_v36  ;;  %v1960_v29 = vpack.c.bf16 %v1376_v24, %v1376_v24  ;;  %2305 = vrcp.f32 %v1057_v1  ;;  %v1089_v59 = vadd.f32 1.0, %v961_v48  ;;  %v868_v26 = vadd.f32 1.0, %v2294_v57 }
 0x165   :  { %v959_v38 = vmul.f32 %v895_v45, %v895_v45  ;;  %v1830_v53 = vadd.f32 -1.0, %v3163_v47  ;;  %v3212_v10 = vadd.f32 %v3073_v28, %v2753_v20  ;;  %vm1278_vm9 = vcmp.gt.f32.partialorder %v3105_v44, 20.0 }
 0x166   :  { %1697 = vst.msk [vmem:[%s3566_s3 + $0x48] sm:$0xf] %vm1678_vm4, %v1960_v29  ;;  %2307 = vrcp.f32 %v1089_v59  ;;  %v1055_v51 = vadd.f32 1.0, %v927_v5  ;;  %v3217_v33 = vadd.f32 %v3073_v28, %v2755_v30  ;;  %v932_v34 = vmul.f32 %v868_v26, %v868_v26 }
 0x167   :  { %v2296_v15 = vpop.eup %2295  ;;  %v1087_v23 = vadd.f32 1.0, %v959_v38  ;;  %2309 = vpow2.f32 %v822_v8  ;;  %v1862_v32 = vadd.f32 -1.0, %v958_v19  ;;  %v677_v20 = vmin.f32 %v3212_v10, 20.0 }
 0x168   :  { %v2298_v61 = vpop.eup %2297  ;;  %v1216_v13 = vmul.f32 %v2296_v15, %v1864_v40  ;;  %2311 = vrcp.f32 %v1055_v51  ;;  %v1833_v49 = vadd.f32 -1.0, %v929_v27  ;;  %vm1249_vm10 = vcmp.gt.f32.partialorder %v3113_v11, 20.0 }
 0x169   :  { %v1182_v16 = vmul.f32 %v2298_v61, %v1830_v53  ;;  %v2300_v7 = vpop.eup %2299  ;;  %2313 = vrcp.f32 %v1087_v23  ;;  %v1060_v36 = vadd.f32 1.0, %v932_v34  ;;  %v764_v6 = vmul.f32 1.442695, %v677_v20 }
 0x16a   :  { %v1344_v47 = vmul.f32 %v1216_v13, %v3077_v50  ;;  %v900_v35 = vadd.f32 1.0, %v2300_v7  ;;  %v709_v19 = vmin.f32 %v3217_v33, 20.0  ;;  %vm1281_vm11 = vcmp.gt.f32.partialorder %v3120_v3, 20.0 }
 0x16b   :  { %v1310_v0 = vmul.f32 %v1182_v16, %v3087_v31  ;;  %2315 = vrcp.f32 %v1060_v36  ;;  %v1865_v40 = vadd.f32 -1.0, %v961_v48  ;;  %v1831_v8 = vadd.f32 -1.0, %v927_v5 }
 0x16c   :  { %v2302_v30 = vpop.eup %2301  ;;  %v1408_v2 = vsel %vm1280_vm7, %v3077_v50, %v1344_v47  ;;  %v964_v45 = vmul.f32 %v900_v35, %v900_v35  ;;  %2317 = vpow2.f32 %v764_v6  ;;  %v828_v52 = vmul.f32 1.442695, %v709_v19 }
 0x16d   :  { %v1992_v1 = vpack.c.bf16 %v1408_v2, %v1408_v2  ;;  %v1374_v21 = vsel %vm1246_vm8, %v3087_v31, %v1310_v0  ;;  %v1214_v57 = vmul.f32 %v2302_v30, %v1862_v32  ;;  %v2304_v27 = vpop.eup %2303  ;;  %v3238_v31 = vadd.f32 %v3073_v28, %v2765_v37 }
 0x16e   :  { %v1958_v24 = vpack.c.bf16 %v1374_v21, %v1374_v21  ;;  %v2306_v29 = vpop.eup %2305  ;;  %v866_v59 = vadd.f32 1.0, %v2304_v27  ;;  %vm1247_vm12 = vcmp.gt.f32.partialorder %v3131_v9, 20.0  ;;  %v1092_v15 = vadd.f32 1.0, %v964_v45 }
 0x16f   :  { %1729 = vst.msk [vmem:[%s3566_s3 + $0xc8] sm:$0xf] %vm1678_vm4, %v1992_v1  ;;  %v1342_v50 = vmul.f32 %v1214_v57, %v3105_v44  ;;  %v1185_v26 = vmul.f32 %v2306_v29, %v1833_v49  ;;  %2319 = vpow2.f32 %v828_v52  ;;  %v1863_v61 = vadd.f32 -1.0, %v959_v38 }
 0x170   :  { %1695 = vst.msk [vmem:[%s3566_s3 + $0x40] sm:$0xf] %vm1678_vm4, %v1958_v24  ;;  %v2308_v53 = vpop.eup %2307  ;;  %vm1279_vm13 = vcmp.gt.f32.partialorder %v3135_v63, 20.0  ;;  %v930_v37 = vmul.f32 %v866_v59, %v866_v59  ;;  %v675_v13 = vmin.f32 %v3238_v31, 20.0  ;;  %2321 = vrcp.f32 %v1092_v15 }
 0x171   :  { %v1406_v48 = vsel %vm1278_vm9, %v3105_v44, %v1342_v50  ;;  %v1313_v16 = vmul.f32 %v1185_v26, %v3113_v11  ;;  %v1217_v23 = vmul.f32 %v2308_v53, %v1865_v40  ;;  %v2310_v5 = vpop.eup %2309  ;;  %v1836_v47 = vadd.f32 -1.0, %v932_v34 }
 0x172   :  { %v1990_v51 = vpack.c.bf16 %v1406_v48, %v1406_v48  ;;  %v1058_v32 = vadd.f32 1.0, %v930_v37  ;;  %v760_v20 = vmul.f32 1.442695, %v675_v13  ;;  %v3253_v7 = vadd.f32 %v3073_v28, %v2767_v12  ;;  %v2312_v44 = vpop.eup %2311 }
 0x173   :  { %v1377_v38 = vsel %vm1249_vm10, %v3113_v11, %v1313_v16  ;;  %v1345_v0 = vmul.f32 %v1217_v23, %v3120_v3  ;;  %v898_v49 = vadd.f32 1.0, %v2310_v5  ;;  %v3265_v34 = vadd.f32 %v3073_v28, %v2807_v43  ;;  %v2314_v36 = vpop.eup %2313 }
 0x174   :  { %1727 = vst.msk [vmem:[%s3566_s3 + $0xc0] sm:$0xf] %vm1678_vm4, %v1990_v51  ;;  %v1961_v12 = vpack.c.bf16 %v1377_v38, %v1377_v38  ;;  %v1183_v30 = vmul.f32 %v2312_v44, %v1831_v8  ;;  %2323 = vrcp.f32 %v1058_v32  ;;  %v707_v2 = vmin.f32 %v3253_v7, 20.0 }
 0x175   :  { %v1409_v35 = vsel %vm1281_vm11, %v3120_v3, %v1345_v0  ;;  %v1215_v6 = vmul.f32 %v2314_v36, %v1863_v61  ;;  %v962_v19 = vmul.f32 %v898_v49, %v898_v49  ;;  %2325 = vpow2.f32 %v760_v20  ;;  %v2316_v11 = vpop.eup %2315 }
 0x176   :  { %1698 = vst.msk [vmem:[%s3566_s3 + $0x4c] sm:$0xf] %vm1678_vm4, %v1961_v12  ;;  %v1993_v43 = vpack.c.bf16 %v1409_v35, %v1409_v35  ;;  %v1311_v1 = vmul.f32 %v1183_v30, %v3131_v9  ;;  %vm1252_vm14 = vcmp.gt.f32.partialorder %v3139_v14, 20.0  ;;  %v824_v21 = vmul.f32 1.442695, %v707_v2  ;;  %v2318_v57 = vpop.eup %2317 }
 0x177   :  { %v1343_v27 = vmul.f32 %v1215_v6, %v3135_v63  ;;  %v1188_v24 = vmul.f32 %v2316_v11, %v1836_v47  ;;  %v1868_v3 = vadd.f32 -1.0, %v964_v45  ;;  %v1090_v52 = vadd.f32 1.0, %v962_v19 }
 0x178   :  { %1730 = vst.msk [vmem:[%s3566_s3 + $0xcc] sm:$0xf] %vm1678_vm4, %v1993_v43  ;;  %v1375_v29 = vsel %vm1247_vm12, %v3131_v9, %v1311_v1  ;;  %v869_v50 = vadd.f32 1.0, %v2318_v57  ;;  %2327 = vpow2.f32 %v824_v21  ;;  %v680_v40 = vmin.f32 %v3265_v34, 20.0 }
 0x179   :  { %v2320_v59 = vpop.eup %2319  ;;  %v1959_v26 = vpack.c.bf16 %v1375_v29, %v1375_v29  ;;  %v1407_v45 = vsel %vm1279_vm13, %v3135_v63, %v1343_v27  ;;  %v1316_v8 = vmul.f32 %v1188_v24, %v3139_v14  ;;  %2329 = vrcp.f32 %v1090_v52 }
 0x17a   :  { %v1991_v15 = vpack.c.bf16 %v1407_v45, %v1407_v45  ;;  %v933_v53 = vmul.f32 %v869_v50, %v869_v50  ;;  %v901_v48 = vadd.f32 1.0, %v2320_v59  ;;  %v770_v61 = vmul.f32 1.442695, %v680_v40  ;;  %v2322_v13 = vpop.eup %2321 }
 0x17b   :  { %1696 = vst.msk [vmem:[%s3566_s3 + $0x44] sm:$0xf] %vm1678_vm4, %v1959_v26  ;;  %v1380_v9 = vsel %vm1252_vm14, %v3139_v14, %v1316_v8  ;;  %v3299_v63 = vadd.f32 %v3073_v28, %v2809_v46  ;;  %v3303_v51 = vadd.f32 %v3073_v28, %v2815_v56  ;;  %v1220_v23 = vmul.f32 %v2322_v13, %v1868_v3 }
 0x17c   :  { %1728 = vst.msk [vmem:[%s3566_s3 + $0xc4] sm:$0xf] %vm1678_vm4, %v1991_v15  ;;  %v1964_v16 = vpack.c.bf16 %v1380_v9, %v1380_v9  ;;  %v1061_v5 = vadd.f32 1.0, %v933_v53  ;;  %v1834_v47 = vadd.f32 -1.0, %v930_v37  ;;  %v965_v32 = vmul.f32 %v901_v48, %v901_v48 }
 0x17d   :  { %2331 = vpow2.f32 %v770_v61  ;;  %v712_v14 = vmin.f32 %v3299_v63, 20.0  ;;  %vm1284_vm15 = vcmp.gt.f32.partialorder %v3154_v18, 20.0  ;;  %v1348_v46 = vmul.f32 %v1220_v23, %v3154_v18 }
 0x17e   :  { %v2324_v20 = vpop.eup %2323  ;;  %1701 = vst.msk [vmem:[%s3566_s3 + $0x58] sm:$0xf] %vm1678_vm4, %v1964_v16  ;;  %2333 = vrcp.f32 %v1061_v5  ;;  %v678_v56 = vmin.f32 %v3303_v51, 20.0  ;;  %vm1250_vm0 = vcmp.gt.f32.partialorder %v3167_v41, 20.0  ;;  %v1093_v37 = vadd.f32 1.0, %v965_v32 }
 0x17f   :  { %v2326_v44 = vpop.eup %2325  ;;  %v1186_v38 = vmul.f32 %v2324_v20, %v1834_v47  ;;  %v834_v0 = vmul.f32 1.442695, %v712_v14  ;;  %v1412_v49 = vsel %vm1284_vm15, %v3154_v18, %v1348_v46  ;;  %v3321_v30 = vadd.f32 %v3073_v28, %v2817_v60 }
 0x180   :  { %v867_v36 = vadd.f32 1.0, %v2326_v44  ;;  %v766_v12 = vmul.f32 1.442695, %v678_v56  ;;  %v1996_v2 = vpack.c.bf16 %v1412_v49, %v1412_v49  ;;  %2335 = vrcp.f32 %v1093_v37 }
 0x181   :  { %v1314_v35 = vmul.f32 %v1186_v38, %v3167_v41  ;;  %v3326_v6 = vadd.f32 %v3073_v28, %v2829_v25  ;;  %v1866_v43 = vadd.f32 -1.0, %v962_v19  ;;  %2337 = vpow2.f32 %v834_v0 }
 0x182   :  { %v2328_v11 = vpop.eup %2327  ;;  %v931_v1 = vmul.f32 %v867_v36, %v867_v36  ;;  %v710_v18 = vmin.f32 %v3321_v30, 20.0  ;;  %1733 = vst.msk [vmem:[%s3566_s3 + $0xd8] sm:$0xf] %vm1678_vm4, %v1996_v2  ;;  %2339 = vpow2.f32 %v766_v12  ;;  %vm1282_vm1 = vcmp.gt.f32.partialorder %v3185_v22, 20.0 }
 0x183   :  { %v2330_v21 = vpop.eup %2329  ;;  %v1378_v60 = vsel %vm1250_vm0, %v3167_v41, %v1314_v35  ;;  %v899_v57 = vadd.f32 1.0, %v2328_v11  ;;  %v681_v25 = vmin.f32 %v3326_v6, 20.0  ;;  %v3345_v41 = vadd.f32 %v3073_v28, %v2831_v4 }
 0x184   :  { %v1962_v27 = vpack.c.bf16 %v1378_v60, %v1378_v60  ;;  %v1218_v19 = vmul.f32 %v2330_v21, %v1866_v43  ;;  %v1059_v24 = vadd.f32 1.0, %v931_v1  ;;  %v830_v52 = vmul.f32 1.442695, %v710_v18 }
 0x185   :  { %v963_v3 = vmul.f32 %v899_v57, %v899_v57  ;;  %v772_v29 = vmul.f32 1.442695, %v681_v25  ;;  %v3349_v40 = vadd.f32 %v3073_v28, %v2842_v42  ;;  %v1837_v26 = vadd.f32 -1.0, %v933_v53 }
 0x186   :  { %1699 = vst.msk [vmem:[%s3566_s3 + $0x50] sm:$0xf] %vm1678_vm4, %v1962_v27  ;;  %v1346_v50 = vmul.f32 %v1218_v19, %v3185_v22  ;;  %2341 = vrcp.f32 %v1059_v24  ;;  %v3353_v8 = vadd.f32 %v3073_v28, %v2844_v58  ;;  %v713_v4 = vmin.f32 %v3345_v41, 20.0 }
 0x187   :  { %v2332_v59 = vpop.eup %2331  ;;  %v1091_v45 = vadd.f32 1.0, %v963_v3  ;;  %2343 = vpow2.f32 %v830_v52  ;;  %v1869_v42 = vadd.f32 -1.0, %v965_v32  ;;  %v679_v53 = vmin.f32 %v3349_v40, 20.0 }
 0x188   :  { %v2334_v15 = vpop.eup %2333  ;;  %v1410_v48 = vsel %vm1282_vm1, %v3185_v22, %v1346_v50  ;;  %v872_v61 = vadd.f32 1.0, %v2332_v59  ;;  %2345 = vpow2.f32 %v772_v29  ;;  %v836_v23 = vmul.f32 1.442695, %v713_v4 }
 0x189   :  { %v1994_v13 = vpack.c.bf16 %v1410_v48, %v1410_v48  ;;  %v1189_v9 = vmul.f32 %v2334_v15, %v1837_v26  ;;  %2347 = vrcp.f32 %v1091_v45  ;;  %vm1253_vm2 = vcmp.gt.f32.partialorder %v3212_v10, 20.0 }
 0x18a   :  { %v936_v16 = vmul.f32 %v872_v61, %v872_v61  ;;  %v2336_v5 = vpop.eup %2335  ;;  %v711_v22 = vmin.f32 %v3353_v8, 20.0  ;;  %v3367_v47 = vadd.f32 %v3073_v28, %v2880_v55  ;;  %vm1285_vm3 = vcmp.gt.f32.partialorder %v3217_v33, 20.0 }
 0x18b   :  { %1731 = vst.msk [vmem:[%s3566_s3 + $0xd0] sm:$0xf] %vm1678_vm4, %v1994_v13  ;;  %v1317_v58 = vmul.f32 %v1189_v9, %v3212_v10  ;;  %v2338_v32 = vpop.eup %2337  ;;  %v1221_v14 = vmul.f32 %v2336_v5, %v1869_v42  ;;  %2349 = vpow2.f32 %v836_v23  ;;  %v768_v38 = vmul.f32 1.442695, %v679_v53 }
 0x18c   :  { %v1064_v20 = vadd.f32 1.0, %v936_v16  ;;  %v2340_v46 = vpop.eup %2339  ;;  %v904_v44 = vadd.f32 1.0, %v2338_v32  ;;  %v832_v37 = vmul.f32 1.442695, %v711_v22  ;;  %v1835_v12 = vadd.f32 -1.0, %v931_v1 }
 0x18d   :  { %v1381_v56 = vsel %vm1253_vm2, %v3212_v10, %v1317_v58  ;;  %v1349_v49 = vmul.f32 %v1221_v14, %v3217_v33  ;;  %v870_v36 = vadd.f32 1.0, %v2340_v46  ;;  %v684_v2 = vmin.f32 %v3367_v47, 20.0 }
 0x18e   :  { %v1965_v0 = vpack.c.bf16 %v1381_v56, %v1381_v56  ;;  %2351 = vrcp.f32 %v1064_v20  ;;  %v968_v55 = vmul.f32 %v904_v44, %v904_v44  ;;  %v3382_v43 = vadd.f32 %v3073_v28, %v2882_v62 }
 0x18f   :  { %2353 = vpow2.f32 %v768_v38  ;;  %v1413_v10 = vsel %vm1285_vm3, %v3217_v33, %v1349_v49  ;;  %v934_v11 = vmul.f32 %v870_v36, %v870_v36  ;;  %vm1251_vm5 = vcmp.gt.f32.partialorder %v3238_v31, 20.0 }
 0x190   :  { %v2342_v35 = vpop.eup %2341  ;;  %1702 = vst.msk [vmem:[%s3566_s3 + $0x5c] sm:$0xf] %vm1678_vm4, %v1965_v0  ;;  %2355 = vpow2.f32 %v832_v37  ;;  %v1997_v18 = vpack.c.bf16 %v1413_v10, %v1413_v10  ;;  %v1096_v60 = vadd.f32 1.0, %v968_v55  ;;  %v1867_v25 = vadd.f32 -1.0, %v963_v3 }
 0x191   :  { %v2344_v1 = vpop.eup %2343  ;;  %v1187_v21 = vmul.f32 %v2342_v35, %v1835_v12  ;;  %v1062_v27 = vadd.f32 1.0, %v934_v11  ;;  %v778_v24 = vmul.f32 1.442695, %v684_v2  ;;  %v716_v29 = vmin.f32 %v3382_v43, 20.0 }
 0x192   :  { %v2346_v57 = vpop.eup %2345  ;;  %v902_v19 = vadd.f32 1.0, %v2344_v1  ;;  %1734 = vst.msk [vmem:[%s3566_s3 + $0xdc] sm:$0xf] %vm1678_vm4, %v1997_v18  ;;  %2357 = vrcp.f32 %v1096_v60  ;;  %vm1283_vm6 = vcmp.gt.f32.partialorder %v3253_v7, 20.0  ;;  %vm1256_vm7 = vcmp.gt.f32.partialorder %v3265_v34, 20.0 }
 0x193   :  { %v2348_v52 = vpop.eup %2347  ;;  %v1315_v62 = vmul.f32 %v1187_v21, %v3238_v31  ;;  %v873_v33 = vadd.f32 1.0, %v2346_v57  ;;  %2359 = vrcp.f32 %v1062_v27  ;;  %v842_v45 = vmul.f32 1.442695, %v716_v29 }
 0x194   :  { %v1219_v50 = vmul.f32 %v2348_v52, %v1867_v25  ;;  %v966_v3 = vmul.f32 %v902_v19, %v902_v19  ;;  %2361 = vpow2.f32 %v778_v24  ;;  %v1840_v13 = vadd.f32 -1.0, %v936_v16  ;;  %v3582_v52 = vld [vmem:[#allocation8_spill] sm:$0xff] }
 0x195   :  { %v1379_v59 = vsel %vm1251_vm5, %v3238_v31, %v1315_v62  ;;  %v937_v26 = vmul.f32 %v873_v33, %v873_v33  ;;  %v2350_v15 = vpop.eup %2349  ;;  %2363 = vpow2.f32 %v842_v45  ;;  %v3406_v53 = vadd.f32 %v3073_v28, %v2885_v17 }
 0x196   :  { %v1963_v48 = vpack.c.bf16 %v1379_v59, %v1379_v59  ;;  %v1347_v61 = vmul.f32 %v1219_v50, %v3253_v7  ;;  %v1094_v4 = vadd.f32 1.0, %v966_v3  ;;  %v905_v42 = vadd.f32 1.0, %v2350_v15 }
 0x197   :  { %v1065_v9 = vadd.f32 1.0, %v937_v26  ;;  %v3410_v16 = vadd.f32 %v3073_v28, %v2889_v54  ;;  %vm1288_vm8 = vcmp.gt.f32.partialorder %v3299_v63, 20.0  ;;  %vm1254_vm9 = vcmp.gt.f32.partialorder %v3303_v51, 20.0 }
 0x198   :  { %v2352_v23 = vpop.eup %2351  ;;  %1700 = vst.msk [vmem:[%s3566_s3 + $0x54] sm:$0xf] %vm1678_vm4, %v1963_v48  ;;  %v1411_v31 = vsel %vm1283_vm6, %v3253_v7, %v1347_v61  ;;  %2365 = vrcp.f32 %v1094_v4  ;;  %v969_v32 = vmul.f32 %v905_v42, %v905_v42  ;;  %v682_v7 = vmin.f32 %v3406_v53, 20.0 }
 0x199   :  { %v2354_v5 = vpop.eup %2353  ;;  %v1995_v58 = vpack.c.bf16 %v1411_v31, %v1411_v31  ;;  %v1192_v22 = vmul.f32 %v2352_v23, %v1840_v13  ;;  %2367 = vrcp.f32 %v1065_v9  ;;  %v714_v46 = vmin.f32 %v3410_v16, 20.0  ;;  %v3583_v31 = vld [vmem:[#allocation9_spill] sm:$0xff] }
 0x19a   :  { %v2356_v14 = vpop.eup %2355  ;;  %v871_v20 = vadd.f32 1.0, %v2354_v5  ;;  %v1097_v54 = vadd.f32 1.0, %v969_v32  ;;  %v1872_v44 = vadd.f32 -1.0, %v968_v55  ;;  %v1838_v38 = vadd.f32 -1.0, %v934_v11 }
 0x19b   :  { %1732 = vst.msk [vmem:[%s3566_s3 + $0xd4] sm:$0xf] %vm1678_vm4, %v1995_v58  ;;  %v1320_v17 = vmul.f32 %v1192_v22, %v3265_v34  ;;  %v903_v56 = vadd.f32 1.0, %v2356_v14  ;;  %v774_v0 = vmul.f32 1.442695, %v682_v7  ;;  %v3426_v2 = vadd.f32 %v3073_v28, %v2915_v39 }
 0x19c   :  { %v935_v37 = vmul.f32 %v871_v20, %v871_v20  ;;  %v2358_v49 = vpop.eup %2357  ;;  %2369 = vrcp.f32 %v1097_v54  ;;  %vm1286_vm10 = vcmp.gt.f32.partialorder %v3321_v30, 20.0  ;;  %v838_v11 = vmul.f32 1.442695, %v714_v46 }
 0x19d   :  { %v1384_v36 = vsel %vm1256_vm7, %v3265_v34, %v1320_v17  ;;  %v967_v12 = vmul.f32 %v903_v56, %v903_v56  ;;  %v2360_v35 = vpop.eup %2359  ;;  %v1224_v1 = vmul.f32 %v2358_v49, %v1872_v44  ;;  %v1870_v60 = vadd.f32 -1.0, %v966_v3 }
 0x19e   :  { %v1968_v10 = vpack.c.bf16 %v1384_v36, %v1384_v36  ;;  %v1063_v55 = vadd.f32 1.0, %v935_v37  ;;  %v2362_v18 = vpop.eup %2361  ;;  %v1190_v21 = vmul.f32 %v2360_v35, %v1838_v38  ;;  %2371 = vpow2.f32 %v774_v0  ;;  %v3584_v0 = vld [vmem:[#allocation10_spill] sm:$0xff] }
 0x19f   :  { %v1095_v57 = vadd.f32 1.0, %v967_v12  ;;  %v1352_v39 = vmul.f32 %v1224_v1, %v3299_v63  ;;  %v876_v34 = vadd.f32 1.0, %v2362_v18  ;;  %v685_v25 = vmin.f32 %v3426_v2, 20.0  ;;  %v2364_v27 = vpop.eup %2363 }
 0x1a0   :  { %1705 = vst.msk [vmem:[%s3566_s3 + $0x68] sm:$0xf] %vm1678_vm4, %v1968_v10  ;;  %2373 = vrcp.f32 %v1063_v55  ;;  %v1318_v19 = vmul.f32 %v1190_v21, %v3303_v51  ;;  %v1841_v24 = vadd.f32 -1.0, %v937_v26  ;;  %v3438_v62 = vadd.f32 %v3073_v28, %v3582_v52 }
 0x1a1   :  { %2375 = vrcp.f32 %v1095_v57  ;;  %v1416_v29 = vsel %vm1288_vm8, %v3299_v63, %v1352_v39  ;;  %v3443_v50 = vmul.f32 %v876_v34, %v876_v34  ;;  %v908_v3 = vadd.f32 1.0, %v2364_v27 }
 0x1a2   :  { %v2366_v33 = vpop.eup %2365  ;;  %2377 = vpow2.f32 %v838_v11  ;;  %v2000_v45 = vpack.c.bf16 %v1416_v29, %v1416_v29  ;;  %v1382_v26 = vsel %vm1254_vm9, %v3303_v51, %v1318_v19  ;;  %v780_v48 = vmul.f32 1.442695, %v685_v25 }
 0x1a3   :  { %v2368_v59 = vpop.eup %2367  ;;  %v1222_v15 = vmul.f32 %v2366_v33, %v1870_v60  ;;  %v1966_v61 = vpack.c.bf16 %v1382_v26, %v1382_v26  ;;  %vm1257_vm11 = vcmp.gt.f32.partialorder %v3326_v6, 20.0  ;;  %v1068_v13 = vadd.f32 1.0, %v3443_v50 }
 0x1a4   :  { %v1193_v4 = vmul.f32 %v2368_v59, %v1841_v24  ;;  %1737 = vst.msk [vmem:[%s3566_s3 + $0xe8] sm:$0xf] %vm1678_vm4, %v2000_v45  ;;  %v972_v9 = vmul.f32 %v908_v3, %v908_v3  ;;  %2379 = vpow2.f32 %v780_v48  ;;  %v717_v42 = vmin.f32 %v3438_v62, 20.0 }
 0x1a5   :  { %v1350_v63 = vmul.f32 %v1222_v15, %v3321_v30  ;;  %1703 = vst.msk [vmem:[%s3566_s3 + $0x60] sm:$0xf] %vm1678_vm4, %v1966_v61  ;;  %v1873_v23 = vadd.f32 -1.0, %v969_v32  ;;  %2381 = vrcp.f32 %v1068_v13  ;;  %v3463_v5 = vadd.f32 %v3073_v28, %v3583_v31 }
 0x1a6   :  { %v1321_v51 = vmul.f32 %v1193_v4, %v3326_v6  ;;  %v2370_v58 = vpop.eup %2369  ;;  %v1839_v14 = vadd.f32 -1.0, %v935_v37  ;;  %v1100_v20 = vadd.f32 1.0, %v972_v9  ;;  %v844_v7 = vmul.f32 1.442695, %v717_v42 }
 0x1a7   :  { %v1414_v22 = vsel %vm1286_vm10, %v3321_v30, %v1350_v63  ;;  %v1225_v54 = vmul.f32 %v2370_v58, %v1873_v23  ;;  %v683_v32 = vmin.f32 %v3463_v5, 20.0  ;;  %v1871_v38 = vadd.f32 -1.0, %v967_v12 }
 0x1a8   :  { %v1998_v46 = vpack.c.bf16 %v1414_v22, %v1414_v22  ;;  %v1385_v17 = vsel %vm1257_vm11, %v3326_v6, %v1321_v51  ;;  %v2372_v56 = vpop.eup %2371  ;;  %2383 = vrcp.f32 %v1100_v20  ;;  %v3474_v49 = vadd.f32 %v3073_v28, %v3584_v0 }
 0x1a9   :  { %v1969_v44 = vpack.c.bf16 %v1385_v17, %v1385_v17  ;;  %v1353_v37 = vmul.f32 %v1225_v54, %v3345_v41  ;;  %v874_v6 = vadd.f32 1.0, %v2372_v56  ;;  %2385 = vpow2.f32 %v844_v7 }
 0x1aa   :  { %v2374_v30 = vpop.eup %2373  ;;  %1735 = vst.msk [vmem:[%s3566_s3 + $0xe0] sm:$0xf] %vm1678_vm4, %v1998_v46  ;;  %v776_v36 = vmul.f32 1.442695, %v683_v32  ;;  %vm1289_vm12 = vcmp.gt.f32.partialorder %v3345_v41, 20.0  ;;  %v715_v12 = vmin.f32 %v3474_v49, 20.0 }
 0x1ab   :  { %v2376_v35 = vpop.eup %2375  ;;  %1706 = vst.msk [vmem:[%s3566_s3 + $0x6c] sm:$0xf] %vm1678_vm4, %v1969_v44  ;;  %v1191_v28 = vmul.f32 %v2374_v30, %v1839_v14  ;;  %v1417_v1 = vsel %vm1289_vm12, %v3345_v41, %v1353_v37  ;;  %v938_v11 = vmul.f32 %v874_v6, %v874_v6  ;;  %vm1255_vm13 = vcmp.gt.f32.partialorder %v3349_v40, 20.0 }
 0x1ac   :  { %v2378_v10 = vpop.eup %2377  ;;  %v1223_v55 = vmul.f32 %v2376_v35, %v1871_v38  ;;  %2387 = vpow2.f32 %v776_v36  ;;  %v2001_v18 = vpack.c.bf16 %v1417_v1, %v1417_v1  ;;  %v840_v57 = vmul.f32 1.442695, %v715_v12 }
 0x1ad   :  { %v1319_v21 = vmul.f32 %v1191_v28, %v3349_v40  ;;  %v906_v60 = vadd.f32 1.0, %v2378_v10  ;;  %vm1287_vm14 = vcmp.gt.f32.partialorder %v3353_v8, 20.0  ;;  %v1066_v34 = vadd.f32 1.0, %v938_v11 }
 0x1ae   :  { %v1351_v39 = vmul.f32 %v1223_v55, %v3353_v8  ;;  %v2380_v25 = vpop.eup %2379  ;;  %1738 = vst.msk [vmem:[%s3566_s3 + $0xec] sm:$0xf] %vm1678_vm4, %v2001_v18  ;;  %v1844_v27 = vadd.f32 -1.0, %v3443_v50  ;;  %2389 = vpow2.f32 %v840_v57  ;;  %v1876_v26 = vadd.f32 -1.0, %v972_v9 }
 0x1af   :  { %v1383_v41 = vsel %vm1255_vm13, %v3349_v40, %v1319_v21  ;;  %v970_v19 = vmul.f32 %v906_v60, %v906_v60  ;;  %v2382_v24 = vpop.eup %2381  ;;  %2391 = vrcp.f32 %v1066_v34  ;;  %v877_v29 = vadd.f32 1.0, %v2380_v25 }
 0x1b0   :  { %v1967_v52 = vpack.c.bf16 %v1383_v41, %v1383_v41  ;;  %v1415_v33 = vsel %vm1287_vm14, %v3353_v8, %v1351_v39  ;;  %v1196_v59 = vmul.f32 %v2382_v24, %v1844_v27  ;;  %vm1260_vm15 = vcmp.gt.f32.partialorder %v3367_v47, 20.0 }
 0x1b1   :  { %v1999_v3 = vpack.c.bf16 %v1415_v33, %v1415_v33  ;;  %v1098_v45 = vadd.f32 1.0, %v970_v19  ;;  %v941_v40 = vmul.f32 %v877_v29, %v877_v29  ;;  %vm1292_vm0 = vcmp.gt.f32.partialorder %v3382_v43, 20.0 }
 0x1b2   :  { %1704 = vst.msk [vmem:[%s3566_s3 + $0x64] sm:$0xf] %vm1678_vm4, %v1967_v52  ;;  %v2384_v15 = vpop.eup %2383  ;;  %v1324_v8 = vmul.f32 %v1196_v59, %v3367_v47  ;;  %v1874_v32 = vadd.f32 -1.0, %v970_v19  ;;  %vm1258_vm1 = vcmp.gt.f32.partialorder %v3406_v53, 20.0  ;;  %vm1290_vm2 = vcmp.gt.f32.partialorder %v3410_v16, 20.0 }
 0x1b3   :  { %1736 = vst.msk [vmem:[%s3566_s3 + $0xe4] sm:$0xf] %vm1678_vm4, %v1999_v3  ;;  %2393 = vrcp.f32 %v1098_v45  ;;  %v2386_v50 = vpop.eup %2385  ;;  %v1228_v48 = vmul.f32 %v2384_v15, %v1876_v26  ;;  %v1069_v61 = vadd.f32 1.0, %v941_v40  ;;  %v1845_v37 = vadd.f32 -1.0, %v941_v40 }
 0x1b4   :  { %v1388_v4 = vsel %vm1260_vm15, %v3367_v47, %v1324_v8  ;;  %v909_v13 = vadd.f32 1.0, %v2386_v50  ;;  %v1842_v47 = vadd.f32 -1.0, %v938_v11  ;;  %vm1261_vm3 = vcmp.gt.f32.partialorder %v3426_v2, 20.0 }
 0x1b5   :  { %v1972_v9 = vpack.c.bf16 %v1388_v4, %v1388_v4  ;;  %v1356_v42 = vmul.f32 %v1228_v48, %v3382_v43  ;;  %2395 = vrcp.f32 %v1069_v61  ;;  %vm1293_vm5 = vcmp.gt.f32.partialorder %v3438_v62, 20.0 }
 0x1b6   :  { %v2388_v63 = vpop.eup %2387  ;;  %v973_v51 = vmul.f32 %v909_v13, %v909_v13  ;;  %vm1259_vm6 = vcmp.gt.f32.partialorder %v3463_v5, 20.0  ;;  %vm1291_vm7 = vcmp.gt.f32.partialorder %v3474_v49, 20.0 }
 0x1b7   :  { %v875_v23 = vadd.f32 1.0, %v2388_v63  ;;  %1709 = vst.msk [vmem:[%s3566_s3 + $0x78] sm:$0xf] %vm1678_vm4, %v1972_v9  ;;  %v1420_v31 = vsel %vm1292_vm0, %v3382_v43, %v1356_v42 }
 0x1b8   :  { %v2390_v58 = vpop.eup %2389  ;;  %v2004_v22 = vpack.c.bf16 %v1420_v31, %v1420_v31  ;;  %v1101_v14 = vadd.f32 1.0, %v973_v51 }
 0x1b9   :  { %v939_v20 = vmul.f32 %v875_v23, %v875_v23  ;;  %v2392_v7 = vpop.eup %2391  ;;  %v907_v46 = vadd.f32 1.0, %v2390_v58 }
 0x1ba   :  { %1741 = vst.msk [vmem:[%s3566_s3 + $0xf8] sm:$0xf] %vm1678_vm4, %v2004_v22  ;;  %v1194_v17 = vmul.f32 %v2392_v7, %v1842_v47  ;;  %2397 = vrcp.f32 %v1101_v14 }
 0x1bb   :  { %v1067_v54 = vadd.f32 1.0, %v939_v20  ;;  %v971_v56 = vmul.f32 %v907_v46, %v907_v46  ;;  %v1843_v60 = vadd.f32 -1.0, %v939_v20 }
 0x1bc   :  { %v1322_v43 = vmul.f32 %v1194_v17, %v3406_v53 }
 0x1bd   :  { %v2394_v44 = vpop.eup %2393  ;;  %2399 = vrcp.f32 %v1067_v54  ;;  %v1099_v0 = vadd.f32 1.0, %v971_v56  ;;  %v1875_v34 = vadd.f32 -1.0, %v971_v56 }
 0x1be   :  { %v1226_v38 = vmul.f32 %v2394_v44, %v1874_v32  ;;  %v1386_v30 = vsel %vm1258_vm1, %v3406_v53, %v1322_v43  ;;  %v1877_v53 = vadd.f32 -1.0, %v973_v51 }
 0x1bf   :  { %v2396_v6 = vpop.eup %2395  ;;  %v1970_v36 = vpack.c.bf16 %v1386_v30, %v1386_v30  ;;  %2401 = vrcp.f32 %v1099_v0 }
 0x1c0   :  { %v1354_v35 = vmul.f32 %v1226_v38, %v3410_v16  ;;  %v1197_v28 = vmul.f32 %v2396_v6, %v1845_v37 }
 0x1c1   :  { %1707 = vst.msk [vmem:[%s3566_s3 + $0x70] sm:$0xf] %vm1678_vm4, %v1970_v36 }
 0x1c2   :  { %v1418_v12 = vsel %vm1290_vm2, %v3410_v16, %v1354_v35  ;;  %v1325_v1 = vmul.f32 %v1197_v28, %v3426_v2 }
 0x1c3   :  { %v2002_v10 = vpack.c.bf16 %v1418_v12, %v1418_v12 }
 0x1c4   :  { %v2398_v55 = vpop.eup %2397  ;;  %v1389_v11 = vsel %vm1261_vm3, %v3426_v2, %v1325_v1 }
 0x1c5   :  { %1739 = vst.msk [vmem:[%s3566_s3 + $0xf0] sm:$0xf] %vm1678_vm4, %v2002_v10  ;;  %v1973_v18 = vpack.c.bf16 %v1389_v11, %v1389_v11  ;;  %v1229_v21 = vmul.f32 %v2398_v55, %v1877_v53 }
 0x1c7   :  { %v2400_v57 = vpop.eup %2399  ;;  %1710 = vst.msk [vmem:[%s3566_s3 + $0x7c] sm:$0xf] %vm1678_vm4, %v1973_v18  ;;  %v1357_v16 = vmul.f32 %v1229_v21, %v3438_v62 }
 0x1c8   :  { %v1195_v39 = vmul.f32 %v2400_v57, %v1843_v60 }
 0x1c9   :  { %v2402_v25 = vpop.eup %2401  ;;  %v1421_v41 = vsel %vm1293_vm5, %v3438_v62, %v1357_v16 }
 0x1ca   :  { %v1323_v2 = vmul.f32 %v1195_v39, %v3463_v5  ;;  %v2005_v27 = vpack.c.bf16 %v1421_v41, %v1421_v41  ;;  %v1227_v19 = vmul.f32 %v2402_v25, %v1875_v34 }
 0x1cc   :  { %v1387_v24 = vsel %vm1259_vm6, %v3463_v5, %v1323_v2  ;;  %1742 = vst.msk [vmem:[%s3566_s3 + $0xfc] sm:$0xf] %vm1678_vm4, %v2005_v27  ;;  %v1355_v33 = vmul.f32 %v1227_v19, %v3474_v49 }
 0x1cd   :  { %v1971_v52 = vpack.c.bf16 %v1387_v24, %v1387_v24 }
 0x1ce   :  { %v1419_v62 = vsel %vm1291_vm7, %v3474_v49, %v1355_v33 }
 0x1cf   :  { %1708 = vst.msk [vmem:[%s3566_s3 + $0x74] sm:$0xf] %vm1678_vm4, %v1971_v52  ;;  %v2003_v29 = vpack.c.bf16 %v1419_v62, %v1419_v62 }
 0x1d1   :  { %1740 = vst.msk [vmem:[%s3566_s3 + $0xf4] sm:$0xf] %vm1678_vm4, %v2003_v29 }

// kernel: downsample1_forward.3
= control target key start
LH: loop header
LB: loop body
LE: loop exit
PB: predicated region body
PF: predicated region fallthrough
CT: control target
= control target key end

     0   :  { %vm355_vm0 = vcmask 261120   ;;  %s11814_s0 = inlined_call_operand.vmem [shape: bf16[128,288], index: 0, kind: input, shape index: {}]   ;;  %s11815_s1 = inlined_call_operand.vmem [shape: bf16[288,64], index: 1, kind: input, shape index: {}]   ;;  %s11816_s2 = inlined_call_operand.vmem [shape: f32[64,128], index: 2, kind: input, shape index: {}]   ;;  %s11817_s3 = inlined_call_operand.vmem [shape: f32[64,32], index: 3, kind: input, shape index: {}]   ;;  %s11818_s4 = inlined_call_operand.vmem [shape: f32[9,128,128], index: 4, kind: input, shape index: {}]   ;;  %s11819_s5 = inlined_call_operand.vmem [shape: f32[9,32,64], index: 5, kind: input, shape index: {}]   ;;  %s11820_s6 = inlined_call_operand.vmem [shape: f32[64,64], index: 6, kind: input, shape index: {}]   ;;  %s11821_s7 = inlined_call_operand.vmem [shape: f32[64,64], index: 7, kind: input, shape index: {}]   ;;  %s11822_s8 = inlined_call_operand.vmem [shape: f32[64,64], index: 8, kind: input, shape index: {}]   ;;  %s11823_s9 = inlined_call_operand.vmem [shape: f32[1,64], index: 9, kind: input, shape index: {}]   ;;  %s11824_s10 = inlined_call_operand.vmem [shape: f32[1,128], index: 10, kind: input, shape index: {}]   ;;  %s11825_s11 = inlined_call_operand.vmem [shape: f32[1,32], index: 11, kind: input, shape index: {}]   ;;  %s11826_s12 = inlined_call_operand.vmem [shape: f32[1,64], index: 12, kind: input, shape index: {}]   ;;  %s11827_s13 = inlined_call_operand.vmem [shape: f32[1,64], index: 13, kind: input, shape index: {}]   ;;  %s11828_s14 = inlined_call_operand.vmem [shape: f32[1,64], index: 14, kind: input, shape index: {}]   ;;  %s11829_s15 = inlined_call_operand.hbm [shape: f32[128,64], index: 15, kind: output, shape index: {}]  }
   0x1   :  { %v9019_v0 = vld [vmem:[%s11815_s1 + $0x40] sm:$0xff]   ;;  %v9021_v2 = vld [vmem:[%s11815_s1 + $0x48] sm:$0xff]   ;;  %v9023_v4 = vld [vmem:[%s11815_s1 + $0x50] sm:$0xff]  }
   0x2   :  { %v9020_v1 = vld [vmem:[%s11815_s1] sm:$0xff]   ;;  %6749 = vmatprep.subr.bf16.mxu0 %v9019_v0  ;;  %v9022_v3 = vld [vmem:[%s11815_s1 + $0x8] sm:$0xff]   ;;  %v9024_v5 = vld [vmem:[%s11815_s1 + $0x10] sm:$0xff]  }
   0x3   :  { %6750 = vmatpush3.bf16.msra.mxu0 %v9020_v1  ;;  %v9025_v6 = vld [vmem:[%s11815_s1 + $0x58] sm:$0xff]   ;;  %v9027_v8 = vld [vmem:[%s11815_s1 + $0x60] sm:$0xff]   ;;  %v9029_v11 = vld [vmem:[%s11815_s1 + $0x68] sm:$0xff]  }
   0x4   :  { %6751 = vmatprep.subr.bf16.mxu0 %v9021_v2  ;;  %v9026_v7 = vld [vmem:[%s11815_s1 + $0x18] sm:$0xff]   ;;  %v9028_v9 = vld [vmem:[%s11815_s1 + $0x20] sm:$0xff]   ;;  %v9030_v12 = vld [vmem:[%s11815_s1 + $0x28] sm:$0xff]  }
   0x5   :  { %v9034_v10 = vld [vmem:[%s11815_s1 + $0x80] sm:$0xff]   ;;  %v9031_v13 = vld [vmem:[%s11815_s1 + $0x70] sm:$0xff]   ;;  %v9039_v15 = vld [vmem:[%s11815_s1 + $0x88] sm:$0xff]  }
   0x6   :  { %7411 = vmatprep.subr.bf16.mxu1 %v9034_v10  ;;  %v9038_v14 = vld [vmem:[%s11814_s0 + $0x4] ss:$12 sps:$4 sm:$0xff]   ;;  %v9040_v16 = vld [vmem:[%s11814_s0 + $0x8] ss:$12 sps:$4 sm:$0xff]   ;;  %v9041_v17 = vld [vmem:[%s11814_s0 + $0x20] ss:$12 sps:$4 sm:$0xff]  }
   0x7   :  { %6752 = vmatpush3.bf16.msra.mxu0 %v9022_v3  ;;  %7412 = vmatpush3.bf16.msra.mxu1 %v9034_v10  ;;  %v9032_v18 = vld [vmem:[%s11815_s1 + $0x30] sm:$0xff]   ;;  %v9033_v19 = vld [vmem:[%s11815_s1 + $0x78] sm:$0xff]   ;;  %v9036_v22 = vld [vmem:[%s11814_s0] ss:$12 sps:$4 sm:$0xff]  }
   0x8   :  { %6753 = vmatprep.subr.bf16.mxu0 %v9023_v4  ;;  %412 = vmatprep.mubr.bf16.mxu0 %v9038_v14  ;;  %v9048_v20 = vld [vmem:[%s11814_s0 + $0x38] ss:$12 sps:$4 sm:$0xff]   ;;  %v9049_v23 = vld [vmem:[%s11814_s0 + $0x50] ss:$12 sps:$4 sm:$0xff]   ;;  %v9056_v24 = vld [vmem:[%s11814_s0 + $0x68] ss:$12 sps:$4 sm:$0xff]  }
   0x9   :  { %7413 = vmatprep.subr.bf16.mxu1 %v9039_v15  ;;  %7415 = vmatprep.mubr.msk.bf16.mxu1 %vm355_vm0, %v9040_v16  ;;  %v9035_v21 = vld [vmem:[%s11815_s1 + $0x38] sm:$0xff]  }
   0xa   :  { %v9042_v25 = vld [vmem:[%s11814_s0 + $0x1c] ss:$12 sps:$4 sm:$0xff]  }
   0xb   :  { %6754 = vmatpush3.bf16.msra.mxu0 %v9024_v5  ;;  %7414 = vmatpush3.bf16.msra.mxu1 %v9039_v15 }
   0xc   :  { %6755 = vmatprep.subr.bf16.mxu0 %v9025_v6 }
   0xe   :  { %7416 = vmatmul.mubr.msk.bf16.vlgmr.msra.gmra.mrb[0].mxu1 %vm355_vm0, %v9041_v17 }
   0xf   :  { %6756 = vmatpush3.bf16.msra.mxu0 %v9026_v7  ;;  %7419 = vmatprep.mubr.msk.bf16.mxu1 %vm355_vm0, %v9048_v20 }
  0x10   :  { %6757 = vmatprep.subr.bf16.mxu0 %v9027_v8 }
  0x13   :  { %6758 = vmatpush3.bf16.msra.mxu0 %v9028_v9 }
  0x14   :  { %6759 = vmatprep.subr.bf16.mxu0 %v9029_v11 }
  0x16   :  { %7420 = vmatmul.mubr.msk.bf16.gmra.mrb[4].mxu1 %vm355_vm0, %v9049_v23 }
  0x17   :  { %6760 = vmatpush3.bf16.msra.mxu0 %v9030_v12  ;;  %7423 = vmatprep.mubr.msk.bf16.mxu1 %vm355_vm0, %v9056_v24 }
  0x18   :  { %6761 = vmatprep.subr.bf16.mxu0 %v9031_v13 }
  0x1b   :  { %6762 = vmatpush3.bf16.msra.mxu0 %v9032_v18 }
  0x1c   :  { %6763 = vmatprep.subr.bf16.mxu0 %v9033_v19 }
  0x1f   :  { %6764 = vmatpush3.bf16.msra.mxu0 %v9035_v21 }
  0x22   :  { %413 = vmatmul.mubr.bf16.vlgmr.msra.gmra.mrb[0].mxu0 %v9036_v22 }
  0x23   :  { %420 = vmatprep.mubr.bf16.mxu0 %v9042_v25 }
  0x24   :  { %20 = vsyncpa [#allocation3], 0  ;;  %v9057_v26 = vld [vmem:[%s11814_s0 + $0x80] ss:$12 sps:$4 sm:$0xff]   ;;  %v9044_v27 = vld [vmem:[%s11814_s0 + $0x18] ss:$12 sps:$4 sm:$0xff]  }
  0x25   :  { %v9064_v28 = vld [vmem:[%s11814_s0 + $0x98] ss:$12 sps:$4 sm:$0xff]   ;;  %v9045_v29 = vld [vmem:[%s11814_s0 + $0x34] ss:$12 sps:$4 sm:$0xff]   ;;  %7424 = vmatmul.mubr.msk.bf16.gmra.mrb[8].mxu1 %vm355_vm0, %v9057_v26  ;;  %v9065_v30 = vld [vmem:[%s11814_s0 + $0xb0] ss:$12 sps:$4 sm:$0xff]  }
  0x26   :  { %7427 = vmatprep.mubr.msk.bf16.mxu1 %vm355_vm0, %v9064_v28  ;;  %v9047_v31 = vld [vmem:[%s11814_s0 + $0x30] ss:$12 sps:$4 sm:$0xff]   ;;  %v9050_v32 = vld [vmem:[%s11814_s0 + $0x4c] ss:$12 sps:$4 sm:$0xff]   ;;  %v9052_v33 = vld [vmem:[%s11814_s0 + $0x48] ss:$12 sps:$4 sm:$0xff]  }
  0x27   :  { %v9053_v34 = vld [vmem:[%s11814_s0 + $0x64] ss:$12 sps:$4 sm:$0xff]   ;;  %v9055_v35 = vld [vmem:[%s11814_s0 + $0x60] ss:$12 sps:$4 sm:$0xff]   ;;  %v9058_v36 = vld [vmem:[%s11814_s0 + $0x7c] ss:$12 sps:$4 sm:$0xff]  }
  0x28   :  { %v9060_v37 = vld [vmem:[%s11814_s0 + $0x78] ss:$12 sps:$4 sm:$0xff]   ;;  %v9061_v38 = vld [vmem:[%s11814_s0 + $0x94] ss:$12 sps:$4 sm:$0xff]   ;;  %v9063_v39 = vld [vmem:[%s11814_s0 + $0x90] ss:$12 sps:$4 sm:$0xff]  }
  0x29   :  { %v9066_v40 = vld [vmem:[%s11814_s0 + $0xac] ss:$12 sps:$4 sm:$0xff]   ;;  %v9068_v41 = vld [vmem:[%s11814_s0 + $0xa8] ss:$12 sps:$4 sm:$0xff]   ;;  %v766_v42 = vld [vmem:[%s11816_s2] sm:$0xff]  ;;  %vm781_vm2 = vcmask 523264  }
  0x2a   :  { %421 = vmatmul.mubr.bf16.gmra.mrb[4].mxu0 %v9044_v27  ;;  %v767_v43 = vld [vmem:[%s11816_s2 + $0x8] sm:$0xff]  ;;  %v768_v45 = vld [vmem:[%s11816_s2 + $0x10] sm:$0xff]  ;;  %v769_v46 = vld [vmem:[%s11816_s2 + $0x18] sm:$0xff] }
  0x2b   :  { %428 = vmatprep.mubr.bf16.mxu0 %v9045_v29  ;;  %v8423_v44 = vpack.c.bf16 %v767_v43, %v766_v42  ;;  %v8427_v47 = vpack.c.bf16 %v769_v46, %v768_v45  ;;  %v770_v48 = vld [vmem:[%s11816_s2 + $0x20] sm:$0xff]  ;;  %v771_v49 = vld [vmem:[%s11816_s2 + $0x28] sm:$0xff]  ;;  %v772_v51 = vld [vmem:[%s11816_s2 + $0x30] sm:$0xff] }
  0x2c   :  { %v8431_v50 = vpack.c.bf16 %v771_v49, %v770_v48  ;;  %v773_v52 = vld [vmem:[%s11816_s2 + $0x38] sm:$0xff]  ;;  %v9724_v62 = vld [vmem:[%s11823_s9] ss:$0 sm:$0xff] }
  0x2d   :  { %7428 = vmatmul.mubr.msk.bf16.gmra.mrb[12].mxu1 %vm355_vm0, %v9065_v30  ;;  %8424 = vmatprep.subr.bf16.mxu1 %v8423_v44  ;;  %v8435_v53 = vpack.c.bf16 %v773_v52, %v772_v51 }
  0x2e   :  { %8426 = vmatpush3.bf16.msra.mxu1 %v8423_v44 }
  0x2f   :  { %8428 = vmatprep.subr.bf16.mxu1 %v8427_v47 }
  0x32   :  { %429 = vmatmul.mubr.bf16.gmra.mrb[8].mxu0 %v9047_v31  ;;  %8430 = vmatpush3.bf16.msra.mxu1 %v8427_v47 }
  0x33   :  { %436 = vmatprep.mubr.bf16.mxu0 %v9050_v32  ;;  %8432 = vmatprep.subr.bf16.mxu1 %v8431_v50 }
  0x36   :  { %8434 = vmatpush3.bf16.msra.mxu1 %v8431_v50 }
  0x37   :  { %8436 = vmatprep.subr.bf16.mxu1 %v8435_v53 }
  0x3a   :  { %437 = vmatmul.mubr.bf16.gmra.mrb[12].mxu0 %v9052_v33  ;;  %8438 = vmatpush3.bf16.msra.mxu1 %v8435_v53 }
  0x3b   :  { %444 = vmatprep.mubr.bf16.mxu0 %v9053_v34 }
  0x42   :  { %445 = vmatmul.mubr.bf16.gmra.mrb[16].mxu0 %v9055_v35 }
  0x43   :  { %452 = vmatprep.mubr.bf16.mxu0 %v9058_v36 }
  0x4a   :  { %453 = vmatmul.mubr.bf16.gmra.mrb[20].mxu0 %v9060_v37 }
  0x4b   :  { %460 = vmatprep.mubr.bf16.mxu0 %v9061_v38 }
  0x52   :  { %461 = vmatmul.mubr.bf16.gmra.mrb[24].mxu0 %v9063_v39 }
  0x53   :  { %468 = vmatprep.mubr.bf16.mxu0 %v9066_v40 }
  0x5a   :  { %469 = vmatmul.mubr.bf16.gmra.mrb[28].mxu0 %v9068_v41 }
  0xe1   :  { %v7417_v54 = vpop.f32.mrb[0].mxu1 }
  0xe2   :  { %v511_v55 = vpop.f32.mrb[1].mxu1 }
  0xe3   :  { %v7418_v56 = vpop.f32.mrb[2].mxu1 }
  0xe4   :  { %v514_v57 = vpop.f32.mrb[3].mxu1 }
  0xe9   :  { %v9719_v58 = vpop.f32.mrb[4].mxu1 }
  0xea   :  { %v527_v60 = vpop.f32.mrb[5].mxu1 }
  0xeb   :  { %v9726_v63 = vpop.f32.mrb[6].mxu1 }
  0xec   :  { %v530_v2 = vpop.f32.mrb[7].mxu1 }
  0xf5   :  { %v6765_v59 = vpop.f32.mrb[0].mxu0 }
  0xf6   :  { %v6766_v61 = vpop.f32.mrb[1].mxu0 }
  0xf7   :  { %v6767_v0 = vadd.f32 %v6766_v61, %v6765_v59  ;;  %v6768_v1 = vpop.f32.mrb[2].mxu0 }
  0xf8   :  { %v6769_v3 = vpop.f32.mrb[3].mxu0  ;;  %v9732_v8 = vpop.f32.mrb[8].mxu1 }
  0xf9   :  { %v6770_v4 = vadd.f32 %v6769_v3, %v6768_v1  ;;  %v415_v5 = vadd.f32 %v6767_v0, %v9724_v62  ;;  %v9737_v12 = vpop.f32.mrb[9].mxu1 }
  0xfa   :  { %v9739_v14 = vpop.f32.mrb[10].mxu1 }
  0xfb   :  { %v9729_v6 = vadd.f32 %v511_v55, %v415_v5  ;;  %v418_v7 = vadd.f32 %v6770_v4, %v9724_v62  ;;  %v9742_v19 = vpop.f32.mrb[11].mxu1 }
  0xfd   :  { %v574_v9 = vmin.f32 %v9729_v6, 20.0  ;;  %v9735_v10 = vadd.f32 %v514_v57, %v418_v7  ;;  %v6771_v11 = vpop.f32.mrb[4].mxu0  ;;  %vm718_vm1 = vcmp.gt.f32.partialorder %v9729_v6, 20.0 }
  0xfe   :  { %v6772_v13 = vpop.f32.mrb[5].mxu0 }
  0xff   :  { %v590_v15 = vmul.f32 1.442695, %v574_v9  ;;  %v575_v16 = vmin.f32 %v9735_v10, 20.0  ;;  %v6773_v17 = vadd.f32 %v6772_v13, %v6771_v11  ;;  %v6774_v18 = vpop.f32.mrb[6].mxu0  ;;  %vm719_vm3 = vcmp.gt.f32.partialorder %v9735_v10, 20.0 }
 0x100   :  { %v6775_v20 = vpop.f32.mrb[7].mxu0  ;;  %v9748_v26 = vpop.f32.mrb[12].mxu1 }
 0x101   :  { %9069 = vpow2.f32 %v590_v15  ;;  %v592_v21 = vmul.f32 1.442695, %v575_v16  ;;  %v423_v22 = vadd.f32 %v6773_v17, %v9724_v62  ;;  %v6776_v23 = vadd.f32 %v6775_v20, %v6774_v18  ;;  %v9753_v30 = vpop.f32.mrb[13].mxu1 }
 0x102   :  { %v9755_v32 = vpop.f32.mrb[14].mxu1 }
 0x103   :  { %9071 = vpow2.f32 %v592_v21  ;;  %v9745_v24 = vadd.f32 %v7417_v54, %v423_v22  ;;  %v426_v25 = vadd.f32 %v6776_v23, %v9724_v62  ;;  %v9758_v37 = vpop.f32.mrb[15].mxu1 }
 0x105   :  { %v576_v27 = vmin.f32 %v9745_v24, 20.0  ;;  %v9751_v28 = vadd.f32 %v7418_v56, %v426_v25  ;;  %v6777_v29 = vpop.f32.mrb[8].mxu0  ;;  %vm720_vm4 = vcmp.gt.f32.partialorder %v9745_v24, 20.0 }
 0x106   :  { %v6778_v31 = vpop.f32.mrb[9].mxu0 }
 0x107   :  { %v594_v33 = vmul.f32 1.442695, %v576_v27  ;;  %v577_v34 = vmin.f32 %v9751_v28, 20.0  ;;  %v6779_v35 = vadd.f32 %v6778_v31, %v6777_v29  ;;  %v6780_v36 = vpop.f32.mrb[10].mxu0  ;;  %vm721_vm5 = vcmp.gt.f32.partialorder %v9751_v28, 20.0 }
 0x108   :  { %v6781_v38 = vpop.f32.mrb[11].mxu0 }
 0x109   :  { %9073 = vpow2.f32 %v594_v33  ;;  %v596_v39 = vmul.f32 1.442695, %v577_v34  ;;  %v6782_v40 = vadd.f32 %v6781_v38, %v6780_v36  ;;  %v431_v41 = vadd.f32 %v6779_v35, %v9724_v62 }
 0x10b   :  { %v9070_v42 = vpop.eup %9069  ;;  %9075 = vpow2.f32 %v596_v39  ;;  %v9761_v43 = vadd.f32 %v527_v60, %v431_v41  ;;  %v434_v44 = vadd.f32 %v6782_v40, %v9724_v62 }
 0x10c   :  { %v622_v45 = vadd.f32 1.0, %v9070_v42 }
 0x10d   :  { %v9072_v46 = vpop.eup %9071  ;;  %v578_v47 = vmin.f32 %v9761_v43, 20.0  ;;  %v9765_v48 = vadd.f32 %v530_v2, %v434_v44  ;;  %v6783_v49 = vpop.f32.mrb[12].mxu0  ;;  %vm722_vm6 = vcmp.gt.f32.partialorder %v9761_v43, 20.0 }
 0x10e   :  { %v638_v50 = vmul.f32 %v622_v45, %v622_v45  ;;  %v623_v51 = vadd.f32 1.0, %v9072_v46  ;;  %v6784_v52 = vpop.f32.mrb[13].mxu0 }
 0x10f   :  { %v598_v53 = vmul.f32 1.442695, %v578_v47  ;;  %v579_v54 = vmin.f32 %v9765_v48, 20.0  ;;  %v6785_v55 = vadd.f32 %v6784_v52, %v6783_v49  ;;  %v6786_v56 = vpop.f32.mrb[14].mxu0  ;;  %vm723_vm7 = vcmp.gt.f32.partialorder %v9765_v48, 20.0 }
 0x110   :  { %v670_v57 = vadd.f32 1.0, %v638_v50  ;;  %v639_v59 = vmul.f32 %v623_v51, %v623_v51  ;;  %v6787_v60 = vpop.f32.mrb[15].mxu0  ;;  %v6264_v38 = vadd.f32 -1.0, %v638_v50 }
 0x111   :  { %9077 = vpow2.f32 %v598_v53  ;;  %v600_v61 = vmul.f32 1.442695, %v579_v54  ;;  %v439_v0 = vadd.f32 %v6785_v55, %v9724_v62  ;;  %v6788_v1 = vadd.f32 %v6787_v60, %v6786_v56 }
 0x112   :  { %9079 = vrcp.f32 %v670_v57  ;;  %v671_v2 = vadd.f32 1.0, %v639_v59  ;;  %v6265_v42 = vadd.f32 -1.0, %v639_v59 }
 0x113   :  { %v9074_v3 = vpop.eup %9073  ;;  %9081 = vpow2.f32 %v600_v61  ;;  %v9770_v4 = vadd.f32 %v9719_v58, %v439_v0  ;;  %v442_v5 = vadd.f32 %v6788_v1, %v9724_v62 }
 0x114   :  { %9083 = vrcp.f32 %v671_v2  ;;  %v624_v7 = vadd.f32 1.0, %v9074_v3 }
 0x115   :  { %v9076_v9 = vpop.eup %9075  ;;  %v580_v11 = vmin.f32 %v9770_v4, 20.0  ;;  %v9775_v13 = vadd.f32 %v9726_v63, %v442_v5  ;;  %v6789_v15 = vpop.f32.mrb[16].mxu0  ;;  %vm724_vm8 = vcmp.gt.f32.partialorder %v9770_v4, 20.0 }
 0x116   :  { %v6790_v16 = vpop.f32.mrb[17].mxu0  ;;  %v640_v17 = vmul.f32 %v624_v7, %v624_v7  ;;  %v625_v18 = vadd.f32 1.0, %v9076_v9 }
 0x117   :  { %v602_v20 = vmul.f32 1.442695, %v580_v11  ;;  %v581_v21 = vmin.f32 %v9775_v13, 20.0  ;;  %v6791_v22 = vadd.f32 %v6790_v16, %v6789_v15  ;;  %v6792_v58 = vpop.f32.mrb[18].mxu0  ;;  %vm725_vm9 = vcmp.gt.f32.partialorder %v9775_v13, 20.0 }
 0x118   :  { %v6793_v23 = vpop.f32.mrb[19].mxu0  ;;  %v672_v25 = vadd.f32 1.0, %v640_v17  ;;  %v641_v27 = vmul.f32 %v625_v18, %v625_v18  ;;  %v6266_v15 = vadd.f32 -1.0, %v640_v17 }
 0x119   :  { %9085 = vpow2.f32 %v602_v20  ;;  %v604_v29 = vmul.f32 1.442695, %v581_v21  ;;  %v6794_v31 = vadd.f32 %v6793_v23, %v6792_v58  ;;  %v447_v33 = vadd.f32 %v6791_v22, %v9724_v62 }
 0x11a   :  { %9087 = vrcp.f32 %v672_v25  ;;  %v673_v63 = vadd.f32 1.0, %v641_v27  ;;  %v6267_v58 = vadd.f32 -1.0, %v641_v27 }
 0x11b   :  { %v9078_v34 = vpop.eup %9077  ;;  %9089 = vpow2.f32 %v604_v29  ;;  %v9780_v35 = vadd.f32 %v9737_v12, %v447_v33  ;;  %v450_v36 = vadd.f32 %v6794_v31, %v9724_v62 }
 0x11c   :  { %v9080_v39 = vpop.eup %9079  ;;  %v626_v40 = vadd.f32 1.0, %v9078_v34  ;;  %9091 = vrcp.f32 %v673_v63 }
 0x11d   :  { %v9082_v41 = vpop.eup %9081  ;;  %v582_v44 = vmin.f32 %v9780_v35, 20.0  ;;  %v9785_v45 = vadd.f32 %v9742_v19, %v450_v36  ;;  %v6795_v46 = vpop.f32.mrb[20].mxu0  ;;  %v702_v47 = vmul.f32 %v9080_v39, %v6264_v38  ;;  %vm726_vm10 = vcmp.gt.f32.partialorder %v9780_v35, 20.0 }
 0x11e   :  { %v9084_v49 = vpop.eup %9083  ;;  %v9787_v51 = vmul.f32 %v626_v40, %v626_v40  ;;  %v627_v12 = vadd.f32 1.0, %v9082_v41  ;;  %v6796_v52 = vpop.f32.mrb[21].mxu0 }
 0x11f   :  { %v703_v50 = vmul.f32 %v9084_v49, %v6265_v42  ;;  %v606_v53 = vmul.f32 1.442695, %v582_v44  ;;  %v583_v54 = vmin.f32 %v9785_v45, 20.0  ;;  %v6797_v55 = vadd.f32 %v6796_v52, %v6795_v46  ;;  %v6798_v56 = vpop.f32.mrb[22].mxu0 }
 0x120   :  { %v674_v19 = vadd.f32 1.0, %v9787_v51  ;;  %v9793_v57 = vmul.f32 %v627_v12, %v627_v12  ;;  %v6799_v59 = vpop.f32.mrb[23].mxu0  ;;  %v734_v60 = vmul.f32 %v702_v47, %v9729_v6  ;;  %v6268_v52 = vadd.f32 -1.0, %v9787_v51 }
 0x121   :  { %v735_v61 = vmul.f32 %v703_v50, %v9735_v10  ;;  %9093 = vpow2.f32 %v606_v53  ;;  %v608_v0 = vmul.f32 1.442695, %v583_v54  ;;  %v455_v1 = vadd.f32 %v6797_v55, %v9724_v62 }
 0x122   :  { %9095 = vrcp.f32 %v674_v19  ;;  %v675_v2 = vadd.f32 1.0, %v9793_v57  ;;  %v6800_v3 = vadd.f32 %v6799_v59, %v6798_v56  ;;  %v750_v5 = vsel %vm718_vm1, %v9729_v6, %v734_v60 }
 0x123   :  { %v9086_v7 = vpop.eup %9085  ;;  %9097 = vpow2.f32 %v608_v0  ;;  %v9803_v9 = vadd.f32 %v9732_v8, %v455_v1  ;;  %7447 = vmatprep.mubr.msk.f32.mxu1 %vm781_vm2, %v750_v5  ;;  %v751_v11 = vsel %vm719_vm3, %v9735_v10, %v735_v61  ;;  %v6269_v1 = vadd.f32 -1.0, %v9793_v57 }
 0x124   :  { %v9088_v16 = vpop.eup %9087  ;;  %9099 = vrcp.f32 %v675_v2  ;;  %v458_v18 = vadd.f32 %v6800_v3, %v9724_v62  ;;  %7448 = vmatmul.mubr.msk.f32.vlgmr.msra.gmra.mrb[16].mxu1 %vm781_vm2, %v751_v11  ;;  %v628_v20 = vadd.f32 1.0, %v9086_v7  ;;  %vm727_vm11 = vcmp.gt.f32.partialorder %v9785_v45, 20.0 }
 0x125   :  { %v9090_v6 = vpop.eup %9089  ;;  %v584_v21 = vmin.f32 %v9803_v9, 20.0  ;;  %v6801_v22 = vpop.f32.mrb[24].mxu0  ;;  %v704_v8 = vmul.f32 %v9088_v16, %v6266_v15  ;;  %vm728_vm12 = vcmp.gt.f32.partialorder %v9803_v9, 20.0 }
 0x126   :  { %v9092_v23 = vpop.eup %9091  ;;  %v9813_v25 = vadd.f32 %v9739_v14, %v458_v18  ;;  %v6802_v29 = vpop.f32.mrb[25].mxu0  ;;  %v9815_v10 = vmul.f32 %v628_v20, %v628_v20  ;;  %v629_v17 = vadd.f32 1.0, %v9090_v6 }
 0x127   :  { %v610_v31 = vmul.f32 1.442695, %v584_v21  ;;  %v6803_v33 = vadd.f32 %v6802_v29, %v6801_v22  ;;  %v6804_v63 = vpop.f32.mrb[26].mxu0  ;;  %v736_v34 = vmul.f32 %v704_v8, %v9745_v24  ;;  %v705_v36 = vmul.f32 %v9092_v23, %v6267_v58 }
 0x128   :  { %v585_v38 = vmin.f32 %v9813_v25, 20.0  ;;  %v6805_v39 = vpop.f32.mrb[27].mxu0  ;;  %v676_v27 = vadd.f32 1.0, %v9815_v10  ;;  %v9821_v40 = vmul.f32 %v629_v17, %v629_v17  ;;  %v6270_v29 = vadd.f32 -1.0, %v9815_v10 }
 0x129   :  { %9101 = vpow2.f32 %v610_v31  ;;  %v6806_v14 = vadd.f32 %v6805_v39, %v6804_v63  ;;  %v463_v41 = vadd.f32 %v6803_v33, %v9724_v62  ;;  %v752_v42 = vsel %vm720_vm4, %v9745_v24, %v736_v34 }
 0x12a   :  { %v612_v44 = vmul.f32 1.442695, %v585_v38  ;;  %7450 = vmatprep.mubr.msk.f32.mxu1 %vm781_vm2, %v752_v42  ;;  %v737_v46 = vmul.f32 %v705_v36, %v9751_v28  ;;  %9103 = vrcp.f32 %v676_v27  ;;  %v677_v50 = vadd.f32 1.0, %v9821_v40 }
 0x12b   :  { %v9094_v47 = vpop.eup %9093  ;;  %v9829_v49 = vadd.f32 %v9753_v30, %v463_v41  ;;  %v466_v12 = vadd.f32 %v6806_v14, %v9724_v62  ;;  %v6271_v34 = vadd.f32 -1.0, %v9821_v40  ;;  %vm729_vm13 = vcmp.gt.f32.partialorder %v9813_v25, 20.0 }
 0x12c   :  { %v9096_v53 = vpop.eup %9095  ;;  %v630_v24 = vadd.f32 1.0, %v9094_v47  ;;  %9105 = vpow2.f32 %v612_v44  ;;  %v753_v54 = vsel %vm721_vm5, %v9751_v28, %v737_v46 }
 0x12d   :  { %v9098_v55 = vpop.eup %9097  ;;  %v586_v56 = vmin.f32 %v9829_v49, 20.0  ;;  %v9837_v19 = vadd.f32 %v9758_v37, %v466_v12  ;;  %7451 = vmatmul.mubr.msk.f32.gmra.mrb[18].mxu1 %vm781_vm2, %v753_v54  ;;  %v6807_v30 = vpop.f32.mrb[28].mxu0  ;;  %v706_v59 = vmul.f32 %v9096_v53, %v6268_v52  ;;  %9107 = vrcp.f32 %v677_v50 }
 0x12e   :  { %v9100_v60 = vpop.eup %9099  ;;  %v646_v51 = vmul.f32 %v630_v24, %v630_v24  ;;  %v631_v61 = vadd.f32 1.0, %v9098_v55  ;;  %v6808_v0 = vpop.f32.mrb[29].mxu0  ;;  %vm730_vm14 = vcmp.gt.f32.partialorder %v9829_v49, 20.0 }
 0x12f   :  { %v614_v28 = vmul.f32 1.442695, %v586_v56  ;;  %v587_v2 = vmin.f32 %v9837_v19, 20.0  ;;  %v6809_v3 = vadd.f32 %v6808_v0, %v6807_v30  ;;  %v6810_v5 = vpop.f32.mrb[30].mxu0  ;;  %v738_v37 = vmul.f32 %v706_v59, %v9761_v43 }
 0x130   :  { %v678_v7 = vadd.f32 1.0, %v646_v51  ;;  %v647_v11 = vmul.f32 %v631_v61, %v631_v61  ;;  %v6811_v15 = vpop.f32.mrb[31].mxu0  ;;  %v707_v16 = vmul.f32 %v9100_v60, %v6269_v1  ;;  %v6272_v47 = vadd.f32 -1.0, %v646_v51 }
 0x131   :  { %9109 = vpow2.f32 %v614_v28  ;;  %v616_v18 = vmul.f32 1.442695, %v587_v2  ;;  %v471_v20 = vadd.f32 %v6809_v3, %v9724_v62  ;;  %v6812_v6 = vadd.f32 %v6811_v15, %v6810_v5 }
 0x132   :  { %9111 = vrcp.f32 %v678_v7  ;;  %v679_v57 = vadd.f32 1.0, %v647_v11  ;;  %v754_v21 = vsel %vm722_vm6, %v9761_v43, %v738_v37  ;;  %v739_v22 = vmul.f32 %v707_v16, %v9765_v48 }
 0x133   :  { %v9102_v8 = vpop.eup %9101  ;;  %9113 = vpow2.f32 %v616_v18  ;;  %v9851_v58 = vadd.f32 %v9748_v26, %v471_v20  ;;  %v474_v23 = vadd.f32 %v6812_v6, %v9724_v62  ;;  %7453 = vmatprep.mubr.msk.f32.mxu1 %vm781_vm2, %v754_v21  ;;  %v6273_v54 = vadd.f32 -1.0, %v647_v11 }
 0x134   :  { %v9104_v17 = vpop.eup %9103  ;;  %9115 = vrcp.f32 %v679_v57  ;;  %v755_v31 = vsel %vm723_vm7, %v9765_v48, %v739_v22  ;;  %v632_v43 = vadd.f32 1.0, %v9102_v8  ;;  %vm731_vm15 = vcmp.gt.f32.partialorder %v9837_v19, 20.0 }
 0x135   :  { %v588_v33 = vmin.f32 %v9851_v58, 20.0  ;;  %v9861_v63 = vadd.f32 %v9755_v32, %v474_v23  ;;  %7454 = vmatmul.mubr.msk.f32.gmra.mrb[20].mxu1 %vm781_vm2, %v755_v31  ;;  %v708_v26 = vmul.f32 %v9104_v17, %v6270_v29  ;;  %vm732_vm1 = vcmp.gt.f32.partialorder %v9851_v58, 20.0 }
 0x136   :  { %v9106_v62 = vpop.eup %9105  ;;  %v648_v36 = vmul.f32 %v632_v43, %v632_v43 }
 0x137   :  { %v9108_v10 = vpop.eup %9107  ;;  %v618_v38 = vmul.f32 1.442695, %v588_v33  ;;  %v589_v39 = vmin.f32 %v9861_v63, 20.0  ;;  %v740_v27 = vmul.f32 %v708_v26, %v9770_v4  ;;  %v633_v48 = vadd.f32 1.0, %v9106_v62 }
 0x138   :  { %v709_v14 = vmul.f32 %v9108_v10, %v6271_v34  ;;  %v680_v41 = vadd.f32 1.0, %v648_v36  ;;  %v6274_v3 = vadd.f32 -1.0, %v648_v36  ;;  %vm733_vm3 = vcmp.gt.f32.partialorder %v9861_v63, 20.0 }
 0x139   :  { %9117 = vpow2.f32 %v618_v38  ;;  %v620_v32 = vmul.f32 1.442695, %v589_v39  ;;  %v756_v42 = vsel %vm724_vm8, %v9770_v4, %v740_v27  ;;  %v649_v44 = vmul.f32 %v633_v48, %v633_v48 }
 0x13a   :  { %7456 = vmatprep.mubr.msk.f32.mxu1 %vm781_vm2, %v756_v42  ;;  %v741_v40 = vmul.f32 %v709_v14, %v9775_v13  ;;  %9119 = vrcp.f32 %v680_v41  ;;  %v1168_v42 = vld [vmem:[%s11817_s3 + $0x8] sm:$0xff] }
 0x13b   :  { %v9110_v46 = vpop.eup %9109  ;;  %9121 = vpow2.f32 %v620_v32  ;;  %v681_v12 = vadd.f32 1.0, %v649_v44  ;;  %v1167_v32 = vld [vmem:[%s11817_s3] sm:$0xff] }
 0x13c   :  { %v9112_v52 = vpop.eup %9111  ;;  %v634_v50 = vadd.f32 1.0, %v9110_v46  ;;  %v757_v53 = vsel %vm725_vm9, %v9775_v13, %v741_v40  ;;  %v1171_v46 = vld [vmem:[%s11817_s3 + $0x20] sm:$0xff] }
 0x13d   :  { %v9114_v24 = vpop.eup %9113  ;;  %7457 = vmatmul.mubr.msk.f32.gmra.mrb[22].mxu1 %vm781_vm2, %v757_v53  ;;  %v710_v4 = vmul.f32 %v9112_v52, %v6272_v47  ;;  %9123 = vrcp.f32 %v681_v12  ;;  %v1172_v47 = vld [vmem:[%s11817_s3 + $0x28] sm:$0xff]  ;;  %v1173_v52 = vld [vmem:[%s11817_s3 + $0x30] sm:$0xff] }
 0x13e   :  { %v9116_v55 = vpop.eup %9115  ;;  %v650_v56 = vmul.f32 %v634_v50, %v634_v50  ;;  %v635_v30 = vadd.f32 1.0, %v9114_v24  ;;  %v8447_v12 = vpack.c.bf16 %v1172_v47, %v1171_v46  ;;  %v1174_v50 = vld [vmem:[%s11817_s3 + $0x38] sm:$0xff]  ;;  %v9933_v24 = vld [vmem:[%s11824_s10] ss:$0 sm:$0xff] }
 0x13f   :  { %v742_v59 = vmul.f32 %v710_v4, %v9780_v35  ;;  %v711_v60 = vmul.f32 %v9116_v55, %v6273_v54  ;;  %v8451_v53 = vpack.c.bf16 %v1174_v50, %v1173_v52 }
 0x140   :  { %v682_v61 = vadd.f32 1.0, %v650_v56  ;;  %v651_v0 = vmul.f32 %v635_v30, %v635_v30  ;;  %v6276_v23 = vadd.f32 -1.0, %v650_v56 }
 0x141   :  { %v758_v51 = vsel %vm726_vm10, %v9780_v35, %v742_v59  ;;  %v743_v13 = vmul.f32 %v711_v60, %v9785_v45  ;;  %v6275_v35 = vadd.f32 -1.0, %v649_v44  ;;  %v8439_v44 = vpack.c.bf16 %v1168_v42, %v1167_v32 }
 0x142   :  { %9125 = vrcp.f32 %v682_v61  ;;  %v683_v1 = vadd.f32 1.0, %v651_v0  ;;  %7459 = vmatprep.mubr.msk.f32.mxu1 %vm781_vm2, %v758_v51  ;;  %v6277_v43 = vadd.f32 -1.0, %v651_v0 }
 0x143   :  { %v9118_v28 = vpop.eup %9117  ;;  %v759_v2 = vsel %vm727_vm11, %v9785_v45, %v743_v13  ;;  %8440 = vmatprep.subr.bf16.mxu1 %v8439_v44 }
 0x144   :  { %v9120_v5 = vpop.eup %9119  ;;  %9127 = vrcp.f32 %v683_v1  ;;  %7460 = vmatmul.mubr.msk.f32.gmra.mrb[24].mxu1 %vm781_vm2, %v759_v2  ;;  %v636_v37 = vadd.f32 1.0, %v9118_v28 }
 0x145   :  { %v9122_v7 = vpop.eup %9121  ;;  %v712_v11 = vmul.f32 %v9120_v5, %v6274_v3  ;;  %8442 = vmatpush3.bf16.msra.mxu1 %v8439_v44 }
 0x146   :  { %v652_v15 = vmul.f32 %v636_v37, %v636_v37  ;;  %v637_v16 = vadd.f32 1.0, %v9122_v7 }
 0x147   :  { %v9124_v18 = vpop.eup %9123  ;;  %v744_v20 = vmul.f32 %v712_v11, %v9803_v9 }
 0x148   :  { %v713_v6 = vmul.f32 %v9124_v18, %v6275_v35  ;;  %v684_v57 = vadd.f32 1.0, %v652_v15  ;;  %v653_v21 = vmul.f32 %v637_v16, %v637_v16  ;;  %v6278_v36 = vadd.f32 -1.0, %v652_v15 }
 0x149   :  { %v760_v45 = vsel %vm728_vm12, %v9803_v9, %v744_v20 }
 0x14a   :  { %7462 = vmatprep.mubr.msk.f32.mxu1 %vm781_vm2, %v760_v45  ;;  %v745_v22 = vmul.f32 %v713_v6, %v9813_v25  ;;  %9129 = vrcp.f32 %v684_v57  ;;  %v685_v8 = vadd.f32 1.0, %v653_v21  ;;  %v6279_v39 = vadd.f32 -1.0, %v653_v21 }
 0x14c   :  { %v9126_v29 = vpop.eup %9125  ;;  %v761_v17 = vsel %vm729_vm13, %v9813_v25, %v745_v22  ;;  %9131 = vrcp.f32 %v685_v8 }
 0x14d   :  { %7463 = vmatmul.mubr.msk.f32.gmra.mrb[26].mxu1 %vm781_vm2, %v761_v17  ;;  %v714_v31 = vmul.f32 %v9126_v29, %v6276_v23 }
 0x14e   :  { %v9128_v33 = vpop.eup %9127 }
 0x14f   :  { %v746_v9 = vmul.f32 %v714_v31, %v9829_v49  ;;  %v715_v26 = vmul.f32 %v9128_v33, %v6277_v43 }
 0x151   :  { %v762_v62 = vsel %vm730_vm14, %v9829_v49, %v746_v9  ;;  %v747_v34 = vmul.f32 %v715_v26, %v9837_v19 }
 0x152   :  { %7465 = vmatprep.mubr.msk.f32.mxu1 %vm781_vm2, %v762_v62 }
 0x153   :  { %v763_v25 = vsel %vm731_vm15, %v9837_v19, %v747_v34 }
 0x154   :  { %v9130_v10 = vpop.eup %9129  ;;  %7466 = vmatmul.mubr.msk.f32.gmra.mrb[28].mxu1 %vm781_vm2, %v763_v25 }
 0x155   :  { %v716_v38 = vmul.f32 %v9130_v10, %v6278_v36 }
 0x156   :  { %v9132_v27 = vpop.eup %9131 }
 0x157   :  { %v748_v48 = vmul.f32 %v716_v38, %v9851_v58  ;;  %v717_v14 = vmul.f32 %v9132_v27, %v6279_v39 }
 0x159   :  { %v764_v49 = vsel %vm732_vm1, %v9851_v58, %v748_v48  ;;  %v749_v41 = vmul.f32 %v717_v14, %v9861_v63  ;;  %v1169_v58 = vld [vmem:[%s11817_s3 + $0x10] sm:$0xff] }
 0x15a   :  { %7468 = vmatprep.mubr.msk.f32.mxu1 %vm781_vm2, %v764_v49 }
 0x15b   :  { %v765_v19 = vsel %vm733_vm3, %v9861_v63, %v749_v41  ;;  %v1170_v63 = vld [vmem:[%s11817_s3 + $0x18] sm:$0xff]  ;;  %s9477_s3 = smov 64  }
 0x15c   :  { %7469 = vmatmul.mubr.msk.f32.gmra.mrb[30].mxu1 %vm781_vm2, %v765_v19  ;;  %v8443_v40 = vpack.c.bf16 %v1170_v63, %v1169_v58 }
 0x15e   :  { %8444 = vmatprep.subr.bf16.mxu1 %v8443_v40 }
 0x15f   :  { %8446 = vmatpush3.bf16.msra.mxu1 %v8443_v40 }
 0x160   :  { %8448 = vmatprep.subr.bf16.mxu1 %v8447_v12 }
 0x163   :  { %8450 = vmatpush3.bf16.msra.mxu1 %v8447_v12 }
 0x164   :  { %8452 = vmatprep.subr.bf16.mxu1 %v8451_v53 }
 0x167   :  { %8454 = vmatpush3.bf16.msra.mxu1 %v8451_v53 }
 0x1f7   :  { %v7449_v4 = vpop.f32.mrb[16].mxu1 }
 0x1f8   :  { %v9936_v54 = vadd.f32 %v7449_v4, %v9933_v24  ;;  %v896_v55 = vpop.f32.mrb[17].mxu1 }
 0x1f9   :  { %v9939_v56 = vadd.f32 %v9933_v24, %v896_v55 }
 0x1fa   :  { %v976_v30 = vmin.f32 %v9936_v54, 20.0  ;;  %vm1120_vm4 = vcmp.gt.f32.partialorder %v9936_v54, 20.0 }
 0x1fb   :  { %v975_v59 = vmin.f32 %v9939_v56, 20.0  ;;  %vm1119_vm5 = vcmp.gt.f32.partialorder %v9939_v56, 20.0 }
 0x1fc   :  { %v993_v60 = vmul.f32 1.442695, %v976_v30 }
 0x1fd   :  { %v991_v61 = vmul.f32 1.442695, %v975_v59 }
 0x1fe   :  { %9133 = vpow2.f32 %v993_v60 }
 0x1ff   :  { %9135 = vpow2.f32 %v991_v61 }
 0x200   :  { %v7452_v0 = vpop.f32.mrb[18].mxu1 }
 0x201   :  { %v9944_v51 = vadd.f32 %v7452_v0, %v9933_v24  ;;  %v906_v13 = vpop.f32.mrb[19].mxu1 }
 0x202   :  { %v9947_v1 = vadd.f32 %v9933_v24, %v906_v13 }
 0x203   :  { %v978_v28 = vmin.f32 %v9944_v51, 20.0  ;;  %vm1122_vm7 = vcmp.gt.f32.partialorder %v9944_v51, 20.0 }
 0x204   :  { %v977_v2 = vmin.f32 %v9947_v1, 20.0  ;;  %vm1121_vm6 = vcmp.gt.f32.partialorder %v9947_v1, 20.0 }
 0x205   :  { %v997_v3 = vmul.f32 1.442695, %v978_v28 }
 0x206   :  { %v995_v5 = vmul.f32 1.442695, %v977_v2 }
 0x207   :  { %9137 = vpow2.f32 %v997_v3 }
 0x208   :  { %v9134_v37 = vpop.eup %9133  ;;  %9139 = vpow2.f32 %v995_v5  ;;  %v7455_v7 = vpop.f32.mrb[20].mxu1 }
 0x209   :  { %v9136_v11 = vpop.eup %9135  ;;  %v1024_v35 = vadd.f32 1.0, %v9134_v37  ;;  %v9952_v15 = vadd.f32 %v7455_v7, %v9933_v24  ;;  %v916_v16 = vpop.f32.mrb[21].mxu1 }
 0x20a   :  { %v1023_v18 = vadd.f32 1.0, %v9136_v11  ;;  %v9955_v20 = vadd.f32 %v9933_v24, %v916_v16 }
 0x20b   :  { %v1040_v6 = vmul.f32 %v1024_v35, %v1024_v35  ;;  %v980_v57 = vmin.f32 %v9952_v15, 20.0  ;;  %vm1124_vm8 = vcmp.gt.f32.partialorder %v9952_v15, 20.0 }
 0x20c   :  { %v979_v21 = vmin.f32 %v9955_v20, 20.0  ;;  %v1039_v45 = vmul.f32 %v1023_v18, %v1023_v18  ;;  %vm1123_vm9 = vcmp.gt.f32.partialorder %v9955_v20, 20.0 }
 0x20d   :  { %v1072_v22 = vadd.f32 1.0, %v1040_v6  ;;  %v1001_v8 = vmul.f32 1.442695, %v980_v57  ;;  %v6298_v41 = vadd.f32 -1.0, %v1040_v6 }
 0x20e   :  { %v999_v23 = vmul.f32 1.442695, %v979_v21  ;;  %v1071_v29 = vadd.f32 1.0, %v1039_v45  ;;  %v6297_v52 = vadd.f32 -1.0, %v1039_v45 }
 0x20f   :  { %9141 = vrcp.f32 %v1072_v22 }
 0x210   :  { %9143 = vpow2.f32 %v1001_v8  ;;  %v7458_v17 = vpop.f32.mrb[22].mxu1 }
 0x211   :  { %v9138_v31 = vpop.eup %9137  ;;  %9145 = vpow2.f32 %v999_v23  ;;  %v9960_v43 = vadd.f32 %v7458_v17, %v9933_v24  ;;  %v926_v33 = vpop.f32.mrb[23].mxu1 }
 0x212   :  { %v9140_v9 = vpop.eup %9139  ;;  %v1026_v26 = vadd.f32 1.0, %v9138_v31  ;;  %v9963_v62 = vadd.f32 %v9933_v24, %v926_v33  ;;  %9147 = vrcp.f32 %v1071_v29 }
 0x213   :  { %v1025_v34 = vadd.f32 1.0, %v9140_v9  ;;  %v982_v25 = vmin.f32 %v9960_v43, 20.0  ;;  %vm1126_vm10 = vcmp.gt.f32.partialorder %v9960_v43, 20.0 }
 0x214   :  { %v1042_v36 = vmul.f32 %v1026_v26, %v1026_v26  ;;  %v981_v10 = vmin.f32 %v9963_v62, 20.0  ;;  %vm1125_vm11 = vcmp.gt.f32.partialorder %v9963_v62, 20.0 }
 0x215   :  { %v1005_v38 = vmul.f32 1.442695, %v982_v25  ;;  %v1041_v39 = vmul.f32 %v1025_v34, %v1025_v34 }
 0x216   :  { %v1074_v27 = vadd.f32 1.0, %v1042_v36  ;;  %v1003_v48 = vmul.f32 1.442695, %v981_v10  ;;  %v6300_v11 = vadd.f32 -1.0, %v1042_v36 }
 0x217   :  { %9149 = vpow2.f32 %v1005_v38  ;;  %v7461_v14 = vpop.f32.mrb[24].mxu1  ;;  %v1073_v49 = vadd.f32 1.0, %v1041_v39  ;;  %v6299_v21 = vadd.f32 -1.0, %v1041_v39 }
 0x218   :  { %9151 = vrcp.f32 %v1074_v27  ;;  %v9968_v19 = vadd.f32 %v7461_v14, %v9933_v24  ;;  %v936_v32 = vpop.f32.mrb[25].mxu1 }
 0x219   :  { %v9142_v42 = vpop.eup %9141  ;;  %9153 = vpow2.f32 %v1003_v48  ;;  %v9971_v44 = vadd.f32 %v9933_v24, %v936_v32 }
 0x21a   :  { %v9144_v58 = vpop.eup %9143  ;;  %v1104_v63 = vmul.f32 %v9142_v42, %v6298_v41  ;;  %v984_v40 = vmin.f32 %v9968_v19, 20.0  ;;  %9155 = vrcp.f32 %v1073_v49  ;;  %vm1128_vm12 = vcmp.gt.f32.partialorder %v9968_v19, 20.0 }
 0x21b   :  { %v9146_v46 = vpop.eup %9145  ;;  %v1028_v47 = vadd.f32 1.0, %v9144_v58  ;;  %v983_v12 = vmin.f32 %v9971_v44, 20.0  ;;  %vm1127_vm13 = vcmp.gt.f32.partialorder %v9971_v44, 20.0 }
 0x21c   :  { %v9148_v50 = vpop.eup %9147  ;;  %v1027_v53 = vadd.f32 1.0, %v9146_v46  ;;  %v1009_v4 = vmul.f32 1.442695, %v984_v40  ;;  %v1136_v60 = vmul.f32 %v1104_v63, %v9936_v54 }
 0x21d   :  { %v1007_v55 = vmul.f32 1.442695, %v983_v12  ;;  %v1103_v30 = vmul.f32 %v9148_v50, %v6297_v52  ;;  %v1044_v59 = vmul.f32 %v1028_v47, %v1028_v47 }
 0x21e   :  { %9157 = vpow2.f32 %v1009_v4  ;;  %v9976_v61 = vmul.f32 %v1027_v53, %v1027_v53  ;;  %v9998_v6 = vsel %vm1120_vm4, %v9936_v54, %v1136_v60 }
 0x21f   :  { %9159 = vpow2.f32 %v1007_v55  ;;  %v1135_v0 = vmul.f32 %v1103_v30, %v9939_v56  ;;  %v1076_v13 = vadd.f32 1.0, %v1044_v59  ;;  %v6302_v39 = vadd.f32 -1.0, %v1044_v59 }
 0x220   :  { %v7464_v28 = vpop.f32.mrb[26].mxu1  ;;  %v1075_v2 = vadd.f32 1.0, %v9976_v61  ;;  %v6301_v40 = vadd.f32 -1.0, %v9976_v61 }
 0x221   :  { %v9150_v3 = vpop.eup %9149  ;;  %v9983_v5 = vadd.f32 %v7464_v28, %v9933_v24  ;;  %v946_v37 = vpop.f32.mrb[27].mxu1  ;;  %v9986_v7 = vsel %vm1119_vm5, %v9939_v56, %v1135_v0  ;;  %9161 = vrcp.f32 %v1076_v13 }
 0x222   :  { %v9152_v35 = vpop.eup %9151  ;;  %v1030_v16 = vadd.f32 1.0, %v9150_v3  ;;  %v9989_v18 = vadd.f32 %v9933_v24, %v946_v37  ;;  %5564 = vrot.lane.b32.xlu0 %v9986_v7, %s9477_s3  ;;  %7487 = vmatprep.mubr.msk.f32.mxu1 %vm781_vm2, %v9986_v7  ;;  %9163 = vrcp.f32 %v1075_v2 }
 0x223   :  { %v9154_v56 = vpop.eup %9153  ;;  %v986_v57 = vmin.f32 %v9983_v5, 20.0  ;;  %7488 = vmatmul.mubr.msk.f32.vlgmr.msra.gmra.mrb[32].mxu1 %vm781_vm2, %v9998_v6  ;;  %v1106_v45 = vmul.f32 %v9152_v35, %v6300_v11  ;;  %vm1130_vm14 = vcmp.gt.f32.partialorder %v9983_v5, 20.0 }
 0x224   :  { %v9156_v22 = vpop.eup %9155  ;;  %v1029_v8 = vadd.f32 1.0, %v9154_v56  ;;  %v985_v23 = vmin.f32 %v9989_v18, 20.0  ;;  %v10004_v29 = vmul.f32 %v1030_v16, %v1030_v16  ;;  %vm1129_vm15 = vcmp.gt.f32.partialorder %v9989_v18, 20.0 }
 0x225   :  { %v1013_v17 = vmul.f32 1.442695, %v986_v57  ;;  %v1105_v31 = vmul.f32 %v9156_v22, %v6299_v21  ;;  %v1138_v54 = vmul.f32 %v1106_v45, %v9944_v51 }
 0x226   :  { %v1011_v33 = vmul.f32 1.442695, %v985_v23  ;;  %5566 = vrot.lane.b32.xlu0 %v9998_v6, %s9477_s3  ;;  %v1078_v9 = vadd.f32 1.0, %v10004_v29  ;;  %v1045_v26 = vmul.f32 %v1029_v8, %v1029_v8 }
 0x227   :  { %9165 = vpow2.f32 %v1013_v17  ;;  %v7467_v34 = vpop.f32.mrb[28].mxu1  ;;  %v1137_v25 = vmul.f32 %v1105_v31, %v9947_v1  ;;  %v10030_v58 = vsel %vm1122_vm7, %v9944_v51, %v1138_v54 }
 0x228   :  { %v9158_v36 = vpop.eup %9157  ;;  %9167 = vpow2.f32 %v1011_v33  ;;  %v10014_v10 = vadd.f32 %v7467_v34, %v9933_v24  ;;  %v956_v38 = vpop.f32.mrb[29].mxu1  ;;  %v1077_v27 = vadd.f32 1.0, %v1045_v26 }
 0x229   :  { %v9160_v48 = vpop.eup %9159  ;;  %v1032_v14 = vadd.f32 1.0, %v9158_v36  ;;  %v10017_v49 = vadd.f32 %v9933_v24, %v956_v38  ;;  %v10020_v41 = vsel %vm1121_vm6, %v9947_v1, %v1137_v25  ;;  %9169 = vrcp.f32 %v1078_v9 }
 0x22a   :  { %v1031_v32 = vadd.f32 1.0, %v9160_v48  ;;  %v988_v42 = vmin.f32 %v10014_v10, 20.0  ;;  %5568 = vrot.lane.b32.xlu1 %v10020_v41, %s9477_s3  ;;  %7490 = vmatprep.mubr.msk.f32.mxu1 %vm781_vm2, %v10020_v41  ;;  %9171 = vrcp.f32 %v1077_v27  ;;  %vm1132_vm1 = vcmp.gt.f32.partialorder %v10014_v10, 20.0 }
 0x22b   :  { %v9162_v63 = vpop.eup %9161  ;;  %v987_v1 = vmin.f32 %v10017_v49, 20.0  ;;  %7491 = vmatmul.mubr.msk.f32.gmra.mrb[34].mxu1 %vm781_vm2, %v10030_v58  ;;  %v1048_v46 = vmul.f32 %v1032_v14, %v1032_v14  ;;  %vm1131_vm3 = vcmp.gt.f32.partialorder %v10017_v49, 20.0 }
 0x22c   :  { %v9164_v47 = vpop.eup %9163  ;;  %v1017_v12 = vmul.f32 1.442695, %v988_v42  ;;  %v1108_v52 = vmul.f32 %v9162_v63, %v6302_v39  ;;  %v1047_v50 = vmul.f32 %v1031_v32, %v1031_v32 }
 0x22d   :  { %v1015_v53 = vmul.f32 1.442695, %v987_v1  ;;  %v1107_v4 = vmul.f32 %v9164_v47, %v6301_v40  ;;  %v1080_v55 = vadd.f32 1.0, %v1048_v46  ;;  %v6306_v38 = vadd.f32 -1.0, %v1048_v46 }
 0x22e   :  { %9173 = vpow2.f32 %v1017_v12  ;;  %5570 = vrot.lane.b32.xlu1 %v10030_v58, %s9477_s3  ;;  %v1140_v51 = vmul.f32 %v1108_v52, %v9952_v15  ;;  %v1079_v30 = vadd.f32 1.0, %v1047_v50 }
 0x22f   :  { %9175 = vpow2.f32 %v1015_v53  ;;  %v7470_v59 = vpop.f32.mrb[30].mxu1  ;;  %v1139_v60 = vmul.f32 %v1107_v4, %v9955_v20 }
 0x230   :  { %v10042_v61 = vadd.f32 %v7470_v59, %v9933_v24  ;;  %v966_v0 = vpop.f32.mrb[31].mxu1  ;;  %v10045_v13 = vsel %vm1124_vm8, %v9952_v15, %v1140_v51  ;;  %9177 = vrcp.f32 %v1080_v55  ;;  %v6304_v15 = vadd.f32 -1.0, %v10004_v29 }
 0x231   :  { %v9166_v28 = vpop.eup %9165  ;;  %v10049_v2 = vadd.f32 %v9933_v24, %v966_v0  ;;  %v10052_v3 = vsel %vm1123_vm9, %v9955_v20, %v1139_v60  ;;  %9179 = vrcp.f32 %v1079_v30  ;;  %v6303_v20 = vadd.f32 -1.0, %v1045_v26 }
 0x232   :  { %v9168_v37 = vpop.eup %9167  ;;  %v1034_v11 = vadd.f32 1.0, %v9166_v28  ;;  %v990_v35 = vmin.f32 %v10042_v61, 20.0  ;;  %5574 = vrot.lane.b32.xlu1 %v10045_v13, %s9477_s3  ;;  %5572 = vrot.lane.b32.xlu0 %v10052_v3, %s9477_s3  ;;  %vm1134_vm4 = vcmp.gt.f32.partialorder %v10042_v61, 20.0 }
 0x233   :  { %v9170_v16 = vpop.eup %9169  ;;  %v1033_v56 = vadd.f32 1.0, %v9168_v37  ;;  %v989_v24 = vmin.f32 %v10049_v2, 20.0  ;;  %7493 = vmatprep.mubr.msk.f32.mxu1 %vm781_vm2, %v10052_v3  ;;  %vm1133_vm5 = vcmp.gt.f32.partialorder %v10049_v2, 20.0 }
 0x234   :  { %v9172_v57 = vpop.eup %9171  ;;  %v1021_v21 = vmul.f32 1.442695, %v990_v35  ;;  %7494 = vmatmul.mubr.msk.f32.gmra.mrb[36].mxu1 %vm781_vm2, %v10045_v13  ;;  %v1110_v45 = vmul.f32 %v9170_v16, %v6304_v15  ;;  %v1050_v22 = vmul.f32 %v1034_v11, %v1034_v11 }
 0x235   :  { %v1019_v8 = vmul.f32 1.442695, %v989_v24  ;;  %v1109_v23 = vmul.f32 %v9172_v57, %v6303_v20  ;;  %v1049_v17 = vmul.f32 %v1033_v56, %v1033_v56 }
 0x236   :  { %9181 = vpow2.f32 %v1021_v21  ;;  %v1142_v29 = vmul.f32 %v1110_v45, %v9960_v43  ;;  %v1082_v31 = vadd.f32 1.0, %v1050_v22 }
 0x237   :  { %9183 = vpow2.f32 %v1019_v8  ;;  %v1141_v33 = vmul.f32 %v1109_v23, %v9963_v62  ;;  %v1081_v54 = vadd.f32 1.0, %v1049_v17  ;;  %v6307_v51 = vadd.f32 -1.0, %v1049_v17 }
 0x238   :  { %v9174_v9 = vpop.eup %9173  ;;  %v10069_v26 = vsel %vm1126_vm10, %v9960_v43, %v1142_v29  ;;  %9185 = vrcp.f32 %v1082_v31  ;;  %v6305_v43 = vadd.f32 -1.0, %v1047_v50 }
 0x239   :  { %v9176_v34 = vpop.eup %9175  ;;  %v1036_v25 = vadd.f32 1.0, %v9174_v9  ;;  %5578 = vrot.lane.b32.xlu1 %v10069_v26, %s9477_s3  ;;  %v10075_v36 = vsel %vm1125_vm11, %v9963_v62, %v1141_v33  ;;  %9187 = vrcp.f32 %v1081_v54 }
 0x23a   :  { %v9178_v39 = vpop.eup %9177  ;;  %v1035_v27 = vadd.f32 1.0, %v9176_v34  ;;  %5576 = vrot.lane.b32.xlu0 %v10075_v36, %s9477_s3  ;;  %7496 = vmatprep.mubr.msk.f32.mxu1 %vm781_vm2, %v10075_v36 }
 0x23b   :  { %v9180_v48 = vpop.eup %9179  ;;  %7497 = vmatmul.mubr.msk.f32.gmra.mrb[38].mxu1 %vm781_vm2, %v10069_v26  ;;  %v1112_v14 = vmul.f32 %v9178_v39, %v6306_v38  ;;  %v1052_v32 = vmul.f32 %v1036_v25, %v1036_v25  ;;  %v10161_v25 = vld [vmem:[%s11825_s11] ss:$0 sm:$0xff] }
 0x23c   :  { %v1111_v42 = vmul.f32 %v9180_v48, %v6305_v43  ;;  %v1051_v62 = vmul.f32 %v1035_v27, %v1035_v27  ;;  %v1567_v48 = vld [vmem:[%s11818_s4] sm:$0xff] }
 0x23d   :  { %v1144_v63 = vmul.f32 %v1112_v14, %v9968_v19  ;;  %v1084_v1 = vadd.f32 1.0, %v1052_v32  ;;  %v6310_v56 = vadd.f32 -1.0, %v1052_v32  ;;  %7543 = vmatprep.mubr.f32.mxu0 %v1567_v48 }
 0x23e   :  { %v1143_v40 = vmul.f32 %v1111_v42, %v9971_v44  ;;  %v1083_v46 = vadd.f32 1.0, %v1051_v62 }
 0x23f   :  { %v10087_v47 = vsel %vm1128_vm12, %v9968_v19, %v1144_v63  ;;  %9189 = vrcp.f32 %v1084_v1  ;;  %v6308_v19 = vadd.f32 -1.0, %v1050_v22 }
 0x240   :  { %v9182_v12 = vpop.eup %9181  ;;  %5582 = vrot.lane.b32.xlu1 %v10087_v47, %s9477_s3  ;;  %v10093_v52 = vsel %vm1127_vm13, %v9971_v44, %v1143_v40  ;;  %9191 = vrcp.f32 %v1083_v46 }
 0x241   :  { %v9184_v50 = vpop.eup %9183  ;;  %v1038_v53 = vadd.f32 1.0, %v9182_v12  ;;  %5580 = vrot.lane.b32.xlu0 %v10093_v52, %s9477_s3  ;;  %7499 = vmatprep.mubr.msk.f32.mxu1 %vm781_vm2, %v10093_v52 }
 0x242   :  { %v9186_v4 = vpop.eup %9185  ;;  %v1037_v55 = vadd.f32 1.0, %v9184_v50  ;;  %7500 = vmatmul.mubr.msk.f32.gmra.mrb[40].mxu1 %vm781_vm2, %v10087_v47 }
 0x243   :  { %v9188_v30 = vpop.eup %9187  ;;  %v1114_v59 = vmul.f32 %v9186_v4, %v6308_v19  ;;  %v1054_v44 = vmul.f32 %v1038_v53, %v1038_v53 }
 0x244   :  { %v1113_v60 = vmul.f32 %v9188_v30, %v6307_v51  ;;  %v1053_v0 = vmul.f32 %v1037_v55, %v1037_v55 }
 0x245   :  { %v1146_v28 = vmul.f32 %v1114_v59, %v9983_v5  ;;  %v1086_v37 = vadd.f32 1.0, %v1054_v44  ;;  %v6312_v23 = vadd.f32 -1.0, %v1054_v44 }
 0x246   :  { %v1145_v11 = vmul.f32 %v1113_v60, %v9989_v18  ;;  %v1085_v35 = vadd.f32 1.0, %v1053_v0 }
 0x247   :  { %v10105_v15 = vsel %vm1130_vm14, %v9983_v5, %v1146_v28  ;;  %9193 = vrcp.f32 %v1086_v37  ;;  %v6309_v5 = vadd.f32 -1.0, %v1051_v62 }
 0x248   :  { %5586 = vrot.lane.b32.xlu1 %v10105_v15, %s9477_s3  ;;  %v10111_v16 = vsel %vm1129_vm15, %v9989_v18, %v1145_v11  ;;  %9195 = vrcp.f32 %v1085_v35 }
 0x249   :  { %v9190_v24 = vpop.eup %9189  ;;  %5584 = vrot.lane.b32.xlu0 %v10111_v16, %s9477_s3  ;;  %7502 = vmatprep.mubr.msk.f32.mxu1 %vm781_vm2, %v10111_v16 }
 0x24a   :  { %v9192_v20 = vpop.eup %9191  ;;  %7503 = vmatmul.mubr.msk.f32.gmra.mrb[42].mxu1 %vm781_vm2, %v10105_v15  ;;  %v1116_v57 = vmul.f32 %v9190_v24, %v6310_v56 }
 0x24b   :  { %v1115_v21 = vmul.f32 %v9192_v20, %v6309_v5 }
 0x24c   :  { %v1148_v45 = vmul.f32 %v1116_v57, %v10014_v10 }
 0x24d   :  { %v1147_v18 = vmul.f32 %v1115_v21, %v10017_v49 }
 0x24e   :  { %v10123_v22 = vsel %vm1132_vm1, %v10014_v10, %v1148_v45  ;;  %v6311_v10 = vadd.f32 -1.0, %v1053_v0 }
 0x24f   :  { %5590 = vrot.lane.b32.xlu1 %v10123_v22, %s9477_s3  ;;  %v10129_v8 = vsel %vm1131_vm3, %v10017_v49, %v1147_v18 }
 0x250   :  { %5588 = vrot.lane.b32.xlu0 %v10129_v8, %s9477_s3  ;;  %7505 = vmatprep.mubr.msk.f32.mxu1 %vm781_vm2, %v10129_v8 }
 0x251   :  { %v9194_v17 = vpop.eup %9193  ;;  %7506 = vmatmul.mubr.msk.f32.gmra.mrb[44].mxu1 %vm781_vm2, %v10123_v22 }
 0x252   :  { %v9196_v29 = vpop.eup %9195  ;;  %v1118_v31 = vmul.f32 %v9194_v17, %v6312_v23 }
 0x253   :  { %v1117_v33 = vmul.f32 %v9196_v29, %v6311_v10 }
 0x254   :  { %v1150_v54 = vmul.f32 %v1118_v31, %v10042_v61 }
 0x255   :  { %v1149_v49 = vmul.f32 %v1117_v33, %v10049_v2 }
 0x256   :  { %v10141_v9 = vsel %vm1134_vm4, %v10042_v61, %v1150_v54  ;;  %v6346_v61 = vld [vmem:[%s11818_s4 + $0x80] sm:$0xff] }
 0x257   :  { %5594 = vrot.lane.b32.xlu1 %v10141_v9, %s9477_s3  ;;  %v10147_v34 = vsel %vm1133_vm5, %v10049_v2, %v1149_v49 }
 0x258   :  { %5592 = vrot.lane.b32.xlu0 %v10147_v34, %s9477_s3  ;;  %7508 = vmatprep.mubr.msk.f32.mxu1 %vm781_vm2, %v10147_v34 }
 0x259   :  { %7509 = vmatmul.mubr.msk.f32.gmra.mrb[46].mxu1 %vm781_vm2, %v10141_v9 }
 0x25a   :  { %7599 = vmatprep.mubr.f32.mxu1 %v6346_v61 }
 0x2f6   :  { %v7489_v2 = vpop.f32.mrb[32].mxu1 }
 0x2f7   :  { %v10164_v38 = vadd.f32 %v7489_v2, %v10161_v25  ;;  %v1296_v39 = vpop.f32.mrb[33].mxu1 }
 0x2f8   :  { %v10167_v27 = vadd.f32 %v10161_v25, %v1296_v39 }
 0x2f9   :  { %v1376_v43 = vmin.f32 %v10164_v38, 20.0  ;;  %vm1520_vm6 = vcmp.gt.f32.partialorder %v10164_v38, 20.0 }
 0x2fa   :  { %v1375_v14 = vmin.f32 %v10167_v27, 20.0  ;;  %vm1519_vm7 = vcmp.gt.f32.partialorder %v10167_v27, 20.0 }
 0x2fb   :  { %v1393_v32 = vmul.f32 1.442695, %v1376_v43 }
 0x2fc   :  { %v1391_v42 = vmul.f32 1.442695, %v1375_v14 }
 0x2fd   :  { %9197 = vpow2.f32 %v1393_v32 }
 0x2fe   :  { %9199 = vpow2.f32 %v1391_v42  ;;  %v7492_v62 = vpop.f32.mrb[34].mxu1 }
 0x2ff   :  { %v10175_v63 = vadd.f32 %v7492_v62, %v10161_v25  ;;  %v1306_v1 = vpop.f32.mrb[35].mxu1 }
 0x300   :  { %v10178_v40 = vadd.f32 %v10161_v25, %v1306_v1 }
 0x301   :  { %v1378_v46 = vmin.f32 %v10175_v63, 20.0  ;;  %vm1522_vm8 = vcmp.gt.f32.partialorder %v10175_v63, 20.0 }
 0x302   :  { %v1377_v12 = vmin.f32 %v10178_v40, 20.0  ;;  %vm1521_vm9 = vcmp.gt.f32.partialorder %v10178_v40, 20.0 }
 0x303   :  { %v1397_v50 = vmul.f32 1.442695, %v1378_v46 }
 0x304   :  { %v1395_v53 = vmul.f32 1.442695, %v1377_v12 }
 0x305   :  { %9201 = vpow2.f32 %v1397_v50 }
 0x306   :  { %9203 = vpow2.f32 %v1395_v53 }
 0x307   :  { %v9198_v19 = vpop.eup %9197  ;;  %v7495_v4 = vpop.f32.mrb[36].mxu1 }
 0x308   :  { %v9200_v55 = vpop.eup %9199  ;;  %v1424_v51 = vadd.f32 1.0, %v9198_v19  ;;  %v10183_v30 = vadd.f32 %v7495_v4, %v10161_v25  ;;  %v1316_v59 = vpop.f32.mrb[37].mxu1 }
 0x309   :  { %v1423_v44 = vadd.f32 1.0, %v9200_v55  ;;  %v10186_v60 = vadd.f32 %v10161_v25, %v1316_v59 }
 0x30a   :  { %v1440_v0 = vmul.f32 %v1424_v51, %v1424_v51  ;;  %v1380_v28 = vmin.f32 %v10183_v30, 20.0  ;;  %vm1524_vm10 = vcmp.gt.f32.partialorder %v10183_v30, 20.0 }
 0x30b   :  { %v1439_v37 = vmul.f32 %v1423_v44, %v1423_v44  ;;  %v1379_v11 = vmin.f32 %v10186_v60, 20.0  ;;  %vm1523_vm11 = vcmp.gt.f32.partialorder %v10186_v60, 20.0 }
 0x30c   :  { %v1472_v35 = vadd.f32 1.0, %v1440_v0  ;;  %v1401_v56 = vmul.f32 1.442695, %v1380_v28  ;;  %v6331_v32 = vadd.f32 -1.0, %v1440_v0 }
 0x30d   :  { %v1471_v24 = vadd.f32 1.0, %v1439_v37  ;;  %v1399_v5 = vmul.f32 1.442695, %v1379_v11  ;;  %v6330_v1 = vadd.f32 -1.0, %v1439_v37 }
 0x30e   :  { %9205 = vrcp.f32 %v1472_v35  ;;  %v7498_v20 = vpop.f32.mrb[38].mxu1 }
 0x30f   :  { %v9202_v57 = vpop.eup %9201  ;;  %9207 = vrcp.f32 %v1471_v24  ;;  %v10191_v21 = vadd.f32 %v7498_v20, %v10161_v25  ;;  %v1326_v45 = vpop.f32.mrb[39].mxu1 }
 0x310   :  { %v9204_v18 = vpop.eup %9203  ;;  %v1426_v23 = vadd.f32 1.0, %v9202_v57  ;;  %9209 = vpow2.f32 %v1401_v56  ;;  %v10194_v17 = vadd.f32 %v10161_v25, %v1326_v45 }
 0x311   :  { %v1425_v10 = vadd.f32 1.0, %v9204_v18  ;;  %9211 = vpow2.f32 %v1399_v5  ;;  %v1382_v29 = vmin.f32 %v10191_v21, 20.0  ;;  %vm1526_vm12 = vcmp.gt.f32.partialorder %v10191_v21, 20.0 }
 0x312   :  { %v1442_v31 = vmul.f32 %v1426_v23, %v1426_v23  ;;  %v1381_v33 = vmin.f32 %v10194_v17, 20.0  ;;  %vm1525_vm13 = vcmp.gt.f32.partialorder %v10194_v17, 20.0 }
 0x313   :  { %v1441_v54 = vmul.f32 %v1425_v10, %v1425_v10  ;;  %v1405_v49 = vmul.f32 1.442695, %v1382_v29 }
 0x314   :  { %v1474_v61 = vadd.f32 1.0, %v1442_v31  ;;  %v1403_v2 = vmul.f32 1.442695, %v1381_v33  ;;  %v6333_v23 = vadd.f32 -1.0, %v1442_v31 }
 0x315   :  { %v1473_v39 = vadd.f32 1.0, %v1441_v54  ;;  %9213 = vpow2.f32 %v1405_v49  ;;  %v7501_v43 = vpop.f32.mrb[40].mxu1  ;;  %v6332_v33 = vadd.f32 -1.0, %v1441_v54 }
 0x316   :  { %9215 = vrcp.f32 %v1474_v61  ;;  %v10199_v48 = vadd.f32 %v7501_v43, %v10161_v25  ;;  %v1336_v14 = vpop.f32.mrb[41].mxu1 }
 0x317   :  { %9217 = vrcp.f32 %v1473_v39  ;;  %v10202_v42 = vadd.f32 %v10161_v25, %v1336_v14 }
 0x318   :  { %v9206_v62 = vpop.eup %9205  ;;  %9219 = vpow2.f32 %v1403_v2  ;;  %v1384_v46 = vmin.f32 %v10199_v48, 20.0  ;;  %vm1528_vm14 = vcmp.gt.f32.partialorder %v10199_v48, 20.0 }
 0x319   :  { %v9208_v12 = vpop.eup %9207  ;;  %v1504_v50 = vmul.f32 %v9206_v62, %v6331_v32  ;;  %v1383_v53 = vmin.f32 %v10202_v42, 20.0  ;;  %vm1527_vm15 = vcmp.gt.f32.partialorder %v10202_v42, 20.0 }
 0x31a   :  { %v9210_v19 = vpop.eup %9209  ;;  %v1503_v4 = vmul.f32 %v9208_v12, %v6330_v1  ;;  %v1409_v55 = vmul.f32 1.442695, %v1384_v46 }
 0x31b   :  { %v9212_v51 = vpop.eup %9211  ;;  %v1536_v59 = vmul.f32 %v1504_v50, %v10164_v38  ;;  %v1428_v44 = vadd.f32 1.0, %v9210_v19  ;;  %v1407_v0 = vmul.f32 1.442695, %v1383_v53 }
 0x31c   :  { %v1535_v28 = vmul.f32 %v1503_v4, %v10167_v27  ;;  %v1427_v37 = vadd.f32 1.0, %v9212_v51  ;;  %9221 = vpow2.f32 %v1409_v55 }
 0x31d   :  { %v1552_v11 = vsel %vm1520_vm6, %v10164_v38, %v1536_v59  ;;  %v1444_v35 = vmul.f32 %v1428_v44, %v1428_v44  ;;  %9223 = vpow2.f32 %v1407_v0  ;;  %v7504_v56 = vpop.f32.mrb[42].mxu1 }
 0x31e   :  { %v1551_v24 = vsel %vm1519_vm7, %v10167_v27, %v1535_v28  ;;  %v1443_v5 = vmul.f32 %v1427_v37, %v1427_v37  ;;  %v10213_v20 = vadd.f32 %v7504_v56, %v10161_v25  ;;  %v1346_v57 = vpop.f32.mrb[43].mxu1 }
 0x31f   :  { %v9214_v45 = vpop.eup %9213  ;;  %v10215_v18 = vpack.c.bf16 %v1552_v11, %v1551_v24  ;;  %v1476_v10 = vadd.f32 1.0, %v1444_v35  ;;  %v10218_v29 = vadd.f32 %v10161_v25, %v1346_v57 }
 0x320   :  { %v9216_v38 = vpop.eup %9215  ;;  %v1475_v49 = vadd.f32 1.0, %v1443_v5  ;;  %v1430_v61 = vadd.f32 1.0, %v9214_v45  ;;  %v1386_v2 = vmin.f32 %v10213_v20, 20.0  ;;  %vm1530_vm1 = vcmp.gt.f32.partialorder %v10213_v20, 20.0 }
 0x321   :  { %v9218_v27 = vpop.eup %9217  ;;  %v1506_v39 = vmul.f32 %v9216_v38, %v6333_v23  ;;  %9225 = vrcp.f32 %v1476_v10  ;;  %v1385_v43 = vmin.f32 %v10218_v29, 20.0  ;;  %8456 = vmatprep.subr.bf16.mxu0 %v10215_v18  ;;  %8488 = vmatprep.subr.bf16.mxu1 %v10215_v18  ;;  %vm1529_vm3 = vcmp.gt.f32.partialorder %v10218_v29, 20.0 }
 0x322   :  { %v9220_v31 = vpop.eup %9219  ;;  %v1505_v14 = vmul.f32 %v9218_v27, %v6332_v33  ;;  %9227 = vrcp.f32 %v1475_v49  ;;  %v1446_v32 = vmul.f32 %v1430_v61, %v1430_v61  ;;  %v1413_v62 = vmul.f32 1.442695, %v1386_v2  ;;  %8458 = vmatpush3.bf16.msra.mxu0 %v10215_v18  ;;  %8490 = vmatpush3.bf16.msra.mxu1 %v10215_v18 }
 0x323   :  { %v1538_v54 = vmul.f32 %v1506_v39, %v10175_v63  ;;  %v1429_v1 = vadd.f32 1.0, %v9220_v31  ;;  %v1411_v46 = vmul.f32 1.442695, %v1385_v43  ;;  %v6334_v33 = vadd.f32 -1.0, %v1443_v5 }
 0x324   :  { %v1537_v12 = vmul.f32 %v1505_v14, %v10178_v40  ;;  %v1478_v50 = vadd.f32 1.0, %v1446_v32  ;;  %9229 = vpow2.f32 %v1413_v62  ;;  %v7507_v53 = vpop.f32.mrb[44].mxu1 }
 0x325   :  { %v1554_v19 = vsel %vm1522_vm8, %v10175_v63, %v1538_v54  ;;  %v1445_v4 = vmul.f32 %v1429_v1, %v1429_v1  ;;  %9231 = vpow2.f32 %v1411_v46  ;;  %v10232_v55 = vadd.f32 %v7507_v53, %v10161_v25  ;;  %v1356_v51 = vpop.f32.mrb[45].mxu1 }
 0x326   :  { %v9222_v59 = vpop.eup %9221  ;;  %v1553_v44 = vsel %vm1521_vm9, %v10178_v40, %v1537_v12  ;;  %9233 = vrcp.f32 %v1478_v50  ;;  %v10236_v0 = vadd.f32 %v10161_v25, %v1356_v51  ;;  %v6335_v40 = vadd.f32 -1.0, %v1444_v35 }
 0x327   :  { %v9224_v28 = vpop.eup %9223  ;;  %v10238_v37 = vpack.c.bf16 %v1554_v19, %v1553_v44  ;;  %v1477_v11 = vadd.f32 1.0, %v1445_v4  ;;  %v1432_v56 = vadd.f32 1.0, %v9222_v59  ;;  %v1388_v63 = vmin.f32 %v10232_v55, 20.0 }
 0x328   :  { %v1431_v24 = vadd.f32 1.0, %v9224_v28  ;;  %v1387_v57 = vmin.f32 %v10236_v0, 20.0  ;;  %v6337_v1 = vadd.f32 -1.0, %v1446_v32  ;;  %vm1532_vm4 = vcmp.gt.f32.partialorder %v10232_v55, 20.0 }
 0x329   :  { %9235 = vrcp.f32 %v1477_v11  ;;  %v1448_v45 = vmul.f32 %v1432_v56, %v1432_v56  ;;  %8460 = vmatprep.subr.bf16.mxu0 %v10238_v37  ;;  %8492 = vmatprep.subr.bf16.mxu1 %v10238_v37  ;;  %v1417_v10 = vmul.f32 1.442695, %v1388_v63  ;;  %vm1531_vm5 = vcmp.gt.f32.partialorder %v10236_v0, 20.0 }
 0x32a   :  { %v1447_v23 = vmul.f32 %v1431_v24, %v1431_v24  ;;  %8462 = vmatpush3.bf16.msra.mxu0 %v10238_v37  ;;  %8494 = vmatpush3.bf16.msra.mxu1 %v10238_v37  ;;  %v1415_v61 = vmul.f32 1.442695, %v1387_v57  ;;  %v6336_v24 = vadd.f32 -1.0, %v1445_v4 }
 0x32b   :  { %v9226_v38 = vpop.eup %9225  ;;  %v1480_v49 = vadd.f32 1.0, %v1448_v45  ;;  %9237 = vpow2.f32 %v1417_v10 }
 0x32c   :  { %v9228_v2 = vpop.eup %9227  ;;  %v1508_v27 = vmul.f32 %v9226_v38, %v6335_v40  ;;  %v1479_v39 = vadd.f32 1.0, %v1447_v23  ;;  %v7510_v43 = vpop.f32.mrb[46].mxu1 }
 0x32d   :  { %v1507_v31 = vmul.f32 %v9228_v2, %v6334_v33  ;;  %9239 = vrcp.f32 %v1480_v49  ;;  %v10248_v35 = vadd.f32 %v7510_v43, %v10161_v25  ;;  %v1366_v14 = vpop.f32.mrb[47].mxu1 }
 0x32e   :  { %v9230_v62 = vpop.eup %9229  ;;  %v1540_v54 = vmul.f32 %v1508_v27, %v10183_v30  ;;  %9241 = vrcp.f32 %v1479_v39  ;;  %v10252_v5 = vadd.f32 %v10161_v25, %v1366_v14  ;;  %v6338_v27 = vadd.f32 -1.0, %v1447_v23 }
 0x32f   :  { %v9232_v46 = vpop.eup %9231  ;;  %v1539_v12 = vmul.f32 %v1507_v31, %v10186_v60  ;;  %v1434_v50 = vadd.f32 1.0, %v9230_v62  ;;  %9243 = vpow2.f32 %v1415_v61  ;;  %v1390_v53 = vmin.f32 %v10248_v35, 20.0 }
 0x330   :  { %v9234_v19 = vpop.eup %9233  ;;  %v1556_v51 = vsel %vm1524_vm10, %v10183_v30, %v1540_v54  ;;  %v1433_v59 = vadd.f32 1.0, %v9232_v46  ;;  %v1389_v32 = vmin.f32 %v10252_v5, 20.0  ;;  %v6339_v61 = vadd.f32 -1.0, %v1448_v45 }
 0x331   :  { %v1555_v25 = vsel %vm1523_vm11, %v10186_v60, %v1539_v12  ;;  %v1510_v44 = vmul.f32 %v9234_v19, %v6337_v1  ;;  %v1450_v28 = vmul.f32 %v1434_v50, %v1434_v50  ;;  %v1421_v11 = vmul.f32 1.442695, %v1390_v53 }
 0x332   :  { %v10262_v56 = vpack.c.bf16 %v1556_v51, %v1555_v25  ;;  %v1449_v63 = vmul.f32 %v1433_v59, %v1433_v59  ;;  %v1419_v57 = vmul.f32 1.442695, %v1389_v32  ;;  %vm1534_vm6 = vcmp.gt.f32.partialorder %v10248_v35, 20.0 }
 0x333   :  { %v9236_v40 = vpop.eup %9235  ;;  %v1542_v10 = vmul.f32 %v1510_v44, %v10191_v21  ;;  %v1482_v38 = vadd.f32 1.0, %v1450_v28  ;;  %9245 = vpow2.f32 %v1421_v11  ;;  %v6341_v32 = vadd.f32 -1.0, %v1450_v28 }
 0x334   :  { %v1509_v30 = vmul.f32 %v9236_v40, %v6336_v24  ;;  %v1481_v33 = vadd.f32 1.0, %v1449_v63  ;;  %9247 = vpow2.f32 %v1419_v57  ;;  %8464 = vmatprep.subr.bf16.mxu0 %v10262_v56  ;;  %8496 = vmatprep.subr.bf16.mxu1 %v10262_v56  ;;  %v6340_v24 = vadd.f32 -1.0, %v1449_v63 }
 0x335   :  { %9249 = vrcp.f32 %v1482_v38  ;;  %8466 = vmatpush3.bf16.msra.mxu0 %v10262_v56  ;;  %8498 = vmatpush3.bf16.msra.mxu1 %v10262_v56  ;;  %v9238_v60 = vpop.eup %9237  ;;  %v1558_v4 = vsel %vm1526_vm12, %v10191_v21, %v1542_v10  ;;  %vm1533_vm7 = vcmp.gt.f32.partialorder %v10252_v5, 20.0 }
 0x336   :  { %v1541_v49 = vmul.f32 %v1509_v30, %v10194_v17  ;;  %9251 = vrcp.f32 %v1481_v33  ;;  %v1436_v39 = vadd.f32 1.0, %v9238_v60 }
 0x337   :  { %v9240_v2 = vpop.eup %9239 }
 0x338   :  { %v9242_v43 = vpop.eup %9241  ;;  %v1557_v31 = vsel %vm1525_vm13, %v10194_v17, %v1541_v49  ;;  %v1512_v14 = vmul.f32 %v9240_v2, %v6339_v61  ;;  %v1452_v46 = vmul.f32 %v1436_v39, %v1436_v39 }
 0x339   :  { %v9244_v62 = vpop.eup %9243  ;;  %v10274_v54 = vpack.c.bf16 %v1558_v4, %v1557_v31  ;;  %v1511_v1 = vmul.f32 %v9242_v43, %v6338_v27 }
 0x33a   :  { %v1544_v21 = vmul.f32 %v1512_v14, %v10199_v48  ;;  %v1435_v12 = vadd.f32 1.0, %v9244_v62  ;;  %v1484_v50 = vadd.f32 1.0, %v1452_v46  ;;  %v6343_v61 = vadd.f32 -1.0, %v1452_v46 }
 0x33b   :  { %v1543_v45 = vmul.f32 %v1511_v1, %v10202_v42  ;;  %8468 = vmatprep.subr.bf16.mxu0 %v10274_v54  ;;  %8500 = vmatprep.subr.bf16.mxu1 %v10274_v54 }
 0x33c   :  { %v1560_v17 = vsel %vm1528_vm14, %v10199_v48, %v1544_v21  ;;  %v1451_v23 = vmul.f32 %v1435_v12, %v1435_v12  ;;  %8470 = vmatpush3.bf16.msra.mxu0 %v10274_v54  ;;  %8502 = vmatpush3.bf16.msra.mxu1 %v10274_v54  ;;  %9253 = vrcp.f32 %v1484_v50 }
 0x33d   :  { %v9246_v53 = vpop.eup %9245  ;;  %v1559_v19 = vsel %vm1527_vm15, %v10202_v42, %v1543_v45 }
 0x33e   :  { %v9248_v51 = vpop.eup %9247  ;;  %v10286_v59 = vpack.c.bf16 %v1560_v17, %v1559_v19  ;;  %v1483_v25 = vadd.f32 1.0, %v1451_v23  ;;  %v1438_v44 = vadd.f32 1.0, %v9246_v53  ;;  %v6342_v39 = vadd.f32 -1.0, %v1451_v23 }
 0x33f   :  { %v9250_v11 = vpop.eup %9249  ;;  %v1437_v48 = vadd.f32 1.0, %v9248_v51  ;;  %v1568_v51 = vld [vmem:[%s11818_s4 + $0x8] sm:$0xff] }
 0x340   :  { %v9252_v57 = vpop.eup %9251  ;;  %v1514_v40 = vmul.f32 %v9250_v11, %v6341_v32  ;;  %9255 = vrcp.f32 %v1483_v25  ;;  %v1454_v10 = vmul.f32 %v1438_v44, %v1438_v44  ;;  %8472 = vmatprep.subr.bf16.mxu0 %v10286_v59  ;;  %8504 = vmatprep.subr.bf16.mxu1 %v10286_v59  ;;  %v1569_v32 = vld [vmem:[%s11818_s4 + $0x10] sm:$0xff]  ;;  %v6349_v25 = vld [vmem:[%s11818_s4 + $0x98] sm:$0xff]  ;;  %v6350_v11 = vld [vmem:[%s11818_s4 + $0xa0] sm:$0xff] }
 0x341   :  { %v1513_v38 = vmul.f32 %v9252_v57, %v6340_v24  ;;  %v1453_v42 = vmul.f32 %v1437_v48, %v1437_v48  ;;  %8474 = vmatpush3.bf16.msra.mxu0 %v10286_v59  ;;  %8506 = vmatpush3.bf16.msra.mxu1 %v10286_v59  ;;  %v1570_v44 = vld [vmem:[%s11818_s4 + $0x18] sm:$0xff]  ;;  %v1571_v24 = vld [vmem:[%s11818_s4 + $0x20] sm:$0xff]  ;;  %v6351_v48 = vld [vmem:[%s11818_s4 + $0xa8] sm:$0xff] }
 0x342   :  { %v1546_v28 = vmul.f32 %v1514_v40, %v10213_v20  ;;  %v1486_v30 = vadd.f32 1.0, %v1454_v10  ;;  %v6345_v62 = vadd.f32 -1.0, %v1454_v10  ;;  %v1572_v57 = vld [vmem:[%s11818_s4 + $0x28] sm:$0xff]  ;;  %v6352_v40 = vld [vmem:[%s11818_s4 + $0xb0] sm:$0xff] }
 0x343   :  { %v1545_v63 = vmul.f32 %v1513_v38, %v10218_v29  ;;  %v1485_v33 = vadd.f32 1.0, %v1453_v42  ;;  %v6344_v46 = vadd.f32 -1.0, %v1453_v42  ;;  %v1573_v10 = vld [vmem:[%s11818_s4 + $0x30] sm:$0xff]  ;;  %v6353_v38 = vld [vmem:[%s11818_s4 + $0xb8] sm:$0xff] }
 0x344   :  { %v1562_v60 = vsel %vm1530_vm1, %v10213_v20, %v1546_v28  ;;  %9257 = vrcp.f32 %v1486_v30  ;;  %v1574_v42 = vld [vmem:[%s11818_s4 + $0x38] sm:$0xff]  ;;  %v6354_v28 = vld [vmem:[%s11818_s4 + $0xc0] sm:$0xff] }
 0x345   :  { %v1561_v4 = vsel %vm1529_vm3, %v10218_v29, %v1545_v63  ;;  %9259 = vrcp.f32 %v1485_v33  ;;  %v1575_v30 = vld [vmem:[%s11818_s4 + $0x40] sm:$0xff]  ;;  %v6355_v63 = vld [vmem:[%s11818_s4 + $0xc8] sm:$0xff] }
 0x346   :  { %v10298_v49 = vpack.c.bf16 %v1562_v60, %v1561_v4  ;;  %v9254_v2 = vpop.eup %9253  ;;  %v1576_v33 = vld [vmem:[%s11818_s4 + $0x48] sm:$0xff]  ;;  %v6356_v60 = vld [vmem:[%s11818_s4 + $0xd0] sm:$0xff] }
 0x347   :  { %v1516_v27 = vmul.f32 %v9254_v2, %v6343_v61  ;;  %v1577_v4 = vld [vmem:[%s11818_s4 + $0x50] sm:$0xff]  ;;  %v6357_v61 = vld [vmem:[%s11818_s4 + $0xd8] sm:$0xff] }
 0x348   :  { %8476 = vmatprep.subr.bf16.mxu0 %v10298_v49  ;;  %8508 = vmatprep.subr.bf16.mxu1 %v10298_v49  ;;  %v1578_v2 = vld [vmem:[%s11818_s4 + $0x58] sm:$0xff] }
 0x349   :  { %8478 = vmatpush3.bf16.msra.mxu0 %v10298_v49  ;;  %8510 = vmatpush3.bf16.msra.mxu1 %v10298_v49  ;;  %v1548_v43 = vmul.f32 %v1516_v27, %v10232_v55  ;;  %v6358_v27 = vld [vmem:[%s11818_s4 + $0xe0] sm:$0xff] }
 0x34a   :  { %v9256_v20 = vpop.eup %9255 }
 0x34b   :  { %v1515_v31 = vmul.f32 %v9256_v20, %v6342_v39  ;;  %v1564_v29 = vsel %vm1532_vm4, %v10232_v55, %v1548_v43  ;;  %v1579_v39 = vld [vmem:[%s11818_s4 + $0x60] sm:$0xff]  ;;  %v6359_v20 = vld [vmem:[%s11818_s4 + $0xe8] sm:$0xff] }
 0x34c   :  { %v1580_v43 = vld [vmem:[%s11818_s4 + $0x68] sm:$0xff] }
 0x34d   :  { %v1547_v14 = vmul.f32 %v1515_v31, %v10236_v0  ;;  %v6360_v31 = vld [vmem:[%s11818_s4 + $0xf0] sm:$0xff] }
 0x34e   :  { %v9258_v1 = vpop.eup %9257 }
 0x34f   :  { %v9260_v21 = vpop.eup %9259  ;;  %v1563_v12 = vsel %vm1531_vm5, %v10236_v0, %v1547_v14  ;;  %v1518_v45 = vmul.f32 %v9258_v1, %v6345_v62  ;;  %v6361_v14 = vld [vmem:[%s11818_s4 + $0xf8] sm:$0xff]  ;;  %v6398_v1 = vld [vmem:[%s11818_s4 + $0x100] sm:$0xff] }
 0x350   :  { %v10310_v50 = vpack.c.bf16 %v1564_v29, %v1563_v12  ;;  %v1517_v17 = vmul.f32 %v9260_v21, %v6344_v46  ;;  %v1581_v29 = vld [vmem:[%s11818_s4 + $0x70] sm:$0xff]  ;;  %v1582_v62 = vld [vmem:[%s11818_s4 + $0x78] sm:$0xff]  ;;  %v6399_v46 = vld [vmem:[%s11818_s4 + $0x108] sm:$0xff] }
 0x351   :  { %v1550_v23 = vmul.f32 %v1518_v45, %v10248_v35  ;;  %v6400_v21 = vld [vmem:[%s11818_s4 + $0x110] sm:$0xff]  ;;  %v6401_v12 = vld [vmem:[%s11818_s4 + $0x118] sm:$0xff]  ;;  %v6402_v45 = vld [vmem:[%s11818_s4 + $0x120] sm:$0xff] }
 0x352   :  { %v1549_v55 = vmul.f32 %v1517_v17, %v10252_v5  ;;  %8480 = vmatprep.subr.bf16.mxu0 %v10310_v50  ;;  %8512 = vmatprep.subr.bf16.mxu1 %v10310_v50  ;;  %v6403_v17 = vld [vmem:[%s11818_s4 + $0x128] sm:$0xff] }
 0x353   :  { %v1566_v53 = vsel %vm1534_vm6, %v10248_v35, %v1550_v23  ;;  %8482 = vmatpush3.bf16.msra.mxu0 %v10310_v50  ;;  %8514 = vmatpush3.bf16.msra.mxu1 %v10310_v50  ;;  %v6347_v35 = vld [vmem:[%s11818_s4 + $0x88] sm:$0xff]  ;;  %v6404_v23 = vld [vmem:[%s11818_s4 + $0x130] sm:$0xff] }
 0x354   :  { %v1565_v0 = vsel %vm1533_vm7, %v10252_v5, %v1549_v55  ;;  %v6348_v5 = vld [vmem:[%s11818_s4 + $0x90] sm:$0xff]  ;;  %v6405_v55 = vld [vmem:[%s11818_s4 + $0x138] sm:$0xff] }
 0x355   :  { %v10322_v19 = vpack.c.bf16 %v1566_v53, %v1565_v0  ;;  %v6406_v53 = vld [vmem:[%s11818_s4 + $0x140] sm:$0xff]  ;;  %v6407_v0 = vld [vmem:[%s11818_s4 + $0x148] sm:$0xff] }
 0x357   :  { %8484 = vmatprep.subr.bf16.mxu0 %v10322_v19  ;;  %8516 = vmatprep.subr.bf16.mxu1 %v10322_v19 }
 0x358   :  { %8486 = vmatpush3.bf16.msra.mxu0 %v10322_v19  ;;  %8518 = vmatpush3.bf16.msra.mxu1 %v10322_v19 }
 0x359   :  { %8536 = vmatprep.subr.bf16.mxu1 %v10215_v18 }
 0x35b   :  { %7600 = vmatmul.mubr.f32.vlgmr.msra.gmra.mrb[48].mxu1 %v6347_v35  ;;  %7544 = vmatmul.mubr.f32.vlgmr.msra.gmra.mrb[32].mxu0 %v1568_v51  ;;  %v6408_v35 = vld [vmem:[%s11818_s4 + $0x150] sm:$0xff]  ;;  %v6409_v51 = vld [vmem:[%s11818_s4 + $0x158] sm:$0xff] }
 0x35c   :  { %8538 = vmatpush3.bf16.msra.mxu1 %v10215_v18  ;;  %7602 = vmatprep.mubr.f32.mxu1 %v6348_v5  ;;  %v6410_v5 = vld [vmem:[%s11818_s4 + $0x160] sm:$0xff] }
 0x35d   :  { %8540 = vmatprep.subr.bf16.mxu1 %v10238_v37  ;;  %7546 = vmatprep.mubr.f32.mxu0 %v1569_v32  ;;  %v6411_v32 = vld [vmem:[%s11818_s4 + $0x168] sm:$0xff] }
 0x35f   :  { %7603 = vmatmul.mubr.f32.gmra.mrb[50].mxu1 %v6349_v25  ;;  %7547 = vmatmul.mubr.f32.gmra.mrb[34].mxu0 %v1570_v44  ;;  %v6362_v25 = vld [vmem:[%s11819_s5 + $0x20] sm:$0xff]  ;;  %v6363_v44 = vld [vmem:[%s11819_s5 + $0x28] sm:$0xff] }
 0x360   :  { %8542 = vmatpush3.bf16.msra.mxu1 %v10238_v37  ;;  %7605 = vmatprep.mubr.f32.mxu1 %v6350_v11  ;;  %v6412_v11 = vld [vmem:[%s11818_s4 + $0x170] sm:$0xff] }
 0x361   :  { %8544 = vmatprep.subr.bf16.mxu1 %v10262_v56  ;;  %7549 = vmatprep.mubr.f32.mxu0 %v1571_v24  ;;  %v8519_v24 = vpack.c.bf16 %v6363_v44, %v6362_v25  ;;  %v6483_v25 = vld [vmem:[%s11818_s4 + $0x268] sm:$0xff]  ;;  %v6484_v44 = vld [vmem:[%s11818_s4 + $0x270] sm:$0xff] }
 0x363   :  { %7606 = vmatmul.mubr.f32.gmra.mrb[52].mxu1 %v6351_v48  ;;  %7550 = vmatmul.mubr.f32.gmra.mrb[36].mxu0 %v1572_v57  ;;  %v6413_v48 = vld [vmem:[%s11818_s4 + $0x178] sm:$0xff]  ;;  %v6434_v57 = vld [vmem:[%s11818_s4 + $0x180] sm:$0xff] }
 0x364   :  { %8546 = vmatpush3.bf16.msra.mxu1 %v10262_v56  ;;  %7608 = vmatprep.mubr.f32.mxu1 %v6352_v40  ;;  %v6435_v40 = vld [vmem:[%s11818_s4 + $0x188] sm:$0xff] }
 0x365   :  { %8548 = vmatprep.subr.bf16.mxu1 %v10274_v54  ;;  %7552 = vmatprep.mubr.f32.mxu0 %v1573_v10  ;;  %v6436_v10 = vld [vmem:[%s11818_s4 + $0x190] sm:$0xff] }
 0x366   :  { %8520 = vmatprep.subr.bf16.mxu0 %v8519_v24 }
 0x367   :  { %7609 = vmatmul.mubr.f32.gmra.mrb[54].mxu1 %v6353_v38  ;;  %7553 = vmatmul.mubr.f32.gmra.mrb[38].mxu0 %v1574_v42  ;;  %v6437_v38 = vld [vmem:[%s11818_s4 + $0x198] sm:$0xff]  ;;  %v6438_v42 = vld [vmem:[%s11818_s4 + $0x1a0] sm:$0xff] }
 0x368   :  { %8550 = vmatpush3.bf16.msra.mxu1 %v10274_v54  ;;  %7611 = vmatprep.mubr.f32.mxu1 %v6354_v28  ;;  %v6439_v28 = vld [vmem:[%s11818_s4 + $0x1a8] sm:$0xff] }
 0x369   :  { %8552 = vmatprep.subr.bf16.mxu1 %v10286_v59  ;;  %7555 = vmatprep.mubr.f32.mxu0 %v1575_v30  ;;  %v6364_v30 = vld [vmem:[%s11819_s5 + $0x30] sm:$0xff] }
 0x36a   :  { %8522 = vmatpush3.bf16.msra.mxu0 %v8519_v24  ;;  %v6506_v24 = vld [vmem:[%s11818_s4 + $0x280] sm:$0xff] }
 0x36b   :  { %7612 = vmatmul.mubr.f32.gmra.mrb[56].mxu1 %v6355_v63  ;;  %7556 = vmatmul.mubr.f32.gmra.mrb[40].mxu0 %v1576_v33  ;;  %v6365_v63 = vld [vmem:[%s11819_s5 + $0x38] sm:$0xff]  ;;  %v6440_v33 = vld [vmem:[%s11818_s4 + $0x1b0] sm:$0xff] }
 0x36c   :  { %8554 = vmatpush3.bf16.msra.mxu1 %v10286_v59  ;;  %7614 = vmatprep.mubr.f32.mxu1 %v6356_v60  ;;  %v8523_v60 = vpack.c.bf16 %v6365_v63, %v6364_v30  ;;  %v6514_v30 = vld [vmem:[%s11818_s4 + $0x2c0] sm:$0xff]  ;;  %v6515_v63 = vld [vmem:[%s11818_s4 + $0x2c8] sm:$0xff] }
 0x36d   :  { %8556 = vmatprep.subr.bf16.mxu1 %v10298_v49  ;;  %7558 = vmatprep.mubr.f32.mxu0 %v1577_v4  ;;  %v6441_v4 = vld [vmem:[%s11818_s4 + $0x1b8] sm:$0xff] }
 0x36e   :  { %8524 = vmatprep.subr.bf16.mxu0 %v8523_v60 }
 0x36f   :  { %7615 = vmatmul.mubr.f32.gmra.mrb[58].mxu1 %v6357_v61  ;;  %7559 = vmatmul.mubr.f32.gmra.mrb[42].mxu0 %v1578_v2  ;;  %v6442_v61 = vld [vmem:[%s11818_s4 + $0x1c0] sm:$0xff]  ;;  %v6443_v2 = vld [vmem:[%s11818_s4 + $0x1c8] sm:$0xff] }
 0x370   :  { %8558 = vmatpush3.bf16.msra.mxu1 %v10298_v49  ;;  %7617 = vmatprep.mubr.f32.mxu1 %v6358_v27  ;;  %v6444_v27 = vld [vmem:[%s11818_s4 + $0x1d0] sm:$0xff] }
 0x371   :  { %8560 = vmatprep.subr.bf16.mxu1 %v10310_v50  ;;  %7561 = vmatprep.mubr.f32.mxu0 %v1579_v39  ;;  %v6445_v39 = vld [vmem:[%s11818_s4 + $0x1d8] sm:$0xff] }
 0x372   :  { %8526 = vmatpush3.bf16.msra.mxu0 %v8523_v60  ;;  %v6517_v60 = vld [vmem:[%s11818_s4 + $0x2d8] sm:$0xff] }
 0x373   :  { %7618 = vmatmul.mubr.f32.gmra.mrb[60].mxu1 %v6359_v20  ;;  %7562 = vmatmul.mubr.f32.gmra.mrb[44].mxu0 %v1580_v43  ;;  %v6446_v20 = vld [vmem:[%s11818_s4 + $0x1e0] sm:$0xff]  ;;  %v6447_v43 = vld [vmem:[%s11818_s4 + $0x1e8] sm:$0xff] }
 0x374   :  { %8562 = vmatpush3.bf16.msra.mxu1 %v10310_v50  ;;  %7620 = vmatprep.mubr.f32.mxu1 %v6360_v31  ;;  %v6448_v31 = vld [vmem:[%s11818_s4 + $0x1f0] sm:$0xff] }
 0x375   :  { %8564 = vmatprep.subr.bf16.mxu1 %v10322_v19  ;;  %7564 = vmatprep.mubr.f32.mxu0 %v1581_v29  ;;  %v1728_v29 = vld [vmem:[%s11819_s5] sm:$0xff] }
 0x377   :  { %7621 = vmatmul.mubr.f32.gmra.mrb[62].mxu1 %v6361_v14  ;;  %7565 = vmatmul.mubr.f32.gmra.mrb[46].mxu0 %v1582_v62  ;;  %v1729_v14 = vld [vmem:[%s11819_s5 + $0x8] sm:$0xff] }
 0x378   :  { %8566 = vmatpush3.bf16.msra.mxu1 %v10322_v19  ;;  %7719 = vmatprep.mubr.f32.mxu1 %v6398_v1  ;;  %v10574_v62 = vpack.c.bf16 %v1729_v14, %v1728_v29  ;;  %v6449_v1 = vld [vmem:[%s11818_s4 + $0x1f8] sm:$0xff]  ;;  %v6546_v29 = vld [vmem:[%s11818_s4 + $0x320] sm:$0xff]  ;;  %v6547_v14 = vld [vmem:[%s11818_s4 + $0x328] sm:$0xff] }
 0x379   :  { %8576 = vmatprep.subr.bf16.mxu1 %v10215_v18 }
 0x37a   :  { %8528 = vmatprep.subr.bf16.mxu0 %v10574_v62 }
 0x37b   :  { %7720 = vmatmul.mubr.f32.vlgmr.msra.gmra.mrb[64].mxu1 %v6399_v46  ;;  %v6470_v46 = vld [vmem:[%s11818_s4 + $0x200] sm:$0xff] }
 0x37c   :  { %8578 = vmatpush3.bf16.msra.mxu1 %v10215_v18  ;;  %7722 = vmatprep.mubr.f32.mxu1 %v6400_v21  ;;  %v6471_v21 = vld [vmem:[%s11818_s4 + $0x208] sm:$0xff] }
 0x37d   :  { %8580 = vmatprep.subr.bf16.mxu1 %v10238_v37 }
 0x37f   :  { %7723 = vmatmul.mubr.f32.gmra.mrb[66].mxu1 %v6401_v12  ;;  %v6472_v12 = vld [vmem:[%s11818_s4 + $0x210] sm:$0xff] }
 0x380   :  { %8582 = vmatpush3.bf16.msra.mxu1 %v10238_v37  ;;  %7725 = vmatprep.mubr.f32.mxu1 %v6402_v45  ;;  %v6473_v45 = vld [vmem:[%s11818_s4 + $0x218] sm:$0xff] }
 0x381   :  { %8584 = vmatprep.subr.bf16.mxu1 %v10262_v56 }
 0x383   :  { %7726 = vmatmul.mubr.f32.gmra.mrb[68].mxu1 %v6403_v17  ;;  %v6474_v17 = vld [vmem:[%s11818_s4 + $0x220] sm:$0xff] }
 0x384   :  { %8586 = vmatpush3.bf16.msra.mxu1 %v10262_v56  ;;  %7728 = vmatprep.mubr.f32.mxu1 %v6404_v23  ;;  %v6475_v23 = vld [vmem:[%s11818_s4 + $0x228] sm:$0xff] }
 0x385   :  { %8588 = vmatprep.subr.bf16.mxu1 %v10274_v54 }
 0x387   :  { %7729 = vmatmul.mubr.f32.gmra.mrb[70].mxu1 %v6405_v55  ;;  %v6476_v55 = vld [vmem:[%s11818_s4 + $0x230] sm:$0xff] }
 0x388   :  { %8590 = vmatpush3.bf16.msra.mxu1 %v10274_v54  ;;  %7731 = vmatprep.mubr.f32.mxu1 %v6406_v53  ;;  %v6477_v53 = vld [vmem:[%s11818_s4 + $0x238] sm:$0xff] }
 0x389   :  { %8592 = vmatprep.subr.bf16.mxu1 %v10286_v59 }
 0x38b   :  { %7732 = vmatmul.mubr.f32.gmra.mrb[72].mxu1 %v6407_v0  ;;  %v6478_v0 = vld [vmem:[%s11818_s4 + $0x240] sm:$0xff] }
 0x38c   :  { %8594 = vmatpush3.bf16.msra.mxu1 %v10286_v59  ;;  %7734 = vmatprep.mubr.f32.mxu1 %v6408_v35  ;;  %v6479_v35 = vld [vmem:[%s11818_s4 + $0x248] sm:$0xff] }
 0x38d   :  { %8596 = vmatprep.subr.bf16.mxu1 %v10298_v49 }
 0x38f   :  { %7735 = vmatmul.mubr.f32.gmra.mrb[74].mxu1 %v6409_v51  ;;  %v6480_v51 = vld [vmem:[%s11818_s4 + $0x250] sm:$0xff] }
 0x390   :  { %8598 = vmatpush3.bf16.msra.mxu1 %v10298_v49  ;;  %7737 = vmatprep.mubr.f32.mxu1 %v6410_v5  ;;  %v6481_v5 = vld [vmem:[%s11818_s4 + $0x258] sm:$0xff] }
 0x391   :  { %8600 = vmatprep.subr.bf16.mxu1 %v10310_v50 }
 0x393   :  { %7738 = vmatmul.mubr.f32.gmra.mrb[76].mxu1 %v6411_v32  ;;  %v6482_v32 = vld [vmem:[%s11818_s4 + $0x260] sm:$0xff] }
 0x394   :  { %8602 = vmatpush3.bf16.msra.mxu1 %v10310_v50  ;;  %7740 = vmatprep.mubr.f32.mxu1 %v6412_v11  ;;  %v6485_v11 = vld [vmem:[%s11818_s4 + $0x278] sm:$0xff] }
 0x395   :  { %8604 = vmatprep.subr.bf16.mxu1 %v10322_v19 }
 0x397   :  { %7741 = vmatmul.mubr.f32.gmra.mrb[78].mxu1 %v6413_v48  ;;  %v6507_v48 = vld [vmem:[%s11818_s4 + $0x288] sm:$0xff] }
 0x398   :  { %8606 = vmatpush3.bf16.msra.mxu1 %v10322_v19  ;;  %7807 = vmatprep.mubr.f32.mxu1 %v6434_v57  ;;  %v6508_v57 = vld [vmem:[%s11818_s4 + $0x290] sm:$0xff] }
 0x399   :  { %8616 = vmatprep.subr.bf16.mxu1 %v10215_v18 }
 0x39b   :  { %7808 = vmatmul.mubr.f32.vlgmr.msra.gmra.mrb[80].mxu1 %v6435_v40  ;;  %v6509_v40 = vld [vmem:[%s11818_s4 + $0x298] sm:$0xff] }
 0x39c   :  { %8618 = vmatpush3.bf16.msra.mxu1 %v10215_v18  ;;  %7810 = vmatprep.mubr.f32.mxu1 %v6436_v10  ;;  %v6510_v10 = vld [vmem:[%s11818_s4 + $0x2a0] sm:$0xff] }
 0x39d   :  { %8620 = vmatprep.subr.bf16.mxu1 %v10238_v37 }
 0x39f   :  { %7811 = vmatmul.mubr.f32.gmra.mrb[82].mxu1 %v6437_v38  ;;  %v6511_v38 = vld [vmem:[%s11818_s4 + $0x2a8] sm:$0xff] }
 0x3a0   :  { %8622 = vmatpush3.bf16.msra.mxu1 %v10238_v37  ;;  %7813 = vmatprep.mubr.f32.mxu1 %v6438_v42  ;;  %v6512_v42 = vld [vmem:[%s11818_s4 + $0x2b0] sm:$0xff] }
 0x3a1   :  { %8624 = vmatprep.subr.bf16.mxu1 %v10262_v56 }
 0x3a3   :  { %7814 = vmatmul.mubr.f32.gmra.mrb[84].mxu1 %v6439_v28  ;;  %v6513_v28 = vld [vmem:[%s11818_s4 + $0x2b8] sm:$0xff] }
 0x3a4   :  { %8626 = vmatpush3.bf16.msra.mxu1 %v10262_v56  ;;  %7816 = vmatprep.mubr.f32.mxu1 %v6440_v33  ;;  %v6516_v33 = vld [vmem:[%s11818_s4 + $0x2d0] sm:$0xff] }
 0x3a5   :  { %8628 = vmatprep.subr.bf16.mxu1 %v10274_v54 }
 0x3a7   :  { %7817 = vmatmul.mubr.f32.gmra.mrb[86].mxu1 %v6441_v4  ;;  %v6518_v4 = vld [vmem:[%s11818_s4 + $0x2e0] sm:$0xff] }
 0x3a8   :  { %8630 = vmatpush3.bf16.msra.mxu1 %v10274_v54  ;;  %7819 = vmatprep.mubr.f32.mxu1 %v6442_v61  ;;  %v6519_v61 = vld [vmem:[%s11818_s4 + $0x2e8] sm:$0xff] }
 0x3a9   :  { %8632 = vmatprep.subr.bf16.mxu1 %v10286_v59 }
 0x3ab   :  { %7820 = vmatmul.mubr.f32.gmra.mrb[88].mxu1 %v6443_v2  ;;  %v6520_v2 = vld [vmem:[%s11818_s4 + $0x2f0] sm:$0xff] }
 0x3ac   :  { %8634 = vmatpush3.bf16.msra.mxu1 %v10286_v59  ;;  %7822 = vmatprep.mubr.f32.mxu1 %v6444_v27  ;;  %v6521_v27 = vld [vmem:[%s11818_s4 + $0x2f8] sm:$0xff] }
 0x3ad   :  { %8636 = vmatprep.subr.bf16.mxu1 %v10298_v49 }
 0x3af   :  { %7823 = vmatmul.mubr.f32.gmra.mrb[90].mxu1 %v6445_v39  ;;  %v6542_v39 = vld [vmem:[%s11818_s4 + $0x300] sm:$0xff] }
 0x3b0   :  { %8638 = vmatpush3.bf16.msra.mxu1 %v10298_v49  ;;  %7825 = vmatprep.mubr.f32.mxu1 %v6446_v20  ;;  %v6543_v20 = vld [vmem:[%s11818_s4 + $0x308] sm:$0xff] }
 0x3b1   :  { %8640 = vmatprep.subr.bf16.mxu1 %v10310_v50 }
 0x3b3   :  { %7826 = vmatmul.mubr.f32.gmra.mrb[92].mxu1 %v6447_v43  ;;  %v6544_v43 = vld [vmem:[%s11818_s4 + $0x310] sm:$0xff] }
 0x3b4   :  { %8642 = vmatpush3.bf16.msra.mxu1 %v10310_v50  ;;  %7828 = vmatprep.mubr.f32.mxu1 %v6448_v31  ;;  %v6545_v31 = vld [vmem:[%s11818_s4 + $0x318] sm:$0xff] }
 0x3b5   :  { %8644 = vmatprep.subr.bf16.mxu1 %v10322_v19 }
 0x3b7   :  { %7829 = vmatmul.mubr.f32.gmra.mrb[94].mxu1 %v6449_v1  ;;  %v6548_v1 = vld [vmem:[%s11818_s4 + $0x330] sm:$0xff] }
 0x3b8   :  { %8646 = vmatpush3.bf16.msra.mxu1 %v10322_v19  ;;  %7895 = vmatprep.mubr.f32.mxu1 %v6470_v46  ;;  %v6549_v46 = vld [vmem:[%s11818_s4 + $0x338] sm:$0xff] }
 0x3b9   :  { %8656 = vmatprep.subr.bf16.mxu1 %v10215_v18 }
 0x3bb   :  { %7896 = vmatmul.mubr.f32.vlgmr.msra.gmra.mrb[96].mxu1 %v6471_v21  ;;  %v6550_v21 = vld [vmem:[%s11818_s4 + $0x340] sm:$0xff] }
 0x3bc   :  { %8658 = vmatpush3.bf16.msra.mxu1 %v10215_v18  ;;  %7898 = vmatprep.mubr.f32.mxu1 %v6472_v12  ;;  %v6551_v12 = vld [vmem:[%s11818_s4 + $0x348] sm:$0xff] }
 0x3bd   :  { %8660 = vmatprep.subr.bf16.mxu1 %v10238_v37 }
 0x3bf   :  { %7899 = vmatmul.mubr.f32.gmra.mrb[98].mxu1 %v6473_v45  ;;  %v6552_v45 = vld [vmem:[%s11818_s4 + $0x350] sm:$0xff] }
 0x3c0   :  { %8662 = vmatpush3.bf16.msra.mxu1 %v10238_v37  ;;  %7901 = vmatprep.mubr.f32.mxu1 %v6474_v17  ;;  %v6553_v17 = vld [vmem:[%s11818_s4 + $0x358] sm:$0xff] }
 0x3c1   :  { %8664 = vmatprep.subr.bf16.mxu1 %v10262_v56 }
 0x3c3   :  { %7902 = vmatmul.mubr.f32.gmra.mrb[100].mxu1 %v6475_v23  ;;  %v6554_v23 = vld [vmem:[%s11818_s4 + $0x360] sm:$0xff] }
 0x3c4   :  { %8666 = vmatpush3.bf16.msra.mxu1 %v10262_v56  ;;  %7904 = vmatprep.mubr.f32.mxu1 %v6476_v55  ;;  %v6555_v55 = vld [vmem:[%s11818_s4 + $0x368] sm:$0xff] }
 0x3c5   :  { %8668 = vmatprep.subr.bf16.mxu1 %v10274_v54 }
 0x3c7   :  { %7905 = vmatmul.mubr.f32.gmra.mrb[102].mxu1 %v6477_v53  ;;  %v6556_v53 = vld [vmem:[%s11818_s4 + $0x370] sm:$0xff] }
 0x3c8   :  { %8670 = vmatpush3.bf16.msra.mxu1 %v10274_v54  ;;  %7907 = vmatprep.mubr.f32.mxu1 %v6478_v0  ;;  %v6557_v0 = vld [vmem:[%s11818_s4 + $0x378] sm:$0xff] }
 0x3c9   :  { %8672 = vmatprep.subr.bf16.mxu1 %v10286_v59 }
 0x3cb   :  { %7908 = vmatmul.mubr.f32.gmra.mrb[104].mxu1 %v6479_v35  ;;  %v6578_v35 = vld [vmem:[%s11818_s4 + $0x380] sm:$0xff] }
 0x3cc   :  { %8674 = vmatpush3.bf16.msra.mxu1 %v10286_v59  ;;  %7910 = vmatprep.mubr.f32.mxu1 %v6480_v51  ;;  %v6579_v51 = vld [vmem:[%s11818_s4 + $0x388] sm:$0xff] }
 0x3cd   :  { %8676 = vmatprep.subr.bf16.mxu1 %v10298_v49 }
 0x3cf   :  { %7911 = vmatmul.mubr.f32.gmra.mrb[106].mxu1 %v6481_v5  ;;  %v6580_v5 = vld [vmem:[%s11818_s4 + $0x390] sm:$0xff] }
 0x3d0   :  { %8678 = vmatpush3.bf16.msra.mxu1 %v10298_v49  ;;  %7913 = vmatprep.mubr.f32.mxu1 %v6482_v32  ;;  %v6581_v32 = vld [vmem:[%s11818_s4 + $0x398] sm:$0xff] }
 0x3d1   :  { %8680 = vmatprep.subr.bf16.mxu1 %v10310_v50 }
 0x3d3   :  { %7914 = vmatmul.mubr.f32.gmra.mrb[108].mxu1 %v6483_v25  ;;  %v6582_v25 = vld [vmem:[%s11818_s4 + $0x3a0] sm:$0xff] }
 0x3d4   :  { %8682 = vmatpush3.bf16.msra.mxu1 %v10310_v50  ;;  %7916 = vmatprep.mubr.f32.mxu1 %v6484_v44  ;;  %v6583_v44 = vld [vmem:[%s11818_s4 + $0x3a8] sm:$0xff] }
 0x3d5   :  { %8684 = vmatprep.subr.bf16.mxu1 %v10322_v19 }
 0x3d7   :  { %7917 = vmatmul.mubr.f32.gmra.mrb[110].mxu1 %v6485_v11  ;;  %v6585_v11 = vld [vmem:[%s11818_s4 + $0x3b8] sm:$0xff] }
 0x3d8   :  { %8686 = vmatpush3.bf16.msra.mxu1 %v10322_v19  ;;  %7983 = vmatprep.mubr.f32.mxu1 %v6506_v24  ;;  %v6587_v24 = vld [vmem:[%s11818_s4 + $0x3c8] sm:$0xff] }
 0x3d9   :  { %8696 = vmatprep.subr.bf16.mxu1 %v10215_v18 }
 0x3db   :  { %7984 = vmatmul.mubr.f32.vlgmr.msra.gmra.mrb[112].mxu1 %v6507_v48  ;;  %v1730_v48 = vld [vmem:[%s11819_s5 + $0x10] sm:$0xff] }
 0x3dc   :  { %8698 = vmatpush3.bf16.msra.mxu1 %v10215_v18  ;;  %7986 = vmatprep.mubr.f32.mxu1 %v6508_v57  ;;  %v6589_v57 = vld [vmem:[%s11818_s4 + $0x3d8] sm:$0xff] }
 0x3dd   :  { %8700 = vmatprep.subr.bf16.mxu1 %v10238_v37 }
 0x3df   :  { %7987 = vmatmul.mubr.f32.gmra.mrb[114].mxu1 %v6509_v40 }
 0x3e0   :  { %8702 = vmatpush3.bf16.msra.mxu1 %v10238_v37  ;;  %7989 = vmatprep.mubr.f32.mxu1 %v6510_v10 }
 0x3e1   :  { %8704 = vmatprep.subr.bf16.mxu1 %v10262_v56 }
 0x3e3   :  { %7990 = vmatmul.mubr.f32.gmra.mrb[116].mxu1 %v6511_v38 }
 0x3e4   :  { %8706 = vmatpush3.bf16.msra.mxu1 %v10262_v56  ;;  %7992 = vmatprep.mubr.f32.mxu1 %v6512_v42 }
 0x3e5   :  { %8708 = vmatprep.subr.bf16.mxu1 %v10274_v54 }
 0x3e7   :  { %7993 = vmatmul.mubr.f32.gmra.mrb[118].mxu1 %v6513_v28  ;;  %v6590_v28 = vld [vmem:[%s11818_s4 + $0x3e0] sm:$0xff] }
 0x3e8   :  { %8710 = vmatpush3.bf16.msra.mxu1 %v10274_v54  ;;  %7995 = vmatprep.mubr.f32.mxu1 %v6514_v30  ;;  %v6414_v30 = vld [vmem:[%s11819_s5 + $0x40] sm:$0xff] }
 0x3e9   :  { %8712 = vmatprep.subr.bf16.mxu1 %v10286_v59 }
 0x3eb   :  { %7996 = vmatmul.mubr.f32.gmra.mrb[120].mxu1 %v6515_v63  ;;  %v6415_v63 = vld [vmem:[%s11819_s5 + $0x48] sm:$0xff] }
 0x3ec   :  { %8714 = vmatpush3.bf16.msra.mxu1 %v10286_v59  ;;  %7998 = vmatprep.mubr.f32.mxu1 %v6516_v33  ;;  %v6591_v33 = vld [vmem:[%s11818_s4 + $0x3e8] sm:$0xff] }
 0x3ed   :  { %8716 = vmatprep.subr.bf16.mxu1 %v10298_v49 }
 0x3ef   :  { %7999 = vmatmul.mubr.f32.gmra.mrb[122].mxu1 %v6517_v60 }
 0x3f0   :  { %8718 = vmatpush3.bf16.msra.mxu1 %v10298_v49  ;;  %8001 = vmatprep.mubr.f32.mxu1 %v6518_v4 }
 0x3f1   :  { %8720 = vmatprep.subr.bf16.mxu1 %v10310_v50 }
 0x3f3   :  { %8002 = vmatmul.mubr.f32.gmra.mrb[124].mxu1 %v6519_v61  ;;  %v10851_v61 = vpack.c.bf16 %v6415_v63, %v6414_v30  ;;  %v6417_v30 = vld [vmem:[%s11819_s5 + $0x58] sm:$0xff] }
 0x3f4   :  { %8722 = vmatpush3.bf16.msra.mxu1 %v10310_v50  ;;  %8004 = vmatprep.mubr.f32.mxu1 %v6520_v2  ;;  %v6625_v63 = vld [vmem:[%s11818_s4 + $0x458] sm:$0xff] }
 0x3f5   :  { %8724 = vmatprep.subr.bf16.mxu1 %v10322_v19 }
 0x3f7   :  { %8005 = vmatmul.mubr.f32.gmra.mrb[126].mxu1 %v6521_v27  ;;  %v6592_v27 = vld [vmem:[%s11818_s4 + $0x3f0] sm:$0xff] }
 0x3f8   :  { %8726 = vmatpush3.bf16.msra.mxu1 %v10322_v19  ;;  %8071 = vmatprep.mubr.f32.mxu1 %v6542_v39 }
 0x3f9   :  { %8736 = vmatprep.subr.bf16.mxu1 %v10215_v18 }
 0x3fb   :  { %8072 = vmatmul.mubr.f32.vlgmr.msra.gmra.mrb[128].mxu1 %v6543_v20 }
 0x3fc   :  { %8738 = vmatpush3.bf16.msra.mxu1 %v10215_v18  ;;  %8074 = vmatprep.mubr.f32.mxu1 %v6544_v43  ;;  %v6614_v43 = vld [vmem:[%s11818_s4 + $0x400] sm:$0xff] }
 0x3fd   :  { %8740 = vmatprep.subr.bf16.mxu1 %v10238_v37 }
 0x3ff   :  { %8075 = vmatmul.mubr.f32.gmra.mrb[130].mxu1 %v6545_v31 }
 0x400   :  { %8742 = vmatpush3.bf16.msra.mxu1 %v10238_v37  ;;  %8077 = vmatprep.mubr.f32.mxu1 %v6546_v29  ;;  %v6615_v29 = vld [vmem:[%s11818_s4 + $0x408] sm:$0xff] }
 0x401   :  { %8744 = vmatprep.subr.bf16.mxu1 %v10262_v56 }
 0x403   :  { %8078 = vmatmul.mubr.f32.gmra.mrb[132].mxu1 %v6547_v14  ;;  %v6616_v14 = vld [vmem:[%s11818_s4 + $0x410] sm:$0xff] }
 0x404   :  { %8746 = vmatpush3.bf16.msra.mxu1 %v10262_v56  ;;  %8080 = vmatprep.mubr.f32.mxu1 %v6548_v1 }
 0x405   :  { %8748 = vmatprep.subr.bf16.mxu1 %v10274_v54 }
 0x407   :  { %8081 = vmatmul.mubr.f32.gmra.mrb[134].mxu1 %v6549_v46 }
 0x408   :  { %8750 = vmatpush3.bf16.msra.mxu1 %v10274_v54  ;;  %8083 = vmatprep.mubr.f32.mxu1 %v6550_v21 }
 0x409   :  { %8752 = vmatprep.subr.bf16.mxu1 %v10286_v59 }
 0x40b   :  { %8084 = vmatmul.mubr.f32.gmra.mrb[136].mxu1 %v6551_v12 }
 0x40c   :  { %8754 = vmatpush3.bf16.msra.mxu1 %v10286_v59  ;;  %8086 = vmatprep.mubr.f32.mxu1 %v6552_v45  ;;  %v6618_v45 = vld [vmem:[%s11818_s4 + $0x420] sm:$0xff] }
 0x40d   :  { %8756 = vmatprep.subr.bf16.mxu1 %v10298_v49 }
 0x40f   :  { %8087 = vmatmul.mubr.f32.gmra.mrb[138].mxu1 %v6553_v17 }
 0x410   :  { %8758 = vmatpush3.bf16.msra.mxu1 %v10298_v49  ;;  %8089 = vmatprep.mubr.f32.mxu1 %v6554_v23 }
 0x411   :  { %8760 = vmatprep.subr.bf16.mxu1 %v10310_v50 }
 0x413   :  { %8090 = vmatmul.mubr.f32.gmra.mrb[140].mxu1 %v6555_v55 }
 0x414   :  { %8762 = vmatpush3.bf16.msra.mxu1 %v10310_v50  ;;  %8092 = vmatprep.mubr.f32.mxu1 %v6556_v53 }
 0x415   :  { %8764 = vmatprep.subr.bf16.mxu1 %v10322_v19 }
 0x417   :  { %8093 = vmatmul.mubr.f32.gmra.mrb[142].mxu1 %v6557_v0  ;;  %v6619_v0 = vld [vmem:[%s11818_s4 + $0x428] sm:$0xff] }
 0x418   :  { %8766 = vmatpush3.bf16.msra.mxu1 %v10322_v19  ;;  %8159 = vmatprep.mubr.f32.mxu1 %v6578_v35  ;;  %v6620_v35 = vld [vmem:[%s11818_s4 + $0x430] sm:$0xff] }
 0x419   :  { %8776 = vmatprep.subr.bf16.mxu1 %v10215_v18 }
 0x41b   :  { %8160 = vmatmul.mubr.f32.vlgmr.msra.gmra.mrb[144].mxu1 %v6579_v51 }
 0x41c   :  { %8778 = vmatpush3.bf16.msra.mxu1 %v10215_v18  ;;  %8162 = vmatprep.mubr.f32.mxu1 %v6580_v5  ;;  %v6584_v18 = vld [vmem:[%s11818_s4 + $0x3b0] sm:$0xff] }
 0x41d   :  { %8780 = vmatprep.subr.bf16.mxu1 %v10238_v37 }
 0x41f   :  { %8163 = vmatmul.mubr.f32.gmra.mrb[146].mxu1 %v6581_v32 }
 0x420   :  { %8782 = vmatpush3.bf16.msra.mxu1 %v10238_v37  ;;  %8165 = vmatprep.mubr.f32.mxu1 %v6582_v25  ;;  %v6586_v37 = vld [vmem:[%s11818_s4 + $0x3c0] sm:$0xff] }
 0x421   :  { %8784 = vmatprep.subr.bf16.mxu1 %v10262_v56 }
 0x423   :  { %8166 = vmatmul.mubr.f32.gmra.mrb[148].mxu1 %v6583_v44  ;;  %v6621_v44 = vld [vmem:[%s11818_s4 + $0x438] sm:$0xff] }
 0x424   :  { %8786 = vmatpush3.bf16.msra.mxu1 %v10262_v56  ;;  %8168 = vmatprep.mubr.f32.mxu1 %v6584_v18  ;;  %v6588_v56 = vld [vmem:[%s11818_s4 + $0x3d0] sm:$0xff]  ;;  %v6622_v18 = vld [vmem:[%s11818_s4 + $0x440] sm:$0xff] }
 0x425   :  { %8788 = vmatprep.subr.bf16.mxu1 %v10274_v54 }
 0x427   :  { %8169 = vmatmul.mubr.f32.gmra.mrb[150].mxu1 %v6585_v11 }
 0x428   :  { %8790 = vmatpush3.bf16.msra.mxu1 %v10274_v54  ;;  %8171 = vmatprep.mubr.f32.mxu1 %v6586_v37  ;;  %v1731_v54 = vld [vmem:[%s11819_s5 + $0x18] sm:$0xff] }
 0x429   :  { %8792 = vmatprep.subr.bf16.mxu1 %v10286_v59 }
 0x42b   :  { %8172 = vmatmul.mubr.f32.gmra.mrb[152].mxu1 %v6587_v24 }
 0x42c   :  { %8794 = vmatpush3.bf16.msra.mxu1 %v10286_v59  ;;  %8174 = vmatprep.mubr.f32.mxu1 %v6588_v56  ;;  %v8531_v59 = vpack.c.bf16 %v1731_v54, %v1730_v48  ;;  %v6623_v48 = vld [vmem:[%s11818_s4 + $0x448] sm:$0xff]  ;;  %v6624_v54 = vld [vmem:[%s11818_s4 + $0x450] sm:$0xff] }
 0x42d   :  { %8796 = vmatprep.subr.bf16.mxu1 %v10298_v49 }
 0x42e   :  { %v7601_v40 = vpop.f32.mrb[48].mxu1  ;;  %v10828_v10 = vpop.f32.mrb[32].mxu0 }
 0x42f   :  { %v1815_v38 = vpop.f32.mrb[49].mxu1  ;;  %v10830_v42 = vpop.f32.mrb[33].mxu0  ;;  %8175 = vmatmul.mubr.f32.gmra.mrb[154].mxu1 %v6589_v57 }
 0x430   :  { %7631 = vmatprep.mubr.msk.f32.mxu0 %vm355_vm0, %v1815_v38  ;;  %8798 = vmatpush3.bf16.msra.mxu1 %v10298_v49 }
 0x431   :  { %7632 = vmatmul.mubr.msk.f32.vlgmr.msra.gmra.mrb[48].mxu0 %vm355_vm0, %v7601_v40  ;;  %8800 = vmatprep.subr.bf16.mxu1 %v10310_v50 }
 0x432   :  { %v7604_v60 = vpop.f32.mrb[50].mxu1  ;;  %8530 = vmatpush3.bf16.msra.mxu0 %v10574_v62  ;;  %v10849_v49 = vpop.f32.mrb[34].mxu0  ;;  %8177 = vmatprep.mubr.f32.mxu1 %v6590_v28  ;;  %v6593_v62 = vld [vmem:[%s11818_s4 + $0x3f8] sm:$0xff]  ;;  %v6416_v28 = vld [vmem:[%s11819_s5 + $0x50] sm:$0xff] }
 0x433   :  { %v1825_v4 = vpop.f32.mrb[51].mxu1  ;;  %8532 = vmatprep.subr.bf16.mxu0 %v8531_v59  ;;  %v10853_v2 = vpop.f32.mrb[35].mxu0  ;;  %8178 = vmatmul.mubr.f32.gmra.mrb[156].mxu1 %v6591_v33  ;;  %v6626_v33 = vld [vmem:[%s11818_s4 + $0x460] sm:$0xff] }
 0x434   :  { %7634 = vmatprep.mubr.msk.f32.mxu0 %vm355_vm0, %v1825_v4  ;;  %8802 = vmatpush3.bf16.msra.mxu1 %v10310_v50  ;;  %v8571_v4 = vpack.c.bf16 %v6417_v30, %v6416_v28  ;;  %v6488_v30 = vld [vmem:[%s11819_s5 + $0x90] sm:$0xff] }
 0x435   :  { %7635 = vmatmul.mubr.msk.f32.gmra.mrb[50].mxu0 %vm355_vm0, %v7604_v60  ;;  %8804 = vmatprep.subr.bf16.mxu1 %v10322_v19 }
 0x436   :  { %v7607_v39 = vpop.f32.mrb[52].mxu1  ;;  %8534 = vmatpush3.bf16.msra.mxu0 %v8531_v59  ;;  %v10865_v20 = vpop.f32.mrb[36].mxu0  ;;  %8180 = vmatprep.mubr.f32.mxu1 %v6592_v27 }
 0x437   :  { %v1835_v31 = vpop.f32.mrb[53].mxu1  ;;  %8568 = vmatprep.subr.bf16.mxu0 %v10851_v61  ;;  %v10871_v50 = vpop.f32.mrb[37].mxu0  ;;  %8181 = vmatmul.mubr.f32.gmra.mrb[158].mxu1 %v6593_v62  ;;  %v6450_v62 = vld [vmem:[%s11819_s5 + $0x60] sm:$0xff] }
 0x438   :  { %7637 = vmatprep.mubr.msk.f32.mxu0 %vm355_vm0, %v1835_v31  ;;  %8806 = vmatpush3.bf16.msra.mxu1 %v10322_v19  ;;  %v6617_v19 = vld [vmem:[%s11818_s4 + $0x418] sm:$0xff] }
 0x439   :  { %7638 = vmatmul.mubr.msk.f32.gmra.mrb[52].mxu0 %vm355_vm0, %v7607_v39  ;;  %8247 = vmatprep.mubr.f32.mxu1 %v6614_v43  ;;  %v6451_v39 = vld [vmem:[%s11819_s5 + $0x68] sm:$0xff] }
 0x43a   :  { %v7610_v1 = vpop.f32.mrb[54].mxu1  ;;  %v10882_v46 = vpop.f32.mrb[38].mxu0  ;;  %v6627_v43 = vld [vmem:[%s11818_s4 + $0x468] sm:$0xff] }
 0x43b   :  { %v1845_v21 = vpop.f32.mrb[55].mxu1  ;;  %v10884_v12 = vpop.f32.mrb[39].mxu0  ;;  %8248 = vmatmul.mubr.f32.vlgmr.msra.gmra.mrb[160].mxu1 %v6615_v29  ;;  %v8607_v29 = vpack.c.bf16 %v6451_v39, %v6450_v62  ;;  %v6523_v62 = vld [vmem:[%s11819_s5 + $0xa8] sm:$0xff] }
 0x43c   :  { %7640 = vmatprep.mubr.msk.f32.mxu0 %vm355_vm0, %v1845_v21  ;;  %8250 = vmatprep.mubr.f32.mxu1 %v6616_v14 }
 0x43d   :  { %7641 = vmatmul.mubr.msk.f32.gmra.mrb[54].mxu0 %vm355_vm0, %v7610_v1  ;;  %v6629_v1 = vld [vmem:[%s11818_s4 + $0x478] sm:$0xff] }
 0x43e   :  { %v7613_v17 = vpop.f32.mrb[56].mxu1  ;;  %v10894_v23 = vpop.f32.mrb[40].mxu0 }
 0x43f   :  { %v1855_v55 = vpop.f32.mrb[57].mxu1  ;;  %v10896_v53 = vpop.f32.mrb[41].mxu0  ;;  %8251 = vmatmul.mubr.f32.gmra.mrb[162].mxu1 %v6617_v19 }
 0x440   :  { %7643 = vmatprep.mubr.msk.f32.mxu0 %vm355_vm0, %v1855_v55  ;;  %8253 = vmatprep.mubr.f32.mxu1 %v6618_v45  ;;  %v6453_v55 = vld [vmem:[%s11819_s5 + $0x78] sm:$0xff] }
 0x441   :  { %7644 = vmatmul.mubr.msk.f32.gmra.mrb[56].mxu0 %vm355_vm0, %v7613_v17 }
 0x442   :  { %v7616_v51 = vpop.f32.mrb[58].mxu1  ;;  %v10906_v5 = vpop.f32.mrb[42].mxu0 }
 0x443   :  { %v1865_v32 = vpop.f32.mrb[59].mxu1  ;;  %v10908_v25 = vpop.f32.mrb[43].mxu0  ;;  %8254 = vmatmul.mubr.f32.gmra.mrb[164].mxu1 %v6619_v0 }
 0x444   :  { %7646 = vmatprep.mubr.msk.f32.mxu0 %vm355_vm0, %v1865_v32  ;;  %8256 = vmatprep.mubr.f32.mxu1 %v6620_v35 }
 0x445   :  { %7647 = vmatmul.mubr.msk.f32.gmra.mrb[58].mxu0 %vm355_vm0, %v7616_v51  ;;  %v6486_v51 = vld [vmem:[%s11819_s5 + $0x80] sm:$0xff] }
 0x446   :  { %v7619_v11 = vpop.f32.mrb[60].mxu1  ;;  %v10918_v37 = vpop.f32.mrb[44].mxu0 }
 0x447   :  { %v1875_v24 = vpop.f32.mrb[61].mxu1  ;;  %v1709_v56 = vpop.f32.mrb[45].mxu0  ;;  %8257 = vmatmul.mubr.f32.gmra.mrb[166].mxu1 %v6621_v44 }
 0x448   :  { %7649 = vmatprep.mubr.msk.f32.mxu0 %vm355_vm0, %v1875_v24  ;;  %8259 = vmatprep.mubr.f32.mxu1 %v6622_v18 }
 0x449   :  { %7650 = vmatmul.mubr.msk.f32.gmra.mrb[60].mxu0 %vm355_vm0, %v7619_v11 }
 0x44a   :  { %v7622_v57 = vpop.f32.mrb[62].mxu1  ;;  %v7566_v40 = vpop.f32.mrb[46].mxu0 }
 0x44b   :  { %v1885_v38 = vpop.f32.mrb[63].mxu1  ;;  %v1719_v59 = vpop.f32.mrb[47].mxu0  ;;  %8260 = vmatmul.mubr.f32.gmra.mrb[168].mxu1 %v6623_v48 }
 0x44c   :  { %7652 = vmatprep.mubr.msk.f32.mxu0 %vm355_vm0, %v1885_v38  ;;  %8262 = vmatprep.mubr.f32.mxu1 %v6624_v54 }
 0x44d   :  { %7653 = vmatmul.mubr.msk.f32.gmra.mrb[62].mxu0 %vm355_vm0, %v7622_v57 }
 0x44e   :  { %7663 = vmatprep.mubr.msk.f32.mxu0 %vm355_vm0, %v10830_v42  ;;  %v7721_v60 = vpop.f32.mrb[64].mxu1  ;;  %v6628_v42 = vld [vmem:[%s11818_s4 + $0x470] sm:$0xff] }
 0x44f   :  { %v2368_v27 = vpop.f32.mrb[65].mxu1  ;;  %8263 = vmatmul.mubr.f32.gmra.mrb[170].mxu1 %v6625_v63  ;;  %v6489_v63 = vld [vmem:[%s11819_s5 + $0x98] sm:$0xff] }
 0x450   :  { %8265 = vmatprep.mubr.f32.mxu1 %v6626_v33 }
 0x451   :  { %7664 = vmatmul.mubr.msk.f32.vlgmr.msra.gmra.mrb[48].mxu0 %vm355_vm0, %v10828_v10 }
 0x452   :  { %8570 = vmatpush3.bf16.msra.mxu0 %v10851_v61  ;;  %7666 = vmatprep.mubr.msk.f32.mxu0 %vm355_vm0, %v10853_v2  ;;  %v7724_v31 = vpop.f32.mrb[66].mxu1 }
 0x453   :  { %8572 = vmatprep.subr.bf16.mxu0 %v8571_v4  ;;  %v2378_v14 = vpop.f32.mrb[67].mxu1  ;;  %8266 = vmatmul.mubr.f32.gmra.mrb[172].mxu1 %v6627_v43 }
 0x454   :  { %8268 = vmatprep.mubr.f32.mxu1 %v6628_v42 }
 0x455   :  { %7667 = vmatmul.mubr.msk.f32.gmra.mrb[50].mxu0 %vm355_vm0, %v10849_v49 }
 0x456   :  { %7669 = vmatprep.mubr.msk.f32.mxu0 %vm355_vm0, %v10871_v50  ;;  %8574 = vmatpush3.bf16.msra.mxu0 %v8571_v4  ;;  %v7727_v10 = vpop.f32.mrb[68].mxu1 }
 0x457   :  { %8608 = vmatprep.subr.bf16.mxu0 %v8607_v29  ;;  %v2388_v61 = vpop.f32.mrb[69].mxu1  ;;  %8269 = vmatmul.mubr.f32.gmra.mrb[174].mxu1 %v6629_v1 }
 0x459   :  { %7670 = vmatmul.mubr.msk.f32.gmra.mrb[52].mxu0 %vm355_vm0, %v10865_v20 }
 0x45a   :  { %7672 = vmatprep.mubr.msk.f32.mxu0 %vm355_vm0, %v10884_v12  ;;  %v7730_v2 = vpop.f32.mrb[70].mxu1 }
 0x45b   :  { %v2398_v21 = vpop.f32.mrb[71].mxu1 }
 0x45d   :  { %7673 = vmatmul.mubr.msk.f32.gmra.mrb[54].mxu0 %vm355_vm0, %v10882_v46 }
 0x45e   :  { %7675 = vmatprep.mubr.msk.f32.mxu0 %vm355_vm0, %v10896_v53  ;;  %v7733_v49 = vpop.f32.mrb[72].mxu1 }
 0x45f   :  { %v2408_v50 = vpop.f32.mrb[73].mxu1 }
 0x461   :  { %7676 = vmatmul.mubr.msk.f32.gmra.mrb[56].mxu0 %vm355_vm0, %v10894_v23  ;;  %v6452_v23 = vld [vmem:[%s11819_s5 + $0x70] sm:$0xff] }
 0x462   :  { %7678 = vmatprep.mubr.msk.f32.mxu0 %vm355_vm0, %v10908_v25  ;;  %v7736_v20 = vpop.f32.mrb[74].mxu1  ;;  %v8611_v0 = vpack.c.bf16 %v6453_v55, %v6452_v23  ;;  %v6558_v55 = vld [vmem:[%s11819_s5 + $0xc0] sm:$0xff] }
 0x463   :  { %v2418_v19 = vpop.f32.mrb[75].mxu1 }
 0x465   :  { %7679 = vmatmul.mubr.msk.f32.gmra.mrb[58].mxu0 %vm355_vm0, %v10906_v5  ;;  %v6487_v5 = vld [vmem:[%s11819_s5 + $0x88] sm:$0xff] }
 0x466   :  { %7681 = vmatprep.mubr.msk.f32.mxu0 %vm355_vm0, %v1709_v56  ;;  %v7739_v12 = vpop.f32.mrb[76].mxu1  ;;  %v8647_v25 = vpack.c.bf16 %v6487_v5, %v6486_v51 }
 0x467   :  { %v2428_v46 = vpop.f32.mrb[77].mxu1 }
 0x469   :  { %7682 = vmatmul.mubr.msk.f32.gmra.mrb[60].mxu0 %vm355_vm0, %v10918_v37 }
 0x46a   :  { %7684 = vmatprep.mubr.msk.f32.mxu0 %vm355_vm0, %v1719_v59  ;;  %v7742_v45 = vpop.f32.mrb[78].mxu1 }
 0x46b   :  { %v2438_v17 = vpop.f32.mrb[79].mxu1 }
 0x46d   :  { %7685 = vmatmul.mubr.msk.f32.gmra.mrb[62].mxu0 %vm355_vm0, %v7566_v40 }
 0x46e   :  { %7751 = vmatprep.mubr.msk.f32.mxu0 %vm355_vm0, %v2368_v27  ;;  %v7809_v53 = vpop.f32.mrb[80].mxu1  ;;  %v6522_v27 = vld [vmem:[%s11819_s5 + $0xa0] sm:$0xff] }
 0x46f   :  { %v2744_v35 = vpop.f32.mrb[81].mxu1  ;;  %v8687_v43 = vpack.c.bf16 %v6523_v62, %v6522_v27 }
 0x471   :  { %7752 = vmatmul.mubr.msk.f32.vlgmr.msra.gmra.mrb[48].mxu0 %vm355_vm0, %v7721_v60  ;;  %v8651_v60 = vpack.c.bf16 %v6489_v63, %v6488_v30  ;;  %v6594_v63 = vld [vmem:[%s11819_s5 + $0xe0] sm:$0xff] }
 0x472   :  { %8610 = vmatpush3.bf16.msra.mxu0 %v8607_v29  ;;  %7754 = vmatprep.mubr.msk.f32.mxu0 %vm355_vm0, %v2378_v14  ;;  %v7812_v32 = vpop.f32.mrb[82].mxu1 }
 0x473   :  { %8612 = vmatprep.subr.bf16.mxu0 %v8611_v0  ;;  %v2754_v44 = vpop.f32.mrb[83].mxu1 }
 0x475   :  { %7755 = vmatmul.mubr.msk.f32.gmra.mrb[50].mxu0 %vm355_vm0, %v7724_v31 }
 0x476   :  { %7757 = vmatprep.mubr.msk.f32.mxu0 %vm355_vm0, %v2388_v61  ;;  %8614 = vmatpush3.bf16.msra.mxu0 %v8611_v0  ;;  %v7815_v18 = vpop.f32.mrb[84].mxu1 }
 0x477   :  { %8648 = vmatprep.subr.bf16.mxu0 %v8647_v25  ;;  %v2764_v11 = vpop.f32.mrb[85].mxu1 }
 0x479   :  { %7758 = vmatmul.mubr.msk.f32.gmra.mrb[52].mxu0 %vm355_vm0, %v7727_v10 }
 0x47a   :  { %7760 = vmatprep.mubr.msk.f32.mxu0 %vm355_vm0, %v2398_v21  ;;  %v7818_v37 = vpop.f32.mrb[86].mxu1 }
 0x47b   :  { %v2774_v24 = vpop.f32.mrb[87].mxu1 }
 0x47d   :  { %7761 = vmatmul.mubr.msk.f32.gmra.mrb[54].mxu0 %vm355_vm0, %v7730_v2 }
 0x47e   :  { %7763 = vmatprep.mubr.msk.f32.mxu0 %vm355_vm0, %v2408_v50  ;;  %v7821_v56 = vpop.f32.mrb[88].mxu1 }
 0x47f   :  { %v2784_v48 = vpop.f32.mrb[89].mxu1 }
 0x481   :  { %7764 = vmatmul.mubr.msk.f32.gmra.mrb[56].mxu0 %vm355_vm0, %v7733_v49 }
 0x482   :  { %7766 = vmatprep.mubr.msk.f32.mxu0 %vm355_vm0, %v2418_v19  ;;  %v7824_v54 = vpop.f32.mrb[90].mxu1 }
 0x483   :  { %v2794_v57 = vpop.f32.mrb[91].mxu1 }
 0x485   :  { %7767 = vmatmul.mubr.msk.f32.gmra.mrb[58].mxu0 %vm355_vm0, %v7736_v20 }
 0x486   :  { %7769 = vmatprep.mubr.msk.f32.mxu0 %vm355_vm0, %v2428_v46  ;;  %v7827_v40 = vpop.f32.mrb[92].mxu1  ;;  %v6525_v46 = vld [vmem:[%s11819_s5 + $0xb8] sm:$0xff] }
 0x487   :  { %v2804_v38 = vpop.f32.mrb[93].mxu1 }
 0x489   :  { %7770 = vmatmul.mubr.msk.f32.gmra.mrb[60].mxu0 %vm355_vm0, %v7739_v12  ;;  %v6524_v12 = vld [vmem:[%s11819_s5 + $0xb0] sm:$0xff] }
 0x48a   :  { %7772 = vmatprep.mubr.msk.f32.mxu0 %vm355_vm0, %v2438_v17  ;;  %v7830_v59 = vpop.f32.mrb[94].mxu1  ;;  %v8691_v17 = vpack.c.bf16 %v6525_v46, %v6524_v12  ;;  %v6630_v46 = vld [vmem:[%s11819_s5 + $0x100] sm:$0xff] }
 0x48b   :  { %v2814_v28 = vpop.f32.mrb[95].mxu1 }
 0x48d   :  { %7773 = vmatmul.mubr.msk.f32.gmra.mrb[62].mxu0 %vm355_vm0, %v7742_v45 }
 0x48e   :  { %7839 = vmatprep.mubr.msk.f32.mxu0 %vm355_vm0, %v2744_v35  ;;  %v7897_v33 = vpop.f32.mrb[96].mxu1 }
 0x48f   :  { %v3120_v4 = vpop.f32.mrb[97].mxu1 }
 0x491   :  { %7840 = vmatmul.mubr.msk.f32.vlgmr.msra.gmra.mrb[48].mxu0 %vm355_vm0, %v7809_v53  ;;  %v6559_v53 = vld [vmem:[%s11819_s5 + $0xc8] sm:$0xff] }
 0x492   :  { %8650 = vmatpush3.bf16.msra.mxu0 %v8647_v25  ;;  %7842 = vmatprep.mubr.msk.f32.mxu0 %vm355_vm0, %v2754_v44  ;;  %v7900_v39 = vpop.f32.mrb[98].mxu1  ;;  %v8727_v35 = vpack.c.bf16 %v6559_v53, %v6558_v55 }
 0x493   :  { %8652 = vmatprep.subr.bf16.mxu0 %v8651_v60  ;;  %v3130_v42 = vpop.f32.mrb[99].mxu1 }
 0x495   :  { %7843 = vmatmul.mubr.msk.f32.gmra.mrb[50].mxu0 %vm355_vm0, %v7812_v32 }
 0x496   :  { %7845 = vmatprep.mubr.msk.f32.mxu0 %vm355_vm0, %v2764_v11  ;;  %8654 = vmatpush3.bf16.msra.mxu0 %v8651_v60  ;;  %v7903_v31 = vpop.f32.mrb[100].mxu1 }
 0x497   :  { %8688 = vmatprep.subr.bf16.mxu0 %v8687_v43  ;;  %v3140_v29 = vpop.f32.mrb[101].mxu1 }
 0x499   :  { %7846 = vmatmul.mubr.msk.f32.gmra.mrb[52].mxu0 %vm355_vm0, %v7815_v18 }
 0x49a   :  { %7848 = vmatprep.mubr.msk.f32.mxu0 %vm355_vm0, %v2774_v24  ;;  %v7906_v14 = vpop.f32.mrb[102].mxu1 }
 0x49b   :  { %v3150_v1 = vpop.f32.mrb[103].mxu1 }
 0x49d   :  { %7849 = vmatmul.mubr.msk.f32.gmra.mrb[54].mxu0 %vm355_vm0, %v7818_v37 }
 0x49e   :  { %7851 = vmatprep.mubr.msk.f32.mxu0 %vm355_vm0, %v2784_v48  ;;  %v7909_v10 = vpop.f32.mrb[104].mxu1 }
 0x49f   :  { %v3160_v61 = vpop.f32.mrb[105].mxu1 }
 0x4a1   :  { %7852 = vmatmul.mubr.msk.f32.gmra.mrb[56].mxu0 %vm355_vm0, %v7821_v56 }
 0x4a2   :  { %7854 = vmatprep.mubr.msk.f32.mxu0 %vm355_vm0, %v2794_v57  ;;  %v7912_v2 = vpop.f32.mrb[106].mxu1 }
 0x4a3   :  { %v3170_v21 = vpop.f32.mrb[107].mxu1 }
 0x4a5   :  { %7855 = vmatmul.mubr.msk.f32.gmra.mrb[58].mxu0 %vm355_vm0, %v7824_v54 }
 0x4a6   :  { %7857 = vmatprep.mubr.msk.f32.mxu0 %vm355_vm0, %v2804_v38  ;;  %v7915_v49 = vpop.f32.mrb[108].mxu1  ;;  %v6561_v38 = vld [vmem:[%s11819_s5 + $0xd8] sm:$0xff] }
 0x4a7   :  { %v3180_v50 = vpop.f32.mrb[109].mxu1 }
 0x4a9   :  { %7858 = vmatmul.mubr.msk.f32.gmra.mrb[60].mxu0 %vm355_vm0, %v7827_v40  ;;  %v6560_v40 = vld [vmem:[%s11819_s5 + $0xd0] sm:$0xff] }
 0x4aa   :  { %7860 = vmatprep.mubr.msk.f32.mxu0 %vm355_vm0, %v2814_v28  ;;  %v7918_v20 = vpop.f32.mrb[110].mxu1  ;;  %v8731_v28 = vpack.c.bf16 %v6561_v38, %v6560_v40 }
 0x4ab   :  { %v3190_v19 = vpop.f32.mrb[111].mxu1 }
 0x4ad   :  { %7861 = vmatmul.mubr.msk.f32.gmra.mrb[62].mxu0 %vm355_vm0, %v7830_v59 }
 0x4ae   :  { %7927 = vmatprep.mubr.msk.f32.mxu0 %vm355_vm0, %v3120_v4  ;;  %v7985_v45 = vpop.f32.mrb[112].mxu1 }
 0x4af   :  { %v3496_v23 = vpop.f32.mrb[113].mxu1 }
 0x4b1   :  { %7928 = vmatmul.mubr.msk.f32.vlgmr.msra.gmra.mrb[48].mxu0 %vm355_vm0, %v7897_v33  ;;  %v6595_v33 = vld [vmem:[%s11819_s5 + $0xe8] sm:$0xff] }
 0x4b2   :  { %8690 = vmatpush3.bf16.msra.mxu0 %v8687_v43  ;;  %7930 = vmatprep.mubr.msk.f32.mxu0 %vm355_vm0, %v3130_v42  ;;  %v7988_v0 = vpop.f32.mrb[114].mxu1  ;;  %v8767_v4 = vpack.c.bf16 %v6595_v33, %v6594_v63 }
 0x4b3   :  { %8692 = vmatprep.subr.bf16.mxu0 %v8691_v17  ;;  %v3506_v51 = vpop.f32.mrb[115].mxu1 }
 0x4b5   :  { %7931 = vmatmul.mubr.msk.f32.gmra.mrb[50].mxu0 %vm355_vm0, %v7900_v39 }
 0x4b6   :  { %7933 = vmatprep.mubr.msk.f32.mxu0 %vm355_vm0, %v3140_v29  ;;  %8694 = vmatpush3.bf16.msra.mxu0 %v8691_v17  ;;  %v7991_v5 = vpop.f32.mrb[116].mxu1 }
 0x4b7   :  { %8728 = vmatprep.subr.bf16.mxu0 %v8727_v35  ;;  %v3516_v32 = vpop.f32.mrb[117].mxu1 }
 0x4b9   :  { %7934 = vmatmul.mubr.msk.f32.gmra.mrb[52].mxu0 %vm355_vm0, %v7903_v31 }
 0x4ba   :  { %7936 = vmatprep.mubr.msk.f32.mxu0 %vm355_vm0, %v3150_v1  ;;  %v7994_v25 = vpop.f32.mrb[118].mxu1 }
 0x4bb   :  { %v3526_v44 = vpop.f32.mrb[119].mxu1 }
 0x4bd   :  { %7937 = vmatmul.mubr.msk.f32.gmra.mrb[54].mxu0 %vm355_vm0, %v7906_v14 }
 0x4be   :  { %7939 = vmatprep.mubr.msk.f32.mxu0 %vm355_vm0, %v3160_v61  ;;  %v7997_v18 = vpop.f32.mrb[120].mxu1 }
 0x4bf   :  { %v3536_v11 = vpop.f32.mrb[121].mxu1 }
 0x4c1   :  { %7940 = vmatmul.mubr.msk.f32.gmra.mrb[56].mxu0 %vm355_vm0, %v7909_v10 }
 0x4c2   :  { %7942 = vmatprep.mubr.msk.f32.mxu0 %vm355_vm0, %v3170_v21  ;;  %v8000_v37 = vpop.f32.mrb[122].mxu1 }
 0x4c3   :  { %v3546_v24 = vpop.f32.mrb[123].mxu1 }
 0x4c5   :  { %7943 = vmatmul.mubr.msk.f32.gmra.mrb[58].mxu0 %vm355_vm0, %v7912_v2 }
 0x4c6   :  { %7945 = vmatprep.mubr.msk.f32.mxu0 %vm355_vm0, %v3180_v50  ;;  %v8003_v56 = vpop.f32.mrb[124].mxu1  ;;  %v6597_v50 = vld [vmem:[%s11819_s5 + $0xf8] sm:$0xff] }
 0x4c7   :  { %v3556_v48 = vpop.f32.mrb[125].mxu1 }
 0x4c9   :  { %7946 = vmatmul.mubr.msk.f32.gmra.mrb[60].mxu0 %vm355_vm0, %v7915_v49  ;;  %v6596_v49 = vld [vmem:[%s11819_s5 + $0xf0] sm:$0xff] }
 0x4ca   :  { %7948 = vmatprep.mubr.msk.f32.mxu0 %vm355_vm0, %v3190_v19  ;;  %v8006_v54 = vpop.f32.mrb[126].mxu1  ;;  %v8771_v19 = vpack.c.bf16 %v6597_v50, %v6596_v49  ;;  %v5153_v49 = vld [vmem:[%s11820_s6 + $0x28] sm:$0xff] }
 0x4cb   :  { %v3566_v57 = vpop.f32.mrb[127].mxu1 }
 0x4cd   :  { %7949 = vmatmul.mubr.msk.f32.gmra.mrb[62].mxu0 %vm355_vm0, %v7918_v20 }
 0x4ce   :  { %8015 = vmatprep.mubr.msk.f32.mxu0 %vm355_vm0, %v3496_v23  ;;  %v8073_v59 = vpop.f32.mrb[128].mxu1 }
 0x4cf   :  { %v3872_v30 = vpop.f32.mrb[129].mxu1 }
 0x4d1   :  { %8016 = vmatmul.mubr.msk.f32.vlgmr.msra.gmra.mrb[48].mxu0 %vm355_vm0, %v7985_v45  ;;  %v6631_v45 = vld [vmem:[%s11819_s5 + $0x108] sm:$0xff] }
 0x4d2   :  { %8730 = vmatpush3.bf16.msra.mxu0 %v8727_v35  ;;  %8018 = vmatprep.mubr.msk.f32.mxu0 %vm355_vm0, %v3506_v51  ;;  %v8076_v60 = vpop.f32.mrb[130].mxu1  ;;  %v8807_v23 = vpack.c.bf16 %v6631_v45, %v6630_v46  ;;  %v5556_v46 = vld [vmem:[%s11822_s8] sm:$0xff]  ;;  %v5557_v45 = vld [vmem:[%s11822_s8 + $0x8] sm:$0xff] }
 0x4d3   :  { %8732 = vmatprep.subr.bf16.mxu0 %v8731_v28  ;;  %v3882_v27 = vpop.f32.mrb[131].mxu1 }
 0x4d5   :  { %8019 = vmatmul.mubr.msk.f32.gmra.mrb[50].mxu0 %vm355_vm0, %v7988_v0 }
 0x4d6   :  { %8021 = vmatprep.mubr.msk.f32.mxu0 %vm355_vm0, %v3516_v32  ;;  %8734 = vmatpush3.bf16.msra.mxu0 %v8731_v28  ;;  %v8079_v62 = vpop.f32.mrb[132].mxu1 }
 0x4d7   :  { %8768 = vmatprep.subr.bf16.mxu0 %v8767_v4  ;;  %v3892_v39 = vpop.f32.mrb[133].mxu1 }
 0x4d9   :  { %8022 = vmatmul.mubr.msk.f32.gmra.mrb[52].mxu0 %vm355_vm0, %v7991_v5 }
 0x4da   :  { %8024 = vmatprep.mubr.msk.f32.mxu0 %vm355_vm0, %v3526_v44  ;;  %v8082_v43 = vpop.f32.mrb[134].mxu1 }
 0x4db   :  { %v3902_v42 = vpop.f32.mrb[135].mxu1 }
 0x4dd   :  { %8025 = vmatmul.mubr.msk.f32.gmra.mrb[54].mxu0 %vm355_vm0, %v7994_v25 }
 0x4de   :  { %8027 = vmatprep.mubr.msk.f32.mxu0 %vm355_vm0, %v3536_v11  ;;  %v8085_v31 = vpop.f32.mrb[136].mxu1 }
 0x4df   :  { %v3912_v29 = vpop.f32.mrb[137].mxu1 }
 0x4e1   :  { %8028 = vmatmul.mubr.msk.f32.gmra.mrb[56].mxu0 %vm355_vm0, %v7997_v18 }
 0x4e2   :  { %8030 = vmatprep.mubr.msk.f32.mxu0 %vm355_vm0, %v3546_v24  ;;  %v8088_v14 = vpop.f32.mrb[138].mxu1 }
 0x4e3   :  { %v3922_v1 = vpop.f32.mrb[139].mxu1 }
 0x4e5   :  { %8031 = vmatmul.mubr.msk.f32.gmra.mrb[58].mxu0 %vm355_vm0, %v8000_v37 }
 0x4e6   :  { %8033 = vmatprep.mubr.msk.f32.mxu0 %vm355_vm0, %v3556_v48  ;;  %v8091_v10 = vpop.f32.mrb[140].mxu1  ;;  %v6633_v48 = vld [vmem:[%s11819_s5 + $0x118] sm:$0xff] }
 0x4e7   :  { %v3932_v61 = vpop.f32.mrb[141].mxu1 }
 0x4e9   :  { %8034 = vmatmul.mubr.msk.f32.gmra.mrb[60].mxu0 %vm355_vm0, %v8003_v56  ;;  %v6632_v56 = vld [vmem:[%s11819_s5 + $0x110] sm:$0xff] }
 0x4ea   :  { %8036 = vmatprep.mubr.msk.f32.mxu0 %vm355_vm0, %v3566_v57  ;;  %v8094_v2 = vpop.f32.mrb[142].mxu1  ;;  %v8811_v57 = vpack.c.bf16 %v6633_v48, %v6632_v56 }
 0x4eb   :  { %v3942_v21 = vpop.f32.mrb[143].mxu1 }
 0x4ed   :  { %8037 = vmatmul.mubr.msk.f32.gmra.mrb[62].mxu0 %vm355_vm0, %v8006_v54 }
 0x4ee   :  { %8103 = vmatprep.mubr.msk.f32.mxu0 %vm355_vm0, %v3872_v30  ;;  %v8161_v20 = vpop.f32.mrb[144].mxu1 }
 0x4ef   :  { %v4248_v12 = vpop.f32.mrb[145].mxu1 }
 0x4f1   :  { %8104 = vmatmul.mubr.msk.f32.vlgmr.msra.gmra.mrb[48].mxu0 %vm355_vm0, %v8073_v59 }
 0x4f2   :  { %8770 = vmatpush3.bf16.msra.mxu0 %v8767_v4  ;;  %8106 = vmatprep.mubr.msk.f32.mxu0 %vm355_vm0, %v3882_v27  ;;  %v8164_v17 = vpop.f32.mrb[146].mxu1 }
 0x4f3   :  { %8772 = vmatprep.subr.bf16.mxu0 %v8771_v19  ;;  %v4258_v55 = vpop.f32.mrb[147].mxu1 }
 0x4f5   :  { %8107 = vmatmul.mubr.msk.f32.gmra.mrb[50].mxu0 %vm355_vm0, %v8076_v60 }
 0x4f6   :  { %8109 = vmatprep.mubr.msk.f32.mxu0 %vm355_vm0, %v3892_v39  ;;  %8774 = vmatpush3.bf16.msra.mxu0 %v8771_v19  ;;  %v8167_v53 = vpop.f32.mrb[148].mxu1  ;;  %v5155_v19 = vld [vmem:[%s11820_s6 + $0x38] sm:$0xff] }
 0x4f7   :  { %8808 = vmatprep.subr.bf16.mxu0 %v8807_v23  ;;  %v4268_v0 = vpop.f32.mrb[149].mxu1 }
 0x4f9   :  { %8110 = vmatmul.mubr.msk.f32.gmra.mrb[52].mxu0 %vm355_vm0, %v8079_v62 }
 0x4fa   :  { %8112 = vmatprep.mubr.msk.f32.mxu0 %vm355_vm0, %v3902_v42  ;;  %v8170_v35 = vpop.f32.mrb[150].mxu1 }
 0x4fb   :  { %v4278_v51 = vpop.f32.mrb[151].mxu1 }
 0x4fd   :  { %8113 = vmatmul.mubr.msk.f32.gmra.mrb[54].mxu0 %vm355_vm0, %v8082_v43 }
 0x4fe   :  { %8115 = vmatprep.mubr.msk.f32.mxu0 %vm355_vm0, %v3912_v29  ;;  %v8173_v5 = vpop.f32.mrb[152].mxu1  ;;  %v5148_v29 = vld [vmem:[%s11820_s6] sm:$0xff] }
 0x4ff   :  { %v4288_v32 = vpop.f32.mrb[153].mxu1 }
 0x501   :  { %8116 = vmatmul.mubr.msk.f32.gmra.mrb[56].mxu0 %vm355_vm0, %v8085_v31 }
 0x502   :  { %8118 = vmatprep.mubr.msk.f32.mxu0 %vm355_vm0, %v3922_v1  ;;  %v8176_v25 = vpop.f32.mrb[154].mxu1 }
 0x503   :  { %v4298_v44 = vpop.f32.mrb[155].mxu1 }
 0x505   :  { %8119 = vmatmul.mubr.msk.f32.gmra.mrb[58].mxu0 %vm355_vm0, %v8088_v14  ;;  %v5149_v14 = vld [vmem:[%s11820_s6 + $0x8] sm:$0xff] }
 0x506   :  { %8121 = vmatprep.mubr.msk.f32.mxu0 %vm355_vm0, %v3932_v61  ;;  %v8179_v18 = vpop.f32.mrb[156].mxu1  ;;  %v8815_v1 = vpack.c.bf16 %v5149_v14, %v5148_v29  ;;  %v5151_v61 = vld [vmem:[%s11820_s6 + $0x18] sm:$0xff] }
 0x507   :  { %v4308_v11 = vpop.f32.mrb[157].mxu1 }
 0x508   :  { %8816 = vmatprep.subr.bf16.mxu1 %v8815_v1 }
 0x509   :  { %8122 = vmatmul.mubr.msk.f32.gmra.mrb[60].mxu0 %vm355_vm0, %v8091_v10  ;;  %8818 = vmatpush3.bf16.msra.mxu1 %v8815_v1  ;;  %v5150_v10 = vld [vmem:[%s11820_s6 + $0x10] sm:$0xff] }
 0x50a   :  { %8124 = vmatprep.mubr.msk.f32.mxu0 %vm355_vm0, %v3942_v21  ;;  %v8182_v37 = vpop.f32.mrb[158].mxu1  ;;  %v5152_v21 = vld [vmem:[%s11820_s6 + $0x20] sm:$0xff] }
 0x50b   :  { %v4318_v24 = vpop.f32.mrb[159].mxu1  ;;  %v8823_v50 = vpack.c.bf16 %v5153_v49, %v5152_v21 }
 0x50d   :  { %8125 = vmatmul.mubr.msk.f32.gmra.mrb[62].mxu0 %vm355_vm0, %v8094_v2  ;;  %v8819_v2 = vpack.c.bf16 %v5151_v61, %v5150_v10 }
 0x50e   :  { %8191 = vmatprep.mubr.msk.f32.mxu0 %vm355_vm0, %v4248_v12  ;;  %v8249_v54 = vpop.f32.mrb[160].mxu1 }
 0x50f   :  { %v4624_v40 = vpop.f32.mrb[161].mxu1  ;;  %8820 = vmatprep.subr.bf16.mxu1 %v8819_v2 }
 0x510   :  { %8822 = vmatpush3.bf16.msra.mxu1 %v8819_v2 }
 0x511   :  { %8192 = vmatmul.mubr.msk.f32.vlgmr.msra.gmra.mrb[48].mxu0 %vm355_vm0, %v8161_v20  ;;  %8824 = vmatprep.subr.bf16.mxu1 %v8823_v50  ;;  %v5154_v20 = vld [vmem:[%s11820_s6 + $0x30] sm:$0xff] }
 0x512   :  { %8810 = vmatpush3.bf16.msra.mxu0 %v8807_v23  ;;  %8194 = vmatprep.mubr.msk.f32.mxu0 %vm355_vm0, %v4258_v55  ;;  %v8252_v38 = vpop.f32.mrb[162].mxu1  ;;  %v8827_v12 = vpack.c.bf16 %v5155_v19, %v5154_v20  ;;  %v11201_v23 = vld [vmem:[%s11826_s12] ss:$0 sm:$0xff] }
 0x513   :  { %8812 = vmatprep.subr.bf16.mxu0 %v8811_v57  ;;  %v4634_v59 = vpop.f32.mrb[163].mxu1 }
 0x514   :  { %8826 = vmatpush3.bf16.msra.mxu1 %v8823_v50 }
 0x515   :  { %8195 = vmatmul.mubr.msk.f32.gmra.mrb[50].mxu0 %vm355_vm0, %v8164_v17  ;;  %8828 = vmatprep.subr.bf16.mxu1 %v8827_v12  ;;  %v11195_v17 = vpack.c.bf16 %v5557_v45, %v5556_v46 }
 0x516   :  { %8197 = vmatprep.mubr.msk.f32.mxu0 %vm355_vm0, %v4268_v0  ;;  %8814 = vmatpush3.bf16.msra.mxu0 %v8811_v57  ;;  %v8255_v28 = vpop.f32.mrb[164].mxu1 }
 0x517   :  { %v4644_v30 = vpop.f32.mrb[165].mxu1 }
 0x518   :  { %8830 = vmatpush3.bf16.msra.mxu1 %v8827_v12 }
 0x519   :  { %8198 = vmatmul.mubr.msk.f32.gmra.mrb[52].mxu0 %vm355_vm0, %v8167_v53  ;;  %8832 = vmatprep.subr.bf16.mxu1 %v11195_v17 }
 0x51a   :  { %8200 = vmatprep.mubr.msk.f32.mxu0 %vm355_vm0, %v4278_v51  ;;  %v8258_v63 = vpop.f32.mrb[166].mxu1 }
 0x51b   :  { %v4654_v33 = vpop.f32.mrb[167].mxu1 }
 0x51d   :  { %8201 = vmatmul.mubr.msk.f32.gmra.mrb[54].mxu0 %vm355_vm0, %v8170_v35 }
 0x51e   :  { %8203 = vmatprep.mubr.msk.f32.mxu0 %vm355_vm0, %v4288_v32  ;;  %v8261_v60 = vpop.f32.mrb[168].mxu1 }
 0x51f   :  { %v4664_v4 = vpop.f32.mrb[169].mxu1 }
 0x521   :  { %8204 = vmatmul.mubr.msk.f32.gmra.mrb[56].mxu0 %vm355_vm0, %v8173_v5 }
 0x522   :  { %8206 = vmatprep.mubr.msk.f32.mxu0 %vm355_vm0, %v4298_v44  ;;  %v8264_v27 = vpop.f32.mrb[170].mxu1 }
 0x523   :  { %v4674_v62 = vpop.f32.mrb[171].mxu1 }
 0x525   :  { %8207 = vmatmul.mubr.msk.f32.gmra.mrb[58].mxu0 %vm355_vm0, %v8176_v25 }
 0x526   :  { %8209 = vmatprep.mubr.msk.f32.mxu0 %vm355_vm0, %v4308_v11  ;;  %v8267_v39 = vpop.f32.mrb[172].mxu1 }
 0x527   :  { %v4684_v43 = vpop.f32.mrb[173].mxu1 }
 0x529   :  { %8210 = vmatmul.mubr.msk.f32.gmra.mrb[60].mxu0 %vm355_vm0, %v8179_v18 }
 0x52a   :  { %8212 = vmatprep.mubr.msk.f32.mxu0 %vm355_vm0, %v4318_v24  ;;  %v8270_v42 = vpop.f32.mrb[174].mxu1 }
 0x52b   :  { %v4694_v31 = vpop.f32.mrb[175].mxu1 }
 0x52d   :  { %8213 = vmatmul.mubr.msk.f32.gmra.mrb[62].mxu0 %vm355_vm0, %v8182_v37 }
 0x52e   :  { %8279 = vmatprep.mubr.msk.f32.mxu0 %vm355_vm0, %v4624_v40 }
 0x531   :  { %8280 = vmatmul.mubr.msk.f32.vlgmr.msra.gmra.mrb[48].mxu0 %vm355_vm0, %v8249_v54 }
 0x532   :  { %8282 = vmatprep.mubr.msk.f32.mxu0 %vm355_vm0, %v4634_v59 }
 0x535   :  { %8283 = vmatmul.mubr.msk.f32.gmra.mrb[50].mxu0 %vm355_vm0, %v8252_v38 }
 0x536   :  { %8285 = vmatprep.mubr.msk.f32.mxu0 %vm355_vm0, %v4644_v30 }
 0x539   :  { %8286 = vmatmul.mubr.msk.f32.gmra.mrb[52].mxu0 %vm355_vm0, %v8255_v28 }
 0x53a   :  { %8288 = vmatprep.mubr.msk.f32.mxu0 %vm355_vm0, %v4654_v33 }
 0x53d   :  { %8289 = vmatmul.mubr.msk.f32.gmra.mrb[54].mxu0 %vm355_vm0, %v8258_v63 }
 0x53e   :  { %8291 = vmatprep.mubr.msk.f32.mxu0 %vm355_vm0, %v4664_v4 }
 0x541   :  { %8292 = vmatmul.mubr.msk.f32.gmra.mrb[56].mxu0 %vm355_vm0, %v8261_v60 }
 0x542   :  { %8294 = vmatprep.mubr.msk.f32.mxu0 %vm355_vm0, %v4674_v62 }
 0x545   :  { %8295 = vmatmul.mubr.msk.f32.gmra.mrb[58].mxu0 %vm355_vm0, %v8264_v27 }
 0x546   :  { %8297 = vmatprep.mubr.msk.f32.mxu0 %vm355_vm0, %v4684_v43 }
 0x549   :  { %8298 = vmatmul.mubr.msk.f32.gmra.mrb[60].mxu0 %vm355_vm0, %v8267_v39 }
 0x54a   :  { %8300 = vmatprep.mubr.msk.f32.mxu0 %vm355_vm0, %v4694_v31 }
 0x54d   :  { %8301 = vmatmul.mubr.msk.f32.gmra.mrb[62].mxu0 %vm355_vm0, %v8270_v42 }
 0x604   :  { %v8281_v55 = vpop.f32.mrb[48].mxu0 }
 0x605   :  { %v11204_v53 = vadd.f32 %v8281_v55, %v11201_v23  ;;  %v4822_v0 = vpop.f32.mrb[49].mxu0 }
 0x606   :  { %v11207_v35 = vadd.f32 %v11201_v23, %v4822_v0 }
 0x607   :  { %v4941_v51 = vmin.f32 %v11204_v53, 20.0  ;;  %vm5085_vm0 = vcmp.gt.f32.partialorder %v11204_v53, 20.0 }
 0x608   :  { %v4940_v5 = vmin.f32 %v11207_v35, 20.0  ;;  %v8284_v32 = vpop.f32.mrb[50].mxu0  ;;  %vm5084_vm8 = vcmp.gt.f32.partialorder %v11207_v35, 20.0 }
 0x609   :  { %v4958_v25 = vmul.f32 1.442695, %v4941_v51  ;;  %v11212_v44 = vadd.f32 %v8284_v32, %v11201_v23  ;;  %v4832_v18 = vpop.f32.mrb[51].mxu0 }
 0x60a   :  { %v4956_v11 = vmul.f32 1.442695, %v4940_v5  ;;  %v11215_v37 = vadd.f32 %v11201_v23, %v4832_v18 }
 0x60b   :  { %9261 = vpow2.f32 %v4958_v25  ;;  %v4943_v24 = vmin.f32 %v11212_v44, 20.0  ;;  %vm5087_vm10 = vcmp.gt.f32.partialorder %v11212_v44, 20.0 }
 0x60c   :  { %9263 = vpow2.f32 %v4956_v11  ;;  %v4942_v56 = vmin.f32 %v11215_v37, 20.0  ;;  %v8287_v48 = vpop.f32.mrb[52].mxu0  ;;  %vm5086_vm9 = vcmp.gt.f32.partialorder %v11215_v37, 20.0 }
 0x60d   :  { %v4962_v54 = vmul.f32 1.442695, %v4943_v24  ;;  %v11220_v57 = vadd.f32 %v8287_v48, %v11201_v23  ;;  %v4842_v40 = vpop.f32.mrb[53].mxu0 }
 0x60e   :  { %v4960_v38 = vmul.f32 1.442695, %v4942_v56  ;;  %v11223_v59 = vadd.f32 %v11201_v23, %v4842_v40 }
 0x60f   :  { %9265 = vpow2.f32 %v4962_v54  ;;  %v4945_v28 = vmin.f32 %v11220_v57, 20.0  ;;  %vm5089_vm11 = vcmp.gt.f32.partialorder %v11220_v57, 20.0 }
 0x610   :  { %9267 = vpow2.f32 %v4960_v38  ;;  %v4944_v30 = vmin.f32 %v11223_v59, 20.0  ;;  %v8290_v63 = vpop.f32.mrb[54].mxu0  ;;  %vm5088_vm12 = vcmp.gt.f32.partialorder %v11223_v59, 20.0 }
 0x611   :  { %v4966_v33 = vmul.f32 1.442695, %v4945_v28  ;;  %v11228_v60 = vadd.f32 %v8290_v63, %v11201_v23  ;;  %v4852_v4 = vpop.f32.mrb[55].mxu0 }
 0x612   :  { %v4964_v27 = vmul.f32 1.442695, %v4944_v30  ;;  %v11231_v62 = vadd.f32 %v11201_v23, %v4852_v4 }
 0x613   :  { %9269 = vpow2.f32 %v4966_v33  ;;  %v4947_v39 = vmin.f32 %v11228_v60, 20.0  ;;  %vm5091_vm14 = vcmp.gt.f32.partialorder %v11228_v60, 20.0 }
 0x614   :  { %9271 = vpow2.f32 %v4964_v27  ;;  %v4946_v43 = vmin.f32 %v11231_v62, 20.0  ;;  %v8293_v42 = vpop.f32.mrb[56].mxu0  ;;  %vm5090_vm13 = vcmp.gt.f32.partialorder %v11231_v62, 20.0 }
 0x615   :  { %v9262_v31 = vpop.eup %9261  ;;  %v4970_v29 = vmul.f32 1.442695, %v4947_v39  ;;  %v11236_v14 = vadd.f32 %v8293_v42, %v11201_v23  ;;  %v4862_v1 = vpop.f32.mrb[57].mxu0 }
 0x616   :  { %v9264_v10 = vpop.eup %9263  ;;  %v4989_v61 = vadd.f32 1.0, %v9262_v31  ;;  %v4968_v2 = vmul.f32 1.442695, %v4946_v43  ;;  %v11239_v21 = vadd.f32 %v11201_v23, %v4862_v1  ;;  %v5558_v31 = vld [vmem:[%s11822_s8 + $0x10] sm:$0xff] }
 0x617   :  { %v4988_v49 = vadd.f32 1.0, %v9264_v10  ;;  %9273 = vpow2.f32 %v4970_v29  ;;  %v4949_v50 = vmin.f32 %v11236_v14, 20.0  ;;  %v5559_v29 = vld [vmem:[%s11822_s8 + $0x18] sm:$0xff]  ;;  %vm5093_vm1 = vcmp.gt.f32.partialorder %v11236_v14, 20.0 }
 0x618   :  { %v5005_v20 = vmul.f32 %v4989_v61, %v4989_v61  ;;  %9275 = vpow2.f32 %v4968_v2  ;;  %v4948_v19 = vmin.f32 %v11239_v21, 20.0  ;;  %v8296_v12 = vpop.f32.mrb[58].mxu0  ;;  %v5560_v2 = vld [vmem:[%s11822_s8 + $0x20] sm:$0xff]  ;;  %vm5092_vm15 = vcmp.gt.f32.partialorder %v11239_v21, 20.0 }
 0x619   :  { %v9266_v46 = vpop.eup %9265  ;;  %v5004_v45 = vmul.f32 %v4988_v49, %v4988_v49  ;;  %v4974_v55 = vmul.f32 1.442695, %v4949_v50  ;;  %v11244_v0 = vadd.f32 %v8296_v12, %v11201_v23  ;;  %v4872_v51 = vpop.f32.mrb[59].mxu0  ;;  %v5561_v49 = vld [vmem:[%s11822_s8 + $0x28] sm:$0xff] }
 0x61a   :  { %v9268_v5 = vpop.eup %9267  ;;  %v5037_v32 = vadd.f32 1.0, %v5005_v20  ;;  %v4991_v25 = vadd.f32 1.0, %v9266_v46  ;;  %v4972_v18 = vmul.f32 1.442695, %v4948_v19  ;;  %v11248_v28 = vadd.f32 %v11201_v23, %v4872_v51 }
 0x61b   :  { %v5036_v11 = vadd.f32 1.0, %v5004_v45  ;;  %v4990_v24 = vadd.f32 1.0, %v9268_v5  ;;  %9277 = vpow2.f32 %v4974_v55  ;;  %v4951_v48 = vmin.f32 %v11244_v0, 20.0 }
 0x61c   :  { %9279 = vrcp.f32 %v5037_v32  ;;  %v5007_v56 = vmul.f32 %v4991_v25, %v4991_v25  ;;  %v8299_v54 = vpop.f32.mrb[60].mxu0  ;;  %v4950_v10 = vmin.f32 %v11248_v28, 20.0  ;;  %v11267_v32 = vpack.c.bf16 %v5559_v29, %v5558_v31 }
 0x61d   :  { %v9270_v40 = vpop.eup %9269  ;;  %9281 = vrcp.f32 %v5036_v11  ;;  %v5006_v38 = vmul.f32 %v4990_v24, %v4990_v24  ;;  %v11251_v30 = vadd.f32 %v8299_v54, %v11201_v23  ;;  %v4882_v63 = vpop.f32.mrb[61].mxu0  ;;  %v4978_v42 = vmul.f32 1.442695, %v4951_v48 }
 0x61e   :  { %v9272_v33 = vpop.eup %9271  ;;  %v5039_v4 = vadd.f32 1.0, %v5007_v56  ;;  %v4993_v27 = vadd.f32 1.0, %v9270_v40  ;;  %9283 = vpow2.f32 %v4972_v18  ;;  %v4976_v11 = vmul.f32 1.442695, %v4950_v10 }
 0x61f   :  { %v5038_v39 = vadd.f32 1.0, %v5006_v38  ;;  %v4992_v43 = vadd.f32 1.0, %v9272_v33  ;;  %v4953_v12 = vmin.f32 %v11251_v30, 20.0  ;;  %v11269_v24 = vpack.c.bf16 %v5561_v49, %v5560_v2 }
 0x620   :  { %9285 = vrcp.f32 %v5039_v4  ;;  %v5009_v1 = vmul.f32 %v4993_v27, %v4993_v27  ;;  %v8302_v61 = vpop.f32.mrb[62].mxu0  ;;  %v11273_v40 = vadd.f32 %v11201_v23, %v4882_v63  ;;  %v6652_v4 = vadd.f32 -1.0, %v5005_v20 }
 0x621   :  { %v9274_v50 = vpop.eup %9273  ;;  %9287 = vrcp.f32 %v5038_v39  ;;  %v5008_v19 = vmul.f32 %v4992_v43, %v4992_v43  ;;  %v4892_v46 = vpop.f32.mrb[63].mxu0  ;;  %v4982_v54 = vmul.f32 1.442695, %v4953_v12  ;;  %v6651_v27 = vadd.f32 -1.0, %v5004_v45 }
 0x622   :  { %v9276_v55 = vpop.eup %9275  ;;  %v5041_v51 = vadd.f32 1.0, %v5009_v1  ;;  %v4995_v5 = vadd.f32 1.0, %v9274_v50  ;;  %9289 = vpow2.f32 %v4978_v42  ;;  %v6654_v42 = vadd.f32 -1.0, %v5007_v56 }
 0x623   :  { %v5040_v25 = vadd.f32 1.0, %v5008_v19  ;;  %v4994_v18 = vadd.f32 1.0, %v9276_v55  ;;  %v11277_v50 = vadd.f32 %v8302_v61, %v11201_v23  ;;  %v4952_v45 = vmin.f32 %v11273_v40, 20.0 }
 0x624   :  { %9291 = vrcp.f32 %v5041_v51  ;;  %v5011_v48 = vmul.f32 %v4995_v5, %v4995_v5  ;;  %v6653_v55 = vadd.f32 -1.0, %v5006_v38  ;;  %vm5095_vm3 = vcmp.gt.f32.partialorder %v11244_v0, 20.0 }
 0x625   :  { %v9278_v33 = vpop.eup %9277  ;;  %9293 = vrcp.f32 %v5040_v25  ;;  %v5010_v39 = vmul.f32 %v4994_v18, %v4994_v18  ;;  %v6656_v25 = vadd.f32 -1.0, %v5009_v1  ;;  %v4980_v61 = vmul.f32 1.442695, %v4952_v45 }
 0x626   :  { %v9280_v43 = vpop.eup %9279  ;;  %v5043_v31 = vadd.f32 1.0, %v5011_v48  ;;  %v4997_v29 = vadd.f32 1.0, %v9278_v33  ;;  %9295 = vpow2.f32 %v4976_v11  ;;  %v11286_v11 = vadd.f32 %v11201_v23, %v4892_v46 }
 0x627   :  { %v9282_v10 = vpop.eup %9281  ;;  %v5069_v2 = vmul.f32 %v9280_v43, %v6652_v4  ;;  %v5042_v49 = vadd.f32 1.0, %v5010_v39  ;;  %9297 = vpow2.f32 %v4982_v54  ;;  %v6655_v4 = vadd.f32 -1.0, %v5008_v19 }
 0x628   :  { %v9284_v63 = vpop.eup %9283  ;;  %v5068_v12 = vmul.f32 %v9282_v10, %v6651_v27  ;;  %9299 = vrcp.f32 %v5043_v31  ;;  %v11279_v20 = vmul.f32 %v4997_v29, %v4997_v29  ;;  %v4955_v38 = vmin.f32 %v11277_v50, 20.0 }
 0x629   :  { %v5101_v56 = vmul.f32 %v5069_v2, %v11204_v53  ;;  %9301 = vrcp.f32 %v5042_v49  ;;  %v4996_v51 = vadd.f32 1.0, %v9284_v63  ;;  %v6658_v10 = vadd.f32 -1.0, %v5011_v48 }
 0x62a   :  { %v9286_v5 = vpop.eup %9285  ;;  %v5045_v18 = vadd.f32 1.0, %v11279_v20  ;;  %v5100_v31 = vmul.f32 %v5068_v12, %v11207_v35  ;;  %v6657_v23 = vadd.f32 -1.0, %v5010_v39  ;;  %v4986_v19 = vmul.f32 1.442695, %v4955_v38 }
 0x62b   :  { %v9288_v54 = vpop.eup %9287  ;;  %v5071_v33 = vmul.f32 %v9286_v5, %v6654_v42  ;;  %v5012_v27 = vmul.f32 %v4996_v51, %v4996_v51  ;;  %v5117_v1 = vsel %vm5085_vm0, %v11204_v53, %v5101_v56  ;;  %v4954_v63 = vmin.f32 %v11286_v11, 20.0 }
 0x62c   :  { %v9290_v43 = vpop.eup %9289  ;;  %v5070_v29 = vmul.f32 %v9288_v54, %v6653_v55  ;;  %9303 = vrcp.f32 %v5045_v18  ;;  %v5116_v51 = vsel %vm5084_vm8, %v11207_v35, %v5100_v31  ;;  %v5133_v18 = vadd.f32 %v5117_v1, %v9998_v6 }
 0x62d   :  { %v5044_v46 = vadd.f32 1.0, %v5012_v27  ;;  %v4999_v2 = vadd.f32 1.0, %v9290_v43  ;;  %v5103_v49 = vmul.f32 %v5071_v33, %v11212_v44  ;;  %9305 = vpow2.f32 %v4980_v61 }
 0x62e   :  { %v9292_v42 = vpop.eup %9291  ;;  %v5102_v12 = vmul.f32 %v5070_v29, %v11215_v37  ;;  %v4984_v56 = vmul.f32 1.442695, %v4954_v63  ;;  %vm5094_vm4 = vcmp.gt.f32.partialorder %v11248_v28, 20.0  ;;  %vm5097_vm5 = vcmp.gt.f32.partialorder %v11251_v30, 20.0 }
 0x62f   :  { %v9294_v45 = vpop.eup %9293  ;;  %v5073_v55 = vmul.f32 %v9292_v42, %v6656_v25  ;;  %9307 = vrcp.f32 %v5044_v46  ;;  %v11298_v48 = vmul.f32 %v4999_v2, %v4999_v2  ;;  %vm5096_vm6 = vcmp.gt.f32.partialorder %v11273_v40, 20.0 }
 0x630   :  { %v9296_v53 = vpop.eup %9295  ;;  %v5072_v39 = vmul.f32 %v9294_v45, %v6655_v4  ;;  %9309 = vpow2.f32 %v4986_v19  ;;  %v5132_v4 = vadd.f32 %v5116_v51, %v9986_v7  ;;  %v5118_v6 = vsel %vm5086_vm9, %v11215_v37, %v5102_v12  ;;  %v5563_v45 = vld [vmem:[%s11822_s8 + $0x38] sm:$0xff] }
 0x631   :  { %v9298_v5 = vpop.eup %9297  ;;  %v5105_v61 = vmul.f32 %v5073_v55, %v11220_v57  ;;  %v5047_v25 = vadd.f32 1.0, %v11298_v48  ;;  %v4998_v54 = vadd.f32 1.0, %v9296_v53  ;;  %9311 = vpow2.f32 %v4984_v56 }
 0x632   :  { %v9300_v33 = vpop.eup %9299  ;;  %v5104_v38 = vmul.f32 %v5072_v39, %v11223_v59  ;;  %v5001_v43 = vadd.f32 1.0, %v9298_v5  ;;  %8319 = vmatprep.mubr.msk.f32.mxu1 %vm781_vm2, %v5132_v4  ;;  %v5134_v1 = vadd.f32 %v5118_v6, %v10020_v41  ;;  %v5119_v7 = vsel %vm5087_vm10, %v11212_v44, %v5103_v49 }
 0x633   :  { %v9302_v29 = vpop.eup %9301  ;;  %v5075_v46 = vmul.f32 %v9300_v33, %v6658_v10  ;;  %9313 = vrcp.f32 %v5047_v25  ;;  %v11308_v2 = vmul.f32 %v4998_v54, %v4998_v54  ;;  %v6660_v10 = vadd.f32 -1.0, %v11279_v20  ;;  %8320 = vmatmul.mubr.msk.f32.vlgmr.msra.gmra.mrb[176].mxu1 %vm781_vm2, %v5133_v18 }
 0x634   :  { %v5074_v35 = vmul.f32 %v9302_v29, %v6657_v23  ;;  %v11313_v31 = vmul.f32 %v5001_v43, %v5001_v43  ;;  %v6659_v19 = vadd.f32 -1.0, %v5012_v27  ;;  %8322 = vmatprep.mubr.msk.f32.mxu1 %vm781_vm2, %v5134_v1  ;;  %v5120_v44 = vsel %vm5088_vm12, %v11223_v59, %v5104_v38  ;;  %8834 = vmatpush3.bf16.msra.mxu1 %v11195_v17  ;;  %v5562_v27 = vld [vmem:[%s11822_s8 + $0x30] sm:$0xff] }
 0x635   :  { %v5046_v42 = vadd.f32 1.0, %v11308_v2  ;;  %v5107_v49 = vmul.f32 %v5075_v46, %v11228_v60  ;;  %v5135_v20 = vadd.f32 %v5119_v7, %v10030_v58  ;;  %v5136_v63 = vadd.f32 %v5120_v44, %v10052_v3  ;;  %8836 = vmatprep.subr.bf16.mxu1 %v11267_v32 }
 0x636   :  { %v9304_v37 = vpop.eup %9303  ;;  %v5106_v23 = vmul.f32 %v5074_v35, %v11231_v62  ;;  %v5049_v41 = vadd.f32 1.0, %v11313_v31  ;;  %v5121_v17 = vsel %vm5089_vm11, %v11220_v57, %v5105_v61  ;;  %v8843_v51 = vpack.c.bf16 %v5563_v45, %v5562_v27 }
 0x637   :  { %9315 = vrcp.f32 %v5046_v42  ;;  %v9306_v59 = vpop.eup %9305  ;;  %v5077_v12 = vmul.f32 %v9304_v37, %v6660_v10  ;;  %8323 = vmatmul.mubr.msk.f32.gmra.mrb[178].mxu1 %vm781_vm2, %v5135_v20  ;;  %v5137_v18 = vadd.f32 %v5121_v17, %v10045_v13  ;;  %v6662_v54 = vadd.f32 -1.0, %v11298_v48 }
 0x638   :  { %9317 = vrcp.f32 %v5049_v41  ;;  %v5122_v58 = vsel %vm5090_vm13, %v11231_v62, %v5106_v23  ;;  %v5000_v55 = vadd.f32 1.0, %v9306_v59  ;;  %8325 = vmatprep.mubr.msk.f32.mxu1 %vm781_vm2, %v5136_v63  ;;  %8838 = vmatpush3.bf16.msra.mxu1 %v11267_v32  ;;  %v6661_v46 = vadd.f32 -1.0, %v11308_v2 }
 0x639   :  { %v9308_v3 = vpop.eup %9307  ;;  %v5138_v56 = vadd.f32 %v5122_v58, %v10075_v36  ;;  %8840 = vmatprep.subr.bf16.mxu1 %v11269_v24  ;;  %v5109_v61 = vmul.f32 %v5077_v12, %v11236_v14  ;;  %v5123_v36 = vsel %vm5091_vm14, %v11228_v60, %v5107_v49  ;;  %vm5099_vm7 = vcmp.gt.f32.partialorder %v11277_v50, 20.0 }
 0x63a   :  { %v9310_v53 = vpop.eup %9309  ;;  %v5076_v39 = vmul.f32 %v9308_v3, %v6659_v19  ;;  %v5016_v57 = vmul.f32 %v5000_v55, %v5000_v55  ;;  %v5139_v29 = vadd.f32 %v5123_v36, %v10069_v26  ;;  %v6664_v26 = vadd.f32 -1.0, %v11313_v31  ;;  %v5565_v55 = vpop.permute.xlu0 %5564  ;;  %v5549_v36 = vld [vmem:[%s11821_s7 + $0x8] sm:$0xff] }
 0x63b   :  { %v5003_v5 = vadd.f32 1.0, %v9310_v53  ;;  %v9312_v62 = vpop.eup %9311  ;;  %8326 = vmatmul.mubr.msk.f32.gmra.mrb[180].mxu1 %vm781_vm2, %v5137_v18  ;;  %v5125_v35 = vsel %vm5093_vm1, %v11236_v14, %v5109_v61  ;;  %vm5098_vm0 = vcmp.gt.f32.partialorder %v11286_v11, 20.0  ;;  %v5569_v53 = vpop.permute.xlu1 %5568 }
 0x63c   :  { %v5108_v25 = vmul.f32 %v5076_v39, %v11239_v21  ;;  %v5048_v32 = vadd.f32 1.0, %v5016_v57  ;;  %v5002_v43 = vadd.f32 1.0, %v9312_v62  ;;  %8328 = vmatprep.mubr.msk.f32.mxu1 %vm781_vm2, %v5138_v56  ;;  %8842 = vmatpush3.bf16.msra.mxu1 %v11269_v24  ;;  %v5141_v2 = vadd.f32 %v5125_v35, %v10087_v47 }
 0x63d   :  { %v9314_v33 = vpop.eup %9313  ;;  %v5019_v38 = vmul.f32 %v5003_v5, %v5003_v5  ;;  %8844 = vmatprep.subr.bf16.mxu1 %v8843_v51  ;;  %v6663_v19 = vadd.f32 -1.0, %v5016_v57 }
 0x63e   :  { %v5079_v13 = vmul.f32 %v9314_v33, %v6662_v54  ;;  %v5124_v4 = vsel %vm5092_vm15, %v11239_v21, %v5108_v25  ;;  %9319 = vrcp.f32 %v5048_v32  ;;  %v5018_v60 = vmul.f32 %v5002_v43, %v5002_v43  ;;  %v5548_v54 = vld [vmem:[%s11821_s7] sm:$0xff]  ;;  %v5550_v32 = vld [vmem:[%s11821_s7 + $0x10] sm:$0xff] }
 0x63f   :  { %v5051_v48 = vadd.f32 1.0, %v5019_v38  ;;  %v5140_v6 = vadd.f32 %v5124_v4, %v10093_v52  ;;  %8329 = vmatmul.mubr.msk.f32.gmra.mrb[182].mxu1 %vm781_vm2, %v5139_v29  ;;  %v6666_v49 = vadd.f32 -1.0, %v5019_v38  ;;  %v8847_v33 = vpack.c.bf16 %v5549_v36, %v5548_v54  ;;  %v5551_v38 = vld [vmem:[%s11821_s7 + $0x18] sm:$0xff]  ;;  %v5553_v4 = vld [vmem:[%s11821_s7 + $0x28] sm:$0xff] }
 0x640   :  { %v5111_v7 = vmul.f32 %v5079_v13, %v11244_v0  ;;  %v5050_v10 = vadd.f32 1.0, %v5018_v60  ;;  %8846 = vmatpush3.bf16.msra.mxu1 %v8843_v51  ;;  %v6665_v63 = vadd.f32 -1.0, %v5018_v60  ;;  %v8851_v43 = vpack.c.bf16 %v5551_v38, %v5550_v32  ;;  %v5552_v13 = vld [vmem:[%s11821_s7 + $0x20] sm:$0xff]  ;;  %v5554_v60 = vld [vmem:[%s11821_s7 + $0x30] sm:$0xff]  ;;  %v5555_v29 = vld [vmem:[%s11821_s7 + $0x38] sm:$0xff] }
 0x641   :  { %v9316_v1 = vpop.eup %9315  ;;  %9321 = vrcp.f32 %v5051_v48  ;;  %8331 = vmatprep.mubr.msk.f32.mxu1 %vm781_vm2, %v5140_v6  ;;  %8848 = vmatprep.subr.bf16.mxu0 %v8847_v33  ;;  %v8855_v48 = vpack.c.bf16 %v5553_v4, %v5552_v13  ;;  %v11445_v6 = vld [vmem:[%s11827_s13] ss:$0 sm:$0xff] }
 0x642   :  { %v9318_v21 = vpop.eup %9317  ;;  %v5078_v24 = vmul.f32 %v9316_v1, %v6661_v46  ;;  %9323 = vrcp.f32 %v5050_v10  ;;  %v5127_v42 = vsel %vm5095_vm3, %v11244_v0, %v5111_v7  ;;  %8863 = vmatprep.subr.bf16.mxu1 %v8847_v33  ;;  %8850 = vmatpush3.bf16.msra.mxu0 %v8847_v33  ;;  %v8859_v46 = vpack.c.bf16 %v5555_v29, %v5554_v60 }
 0x643   :  { %v5081_v14 = vmul.f32 %v9318_v21, %v6664_v26  ;;  %8332 = vmatmul.mubr.msk.f32.gmra.mrb[184].mxu1 %vm781_vm2, %v5141_v2  ;;  %v5143_v31 = vadd.f32 %v5127_v42, %v10105_v15  ;;  %8852 = vmatprep.subr.bf16.mxu0 %v8851_v43 }
 0x644   :  { %v5110_v52 = vmul.f32 %v5078_v24, %v11248_v28 }
 0x645   :  { %v5113_v47 = vmul.f32 %v5081_v14, %v11251_v30 }
 0x646   :  { %v5126_v37 = vsel %vm5094_vm4, %v11248_v28, %v5110_v52  ;;  %8854 = vmatpush3.bf16.msra.mxu0 %v8851_v43 }
 0x647   :  { %v5142_v23 = vadd.f32 %v5126_v37, %v10111_v16  ;;  %v5129_v15 = vsel %vm5097_vm5, %v11251_v30, %v5113_v47  ;;  %8856 = vmatprep.subr.bf16.mxu0 %v8855_v48 }
 0x648   :  { %v9320_v41 = vpop.eup %9319  ;;  %v5145_v58 = vadd.f32 %v5129_v15, %v10123_v22  ;;  %v5567_v22 = vpop.permute.xlu0 %5566 }
 0x649   :  { %8334 = vmatprep.mubr.msk.f32.mxu1 %vm781_vm2, %v5142_v23  ;;  %v5080_v44 = vmul.f32 %v9320_v41, %v6663_v19 }
 0x64a   :  { %8335 = vmatmul.mubr.msk.f32.gmra.mrb[186].mxu1 %vm781_vm2, %v5143_v31  ;;  %8858 = vmatpush3.bf16.msra.mxu0 %v8855_v48 }
 0x64b   :  { %v9322_v20 = vpop.eup %9321  ;;  %v5112_v0 = vmul.f32 %v5080_v44, %v11273_v40  ;;  %8860 = vmatprep.subr.bf16.mxu0 %v8859_v46 }
 0x64c   :  { %v5083_v28 = vmul.f32 %v9322_v20, %v6666_v49  ;;  %v9324_v16 = vpop.eup %9323  ;;  %v5573_v39 = vpop.permute.xlu0 %5572 }
 0x64d   :  { %v5082_v45 = vmul.f32 %v9324_v16, %v6665_v63  ;;  %v5128_v59 = vsel %vm5096_vm6, %v11273_v40, %v5112_v0 }
 0x64e   :  { %v5115_v27 = vmul.f32 %v5083_v28, %v11277_v50  ;;  %v5144_v12 = vadd.f32 %v5128_v59, %v10129_v8  ;;  %8862 = vmatpush3.bf16.msra.mxu0 %v8859_v46 }
 0x64f   :  { %v5114_v17 = vmul.f32 %v5082_v45, %v11286_v11 }
 0x650   :  { %8337 = vmatprep.mubr.msk.f32.mxu1 %vm781_vm2, %v5144_v12  ;;  %v5131_v3 = vsel %vm5099_vm7, %v11277_v50, %v5115_v27  ;;  %v5571_v50 = vpop.permute.xlu1 %5570 }
 0x651   :  { %8338 = vmatmul.mubr.msk.f32.gmra.mrb[188].mxu1 %vm781_vm2, %v5145_v58  ;;  %v5130_v30 = vsel %vm5098_vm0, %v11286_v11, %v5114_v17  ;;  %v5147_v8 = vadd.f32 %v5131_v3, %v10141_v9  ;;  %v5577_v9 = vpop.permute.xlu0 %5576 }
 0x652   :  { %v5146_v40 = vadd.f32 %v5130_v30, %v10147_v34 }
 0x654   :  { %8340 = vmatprep.mubr.msk.f32.mxu1 %vm781_vm2, %v5146_v40  ;;  %v5575_v34 = vpop.permute.xlu1 %5574 }
 0x655   :  { %8341 = vmatmul.mubr.msk.f32.gmra.mrb[190].mxu1 %vm781_vm2, %v5147_v8  ;;  %v5581_v56 = vpop.permute.xlu0 %5580 }
 0x656   :  { %8359 = vmatprep.mubr.msk.f32.mxu1 %vm781_vm2, %v5565_v55 }
 0x658   :  { %v5579_v11 = vpop.permute.xlu1 %5578 }
 0x659   :  { %8360 = vmatmul.mubr.msk.f32.vlgmr.msra.gmra.mrb[192].mxu1 %vm781_vm2, %v5567_v22  ;;  %v5585_v57 = vpop.permute.xlu0 %5584 }
 0x65a   :  { %8362 = vmatprep.mubr.msk.f32.mxu1 %vm781_vm2, %v5569_v53  ;;  %8867 = vmatpush3.bf16.msra.mxu1 %v8847_v33 }
 0x65b   :  { %8864 = vmatprep.subr.bf16.mxu1 %v8851_v43 }
 0x65c   :  { %v5583_v51 = vpop.permute.xlu1 %5582 }
 0x65d   :  { %8363 = vmatmul.mubr.msk.f32.gmra.mrb[194].mxu1 %vm781_vm2, %v5571_v50  ;;  %v5589_v18 = vpop.permute.xlu0 %5588 }
 0x65e   :  { %8365 = vmatprep.mubr.msk.f32.mxu1 %vm781_vm2, %v5573_v39  ;;  %8868 = vmatpush3.bf16.msra.mxu1 %v8851_v43 }
 0x65f   :  { %8865 = vmatprep.subr.bf16.mxu1 %v8855_v48 }
 0x660   :  { %v5587_v5 = vpop.permute.xlu1 %5586 }
 0x661   :  { %8366 = vmatmul.mubr.msk.f32.gmra.mrb[196].mxu1 %vm781_vm2, %v5575_v34  ;;  %v5593_v61 = vpop.permute.xlu0 %5592 }
 0x662   :  { %8368 = vmatprep.mubr.msk.f32.mxu1 %vm781_vm2, %v5577_v9  ;;  %8869 = vmatpush3.bf16.msra.mxu1 %v8855_v48 }
 0x663   :  { %8866 = vmatprep.subr.bf16.mxu1 %v8859_v46 }
 0x664   :  { %v5591_v62 = vpop.permute.xlu1 %5590 }
 0x665   :  { %8369 = vmatmul.mubr.msk.f32.gmra.mrb[198].mxu1 %vm781_vm2, %v5579_v11 }
 0x666   :  { %8371 = vmatprep.mubr.msk.f32.mxu1 %vm781_vm2, %v5581_v56  ;;  %8870 = vmatpush3.bf16.msra.mxu1 %v8859_v46 }
 0x668   :  { %v5595_v25 = vpop.permute.xlu1 %5594 }
 0x669   :  { %8372 = vmatmul.mubr.msk.f32.gmra.mrb[200].mxu1 %vm781_vm2, %v5583_v51 }
 0x66a   :  { %8374 = vmatprep.mubr.msk.f32.mxu1 %vm781_vm2, %v5585_v57 }
 0x66d   :  { %8375 = vmatmul.mubr.msk.f32.gmra.mrb[202].mxu1 %vm781_vm2, %v5587_v5 }
 0x66e   :  { %8377 = vmatprep.mubr.msk.f32.mxu1 %vm781_vm2, %v5589_v18 }
 0x671   :  { %8378 = vmatmul.mubr.msk.f32.gmra.mrb[204].mxu1 %vm781_vm2, %v5591_v62 }
 0x672   :  { %8380 = vmatprep.mubr.msk.f32.mxu1 %vm781_vm2, %v5593_v61 }
 0x675   :  { %8381 = vmatmul.mubr.msk.f32.gmra.mrb[206].mxu1 %vm781_vm2, %v5595_v25 }
 0x706   :  { %v8321_v35 = vpop.f32.mrb[176].mxu1 }
 0x707   :  { %v11448_v1 = vadd.f32 %v8321_v35, %v11445_v6  ;;  %v5277_v7 = vpop.f32.mrb[177].mxu1 }
 0x708   :  { %v11451_v10 = vadd.f32 %v11445_v6, %v5277_v7 }
 0x709   :  { %v5357_v21 = vmin.f32 %v11448_v1, 20.0  ;;  %vm5501_vm9 = vcmp.gt.f32.partialorder %v11448_v1, 20.0 }
 0x70a   :  { %v5356_v24 = vmin.f32 %v11451_v10, 20.0  ;;  %v8324_v26 = vpop.f32.mrb[178].mxu1  ;;  %vm5500_vm8 = vcmp.gt.f32.partialorder %v11451_v10, 20.0 }
 0x70b   :  { %v5374_v2 = vmul.f32 1.442695, %v5357_v21  ;;  %v11456_v52 = vadd.f32 %v8324_v26, %v11445_v6  ;;  %v5287_v14 = vpop.f32.mrb[179].mxu1 }
 0x70c   :  { %v5372_v42 = vmul.f32 1.442695, %v5356_v24  ;;  %v11459_v37 = vadd.f32 %v11445_v6, %v5287_v14 }
 0x70d   :  { %9325 = vpow2.f32 %v5374_v2  ;;  %v5359_v23 = vmin.f32 %v11456_v52, 20.0  ;;  %vm5503_vm11 = vcmp.gt.f32.partialorder %v11456_v52, 20.0 }
 0x70e   :  { %9327 = vpow2.f32 %v5372_v42  ;;  %v5358_v19 = vmin.f32 %v11459_v37, 20.0  ;;  %v8327_v31 = vpop.f32.mrb[180].mxu1  ;;  %vm5502_vm10 = vcmp.gt.f32.partialorder %v11459_v37, 20.0 }
 0x70f   :  { %v5378_v41 = vmul.f32 1.442695, %v5359_v23  ;;  %v11464_v47 = vadd.f32 %v8327_v31, %v11445_v6  ;;  %v5297_v44 = vpop.f32.mrb[181].mxu1 }
 0x710   :  { %v5376_v49 = vmul.f32 1.442695, %v5358_v19  ;;  %v11467_v20 = vadd.f32 %v11445_v6, %v5297_v44 }
 0x711   :  { %9329 = vpow2.f32 %v5378_v41  ;;  %v5361_v0 = vmin.f32 %v11464_v47, 20.0  ;;  %vm5505_vm13 = vcmp.gt.f32.partialorder %v11464_v47, 20.0 }
 0x712   :  { %9331 = vpow2.f32 %v5376_v49  ;;  %v5360_v28 = vmin.f32 %v11467_v20, 20.0  ;;  %v8330_v63 = vpop.f32.mrb[182].mxu1  ;;  %vm5504_vm12 = vcmp.gt.f32.partialorder %v11467_v20, 20.0 }
 0x713   :  { %v5382_v16 = vmul.f32 1.442695, %v5361_v0  ;;  %v11472_v15 = vadd.f32 %v8330_v63, %v11445_v6  ;;  %v5307_v27 = vpop.f32.mrb[183].mxu1 }
 0x714   :  { %v5380_v45 = vmul.f32 1.442695, %v5360_v28  ;;  %v11475_v59 = vadd.f32 %v11445_v6, %v5307_v27 }
 0x715   :  { %9333 = vpow2.f32 %v5382_v16  ;;  %v5363_v12 = vmin.f32 %v11472_v15, 20.0  ;;  %vm5507_vm15 = vcmp.gt.f32.partialorder %v11472_v15, 20.0 }
 0x716   :  { %9335 = vpow2.f32 %v5380_v45  ;;  %v5362_v17 = vmin.f32 %v11475_v59, 20.0  ;;  %v8333_v58 = vpop.f32.mrb[184].mxu1  ;;  %vm5506_vm14 = vcmp.gt.f32.partialorder %v11475_v59, 20.0 }
 0x717   :  { %v9326_v3 = vpop.eup %9325  ;;  %v5386_v30 = vmul.f32 1.442695, %v5363_v12  ;;  %v11480_v55 = vadd.f32 %v8333_v58, %v11445_v6  ;;  %v5317_v40 = vpop.f32.mrb[185].mxu1 }
 0x718   :  { %v9328_v8 = vpop.eup %9327  ;;  %v5405_v53 = vadd.f32 1.0, %v9326_v3  ;;  %v5384_v22 = vmul.f32 1.442695, %v5362_v17  ;;  %v11483_v50 = vadd.f32 %v11445_v6, %v5317_v40 }
 0x719   :  { %v5404_v39 = vadd.f32 1.0, %v9328_v8  ;;  %9337 = vpow2.f32 %v5386_v30  ;;  %v5365_v34 = vmin.f32 %v11480_v55, 20.0  ;;  %vm5509_vm3 = vcmp.gt.f32.partialorder %v11480_v55, 20.0 }
 0x71a   :  { %v5421_v9 = vmul.f32 %v5405_v53, %v5405_v53  ;;  %9339 = vpow2.f32 %v5384_v22  ;;  %v5364_v11 = vmin.f32 %v11483_v50, 20.0  ;;  %vm5508_vm1 = vcmp.gt.f32.partialorder %v11483_v50, 20.0 }
 0x71b   :  { %v9330_v56 = vpop.eup %9329  ;;  %v5420_v51 = vmul.f32 %v5404_v39, %v5404_v39  ;;  %v5390_v57 = vmul.f32 1.442695, %v5365_v34 }
 0x71c   :  { %v9332_v18 = vpop.eup %9331  ;;  %v5453_v62 = vadd.f32 1.0, %v5421_v9  ;;  %v5407_v61 = vadd.f32 1.0, %v9330_v56  ;;  %v5388_v25 = vmul.f32 1.442695, %v5364_v11  ;;  %v6685_v26 = vadd.f32 -1.0, %v5421_v9 }
 0x71d   :  { %v8336_v5 = vpop.f32.mrb[186].mxu1  ;;  %v5452_v36 = vadd.f32 1.0, %v5420_v51  ;;  %v5406_v33 = vadd.f32 1.0, %v9332_v18  ;;  %9341 = vpow2.f32 %v5390_v57  ;;  %v6684_v31 = vadd.f32 -1.0, %v5420_v51 }
 0x71e   :  { %v5327_v54 = vpop.f32.mrb[187].mxu1  ;;  %v11488_v32 = vadd.f32 %v8336_v5, %v11445_v6  ;;  %9343 = vrcp.f32 %v5453_v62  ;;  %v5423_v38 = vmul.f32 %v5407_v61, %v5407_v61 }
 0x71f   :  { %v11491_v43 = vadd.f32 %v11445_v6, %v5327_v54  ;;  %v9334_v13 = vpop.eup %9333  ;;  %9345 = vrcp.f32 %v5452_v36  ;;  %v5422_v4 = vmul.f32 %v5406_v33, %v5406_v33 }
 0x720   :  { %v5367_v48 = vmin.f32 %v11488_v32, 20.0  ;;  %v9336_v60 = vpop.eup %9335  ;;  %v5455_v29 = vadd.f32 1.0, %v5423_v38  ;;  %v5409_v46 = vadd.f32 1.0, %v9334_v13  ;;  %9347 = vpow2.f32 %v5388_v25 }
 0x721   :  { %v5366_v35 = vmin.f32 %v11491_v43, 20.0  ;;  %v5454_v7 = vadd.f32 1.0, %v5422_v4  ;;  %v5408_v21 = vadd.f32 1.0, %v9336_v60  ;;  %v6686_v41 = vadd.f32 -1.0, %v5422_v4 }
 0x722   :  { %v5394_v24 = vmul.f32 1.442695, %v5367_v48  ;;  %9349 = vrcp.f32 %v5455_v29  ;;  %v5425_v2 = vmul.f32 %v5409_v46, %v5409_v46  ;;  %v6687_v58 = vadd.f32 -1.0, %v5423_v38 }
 0x723   :  { %v5392_v14 = vmul.f32 1.442695, %v5366_v35  ;;  %v9338_v42 = vpop.eup %9337  ;;  %9351 = vrcp.f32 %v5454_v7  ;;  %v5424_v23 = vmul.f32 %v5408_v21, %v5408_v21  ;;  %vm5510_vm4 = vcmp.gt.f32.partialorder %v11491_v43, 20.0 }
 0x724   :  { %v8339_v19 = vpop.f32.mrb[188].mxu1  ;;  %v9340_v44 = vpop.eup %9339  ;;  %v5457_v49 = vadd.f32 1.0, %v5425_v2  ;;  %v5411_v0 = vadd.f32 1.0, %v9338_v42  ;;  %9353 = vpow2.f32 %v5394_v24  ;;  %v6689_v24 = vadd.f32 -1.0, %v5425_v2 }
 0x725   :  { %v11496_v28 = vadd.f32 %v8339_v19, %v11445_v6  ;;  %v5337_v63 = vpop.f32.mrb[189].mxu1  ;;  %v5456_v16 = vadd.f32 1.0, %v5424_v23  ;;  %v5410_v27 = vadd.f32 1.0, %v9340_v44  ;;  %9355 = vpow2.f32 %v5392_v14 }
 0x726   :  { %v11499_v45 = vadd.f32 %v11445_v6, %v5337_v63  ;;  %9357 = vrcp.f32 %v5457_v49  ;;  %v11503_v12 = vmul.f32 %v5411_v0, %v5411_v0  ;;  %v6688_v53 = vadd.f32 -1.0, %v5424_v23 }
 0x727   :  { %v5369_v17 = vmin.f32 %v11496_v28, 20.0  ;;  %v9342_v3 = vpop.eup %9341  ;;  %9359 = vrcp.f32 %v5456_v16  ;;  %v11506_v30 = vmul.f32 %v5410_v27, %v5410_v27  ;;  %vm5511_vm5 = vcmp.gt.f32.partialorder %v11488_v32, 20.0 }
 0x728   :  { %v5368_v40 = vmin.f32 %v11499_v45, 20.0  ;;  %v8342_v8 = vpop.f32.mrb[190].mxu1  ;;  %v9344_v22 = vpop.eup %9343  ;;  %v5459_v39 = vadd.f32 1.0, %v11503_v12  ;;  %v5413_v34 = vadd.f32 1.0, %v9342_v3  ;;  %vm5512_vm6 = vcmp.gt.f32.partialorder %v11499_v45, 20.0 }
 0x729   :  { %v5398_v9 = vmul.f32 1.442695, %v5369_v17  ;;  %v11511_v11 = vadd.f32 %v8342_v8, %v11445_v6  ;;  %v5347_v56 = vpop.f32.mrb[191].mxu1  ;;  %v9346_v51 = vpop.eup %9345  ;;  %v5485_v57 = vmul.f32 %v9344_v22, %v6685_v26  ;;  %v5458_v5 = vadd.f32 1.0, %v11506_v30 }
 0x72a   :  { %v5396_v18 = vmul.f32 1.442695, %v5368_v40  ;;  %v11515_v62 = vadd.f32 %v11445_v6, %v5347_v56  ;;  %v9348_v61 = vpop.eup %9347  ;;  %9361 = vrcp.f32 %v5459_v39  ;;  %v11517_v25 = vmul.f32 %v5413_v34, %v5413_v34 }
 0x72b   :  { %v5371_v54 = vmin.f32 %v11511_v11, 20.0  ;;  %v5484_v36 = vmul.f32 %v9346_v51, %v6684_v31  ;;  %v5517_v33 = vmul.f32 %v5485_v57, %v11448_v1  ;;  %9363 = vrcp.f32 %v5458_v5 }
 0x72c   :  { %v5412_v38 = vadd.f32 1.0, %v9348_v61  ;;  %v5370_v13 = vmin.f32 %v11515_v62, 20.0  ;;  %v11522_v4 = vpop.f32.mrb[192].mxu1  ;;  %v9350_v48 = vpop.eup %9349  ;;  %v5461_v60 = vadd.f32 1.0, %v11517_v25  ;;  %9365 = vpow2.f32 %v5398_v9 }
 0x72d   :  { %v5402_v6 = vmul.f32 1.442695, %v5371_v54  ;;  %v11525_v29 = vpop.f32.mrb[193].mxu1  ;;  %v5516_v46 = vmul.f32 %v5484_v36, %v11451_v10  ;;  %v9352_v35 = vpop.eup %9351  ;;  %9367 = vpow2.f32 %v5396_v18  ;;  %v5487_v23 = vmul.f32 %v9350_v48, %v6687_v58 }
 0x72e   :  { %v11528_v7 = vmul.f32 %v5412_v38, %v5412_v38  ;;  %v5400_v21 = vmul.f32 1.442695, %v5370_v13  ;;  %v9354_v26 = vpop.eup %9353  ;;  %9369 = vrcp.f32 %v5461_v60  ;;  %v5486_v42 = vmul.f32 %v9352_v35, %v6686_v41 }
 0x72f   :  { %v5532_v14 = vsel %vm5500_vm8, %v11451_v10, %v5516_v46  ;;  %v9356_v19 = vpop.eup %9355  ;;  %v5415_v44 = vadd.f32 1.0, %v9354_v26  ;;  %9371 = vpow2.f32 %v5402_v6  ;;  %v5533_v2 = vsel %vm5501_vm9, %v11448_v1, %v5517_v33 }
 0x730   :  { %v5460_v31 = vadd.f32 1.0, %v11528_v7  ;;  %v11534_v49 = vpop.f32.mrb[194].mxu1  ;;  %8399 = vmatprep.mubr.msk.f32.mxu0 %vm781_vm2, %v5532_v14  ;;  %v9358_v0 = vpop.eup %9357  ;;  %v5414_v63 = vadd.f32 1.0, %v9356_v19  ;;  %9373 = vpow2.f32 %v5400_v21  ;;  %v5518_v10 = vmul.f32 %v5486_v42, %v11459_v37 }
 0x731   :  { %v11540_v16 = vpop.f32.mrb[195].mxu1  ;;  %8400 = vmatmul.mubr.msk.f32.vlgmr.msra.gmra.mrb[64].mxu0 %vm781_vm2, %v5533_v2  ;;  %v5519_v41 = vmul.f32 %v5487_v23, %v11456_v52  ;;  %v9360_v27 = vpop.eup %9359  ;;  %v11545_v17 = vmul.f32 %v5415_v44, %v5415_v44  ;;  %v5489_v58 = vmul.f32 %v9358_v0, %v6689_v24  ;;  %v6691_v9 = vadd.f32 -1.0, %v11503_v12 }
 0x732   :  { %9375 = vrcp.f32 %v5460_v31  ;;  %v11548_v3 = vmul.f32 %v5414_v63, %v5414_v63  ;;  %v5534_v1 = vsel %vm5502_vm10, %v11459_v37, %v5518_v10  ;;  %v5488_v40 = vmul.f32 %v9360_v27, %v6688_v53 }
 0x733   :  { %v5463_v8 = vadd.f32 1.0, %v11545_v17  ;;  %8402 = vmatprep.mubr.msk.f32.mxu0 %vm781_vm2, %v5534_v1  ;;  %v5535_v39 = vsel %vm5503_vm11, %v11456_v52, %v5519_v41  ;;  %v5521_v34 = vmul.f32 %v5489_v58, %v11464_v47  ;;  %v6690_v53 = vadd.f32 -1.0, %v11506_v30 }
 0x734   :  { %v11553_v22 = vpop.f32.mrb[196].mxu1  ;;  %v9362_v56 = vpop.eup %9361  ;;  %v5462_v51 = vadd.f32 1.0, %v11548_v3  ;;  %v5520_v37 = vmul.f32 %v5488_v40, %v11467_v20  ;;  %v6693_v13 = vadd.f32 -1.0, %v11517_v25  ;;  %v6692_v14 = vadd.f32 -1.0, %v11528_v7 }
 0x735   :  { %v11560_v57 = vpop.f32.mrb[197].mxu1  ;;  %8403 = vmatmul.mubr.msk.f32.gmra.mrb[66].mxu0 %vm781_vm2, %v5535_v39  ;;  %v9364_v5 = vpop.eup %9363  ;;  %9377 = vrcp.f32 %v5463_v8  ;;  %v5491_v52 = vmul.f32 %v9362_v56, %v6691_v9  ;;  %v5537_v30 = vsel %vm5505_vm13, %v11464_v47, %v5521_v34  ;;  %v6695_v41 = vadd.f32 -1.0, %v11545_v17 }
 0x736   :  { %v9366_v18 = vpop.eup %9365  ;;  %9379 = vrcp.f32 %v5462_v51  ;;  %v5536_v12 = vsel %vm5504_vm12, %v11467_v20, %v5520_v37  ;;  %v5490_v61 = vmul.f32 %v9364_v5, %v6690_v53  ;;  %vm5513_vm7 = vcmp.gt.f32.partialorder %v11496_v28, 20.0 }
 0x737   :  { %v9368_v54 = vpop.eup %9367  ;;  %v5417_v36 = vadd.f32 1.0, %v9366_v18  ;;  %8405 = vmatprep.mubr.msk.f32.mxu0 %vm781_vm2, %v5536_v12  ;;  %v5523_v38 = vmul.f32 %v5491_v52, %v11472_v15  ;;  %vm5514_vm0 = vcmp.gt.f32.partialorder %v11515_v62, 20.0  ;;  %vm5515_vm8 = vcmp.gt.f32.partialorder %v11511_v11, 20.0 }
 0x738   :  { %v11568_v33 = vpop.f32.mrb[198].mxu1  ;;  %v9370_v48 = vpop.eup %9369  ;;  %v5416_v60 = vadd.f32 1.0, %v9368_v54  ;;  %v5522_v20 = vmul.f32 %v5490_v61, %v11475_v59 }
 0x739   :  { %v11574_v6 = vpop.f32.mrb[199].mxu1  ;;  %8406 = vmatmul.mubr.msk.f32.gmra.mrb[68].mxu0 %vm781_vm2, %v5537_v30  ;;  %v9372_v46 = vpop.eup %9371  ;;  %v5433_v35 = vmul.f32 %v5417_v36, %v5417_v36  ;;  %v5493_v21 = vmul.f32 %v9370_v48, %v6693_v13  ;;  %v5539_v44 = vsel %vm5507_vm15, %v11472_v15, %v5523_v38  ;;  %v6694_v15 = vadd.f32 -1.0, %v11548_v3 }
 0x73a   :  { %v9374_v47 = vpop.eup %9373  ;;  %v5432_v24 = vmul.f32 %v5416_v60, %v5416_v60  ;;  %v5419_v26 = vadd.f32 1.0, %v9372_v46  ;;  %v5538_v25 = vsel %vm5506_vm14, %v11475_v59, %v5522_v20 }
 0x73b   :  { %v5465_v23 = vadd.f32 1.0, %v5433_v35  ;;  %v5418_v19 = vadd.f32 1.0, %v9374_v47  ;;  %8408 = vmatprep.mubr.msk.f32.mxu0 %vm781_vm2, %v5538_v25  ;;  %v5525_v7 = vmul.f32 %v5493_v21, %v11480_v55  ;;  %v6697_v37 = vadd.f32 -1.0, %v5433_v35 }
 0x73c   :  { %v9376_v42 = vpop.eup %9375  ;;  %v11582_v31 = vpop.f32.mrb[200].mxu1  ;;  %v5464_v2 = vadd.f32 1.0, %v5432_v24  ;;  %v5435_v0 = vmul.f32 %v5419_v26, %v5419_v26 }
 0x73d   :  { %v11586_v63 = vpop.f32.mrb[201].mxu1  ;;  %8409 = vmatmul.mubr.msk.f32.gmra.mrb[70].mxu0 %vm781_vm2, %v5539_v44  ;;  %v5492_v10 = vmul.f32 %v9376_v42, %v6692_v14  ;;  %9381 = vrcp.f32 %v5465_v23  ;;  %v5434_v59 = vmul.f32 %v5418_v19, %v5418_v19  ;;  %v5541_v17 = vsel %vm5509_vm3, %v11480_v55, %v5525_v7 }
 0x73e   :  { %9383 = vrcp.f32 %v5464_v2  ;;  %v5467_v27 = vadd.f32 1.0, %v5435_v0  ;;  %v6696_v55 = vadd.f32 -1.0, %v5432_v24  ;;  %v6699_v12 = vadd.f32 -1.0, %v5435_v0 }
 0x73f   :  { %v5524_v58 = vmul.f32 %v5492_v10, %v11483_v50  ;;  %v9378_v1 = vpop.eup %9377  ;;  %v5466_v40 = vadd.f32 1.0, %v5434_v59  ;;  %v6698_v36 = vadd.f32 -1.0, %v5434_v59 }
 0x740   :  { %v9380_v8 = vpop.eup %9379  ;;  %v5495_v39 = vmul.f32 %v9378_v1, %v6695_v41  ;;  %9385 = vrcp.f32 %v5467_v27 }
 0x741   :  { %v5540_v34 = vsel %vm5508_vm1, %v11483_v50, %v5524_v58  ;;  %9387 = vrcp.f32 %v5466_v40  ;;  %v5494_v9 = vmul.f32 %v9380_v8, %v6694_v15 }
 0x742   :  { %8411 = vmatprep.mubr.msk.f32.mxu0 %vm781_vm2, %v5540_v34  ;;  %v5527_v56 = vmul.f32 %v5495_v39, %v11488_v32 }
 0x743   :  { %8412 = vmatmul.mubr.msk.f32.gmra.mrb[72].mxu0 %vm781_vm2, %v5541_v17  ;;  %v5526_v51 = vmul.f32 %v5494_v9, %v11491_v43 }
 0x744   :  { %v5543_v3 = vsel %vm5511_vm5, %v11488_v32, %v5527_v56 }
 0x745   :  { %v5542_v50 = vsel %vm5510_vm4, %v11491_v43, %v5526_v51 }
 0x746   :  { %8414 = vmatprep.mubr.msk.f32.mxu1 %vm781_vm2, %v5542_v50 }
 0x747   :  { %v9382_v53 = vpop.eup %9381  ;;  %8415 = vmatmul.mubr.msk.f32.vlgmr.msra.gmra.mrb[202].mxu1 %vm781_vm2, %v5543_v3 }
 0x748   :  { %v9384_v5 = vpop.eup %9383  ;;  %v5497_v52 = vmul.f32 %v9382_v53, %v6697_v37 }
 0x749   :  { %v5496_v18 = vmul.f32 %v9384_v5, %v6696_v55 }
 0x74a   :  { %v9386_v61 = vpop.eup %9385  ;;  %v5529_v54 = vmul.f32 %v5497_v52, %v11496_v28 }
 0x74b   :  { %v9388_v30 = vpop.eup %9387  ;;  %v5528_v43 = vmul.f32 %v5496_v18, %v11499_v45  ;;  %v5499_v38 = vmul.f32 %v9386_v61, %v6699_v12 }
 0x74c   :  { %v5498_v32 = vmul.f32 %v9388_v30, %v6698_v36  ;;  %v5545_v48 = vsel %vm5513_vm7, %v11496_v28, %v5529_v54  ;;  %v11626_v28 = vld [vmem:[%s11828_s14] ss:$0 sm:$0xff]  ;;  %s9478_s14 = smov [#allocation2]  }
 0x74d   :  { %v5544_v13 = vsel %vm5512_vm6, %v11499_v45, %v5528_v43  ;;  %v5531_v20 = vmul.f32 %v5499_v38, %v11511_v11  ;;  %s6202_s27 = sshll.u32 %s9478_s14, 4  ;;  %s6203_s27 = int_to_ptr.vmem [resolvable:$true] %s6202_s27 }
 0x74e   :  { %8417 = vmatprep.mubr.msk.f32.mxu1 %vm781_vm2, %v5544_v13  ;;  %v5530_v60 = vmul.f32 %v5498_v32, %v11515_v62  ;;  %s9453_s5 = scalar_lea.vmem %s6203_s27, 2048  ;;  %p9458_p1 = scmp.lt.s32.totalorder %s6203_s27, %s6203_s27 }
 0x74f   :  { %8418 = vmatmul.mubr.msk.f32.gmra.mrb[204].mxu1 %vm781_vm2, %v5545_v48  ;;  %v5547_v45 = vsel %vm5515_vm8, %v11511_v11, %v5531_v20  ;;  %p9454_p0 = scmp.ne.s32.totalorder %s6203_s27, %s9453_s5  ;;  %p9459_p2 = scmp.lt.s32.totalorder %s9453_s5, %s9453_s5 }
 0x750   :  { %v5546_v46 = vsel %vm5514_vm0, %v11515_v62, %v5530_v60 }
 0x751   :  { %8420 = vmatprep.mubr.msk.f32.mxu1 %vm781_vm2, %v5546_v46  ;;  %p9460_p3 = por %p9459_p2, %p9458_p1 }
 0x753   :  { %8421 = vmatmul.mubr.msk.f32.gmra.mrb[206].mxu1 %vm781_vm2, %v5547_v45  ;;  %p9461_p4 = pnand %p9460_p3, %p9454_p0 }
 0x804   :  { %v8401_v35 = vpop.f32.mrb[64].mxu0 }
 0x805   :  { %v5893_v21 = vadd.f32 %v8401_v35, %v11522_v4  ;;  %v5887_v47 = vpop.f32.mrb[65].mxu0 }
 0x806   :  { %v5888_v24 = vadd.f32 %v5887_v47, %v11525_v29 }
 0x807   :  { %v11631_v62 = vadd.f32 %v11626_v28, %v5893_v21 }
 0x808   :  { %v11634_v26 = vadd.f32 %v11626_v28, %v5888_v24  ;;  %v8404_v11 = vpop.f32.mrb[66].mxu0 }
 0x809   :  { %v5990_v25 = vmin.f32 %v11631_v62, 20.0  ;;  %v5903_v14 = vadd.f32 %v8404_v11, %v11534_v49  ;;  %v5897_v42 = vpop.f32.mrb[67].mxu0  ;;  %vm6134_vm9 = vcmp.gt.f32.partialorder %v11631_v62, 20.0 }
 0x80a   :  { %v5989_v23 = vmin.f32 %v11634_v26, 20.0  ;;  %v5898_v19 = vadd.f32 %v5897_v42, %v11540_v16  ;;  %vm6133_vm10 = vcmp.gt.f32.partialorder %v11634_v26, 20.0 }
 0x80b   :  { %v6007_v4 = vmul.f32 1.442695, %v5990_v25  ;;  %v11641_v44 = vadd.f32 %v11626_v28, %v5903_v14 }
 0x80c   :  { %v6005_v29 = vmul.f32 1.442695, %v5989_v23  ;;  %v11644_v2 = vadd.f32 %v11626_v28, %v5898_v19  ;;  %v8407_v0 = vpop.f32.mrb[68].mxu0 }
 0x80d   :  { %9389 = vpow2.f32 %v6007_v4  ;;  %v5992_v10 = vmin.f32 %v11641_v44, 20.0  ;;  %v5913_v59 = vadd.f32 %v8407_v0, %v11553_v22  ;;  %v5907_v49 = vpop.f32.mrb[69].mxu0  ;;  %vm6136_vm11 = vcmp.gt.f32.partialorder %v11641_v44, 20.0 }
 0x80e   :  { %9391 = vpow2.f32 %v6005_v29  ;;  %v5991_v7 = vmin.f32 %v11644_v2, 20.0  ;;  %v5908_v16 = vadd.f32 %v5907_v49, %v11560_v57  ;;  %vm6135_vm12 = vcmp.gt.f32.partialorder %v11644_v2, 20.0 }
 0x80f   :  { %v6011_v41 = vmul.f32 1.442695, %v5992_v10  ;;  %v11651_v27 = vadd.f32 %v11626_v28, %v5913_v59 }
 0x810   :  { %v6009_v58 = vmul.f32 1.442695, %v5991_v7  ;;  %v11654_v1 = vadd.f32 %v11626_v28, %v5908_v16  ;;  %v8410_v40 = vpop.f32.mrb[70].mxu0 }
 0x811   :  { %9393 = vpow2.f32 %v6011_v41  ;;  %v5994_v15 = vmin.f32 %v11651_v27, 20.0  ;;  %v5923_v22 = vadd.f32 %v8410_v40, %v11568_v33  ;;  %v5917_v8 = vpop.f32.mrb[71].mxu0  ;;  %vm6138_vm13 = vcmp.gt.f32.partialorder %v11651_v27, 20.0 }
 0x812   :  { %9395 = vpow2.f32 %v6009_v58  ;;  %v5993_v39 = vmin.f32 %v11654_v1, 20.0  ;;  %v5918_v57 = vadd.f32 %v5917_v8, %v11574_v6  ;;  %vm6137_vm14 = vcmp.gt.f32.partialorder %v11654_v1, 20.0 }
 0x813   :  { %v6015_v34 = vmul.f32 1.442695, %v5994_v15  ;;  %v11661_v17 = vadd.f32 %v11626_v28, %v5923_v22 }
 0x814   :  { %v6013_v9 = vmul.f32 1.442695, %v5993_v39  ;;  %v11664_v56 = vadd.f32 %v11626_v28, %v5918_v57 }
 0x815   :  { %9397 = vpow2.f32 %v6015_v34  ;;  %v5996_v51 = vmin.f32 %v11661_v17, 20.0  ;;  %vm6140_vm15 = vcmp.gt.f32.partialorder %v11661_v17, 20.0 }
 0x816   :  { %9399 = vpow2.f32 %v6013_v9  ;;  %v5995_v33 = vmin.f32 %v11664_v56, 20.0  ;;  %v8413_v50 = vpop.f32.mrb[72].mxu0  ;;  %vm6139_vm1 = vcmp.gt.f32.partialorder %v11664_v56, 20.0 }
 0x817   :  { %v9390_v3 = vpop.eup %9389  ;;  %v6019_v37 = vmul.f32 1.442695, %v5996_v51  ;;  %v5933_v53 = vadd.f32 %v8413_v50, %v11582_v31  ;;  %v5927_v6 = vpop.f32.mrb[73].mxu0 }
 0x818   :  { %v9392_v55 = vpop.eup %9391  ;;  %v6038_v5 = vadd.f32 1.0, %v9390_v3  ;;  %v6017_v52 = vmul.f32 1.442695, %v5995_v33  ;;  %v5928_v18 = vadd.f32 %v5927_v6, %v11586_v63 }
 0x819   :  { %v6037_v12 = vadd.f32 1.0, %v9392_v55  ;;  %9401 = vpow2.f32 %v6019_v37  ;;  %v11671_v61 = vadd.f32 %v11626_v28, %v5933_v53 }
 0x81a   :  { %v6054_v54 = vmul.f32 %v6038_v5, %v6038_v5  ;;  %9403 = vpow2.f32 %v6017_v52  ;;  %v11674_v36 = vadd.f32 %v11626_v28, %v5928_v18  ;;  %v8416_v38 = vpop.f32.mrb[202].mxu1 }
 0x81b   :  { %v9394_v30 = vpop.eup %9393  ;;  %v6053_v43 = vmul.f32 %v6037_v12, %v6037_v12  ;;  %v5998_v31 = vmin.f32 %v11671_v61, 20.0  ;;  %v5937_v60 = vpop.f32.mrb[203].mxu1  ;;  %v11679_v11 = vadd.f32 %v8416_v38, %v11626_v28  ;;  %vm6142_vm3 = vcmp.gt.f32.partialorder %v11671_v61, 20.0 }
 0x81c   :  { %v9396_v32 = vpop.eup %9395  ;;  %v6086_v13 = vadd.f32 1.0, %v6054_v54  ;;  %v6040_v48 = vadd.f32 1.0, %v9394_v30  ;;  %v5997_v63 = vmin.f32 %v11674_v36, 20.0  ;;  %v11682_v25 = vadd.f32 %v11626_v28, %v5937_v60 }
 0x81d   :  { %v6085_v20 = vadd.f32 1.0, %v6053_v43  ;;  %v6039_v46 = vadd.f32 1.0, %v9396_v32  ;;  %v6023_v45 = vmul.f32 1.442695, %v5998_v31  ;;  %v6000_v0 = vmin.f32 %v11679_v11, 20.0 }
 0x81e   :  { %9405 = vrcp.f32 %v6086_v13  ;;  %v6056_v35 = vmul.f32 %v6040_v48, %v6040_v48  ;;  %v6021_v21 = vmul.f32 1.442695, %v5997_v63  ;;  %v5999_v49 = vmin.f32 %v11682_v25, 20.0 }
 0x81f   :  { %v9398_v47 = vpop.eup %9397  ;;  %9407 = vrcp.f32 %v6085_v20  ;;  %v6055_v24 = vmul.f32 %v6039_v46, %v6039_v46  ;;  %v6027_v40 = vmul.f32 1.442695, %v6000_v0  ;;  %v6734_v9 = vadd.f32 -1.0, %v6054_v54 }
 0x820   :  { %v9400_v14 = vpop.eup %9399  ;;  %v6088_v42 = vadd.f32 1.0, %v6056_v35  ;;  %v6042_v23 = vadd.f32 1.0, %v9398_v47  ;;  %9409 = vpow2.f32 %v6023_v45  ;;  %v6025_v39 = vmul.f32 1.442695, %v5999_v49 }
 0x821   :  { %v6087_v19 = vadd.f32 1.0, %v6055_v24  ;;  %v6041_v4 = vadd.f32 1.0, %v9400_v14  ;;  %9411 = vpow2.f32 %v6021_v21  ;;  %v6733_v37 = vadd.f32 -1.0, %v6053_v43 }
 0x822   :  { %9413 = vrcp.f32 %v6088_v42  ;;  %v11684_v29 = vmul.f32 %v6042_v23, %v6042_v23  ;;  %v8419_v7 = vpop.f32.mrb[204].mxu1  ;;  %v6736_v30 = vadd.f32 -1.0, %v6056_v35  ;;  %v6735_v60 = vadd.f32 -1.0, %v6055_v24 }
 0x823   :  { %v9402_v10 = vpop.eup %9401  ;;  %9415 = vrcp.f32 %v6087_v19  ;;  %v11687_v59 = vmul.f32 %v6041_v4, %v6041_v4  ;;  %v5947_v15 = vpop.f32.mrb[205].mxu1  ;;  %v11697_v34 = vadd.f32 %v8419_v7, %v11626_v28  ;;  %vm6141_vm4 = vcmp.gt.f32.partialorder %v11674_v36, 20.0 }
 0x824   :  { %v9404_v16 = vpop.eup %9403  ;;  %v6090_v41 = vadd.f32 1.0, %v11684_v29  ;;  %v6044_v58 = vadd.f32 1.0, %v9402_v10  ;;  %v11702_v33 = vadd.f32 %v11626_v28, %v5947_v15  ;;  %v6738_v19 = vadd.f32 -1.0, %v11684_v29 }
 0x825   :  { %v6089_v22 = vadd.f32 1.0, %v11687_v59  ;;  %v6043_v8 = vadd.f32 1.0, %v9404_v16  ;;  %v6002_v6 = vmin.f32 %v11697_v34, 20.0  ;;  %vm6144_vm5 = vcmp.gt.f32.partialorder %v11679_v11, 20.0 }
 0x826   :  { %9417 = vrcp.f32 %v6090_v41  ;;  %v11694_v57 = vmul.f32 %v6044_v58, %v6044_v58  ;;  %v8422_v50 = vpop.f32.mrb[206].mxu1  ;;  %v6001_v13 = vmin.f32 %v11702_v33, 20.0  ;;  %vm6143_vm6 = vcmp.gt.f32.partialorder %v11682_v25, 20.0 }
 0x827   :  { %9419 = vrcp.f32 %v6089_v22  ;;  %v11699_v51 = vmul.f32 %v6043_v8, %v6043_v8  ;;  %v5957_v55 = vpop.f32.mrb[207].mxu1  ;;  %v6031_v43 = vmul.f32 1.442695, %v6002_v6  ;;  %v11725_v23 = vadd.f32 %v8422_v50, %v11626_v28 }
 0x828   :  { %v9406_v3 = vpop.eup %9405  ;;  %v6092_v53 = vadd.f32 1.0, %v11694_v57  ;;  %9421 = vpow2.f32 %v6027_v40  ;;  %v6029_v47 = vmul.f32 1.442695, %v6001_v13  ;;  %vm6146_vm7 = vcmp.gt.f32.partialorder %v11697_v34, 20.0 }
 0x829   :  { %v9408_v5 = vpop.eup %9407  ;;  %v6118_v52 = vmul.f32 %v9406_v3, %v6734_v9  ;;  %v6091_v18 = vadd.f32 1.0, %v11699_v51  ;;  %9423 = vpow2.f32 %v6025_v39  ;;  %v6004_v7 = vmin.f32 %v11725_v23, 20.0 }
 0x82a   :  { %v9410_v12 = vpop.eup %9409  ;;  %v6117_v54 = vmul.f32 %v9408_v5, %v6733_v37  ;;  %9425 = vrcp.f32 %v6092_v53  ;;  %v11747_v9 = vadd.f32 %v11626_v28, %v5957_v55  ;;  %v6739_v37 = vadd.f32 -1.0, %v11699_v51 }
 0x82b   :  { %v9412_v31 = vpop.eup %9411  ;;  %v6150_v38 = vmul.f32 %v6118_v52, %v11631_v62  ;;  %9427 = vrcp.f32 %v6091_v18  ;;  %v6046_v32 = vadd.f32 1.0, %v9410_v12  ;;  %v6035_v15 = vmul.f32 1.442695, %v6004_v7 }
 0x82c   :  { %v9414_v48 = vpop.eup %9413  ;;  %v6149_v63 = vmul.f32 %v6117_v54, %v11634_v26  ;;  %v6045_v20 = vadd.f32 1.0, %v9412_v31  ;;  %9429 = vpow2.f32 %v6031_v43  ;;  %vm6145_vm0 = vcmp.gt.f32.partialorder %v11702_v33, 20.0 }
 0x82d   :  { %v9416_v46 = vpop.eup %9415  ;;  %v6166_v45 = vsel %vm6134_vm9, %v11631_v62, %v6150_v38  ;;  %v6120_v35 = vmul.f32 %v9414_v48, %v6736_v30  ;;  %v11716_v21 = vmul.f32 %v6046_v32, %v6046_v32  ;;  %9431 = vpow2.f32 %v6029_v47 }
 0x82e   :  { %6182 = vst.msk [vmem:[#allocation2 + $0x8] sm:$0xff] %vm781_vm2, %v6166_v45  ;;  %v6165_v14 = vsel %vm6133_vm10, %v11634_v26, %v6149_v63  ;;  %v6119_v24 = vmul.f32 %v9416_v46, %v6735_v60  ;;  %v11722_v42 = vmul.f32 %v6045_v20, %v6045_v20  ;;  %v6737_v26 = vadd.f32 -1.0, %v11687_v59 }
 0x82f   :  { %6181 = vst.msk [vmem:[#allocation2] sm:$0xff] %vm781_vm2, %v6165_v14  ;;  %v6152_v62 = vmul.f32 %v6120_v35, %v11641_v44  ;;  %v6094_v4 = vadd.f32 1.0, %v11716_v21  ;;  %v6742_v48 = vadd.f32 -1.0, %v11716_v21  ;;  %vm6148_vm8 = vcmp.gt.f32.partialorder %v11725_v23, 20.0 }
 0x830   :  { %v9418_v0 = vpop.eup %9417  ;;  %v6151_v10 = vmul.f32 %v6119_v24, %v11644_v2  ;;  %v6093_v49 = vadd.f32 1.0, %v11722_v42  ;;  %v6741_v20 = vadd.f32 -1.0, %v11722_v42  ;;  %vm6147_vm9 = vcmp.gt.f32.partialorder %v11747_v9, 20.0 }
 0x831   :  { %v9420_v16 = vpop.eup %9419  ;;  %v6168_v41 = vsel %vm6136_vm11, %v11641_v44, %v6152_v62  ;;  %v6122_v58 = vmul.f32 %v9418_v0, %v6738_v19  ;;  %9433 = vrcp.f32 %v6094_v4  ;;  %v6740_v44 = vadd.f32 -1.0, %v11694_v57 }
 0x832   :  { %v9422_v29 = vpop.eup %9421  ;;  %6184 = vst.msk [vmem:[#allocation2 + $0x18] sm:$0xff] %vm781_vm2, %v6168_v41  ;;  %v6167_v59 = vsel %vm6135_vm12, %v11644_v2, %v6151_v10  ;;  %v6121_v40 = vmul.f32 %v9420_v16, %v6737_v26  ;;  %9435 = vrcp.f32 %v6093_v49  ;;  %v6003_v57 = vmin.f32 %v11747_v9, 20.0 }
 0x833   :  { %v9424_v22 = vpop.eup %9423  ;;  %6183 = vst.msk [vmem:[#allocation2 + $0x10] sm:$0xff] %vm781_vm2, %v6167_v59  ;;  %v6154_v8 = vmul.f32 %v6122_v58, %v11651_v27  ;;  %v6048_v39 = vadd.f32 1.0, %v9422_v29  ;;  %9437 = vpow2.f32 %v6035_v15 }
 0x834   :  { %v9426_v50 = vpop.eup %9425  ;;  %v6153_v3 = vmul.f32 %v6121_v40, %v11654_v1  ;;  %v6047_v2 = vadd.f32 1.0, %v9424_v22  ;;  %v6033_v31 = vmul.f32 1.442695, %v6003_v57 }
 0x835   :  { %v9428_v53 = vpop.eup %9427  ;;  %v6170_v6 = vsel %vm6138_vm13, %v11651_v27, %v6154_v8  ;;  %v6124_v5 = vmul.f32 %v9426_v50, %v6740_v44  ;;  %v6064_v52 = vmul.f32 %v6048_v39, %v6048_v39 }
 0x836   :  { %v9430_v18 = vpop.eup %9429  ;;  %6186 = vst.msk [vmem:[#allocation2 + $0x28] sm:$0xff] %vm781_vm2, %v6170_v6  ;;  %v6169_v28 = vsel %vm6137_vm14, %v11654_v1, %v6153_v3  ;;  %v6123_v55 = vmul.f32 %v9428_v53, %v6739_v37  ;;  %v6063_v51 = vmul.f32 %v6047_v2, %v6047_v2 }
 0x837   :  { %6185 = vst.msk [vmem:[#allocation2 + $0x20] sm:$0xff] %vm781_vm2, %v6169_v28  ;;  %v6156_v12 = vmul.f32 %v6124_v5, %v11661_v17  ;;  %v6096_v54 = vadd.f32 1.0, %v6064_v52  ;;  %v6050_v30 = vadd.f32 1.0, %v9430_v18  ;;  %v9432_v38 = vpop.eup %9431  ;;  %v6744_v0 = vadd.f32 -1.0, %v6064_v52 }
 0x838   :  { %v6155_v27 = vmul.f32 %v6123_v55, %v11664_v56  ;;  %v6095_v43 = vadd.f32 1.0, %v6063_v51  ;;  %v6049_v63 = vadd.f32 1.0, %v9432_v38  ;;  %v6743_v26 = vadd.f32 -1.0, %v6063_v51 }
 0x839   :  { %v6172_v32 = vsel %vm6140_vm15, %v11661_v17, %v6156_v12  ;;  %9439 = vrcp.f32 %v6096_v54  ;;  %v6066_v1 = vmul.f32 %v6050_v30, %v6050_v30 }
 0x83a   :  { %6188 = vst.msk [vmem:[#allocation2 + $0x38] sm:$0xff] %vm781_vm2, %v6172_v32  ;;  %v6171_v13 = vsel %vm6139_vm1, %v11664_v56, %v6155_v27  ;;  %9441 = vrcp.f32 %v6095_v43  ;;  %v6065_v35 = vmul.f32 %v6049_v63, %v6049_v63 }
 0x83b   :  { %v9434_v60 = vpop.eup %9433  ;;  %6187 = vst.msk [vmem:[#allocation2 + $0x30] sm:$0xff] %vm781_vm2, %v6171_v13  ;;  %v6098_v46 = vadd.f32 1.0, %v6066_v1  ;;  %9443 = vpow2.f32 %v6033_v31  ;;  %v6746_v29 = vadd.f32 -1.0, %v6066_v1 }
 0x83c   :  { %v9436_v17 = vpop.eup %9435  ;;  %v6126_v45 = vmul.f32 %v9434_v60, %v6742_v48  ;;  %v6097_v56 = vadd.f32 1.0, %v6065_v35  ;;  %v6745_v39 = vadd.f32 -1.0, %v6065_v35 }
 0x83d   :  { %v6125_v47 = vmul.f32 %v9436_v17, %v6741_v20  ;;  %9445 = vrcp.f32 %v6098_v46  ;;  %v9438_v14 = vpop.eup %9437 }
 0x83e   :  { %v6158_v24 = vmul.f32 %v6126_v45, %v11671_v61  ;;  %v6052_v62 = vadd.f32 1.0, %v9438_v14  ;;  %9447 = vrcp.f32 %v6097_v56 }
 0x83f   :  { %v6157_v21 = vmul.f32 %v6125_v47, %v11674_v36 }
 0x840   :  { %v6174_v19 = vsel %vm6142_vm3, %v11671_v61, %v6158_v24  ;;  %v6068_v4 = vmul.f32 %v6052_v62, %v6052_v62 }
 0x841   :  { %6190 = vst.msk [vmem:[#allocation2 + $0x48] sm:$0xff] %vm781_vm2, %v6174_v19  ;;  %v6173_v42 = vsel %vm6141_vm4, %v11674_v36, %v6157_v21 }
 0x842   :  { %6189 = vst.msk [vmem:[#allocation2 + $0x40] sm:$0xff] %vm781_vm2, %v6173_v42  ;;  %v6100_v49 = vadd.f32 1.0, %v6068_v4 }
 0x843   :  { %v9440_v10 = vpop.eup %9439 }
 0x844   :  { %v9442_v7 = vpop.eup %9441  ;;  %v6128_v16 = vmul.f32 %v9440_v10, %v6744_v0  ;;  %9449 = vrcp.f32 %v6100_v49 }
 0x845   :  { %v9444_v41 = vpop.eup %9443  ;;  %v6127_v58 = vmul.f32 %v9442_v7, %v6743_v26 }
 0x846   :  { %v6160_v61 = vmul.f32 %v6128_v16, %v11679_v11  ;;  %v6051_v59 = vadd.f32 1.0, %v9444_v41 }
 0x847   :  { %v9446_v40 = vpop.eup %9445  ;;  %v6159_v36 = vmul.f32 %v6127_v58, %v11682_v25 }
 0x848   :  { %v6176_v15 = vsel %vm6144_vm5, %v11679_v11, %v6160_v61  ;;  %v6130_v22 = vmul.f32 %v9446_v40, %v6746_v29  ;;  %v6067_v8 = vmul.f32 %v6051_v59, %v6051_v59  ;;  %v9448_v50 = vpop.eup %9447 }
 0x849   :  { %6192 = vst.msk [vmem:[#allocation2 + $0x58] sm:$0xff] %vm781_vm2, %v6176_v15  ;;  %v6175_v44 = vsel %vm6143_vm6, %v11682_v25, %v6159_v36  ;;  %v6129_v2 = vmul.f32 %v9448_v50, %v6745_v39  ;;  %v6748_v25 = vadd.f32 -1.0, %v6068_v4 }
 0x84a   :  { %6191 = vst.msk [vmem:[#allocation2 + $0x50] sm:$0xff] %vm781_vm2, %v6175_v44  ;;  %v6162_v3 = vmul.f32 %v6130_v22, %v11697_v34  ;;  %v6099_v37 = vadd.f32 1.0, %v6067_v8  ;;  %v6747_v18 = vadd.f32 -1.0, %v6067_v8 }
 0x84b   :  { %v6161_v53 = vmul.f32 %v6129_v2, %v11702_v33 }
 0x84c   :  { %v6178_v11 = vsel %vm6146_vm7, %v11697_v34, %v6162_v3  ;;  %9451 = vrcp.f32 %v6099_v37 }
 0x84d   :  { %6194 = vst.msk [vmem:[#allocation2 + $0x68] sm:$0xff] %vm781_vm2, %v6178_v11  ;;  %v6177_v5 = vsel %vm6145_vm0, %v11702_v33, %v6161_v53 }
 0x84e   :  { %v9450_v6 = vpop.eup %9449  ;;  %6193 = vst.msk [vmem:[#allocation2 + $0x60] sm:$0xff] %vm781_vm2, %v6177_v5 }
 0x84f   :  { %v6132_v52 = vmul.f32 %v9450_v6, %v6748_v25 }
 0x851   :  { %v6164_v57 = vmul.f32 %v6132_v52, %v11725_v23 }
 0x853   :  { %v6180_v34 = vsel %vm6148_vm8, %v11725_v23, %v6164_v57 }
 0x854   :  { %6196 = vst.msk [vmem:[#allocation2 + $0x78] sm:$0xff] %vm781_vm2, %v6180_v34 }
 0x856   :  { %v9452_v28 = vpop.eup %9451 }
 0x857   :  { %v6131_v55 = vmul.f32 %v9452_v28, %v6747_v18 }
 0x859   :  { %v6163_v51 = vmul.f32 %v6131_v55, %v11747_v9 }
 0x85b   :  { %v6179_v33 = vsel %vm6147_vm9, %v11747_v9, %v6163_v51 }
 0x85c   :  { %6195 = vst.msk [vmem:[#allocation2 + $0x70] sm:$0xff] %vm781_vm2, %v6179_v33 }
 0x85d   :  { %9464 = shalt.err (!%p9461_p4)
}
 0x85e   :  { %s9465_s4 = scalar_lea.hbm %s11829_s15, 2048 }
 0x85f   :  { %p9466_p5 = scmp.ne.s32.totalorder %s11829_s15, %s9465_s4  ;;  %p9469_p6 = scmp.lt.u32.totalorder %s9465_s4, %s11829_s15 }
 0x861   :  { %p9471_p7 = pnand %p9469_p6, %p9466_p5 }
 0x863   :  { %9474 = shalt.err (!%p9471_p7)
}
 0x864   :  { %s9479_s8 = smov 128   ;;  %s9480_s18 = smov 8  }
 0x865   :  { %6208 = dma.vmem_to_hbm [thread:$0]  %s6203_s27, 2048, %s11829_s15, [#allocation3], %s9479_s8, %s9479_s8, %s9480_s18  }
 0x866   :  { %9475 = dma.done.wait [#allocation3], 2048  }
 0x867   :  { %9476 = vsyncadd [#allocation3], 4294965248 }
 0x868   :  { %6212 = vsyncpa [#allocation3], 1 }

</bundles_post_ra>
